<compile_context>
chip_gen: v7x
topology: tpu7x:2x2x1
jax: 0.10.0
libtpu: 0.0.40
codegen_flags: <defaults>
</compile_context>

<pallas_src>
import numpy as np
import jax
import jax.numpy as jnp
from jax import lax
from jax.experimental import pallas as pl
from jax.experimental.pallas import tpu as pltpu

# ----------------------------- configuration --------------------------------
IN_CHANNELS = 4
H, W = 10, 10                      # map_size
P = H * W                          # 100 real pixels per board
CPB = 128                          # lanes per board (P padded to a 128 multiple)
NB_FILTERS = 32                    # config2.nb_filters_3x3
NB_RES_BLOCKS = 2                  # config2.nb_residual_blocks
VALUE_HIDDEN = 32                  # config2.value_head_hidden_layer_size
POLICY_OUT = 570
POLICY_PAD = 640                   # 570 padded up to a multiple of 128 lanes
BN_EPS = 1e-5

# tap order k = (dy+1)*3 + (dx+1)  == torch kernel index ky*3 + kx
TAPS = tuple((dy, dx) for dy in (-1, 0, 1) for dx in (-1, 0, 1))


def _build_tap_masks():
    # mask[k, p] = 1 iff pixel p has a valid in-board neighbour for tap k.
    m = np.zeros((9, P), np.float32)
    for k, (dy, dx) in enumerate(TAPS):
        for y in range(H):
            for x in range(W):
                if 0 <= y + dy < H and 0 <= x + dx < W:
                    m[k, y * W + x] = 1.0
    return m


TAP_MASKS_P = _build_tap_masks()


# ----------------------------- the Pallas kernel -----------------------------
def cnn_net_kernel(x_ref, mask_ref, cbw_ref, resw_ref, bn_ref, hcw_ref, hbn_ref,
                   fcpw_ref, fcpb_ref, fcvw_ref, fcvb_ref, fc2w_ref, fc2b_ref,
                   value_ref, vcap_ref, policy_ref,
                   xcm, pbuf, flatbuf):
    bpp = mask_ref.shape[1]                       # B * CPB (lane-dense, 128-multiple)
    nb = flatbuf.shape[0]                         # batch size
    masks = mask_ref[...]                         # (9, B*CPB), 0 on pad columns
    colmask = masks[4:5, :]                       # center tap == real-pixel mask
    inv_n = 1.0 / float(nb * P)                   # BatchNorm count (real pixels only)

    def lane_roll(x, s):
        # circular lane shift: result[:, p] = x[:, (p + s) % n], s is a static int.
        # Cross-row / cross-board / pad wraps are all zeroed by the tap masks.
        n = x.shape[1]
        s = s % n
        if s == 0:
            return x
        return jnp.concatenate([x[:, s:], x[:, :s]], axis=1)

    def conv3x3(x, w_t, bias_col):
        # x: (Cin, B*CPB) f32; w_t: (Cout, 9*Cin) bf16; bias_col: (Cout, 1) f32
        cin = x.shape[0]
        for k, (dy, dx) in enumerate(TAPS):
            shift = dy * W + dx
            tap = lane_roll(x, shift) * masks[k:k + 1, :]       # pure data movement
            pbuf[k * cin:(k + 1) * cin, :] = tap.astype(jnp.bfloat16)
        patch = pbuf[0:9 * cin, :]                              # (9*Cin, B*CPB) im2col
        return jnp.dot(w_t, patch, preferred_element_type=jnp.float32) + bias_col

    def bn(x, gamma_col, beta_col):
        # PyTorch training-mode BatchNorm (batch statistics), masked to real pixels.
        mean = jnp.sum(x * colmask, axis=1, keepdims=True) * inv_n
        d = (x - mean) * colmask
        var = jnp.sum(d * d, axis=1, keepdims=True) * inv_n
        return (x - mean) * lax.rsqrt(var + BN_EPS) * gamma_col + beta_col

    relu = lambda v: jnp.maximum(v, 0.0)

    # ------- NCHW -> channel-major padded layout (inside the kernel, no XLA op) -------
    xcm[...] = jnp.zeros(xcm.shape, xcm.dtype)    # keeps per-board pad lanes finite (0)
    for b in range(nb):
        for c in range(IN_CHANNELS):
            r = b * IN_CHANNELS + c
            xcm[c:c + 1, b * CPB:b * CPB + P] = x_ref[r:r + 1, :]
    x0 = xcm[...]                                 # (Cin, B*CPB)

    # ---------------- trunk: Conv_block + residual blocks ----------------
    pk = bn_ref[0]                                # (F, 3) [conv bias | gamma | beta]
    out = relu(bn(conv3x3(x0, cbw_ref[...], pk[:, 0:1]), pk[:, 1:2], pk[:, 2:3]))

    for i in range(NB_RES_BLOCKS):
        identity = out
        p1 = bn_ref[1 + 2 * i]
        o = relu(bn(conv3x3(out, resw_ref[2 * i], p1[:, 0:1]), p1[:, 1:2], p1[:, 2:3]))
        p2 = bn_ref[2 + 2 * i]
        o = bn(conv3x3(o, resw_ref[2 * i + 1], p2[:, 0:1]), p2[:, 1:2], p2[:, 2:3])
        out = relu(o + identity)

    # -------- fused head 1x1 convs: rows = [value | capture | policy0 | policy1] --------
    hb = hbn_ref[...]                             # (4, 3)
    ha = jnp.dot(hcw_ref[...], out.astype(jnp.bfloat16),
                 preferred_element_type=jnp.float32) + hb[:, 0:1]
    ha = relu(bn(ha, hb[:, 1:2], hb[:, 2:3]))     # (4, B*CPB)

    # per-board flatten: full-128-wide, 128-aligned row copies into bf16 scratch.
    # flat[b, c*CPB + p] = ha[c, b*CPB + p]; pad lanes are finite and hit zero weights.
    for b in range(nb):
        for c in range(4):
            flatbuf[b:b + 1, c * CPB:(c + 1) * CPB] = \
                ha[c:c + 1, b * CPB:(b + 1) * CPB].astype(jnp.bfloat16)
    flat = flatbuf[...]                           # (B, 4*CPB) bf16

    # split head FCs (no structural-zero blocks):
    #   policy: (B, 2*CPB) x (2*CPB, 640);  value/capture: (B, 2*CPB) x (2*CPB, 64)
    logits = jnp.dot(flat[:, 2 * CPB:], fcpw_ref[...],
                     preferred_element_type=jnp.float32) + fcpb_ref[...]
    fcv = jnp.dot(flat[:, :2 * CPB], fcvw_ref[...],
                  preferred_element_type=jnp.float32) + fcvb_ref[...]

    # value / capture heads: relu -> block-diagonal fc2 -> tanh
    hidden = relu(fcv)                            # (B, 64) f32
    vv = jnp.tanh(jnp.dot(hidden, fc2w_ref[...],
                          preferred_element_type=jnp.float32) + fc2b_ref[...])
    value_ref[...] = vv[:, 0:1]
    vcap_ref[...] = vv[:, 1:2]

    # policy head: exact softmax over the 570 real columns (pad columns masked out)
    col = lax.broadcasted_iota(jnp.int32, (1, POLICY_PAD), 1)
    logits = jnp.where(col < POLICY_OUT, logits, jnp.float32(-1e30))
    m = jnp.max(logits, axis=1, keepdims=True)
    e = jnp.exp(logits - m)                       # pad columns underflow to exactly 0
    policy_ref[...] = e / jnp.sum(e, axis=1, keepdims=True)


# ----------------------------- parameters -------------------------------------
def init_params(seed=0):
    rng = np.random.default_rng(seed)
    F = NB_FILTERS

    def rand(*shape, scale=0.05):
        return (rng.standard_normal(shape) * scale).astype(np.float32)

    params = {
        'cb_w': rand(F, IN_CHANNELS, 3, 3),
        'cb_b': rand(F), 'cb_g': 1.0 + rand(F), 'cb_be': rand(F),
        'res_w': [], 'res_b': [], 'res_g': [], 'res_be': [],
    }
    for _ in range(NB_RES_BLOCKS):
        for _ in range(2):
            params['res_w'].append(rand(F, F, 3, 3))
            params['res_b'].append(rand(F))
            params['res_g'].append(1.0 + rand(F))
            params['res_be'].append(rand(F))

    def value_head():
        return {'cw': rand(1, F, 1, 1), 'cb': rand(1), 'cg': 1.0 + rand(1),
                'cbe': rand(1),
                'fc1w': rand(VALUE_HIDDEN, P), 'fc1b': rand(VALUE_HIDDEN),
                'fc2w': rand(1, VALUE_HIDDEN), 'fc2b': rand(1)}

    params['value_head'] = value_head()
    params['value_capture_head'] = value_head()
    params['policy_head'] = {
        'cw': rand(2, F, 1, 1), 'cb': rand(2), 'cg': 1.0 + rand(2), 'cbe': rand(2),
        'fcw': rand(POLICY_OUT, 2 * P), 'fcb': rand(POLICY_OUT)}
    return params


def _fuse_conv_w(w_torch):
    # torch (Cout, Cin, 3, 3) -> (Cout, 9*Cin), column index = k*Cin + ci, k = ky*3+kx
    co, ci = w_torch.shape[0], w_torch.shape[1]
    return np.transpose(w_torch, (0, 2, 3, 1)).reshape(co, 9 * ci).astype(np.float32)


def pack_params(p):
    F = NB_FILTERS
    cb_w = _fuse_conv_w(p['cb_w'])                                  # (F, 36)
    res_w = np.stack([_fuse_conv_w(w) for w in p['res_w']], 0)      # (4, F, 288)

    bn_pack = np.zeros((1 + 2 * NB_RES_BLOCKS, F, 3), np.float32)
    bn_pack[0, :, 0], bn_pack[0, :, 1], bn_pack[0, :, 2] = p['cb_b'], p['cb_g'], p['cb_be']
    for j in range(2 * NB_RES_BLOCKS):
        bn_pack[1 + j, :, 0] = p['res_b'][j]
        bn_pack[1 + j, :, 1] = p['res_g'][j]
        bn_pack[1 + j, :, 2] = p['res_be'][j]

    vh, vc, ph = p['value_head'], p['value_capture_head'], p['policy_head']
    hcw = np.concatenate([vh['cw'].reshape(1, F), vc['cw'].reshape(1, F),
                          ph['cw'].reshape(2, F)], axis=0)          # (4, F)
    hbn = np.zeros((4, 3), np.float32)
    hbn[:, 0] = np.concatenate([vh['cb'], vc['cb'], ph['cb']])
    hbn[:, 1] = np.concatenate([vh['cg'], vc['cg'], ph['cg']])
    hbn[:, 2] = np.concatenate([vh['cbe'], vc['cbe'], ph['cbe']])

    # policy FC: flat cols [policy ch0 block | policy ch1 block] (128-wide blocks,
    # rows >= 100 of each block are zero -> padded flat lanes contribute nothing)
    fcp_w = np.zeros((2 * CPB, POLICY_PAD), np.float32)
    for cpol in range(2):
        fcp_w[cpol * CPB:cpol * CPB + P, :POLICY_OUT] = \
            ph['fcw'][:, cpol * P:(cpol + 1) * P].T
    fcp_b = np.zeros((1, POLICY_PAD), np.float32)
    fcp_b[0, :POLICY_OUT] = ph['fcb']

    # value / capture FC1: flat cols [value block | capture block]
    fcv_w = np.zeros((2 * CPB, 2 * VALUE_HIDDEN), np.float32)
    fcv_w[0:P, 0:VALUE_HIDDEN] = vh['fc1w'].T
    fcv_w[CPB:CPB + P, VALUE_HIDDEN:] = vc['fc1w'].T
    fcv_b = np.concatenate([vh['fc1b'], vc['fc1b']]).reshape(1, 2 * VALUE_HIDDEN)

    fc2_w = np.zeros((2 * VALUE_HIDDEN, 2), np.float32)             # block diagonal
    fc2_w[:VALUE_HIDDEN, 0] = vh['fc2w'][0]
    fc2_w[VALUE_HIDDEN:, 1] = vc['fc2w'][0]
    fc2_b = np.array([[vh['fc2b'][0], vc['fc2b'][0]]], np.float32)

    # bf16 for everything that feeds the MXU; f32 for BN/bias/softmax/tanh params.
    out = {
        'cb_w': jnp.asarray(cb_w, jnp.bfloat16),
        'res_w': jnp.asarray(res_w, jnp.bfloat16),
        'bn': jnp.asarray(bn_pack, jnp.float32),
        'hcw': jnp.asarray(hcw, jnp.bfloat16),
        'hbn': jnp.asarray(hbn, jnp.float32),
        'fcp_w': jnp.asarray(fcp_w, jnp.bfloat16),
        'fcp_b': jnp.asarray(fcp_b, jnp.float32),
        'fcv_w': jnp.asarray(fcv_w, jnp.bfloat16),
        'fcv_b': jnp.asarray(fcv_b, jnp.float32),
        'fc2_w': jnp.asarray(fc2_w, jnp.float32),
        'fc2_b': jnp.asarray(fc2_b, jnp.float32),
    }
    return out


# ----------------------------- wrapper -----------------------------------------
@jax.jit
def _forward(packed, x_nchw):
    B = x_nchw.shape[0]
    bpp = B * CPB
    # free reshape only -- channel-major relayout happens inside the kernel
    x2 = x_nchw.astype(jnp.float32).reshape(B * IN_CHANNELS, P)

    # tap masks (per-board, zero on pad lanes) as a trace-time constant: no per-call op
    masks_np = np.zeros((9, bpp), np.float32)
    for b in range(B):
        masks_np[:, b * CPB:b * CPB + P] = TAP_MASKS_P
    masks = jnp.asarray(masks_np)

    vspec = pl.BlockSpec(memory_space=pltpu.MemorySpace.VMEM)
    value, vcap, policy_pad = pl.pallas_call(
        cnn_net_kernel,
        out_shape=(jax.ShapeDtypeStruct((B, 1), jnp.float32),
                   jax.ShapeDtypeStruct((B, 1), jnp.float32),
                   jax.ShapeDtypeStruct((B, POLICY_PAD), jnp.float32)),
        in_specs=[vspec] * 13,
        out_specs=(vspec, vspec, vspec),
        scratch_shapes=[
            pltpu.VMEM((IN_CHANNELS, bpp), jnp.float32),            # channel-major input
            pltpu.VMEM((9 * NB_FILTERS, bpp), jnp.bfloat16),        # im2col patch
            pltpu.VMEM((B, 4 * CPB), jnp.bfloat16),                 # flattened heads
        ],
        compiler_params=pltpu.CompilerParams(vmem_limit_bytes=32 * 1024 * 1024),
    )(x2, masks, packed['cb_w'], packed['res_w'], packed['bn'],
      packed['hcw'], packed['hbn'], packed['fcp_w'], packed['fcp_b'],
      packed['fcv_w'], packed['fcv_b'], packed['fc2_w'], packed['fc2_b'])

    return value, vcap, policy_pad[:, :POLICY_OUT]


def cnn_net_forward(packed, x_nchw, is_capture=False):
    value, value_capture, policy = _forward(packed, x_nchw)
    if is_capture:
        return value_capture
    return value, policy


# ----------------------------- main ---------------------------------------------
if __name__ == "__main__":
    # TODO(synk): nn.BatchNorm2d running-statistics updates (a training-time side
    # effect) are not modeled; normalization itself uses batch stats as PyTorch
    # training mode does.
    B = 2
    key = jax.random.PRNGKey(0)
    x = jax.random.normal(key, (B, IN_CHANNELS, H, W), dtype=jnp.float32)

    params = init_params(seed=0)
    packed = pack_params(params)

    value, policy = cnn_net_forward(packed, x, is_capture=False)
    value_cap = cnn_net_forward(packed, x, is_capture=True)
    jax.block_until_ready((value, policy, value_cap))

    assert value.shape == (B, 1)
    assert policy.shape == (B, POLICY_OUT)
    assert value_cap.shape == (B, 1)
    assert np.allclose(np.asarray(policy).sum(axis=1), 1.0, atol=1e-3)
    assert np.all(np.abs(np.asarray(value)) <= 1.0 + 1e-6)
    assert np.all(np.abs(np.asarray(value_cap)) <= 1.0 + 1e-6)

    print("KERNEL_OK")
</pallas_src>

<mosaic_0001>
module attributes {stable_mosaic.version = 11 : i64} {
  func.func @cnn_net_kernel(%arg0: memref<8x100xf32, #tpu.memory_space<vmem>>, %arg1: memref<9x256xf32, #tpu.memory_space<vmem>>, %arg2: memref<32x36xbf16, #tpu.memory_space<vmem>>, %arg3: memref<4x32x288xbf16, #tpu.memory_space<vmem>>, %arg4: memref<5x32x3xf32, #tpu.memory_space<vmem>>, %arg5: memref<4x32xbf16, #tpu.memory_space<vmem>>, %arg6: memref<4x3xf32, #tpu.memory_space<vmem>>, %arg7: memref<256x640xbf16, #tpu.memory_space<vmem>>, %arg8: memref<1x640xf32, #tpu.memory_space<vmem>>, %arg9: memref<256x64xbf16, #tpu.memory_space<vmem>>, %arg10: memref<1x64xf32, #tpu.memory_space<vmem>>, %arg11: memref<64x2xf32, #tpu.memory_space<vmem>>, %arg12: memref<1x2xf32, #tpu.memory_space<vmem>>, %arg13: memref<2x1xf32, #tpu.memory_space<vmem>>, %arg14: memref<2x1xf32, #tpu.memory_space<vmem>>, %arg15: memref<2x640xf32, #tpu.memory_space<vmem>>, %arg16: memref<4x256xf32, #tpu.memory_space<vmem>>, %arg17: memref<288x256xbf16, #tpu.memory_space<vmem>>, %arg18: memref<2x512xbf16, #tpu.memory_space<vmem>>) attributes {dimension_semantics = [], scalar_prefetch = 0 : i64, scratch_operands = 3 : i64, tpu.core_type = #tpu.core_type<tc>} {
    %c0 = arith.constant 0 : index
    %c0_0 = arith.constant 0 : index
    %0 = vector.load %arg1[%c0, %c0_0] : memref<9x256xf32, #tpu.memory_space<vmem>>, vector<9x256xf32>
    %1 = vector.extract_strided_slice %0 {offsets = [4, 0], sizes = [1, 256], strides = [1, 1]} : vector<9x256xf32> to vector<1x256xf32>
    %cst = arith.constant 0.000000e+00 : f32
    %2 = vector.broadcast %cst : f32 to vector<4x256xf32>
    %c0_1 = arith.constant 0 : index
    %c0_2 = arith.constant 0 : index
    %3 = vector.load %arg16[%c0_1, %c0_2] : memref<4x256xf32, #tpu.memory_space<vmem>>, vector<4x256xf32>
    tpu.vector_store %arg16[%c0_1, %c0_2], %2 {strides = array<i32>} : memref<4x256xf32, #tpu.memory_space<vmem>>, vector<4x256xf32>,
    %c0_3 = arith.constant 0 : index
    %c0_4 = arith.constant 0 : index
    %4 = vector.load %arg0[%c0_3, %c0_4] : memref<8x100xf32, #tpu.memory_space<vmem>>, vector<1x100xf32>
    %c0_5 = arith.constant 0 : index
    %c0_6 = arith.constant 0 : index
    %5 = vector.load %arg16[%c0_5, %c0_6] : memref<4x256xf32, #tpu.memory_space<vmem>>, vector<1x100xf32>
    tpu.vector_store %arg16[%c0_5, %c0_6], %4 {strides = array<i32>} : memref<4x256xf32, #tpu.memory_space<vmem>>, vector<1x100xf32>,
    %c1 = arith.constant 1 : index
    %c0_7 = arith.constant 0 : index
    %6 = vector.load %arg0[%c1, %c0_7] : memref<8x100xf32, #tpu.memory_space<vmem>>, vector<1x100xf32>
    %c1_8 = arith.constant 1 : index
    %c0_9 = arith.constant 0 : index
    %7 = vector.load %arg16[%c1_8, %c0_9] : memref<4x256xf32, #tpu.memory_space<vmem>>, vector<1x100xf32>
    tpu.vector_store %arg16[%c1_8, %c0_9], %6 {strides = array<i32>} : memref<4x256xf32, #tpu.memory_space<vmem>>, vector<1x100xf32>,
    %c2 = arith.constant 2 : index
    %c0_10 = arith.constant 0 : index
    %8 = vector.load %arg0[%c2, %c0_10] : memref<8x100xf32, #tpu.memory_space<vmem>>, vector<1x100xf32>
    %c2_11 = arith.constant 2 : index
    %c0_12 = arith.constant 0 : index
    %9 = vector.load %arg16[%c2_11, %c0_12] : memref<4x256xf32, #tpu.memory_space<vmem>>, vector<1x100xf32>
    tpu.vector_store %arg16[%c2_11, %c0_12], %8 {strides = array<i32>} : memref<4x256xf32, #tpu.memory_space<vmem>>, vector<1x100xf32>,
    %c3 = arith.constant 3 : index
    %c0_13 = arith.constant 0 : index
    %10 = vector.load %arg0[%c3, %c0_13] : memref<8x100xf32, #tpu.memory_space<vmem>>, vector<1x100xf32>
    %c3_14 = arith.constant 3 : index
    %c0_15 = arith.constant 0 : index
    %11 = vector.load %arg16[%c3_14, %c0_15] : memref<4x256xf32, #tpu.memory_space<vmem>>, vector<1x100xf32>
    tpu.vector_store %arg16[%c3_14, %c0_15], %10 {strides = array<i32>} : memref<4x256xf32, #tpu.memory_space<vmem>>, vector<1x100xf32>,
    %c4 = arith.constant 4 : index
    %c0_16 = arith.constant 0 : index
    %12 = vector.load %arg0[%c4, %c0_16] : memref<8x100xf32, #tpu.memory_space<vmem>>, vector<1x100xf32>
    %c0_17 = arith.constant 0 : index
    %c128 = arith.constant 128 : index
    %13 = vector.load %arg16[%c0_17, %c128] : memref<4x256xf32, #tpu.memory_space<vmem>>, vector<1x100xf32>
    tpu.vector_store %arg16[%c0_17, %c128], %12 {strides = array<i32>} : memref<4x256xf32, #tpu.memory_space<vmem>>, vector<1x100xf32>,
    %c5 = arith.constant 5 : index
    %c0_18 = arith.constant 0 : index
    %14 = vector.load %arg0[%c5, %c0_18] : memref<8x100xf32, #tpu.memory_space<vmem>>, vector<1x100xf32>
    %c1_19 = arith.constant 1 : index
    %c128_20 = arith.constant 128 : index
    %15 = vector.load %arg16[%c1_19, %c128_20] : memref<4x256xf32, #tpu.memory_space<vmem>>, vector<1x100xf32>
    tpu.vector_store %arg16[%c1_19, %c128_20], %14 {strides = array<i32>} : memref<4x256xf32, #tpu.memory_space<vmem>>, vector<1x100xf32>,
    %c6 = arith.constant 6 : index
    %c0_21 = arith.constant 0 : index
    %16 = vector.load %arg0[%c6, %c0_21] : memref<8x100xf32, #tpu.memory_space<vmem>>, vector<1x100xf32>
    %c2_22 = arith.constant 2 : index
    %c128_23 = arith.constant 128 : index
    %17 = vector.load %arg16[%c2_22, %c128_23] : memref<4x256xf32, #tpu.memory_space<vmem>>, vector<1x100xf32>
    tpu.vector_store %arg16[%c2_22, %c128_23], %16 {strides = array<i32>} : memref<4x256xf32, #tpu.memory_space<vmem>>, vector<1x100xf32>,
    %c7 = arith.constant 7 : index
    %c0_24 = arith.constant 0 : index
    %18 = vector.load %arg0[%c7, %c0_24] : memref<8x100xf32, #tpu.memory_space<vmem>>, vector<1x100xf32>
    %c3_25 = arith.constant 3 : index
    %c128_26 = arith.constant 128 : index
    %19 = vector.load %arg16[%c3_25, %c128_26] : memref<4x256xf32, #tpu.memory_space<vmem>>, vector<1x100xf32>
    tpu.vector_store %arg16[%c3_25, %c128_26], %18 {strides = array<i32>} : memref<4x256xf32, #tpu.memory_space<vmem>>, vector<1x100xf32>,
    %c0_27 = arith.constant 0 : index
    %c0_28 = arith.constant 0 : index
    %20 = vector.load %arg16[%c0_27, %c0_28] : memref<4x256xf32, #tpu.memory_space<vmem>>, vector<4x256xf32>
    %c0_29 = arith.constant 0 : index
    %c0_30 = arith.constant 0 : index
    %c0_31 = arith.constant 0 : index
    %21 = vector.load %arg4[%c0_29, %c0_30, %c0_31] : memref<5x32x3xf32, #tpu.memory_space<vmem>>, vector<1x32x3xf32>
    %22 = vector.shape_cast %21 : vector<1x32x3xf32> to vector<32x3xf32>
    %c0_32 = arith.constant 0 : index
    %c0_33 = arith.constant 0 : index
    %23 = vector.load %arg2[%c0_32, %c0_33] : memref<32x36xbf16, #tpu.memory_space<vmem>>, vector<32x36xbf16>
    %24 = vector.extract_strided_slice %22 {offsets = [0, 0], sizes = [32, 1], strides = [1, 1]} : vector<32x3xf32> to vector<32x1xf32>
    %25 = vector.extract_strided_slice %20 {offsets = [0, 245], sizes = [4, 11], strides = [1, 1]} : vector<4x256xf32> to vector<4x11xf32>
    %26 = vector.extract_strided_slice %20 {offsets = [0, 0], sizes = [4, 245], strides = [1, 1]} : vector<4x256xf32> to vector<4x245xf32>
    %27 = tpu.concatenate %25, %26 in 1 : vector<4x11xf32>, vector<4x245xf32> -> vector<4x256xf32>
    %28 = vector.extract_strided_slice %0 {offsets = [0, 0], sizes = [1, 256], strides = [1, 1]} : vector<9x256xf32> to vector<1x256xf32>
    %29 = vector.broadcast %28 : vector<1x256xf32> to vector<4x256xf32>
    %30 = arith.mulf %27, %29 : vector<4x256xf32>
    %31 = arith.truncf %30 : vector<4x256xf32> to vector<4x256xbf16>
    %c0_34 = arith.constant 0 : index
    %c0_35 = arith.constant 0 : index
    %32 = vector.load %arg17[%c0_34, %c0_35] : memref<288x256xbf16, #tpu.memory_space<vmem>>, vector<4x256xbf16>
    tpu.vector_store %arg17[%c0_34, %c0_35], %31 {strides = array<i32>} : memref<288x256xbf16, #tpu.memory_space<vmem>>, vector<4x256xbf16>,
    %33 = vector.extract_strided_slice %20 {offsets = [0, 246], sizes = [4, 10], strides = [1, 1]} : vector<4x256xf32> to vector<4x10xf32>
    %34 = vector.extract_strided_slice %20 {offsets = [0, 0], sizes = [4, 246], strides = [1, 1]} : vector<4x256xf32> to vector<4x246xf32>
    %35 = tpu.concatenate %33, %34 in 1 : vector<4x10xf32>, vector<4x246xf32> -> vector<4x256xf32>
    %36 = vector.extract_strided_slice %0 {offsets = [1, 0], sizes = [1, 256], strides = [1, 1]} : vector<9x256xf32> to vector<1x256xf32>
    %37 = vector.broadcast %36 : vector<1x256xf32> to vector<4x256xf32>
    %38 = arith.mulf %35, %37 : vector<4x256xf32>
    %39 = arith.truncf %38 : vector<4x256xf32> to vector<4x256xbf16>
    %c4_36 = arith.constant 4 : index
    %c0_37 = arith.constant 0 : index
    %40 = vector.load %arg17[%c4_36, %c0_37] : memref<288x256xbf16, #tpu.memory_space<vmem>>, vector<4x256xbf16>
    tpu.vector_store %arg17[%c4_36, %c0_37], %39 {strides = array<i32>} : memref<288x256xbf16, #tpu.memory_space<vmem>>, vector<4x256xbf16>,
    %41 = vector.extract_strided_slice %20 {offsets = [0, 247], sizes = [4, 9], strides = [1, 1]} : vector<4x256xf32> to vector<4x9xf32>
    %42 = vector.extract_strided_slice %20 {offsets = [0, 0], sizes = [4, 247], strides = [1, 1]} : vector<4x256xf32> to vector<4x247xf32>
    %43 = tpu.concatenate %41, %42 in 1 : vector<4x9xf32>, vector<4x247xf32> -> vector<4x256xf32>
    %44 = vector.extract_strided_slice %0 {offsets = [2, 0], sizes = [1, 256], strides = [1, 1]} : vector<9x256xf32> to vector<1x256xf32>
    %45 = vector.broadcast %44 : vector<1x256xf32> to vector<4x256xf32>
    %46 = arith.mulf %43, %45 : vector<4x256xf32>
    %47 = arith.truncf %46 : vector<4x256xf32> to vector<4x256xbf16>
    %c8 = arith.constant 8 : index
    %c0_38 = arith.constant 0 : index
    %48 = vector.load %arg17[%c8, %c0_38] : memref<288x256xbf16, #tpu.memory_space<vmem>>, vector<4x256xbf16>
    tpu.vector_store %arg17[%c8, %c0_38], %47 {strides = array<i32>} : memref<288x256xbf16, #tpu.memory_space<vmem>>, vector<4x256xbf16>,
    %49 = vector.extract_strided_slice %20 {offsets = [0, 255], sizes = [4, 1], strides = [1, 1]} : vector<4x256xf32> to vector<4x1xf32>
    %50 = vector.extract_strided_slice %20 {offsets = [0, 0], sizes = [4, 255], strides = [1, 1]} : vector<4x256xf32> to vector<4x255xf32>
    %51 = tpu.concatenate %49, %50 in 1 : vector<4x1xf32>, vector<4x255xf32> -> vector<4x256xf32>
    %52 = vector.extract_strided_slice %0 {offsets = [3, 0], sizes = [1, 256], strides = [1, 1]} : vector<9x256xf32> to vector<1x256xf32>
    %53 = vector.broadcast %52 : vector<1x256xf32> to vector<4x256xf32>
    %54 = arith.mulf %51, %53 : vector<4x256xf32>
    %55 = arith.truncf %54 : vector<4x256xf32> to vector<4x256xbf16>
    %c12 = arith.constant 12 : index
    %c0_39 = arith.constant 0 : index
    %56 = vector.load %arg17[%c12, %c0_39] : memref<288x256xbf16, #tpu.memory_space<vmem>>, vector<4x256xbf16>
    tpu.vector_store %arg17[%c12, %c0_39], %55 {strides = array<i32>} : memref<288x256xbf16, #tpu.memory_space<vmem>>, vector<4x256xbf16>,
    %57 = vector.extract_strided_slice %0 {offsets = [4, 0], sizes = [1, 256], strides = [1, 1]} : vector<9x256xf32> to vector<1x256xf32>
    %58 = vector.broadcast %57 : vector<1x256xf32> to vector<4x256xf32>
    %59 = arith.mulf %20, %58 : vector<4x256xf32>
    %60 = arith.truncf %59 : vector<4x256xf32> to vector<4x256xbf16>
    %c16 = arith.constant 16 : index
    %c0_40 = arith.constant 0 : index
    %61 = vector.load %arg17[%c16, %c0_40] : memref<288x256xbf16, #tpu.memory_space<vmem>>, vector<4x256xbf16>
    tpu.vector_store %arg17[%c16, %c0_40], %60 {strides = array<i32>} : memref<288x256xbf16, #tpu.memory_space<vmem>>, vector<4x256xbf16>,
    %62 = vector.extract_strided_slice %20 {offsets = [0, 1], sizes = [4, 255], strides = [1, 1]} : vector<4x256xf32> to vector<4x255xf32>
    %63 = vector.extract_strided_slice %20 {offsets = [0, 0], sizes = [4, 1], strides = [1, 1]} : vector<4x256xf32> to vector<4x1xf32>
    %64 = tpu.concatenate %62, %63 in 1 : vector<4x255xf32>, vector<4x1xf32> -> vector<4x256xf32>
    %65 = vector.extract_strided_slice %0 {offsets = [5, 0], sizes = [1, 256], strides = [1, 1]} : vector<9x256xf32> to vector<1x256xf32>
    %66 = vector.broadcast %65 : vector<1x256xf32> to vector<4x256xf32>
    %67 = arith.mulf %64, %66 : vector<4x256xf32>
    %68 = arith.truncf %67 : vector<4x256xf32> to vector<4x256xbf16>
    %c20 = arith.constant 20 : index
    %c0_41 = arith.constant 0 : index
    %69 = vector.load %arg17[%c20, %c0_41] : memref<288x256xbf16, #tpu.memory_space<vmem>>, vector<4x256xbf16>
    tpu.vector_store %arg17[%c20, %c0_41], %68 {strides = array<i32>} : memref<288x256xbf16, #tpu.memory_space<vmem>>, vector<4x256xbf16>,
    %70 = vector.extract_strided_slice %20 {offsets = [0, 9], sizes = [4, 247], strides = [1, 1]} : vector<4x256xf32> to vector<4x247xf32>
    %71 = vector.extract_strided_slice %20 {offsets = [0, 0], sizes = [4, 9], strides = [1, 1]} : vector<4x256xf32> to vector<4x9xf32>
    %72 = tpu.concatenate %70, %71 in 1 : vector<4x247xf32>, vector<4x9xf32> -> vector<4x256xf32>
    %73 = vector.extract_strided_slice %0 {offsets = [6, 0], sizes = [1, 256], strides = [1, 1]} : vector<9x256xf32> to vector<1x256xf32>
    %74 = vector.broadcast %73 : vector<1x256xf32> to vector<4x256xf32>
    %75 = arith.mulf %72, %74 : vector<4x256xf32>
    %76 = arith.truncf %75 : vector<4x256xf32> to vector<4x256xbf16>
    %c24 = arith.constant 24 : index
    %c0_42 = arith.constant 0 : index
    %77 = vector.load %arg17[%c24, %c0_42] : memref<288x256xbf16, #tpu.memory_space<vmem>>, vector<4x256xbf16>
    tpu.vector_store %arg17[%c24, %c0_42], %76 {strides = array<i32>} : memref<288x256xbf16, #tpu.memory_space<vmem>>, vector<4x256xbf16>,
    %78 = vector.extract_strided_slice %20 {offsets = [0, 10], sizes = [4, 246], strides = [1, 1]} : vector<4x256xf32> to vector<4x246xf32>
    %79 = vector.extract_strided_slice %20 {offsets = [0, 0], sizes = [4, 10], strides = [1, 1]} : vector<4x256xf32> to vector<4x10xf32>
    %80 = tpu.concatenate %78, %79 in 1 : vector<4x246xf32>, vector<4x10xf32> -> vector<4x256xf32>
    %81 = vector.extract_strided_slice %0 {offsets = [7, 0], sizes = [1, 256], strides = [1, 1]} : vector<9x256xf32> to vector<1x256xf32>
    %82 = vector.broadcast %81 : vector<1x256xf32> to vector<4x256xf32>
    %83 = arith.mulf %80, %82 : vector<4x256xf32>
    %84 = arith.truncf %83 : vector<4x256xf32> to vector<4x256xbf16>
    %c28 = arith.constant 28 : index
    %c0_43 = arith.constant 0 : index
    %85 = vector.load %arg17[%c28, %c0_43] : memref<288x256xbf16, #tpu.memory_space<vmem>>, vector<4x256xbf16>
    tpu.vector_store %arg17[%c28, %c0_43], %84 {strides = array<i32>} : memref<288x256xbf16, #tpu.memory_space<vmem>>, vector<4x256xbf16>,
    %86 = vector.extract_strided_slice %20 {offsets = [0, 11], sizes = [4, 245], strides = [1, 1]} : vector<4x256xf32> to vector<4x245xf32>
    %87 = vector.extract_strided_slice %20 {offsets = [0, 0], sizes = [4, 11], strides = [1, 1]} : vector<4x256xf32> to vector<4x11xf32>
    %88 = tpu.concatenate %86, %87 in 1 : vector<4x245xf32>, vector<4x11xf32> -> vector<4x256xf32>
    %89 = vector.extract_strided_slice %0 {offsets = [8, 0], sizes = [1, 256], strides = [1, 1]} : vector<9x256xf32> to vector<1x256xf32>
    %90 = vector.broadcast %89 : vector<1x256xf32> to vector<4x256xf32>
    %91 = arith.mulf %88, %90 : vector<4x256xf32>
    %92 = arith.truncf %91 : vector<4x256xf32> to vector<4x256xbf16>
    %c32 = arith.constant 32 : index
    %c0_44 = arith.constant 0 : index
    %93 = vector.load %arg17[%c32, %c0_44] : memref<288x256xbf16, #tpu.memory_space<vmem>>, vector<4x256xbf16>
    tpu.vector_store %arg17[%c32, %c0_44], %92 {strides = array<i32>} : memref<288x256xbf16, #tpu.memory_space<vmem>>, vector<4x256xbf16>,
    %c0_45 = arith.constant 0 : index
    %c0_46 = arith.constant 0 : index
    %94 = vector.load %arg17[%c0_45, %c0_46] : memref<288x256xbf16, #tpu.memory_space<vmem>>, vector<36x256xbf16>
    %cst_47 = arith.constant dense<0.000000e+00> : vector<32x256xf32>
    %95 = tpu.matmul %23, %94, %cst_47 {dimension_numbers = #tpu.dot_dimension_numbers<[1], [0], [0], [1], [0, 0, 1, 1], [], []>} : vector<32x36xbf16>, vector<36x256xbf16>, vector<32x256xf32> -> vector<32x256xf32>
    %96 = vector.broadcast %24 : vector<32x1xf32> to vector<32x256xf32>
    %97 = arith.addf %95, %96 : vector<32x256xf32>
    %98 = vector.extract_strided_slice %22 {offsets = [0, 1], sizes = [32, 1], strides = [1, 1]} : vector<32x3xf32> to vector<32x1xf32>
    %99 = vector.extract_strided_slice %22 {offsets = [0, 2], sizes = [32, 1], strides = [1, 1]} : vector<32x3xf32> to vector<32x1xf32>
    %100 = vector.broadcast %1 : vector<1x256xf32> to vector<32x256xf32>
    %101 = arith.mulf %97, %100 : vector<32x256xf32>
    %cst_48 = arith.constant dense<0.000000e+00> : vector<32xf32>
    %102 = vector.multi_reduction <add>, %101, %cst_48 [1] : vector<32x256xf32> to vector<32xf32>
    %103 = vector.shape_cast %102 : vector<32xf32> to vector<32x1xf32>
    %cst_49 = arith.constant 5.000000e-03 : f32
    %104 = vector.broadcast %cst_49 : f32 to vector<32x1xf32>
    %105 = arith.mulf %103, %104 : vector<32x1xf32>
    %106 = vector.broadcast %105 : vector<32x1xf32> to vector<32x256xf32>
    %107 = arith.subf %97, %106 : vector<32x256xf32>
    %108 = vector.broadcast %1 : vector<1x256xf32> to vector<32x256xf32>
    %109 = arith.mulf %107, %108 : vector<32x256xf32>
    %110 = arith.mulf %109, %109 : vector<32x256xf32>
    %cst_50 = arith.constant dense<0.000000e+00> : vector<32xf32>
    %111 = vector.multi_reduction <add>, %110, %cst_50 [1] : vector<32x256xf32> to vector<32xf32>
    %112 = vector.shape_cast %111 : vector<32xf32> to vector<32x1xf32>
    %cst_51 = arith.constant 5.000000e-03 : f32
    %113 = vector.broadcast %cst_51 : f32 to vector<32x1xf32>
    %114 = arith.mulf %112, %113 : vector<32x1xf32>
    %115 = vector.broadcast %105 : vector<32x1xf32> to vector<32x256xf32>
    %116 = arith.subf %97, %115 : vector<32x256xf32>
    %cst_52 = arith.constant 9.99999974E-6 : f32
    %117 = vector.broadcast %cst_52 : f32 to vector<32x1xf32>
    %118 = arith.addf %114, %117 : vector<32x1xf32>
    %119 = math.rsqrt %118 : vector<32x1xf32>
    %120 = vector.broadcast %119 : vector<32x1xf32> to vector<32x256xf32>
    %121 = arith.mulf %116, %120 : vector<32x256xf32>
    %122 = vector.broadcast %98 : vector<32x1xf32> to vector<32x256xf32>
    %123 = arith.mulf %121, %122 : vector<32x256xf32>
    %124 = vector.broadcast %99 : vector<32x1xf32> to vector<32x256xf32>
    %125 = arith.addf %123, %124 : vector<32x256xf32>
    %cst_53 = arith.constant 0.000000e+00 : f32
    %126 = vector.broadcast %cst_53 : f32 to vector<32x256xf32>
    %127 = arith.maximumf %125, %126 : vector<32x256xf32>
    %c1_54 = arith.constant 1 : index
    %c0_55 = arith.constant 0 : index
    %c0_56 = arith.constant 0 : index
    %128 = vector.load %arg4[%c1_54, %c0_55, %c0_56] : memref<5x32x3xf32, #tpu.memory_space<vmem>>, vector<1x32x3xf32>
    %129 = vector.shape_cast %128 : vector<1x32x3xf32> to vector<32x3xf32>
    %c0_57 = arith.constant 0 : index
    %c0_58 = arith.constant 0 : index
    %c0_59 = arith.constant 0 : index
    %130 = vector.load %arg3[%c0_57, %c0_58, %c0_59] : memref<4x32x288xbf16, #tpu.memory_space<vmem>>, vector<1x32x288xbf16>
    %131 = vector.shape_cast %130 : vector<1x32x288xbf16> to vector<32x288xbf16>
    %132 = vector.extract_strided_slice %129 {offsets = [0, 0], sizes = [32, 1], strides = [1, 1]} : vector<32x3xf32> to vector<32x1xf32>
    %133 = vector.extract_strided_slice %127 {offsets = [0, 245], sizes = [32, 11], strides = [1, 1]} : vector<32x256xf32> to vector<32x11xf32>
    %134 = vector.extract_strided_slice %127 {offsets = [0, 0], sizes = [32, 245], strides = [1, 1]} : vector<32x256xf32> to vector<32x245xf32>
    %135 = tpu.concatenate %133, %134 in 1 : vector<32x11xf32>, vector<32x245xf32> -> vector<32x256xf32>
    %136 = vector.extract_strided_slice %0 {offsets = [0, 0], sizes = [1, 256], strides = [1, 1]} : vector<9x256xf32> to vector<1x256xf32>
    %137 = vector.broadcast %136 : vector<1x256xf32> to vector<32x256xf32>
    %138 = arith.mulf %135, %137 : vector<32x256xf32>
    %139 = arith.truncf %138 : vector<32x256xf32> to vector<32x256xbf16>
    %c0_60 = arith.constant 0 : index
    %c0_61 = arith.constant 0 : index
    %140 = vector.load %arg17[%c0_60, %c0_61] : memref<288x256xbf16, #tpu.memory_space<vmem>>, vector<32x256xbf16>
    tpu.vector_store %arg17[%c0_60, %c0_61], %139 {strides = array<i32>} : memref<288x256xbf16, #tpu.memory_space<vmem>>, vector<32x256xbf16>,
    %141 = vector.extract_strided_slice %127 {offsets = [0, 246], sizes = [32, 10], strides = [1, 1]} : vector<32x256xf32> to vector<32x10xf32>
    %142 = vector.extract_strided_slice %127 {offsets = [0, 0], sizes = [32, 246], strides = [1, 1]} : vector<32x256xf32> to vector<32x246xf32>
    %143 = tpu.concatenate %141, %142 in 1 : vector<32x10xf32>, vector<32x246xf32> -> vector<32x256xf32>
    %144 = vector.extract_strided_slice %0 {offsets = [1, 0], sizes = [1, 256], strides = [1, 1]} : vector<9x256xf32> to vector<1x256xf32>
    %145 = vector.broadcast %144 : vector<1x256xf32> to vector<32x256xf32>
    %146 = arith.mulf %143, %145 : vector<32x256xf32>
    %147 = arith.truncf %146 : vector<32x256xf32> to vector<32x256xbf16>
    %c32_62 = arith.constant 32 : index
    %c0_63 = arith.constant 0 : index
    %148 = vector.load %arg17[%c32_62, %c0_63] : memref<288x256xbf16, #tpu.memory_space<vmem>>, vector<32x256xbf16>
    tpu.vector_store %arg17[%c32_62, %c0_63], %147 {strides = array<i32>} : memref<288x256xbf16, #tpu.memory_space<vmem>>, vector<32x256xbf16>,
    %149 = vector.extract_strided_slice %127 {offsets = [0, 247], sizes = [32, 9], strides = [1, 1]} : vector<32x256xf32> to vector<32x9xf32>
    %150 = vector.extract_strided_slice %127 {offsets = [0, 0], sizes = [32, 247], strides = [1, 1]} : vector<32x256xf32> to vector<32x247xf32>
    %151 = tpu.concatenate %149, %150 in 1 : vector<32x9xf32>, vector<32x247xf32> -> vector<32x256xf32>
    %152 = vector.extract_strided_slice %0 {offsets = [2, 0], sizes = [1, 256], strides = [1, 1]} : vector<9x256xf32> to vector<1x256xf32>
    %153 = vector.broadcast %152 : vector<1x256xf32> to vector<32x256xf32>
    %154 = arith.mulf %151, %153 : vector<32x256xf32>
    %155 = arith.truncf %154 : vector<32x256xf32> to vector<32x256xbf16>
    %c64 = arith.constant 64 : index
    %c0_64 = arith.constant 0 : index
    %156 = vector.load %arg17[%c64, %c0_64] : memref<288x256xbf16, #tpu.memory_space<vmem>>, vector<32x256xbf16>
    tpu.vector_store %arg17[%c64, %c0_64], %155 {strides = array<i32>} : memref<288x256xbf16, #tpu.memory_space<vmem>>, vector<32x256xbf16>,
    %157 = vector.extract_strided_slice %127 {offsets = [0, 255], sizes = [32, 1], strides = [1, 1]} : vector<32x256xf32> to vector<32x1xf32>
    %158 = vector.extract_strided_slice %127 {offsets = [0, 0], sizes = [32, 255], strides = [1, 1]} : vector<32x256xf32> to vector<32x255xf32>
    %159 = tpu.concatenate %157, %158 in 1 : vector<32x1xf32>, vector<32x255xf32> -> vector<32x256xf32>
    %160 = vector.extract_strided_slice %0 {offsets = [3, 0], sizes = [1, 256], strides = [1, 1]} : vector<9x256xf32> to vector<1x256xf32>
    %161 = vector.broadcast %160 : vector<1x256xf32> to vector<32x256xf32>
    %162 = arith.mulf %159, %161 : vector<32x256xf32>
    %163 = arith.truncf %162 : vector<32x256xf32> to vector<32x256xbf16>
    %c96 = arith.constant 96 : index
    %c0_65 = arith.constant 0 : index
    %164 = vector.load %arg17[%c96, %c0_65] : memref<288x256xbf16, #tpu.memory_space<vmem>>, vector<32x256xbf16>
    tpu.vector_store %arg17[%c96, %c0_65], %163 {strides = array<i32>} : memref<288x256xbf16, #tpu.memory_space<vmem>>, vector<32x256xbf16>,
    %165 = vector.extract_strided_slice %0 {offsets = [4, 0], sizes = [1, 256], strides = [1, 1]} : vector<9x256xf32> to vector<1x256xf32>
    %166 = vector.broadcast %165 : vector<1x256xf32> to vector<32x256xf32>
    %167 = arith.mulf %127, %166 : vector<32x256xf32>
    %168 = arith.truncf %167 : vector<32x256xf32> to vector<32x256xbf16>
    %c128_66 = arith.constant 128 : index
    %c0_67 = arith.constant 0 : index
    %169 = vector.load %arg17[%c128_66, %c0_67] : memref<288x256xbf16, #tpu.memory_space<vmem>>, vector<32x256xbf16>
    tpu.vector_store %arg17[%c128_66, %c0_67], %168 {strides = array<i32>} : memref<288x256xbf16, #tpu.memory_space<vmem>>, vector<32x256xbf16>,
    %170 = vector.extract_strided_slice %127 {offsets = [0, 1], sizes = [32, 255], strides = [1, 1]} : vector<32x256xf32> to vector<32x255xf32>
    %171 = vector.extract_strided_slice %127 {offsets = [0, 0], sizes = [32, 1], strides = [1, 1]} : vector<32x256xf32> to vector<32x1xf32>
    %172 = tpu.concatenate %170, %171 in 1 : vector<32x255xf32>, vector<32x1xf32> -> vector<32x256xf32>
    %173 = vector.extract_strided_slice %0 {offsets = [5, 0], sizes = [1, 256], strides = [1, 1]} : vector<9x256xf32> to vector<1x256xf32>
    %174 = vector.broadcast %173 : vector<1x256xf32> to vector<32x256xf32>
    %175 = arith.mulf %172, %174 : vector<32x256xf32>
    %176 = arith.truncf %175 : vector<32x256xf32> to vector<32x256xbf16>
    %c160 = arith.constant 160 : index
    %c0_68 = arith.constant 0 : index
    %177 = vector.load %arg17[%c160, %c0_68] : memref<288x256xbf16, #tpu.memory_space<vmem>>, vector<32x256xbf16>
    tpu.vector_store %arg17[%c160, %c0_68], %176 {strides = array<i32>} : memref<288x256xbf16, #tpu.memory_space<vmem>>, vector<32x256xbf16>,
    %178 = vector.extract_strided_slice %127 {offsets = [0, 9], sizes = [32, 247], strides = [1, 1]} : vector<32x256xf32> to vector<32x247xf32>
    %179 = vector.extract_strided_slice %127 {offsets = [0, 0], sizes = [32, 9], strides = [1, 1]} : vector<32x256xf32> to vector<32x9xf32>
    %180 = tpu.concatenate %178, %179 in 1 : vector<32x247xf32>, vector<32x9xf32> -> vector<32x256xf32>
    %181 = vector.extract_strided_slice %0 {offsets = [6, 0], sizes = [1, 256], strides = [1, 1]} : vector<9x256xf32> to vector<1x256xf32>
    %182 = vector.broadcast %181 : vector<1x256xf32> to vector<32x256xf32>
    %183 = arith.mulf %180, %182 : vector<32x256xf32>
    %184 = arith.truncf %183 : vector<32x256xf32> to vector<32x256xbf16>
    %c192 = arith.constant 192 : index
    %c0_69 = arith.constant 0 : index
    %185 = vector.load %arg17[%c192, %c0_69] : memref<288x256xbf16, #tpu.memory_space<vmem>>, vector<32x256xbf16>
    tpu.vector_store %arg17[%c192, %c0_69], %184 {strides = array<i32>} : memref<288x256xbf16, #tpu.memory_space<vmem>>, vector<32x256xbf16>,
    %186 = vector.extract_strided_slice %127 {offsets = [0, 10], sizes = [32, 246], strides = [1, 1]} : vector<32x256xf32> to vector<32x246xf32>
    %187 = vector.extract_strided_slice %127 {offsets = [0, 0], sizes = [32, 10], strides = [1, 1]} : vector<32x256xf32> to vector<32x10xf32>
    %188 = tpu.concatenate %186, %187 in 1 : vector<32x246xf32>, vector<32x10xf32> -> vector<32x256xf32>
    %189 = vector.extract_strided_slice %0 {offsets = [7, 0], sizes = [1, 256], strides = [1, 1]} : vector<9x256xf32> to vector<1x256xf32>
    %190 = vector.broadcast %189 : vector<1x256xf32> to vector<32x256xf32>
    %191 = arith.mulf %188, %190 : vector<32x256xf32>
    %192 = arith.truncf %191 : vector<32x256xf32> to vector<32x256xbf16>
    %c224 = arith.constant 224 : index
    %c0_70 = arith.constant 0 : index
    %193 = vector.load %arg17[%c224, %c0_70] : memref<288x256xbf16, #tpu.memory_space<vmem>>, vector<32x256xbf16>
    tpu.vector_store %arg17[%c224, %c0_70], %192 {strides = array<i32>} : memref<288x256xbf16, #tpu.memory_space<vmem>>, vector<32x256xbf16>,
    %194 = vector.extract_strided_slice %127 {offsets = [0, 11], sizes = [32, 245], strides = [1, 1]} : vector<32x256xf32> to vector<32x245xf32>
    %195 = vector.extract_strided_slice %127 {offsets = [0, 0], sizes = [32, 11], strides = [1, 1]} : vector<32x256xf32> to vector<32x11xf32>
    %196 = tpu.concatenate %194, %195 in 1 : vector<32x245xf32>, vector<32x11xf32> -> vector<32x256xf32>
    %197 = vector.extract_strided_slice %0 {offsets = [8, 0], sizes = [1, 256], strides = [1, 1]} : vector<9x256xf32> to vector<1x256xf32>
    %198 = vector.broadcast %197 : vector<1x256xf32> to vector<32x256xf32>
    %199 = arith.mulf %196, %198 : vector<32x256xf32>
    %200 = arith.truncf %199 : vector<32x256xf32> to vector<32x256xbf16>
    %c256 = arith.constant 256 : index
    %c0_71 = arith.constant 0 : index
    %201 = vector.load %arg17[%c256, %c0_71] : memref<288x256xbf16, #tpu.memory_space<vmem>>, vector<32x256xbf16>
    tpu.vector_store %arg17[%c256, %c0_71], %200 {strides = array<i32>} : memref<288x256xbf16, #tpu.memory_space<vmem>>, vector<32x256xbf16>,
    %c0_72 = arith.constant 0 : index
    %c0_73 = arith.constant 0 : index
    %202 = vector.load %arg17[%c0_72, %c0_73] : memref<288x256xbf16, #tpu.memory_space<vmem>>, vector<288x256xbf16>
    %cst_74 = arith.constant dense<0.000000e+00> : vector<32x256xf32>
    %203 = tpu.matmul %131, %202, %cst_74 {dimension_numbers = #tpu.dot_dimension_numbers<[1], [0], [0], [1], [0, 0, 1, 1], [], []>} : vector<32x288xbf16>, vector<288x256xbf16>, vector<32x256xf32> -> vector<32x256xf32>
    %204 = vector.broadcast %132 : vector<32x1xf32> to vector<32x256xf32>
    %205 = arith.addf %203, %204 : vector<32x256xf32>
    %206 = vector.extract_strided_slice %129 {offsets = [0, 1], sizes = [32, 1], strides = [1, 1]} : vector<32x3xf32> to vector<32x1xf32>
    %207 = vector.extract_strided_slice %129 {offsets = [0, 2], sizes = [32, 1], strides = [1, 1]} : vector<32x3xf32> to vector<32x1xf32>
    %208 = vector.broadcast %1 : vector<1x256xf32> to vector<32x256xf32>
    %209 = arith.mulf %205, %208 : vector<32x256xf32>
    %cst_75 = arith.constant dense<0.000000e+00> : vector<32xf32>
    %210 = vector.multi_reduction <add>, %209, %cst_75 [1] : vector<32x256xf32> to vector<32xf32>
    %211 = vector.shape_cast %210 : vector<32xf32> to vector<32x1xf32>
    %cst_76 = arith.constant 5.000000e-03 : f32
    %212 = vector.broadcast %cst_76 : f32 to vector<32x1xf32>
    %213 = arith.mulf %211, %212 : vector<32x1xf32>
    %214 = vector.broadcast %213 : vector<32x1xf32> to vector<32x256xf32>
    %215 = arith.subf %205, %214 : vector<32x256xf32>
    %216 = vector.broadcast %1 : vector<1x256xf32> to vector<32x256xf32>
    %217 = arith.mulf %215, %216 : vector<32x256xf32>
    %218 = arith.mulf %217, %217 : vector<32x256xf32>
    %cst_77 = arith.constant dense<0.000000e+00> : vector<32xf32>
    %219 = vector.multi_reduction <add>, %218, %cst_77 [1] : vector<32x256xf32> to vector<32xf32>
    %220 = vector.shape_cast %219 : vector<32xf32> to vector<32x1xf32>
    %cst_78 = arith.constant 5.000000e-03 : f32
    %221 = vector.broadcast %cst_78 : f32 to vector<32x1xf32>
    %222 = arith.mulf %220, %221 : vector<32x1xf32>
    %223 = vector.broadcast %213 : vector<32x1xf32> to vector<32x256xf32>
    %224 = arith.subf %205, %223 : vector<32x256xf32>
    %cst_79 = arith.constant 9.99999974E-6 : f32
    %225 = vector.broadcast %cst_79 : f32 to vector<32x1xf32>
    %226 = arith.addf %222, %225 : vector<32x1xf32>
    %227 = math.rsqrt %226 : vector<32x1xf32>
    %228 = vector.broadcast %227 : vector<32x1xf32> to vector<32x256xf32>
    %229 = arith.mulf %224, %228 : vector<32x256xf32>
    %230 = vector.broadcast %206 : vector<32x1xf32> to vector<32x256xf32>
    %231 = arith.mulf %229, %230 : vector<32x256xf32>
    %232 = vector.broadcast %207 : vector<32x1xf32> to vector<32x256xf32>
    %233 = arith.addf %231, %232 : vector<32x256xf32>
    %cst_80 = arith.constant 0.000000e+00 : f32
    %234 = vector.broadcast %cst_80 : f32 to vector<32x256xf32>
    %235 = arith.maximumf %233, %234 : vector<32x256xf32>
    %c2_81 = arith.constant 2 : index
    %c0_82 = arith.constant 0 : index
    %c0_83 = arith.constant 0 : index
    %236 = vector.load %arg4[%c2_81, %c0_82, %c0_83] : memref<5x32x3xf32, #tpu.memory_space<vmem>>, vector<1x32x3xf32>
    %237 = vector.shape_cast %236 : vector<1x32x3xf32> to vector<32x3xf32>
    %c1_84 = arith.constant 1 : index
    %c0_85 = arith.constant 0 : index
    %c0_86 = arith.constant 0 : index
    %238 = vector.load %arg3[%c1_84, %c0_85, %c0_86] : memref<4x32x288xbf16, #tpu.memory_space<vmem>>, vector<1x32x288xbf16>
    %239 = vector.shape_cast %238 : vector<1x32x288xbf16> to vector<32x288xbf16>
    %240 = vector.extract_strided_slice %237 {offsets = [0, 0], sizes = [32, 1], strides = [1, 1]} : vector<32x3xf32> to vector<32x1xf32>
    %241 = vector.extract_strided_slice %235 {offsets = [0, 245], sizes = [32, 11], strides = [1, 1]} : vector<32x256xf32> to vector<32x11xf32>
    %242 = vector.extract_strided_slice %235 {offsets = [0, 0], sizes = [32, 245], strides = [1, 1]} : vector<32x256xf32> to vector<32x245xf32>
    %243 = tpu.concatenate %241, %242 in 1 : vector<32x11xf32>, vector<32x245xf32> -> vector<32x256xf32>
    %244 = vector.extract_strided_slice %0 {offsets = [0, 0], sizes = [1, 256], strides = [1, 1]} : vector<9x256xf32> to vector<1x256xf32>
    %245 = vector.broadcast %244 : vector<1x256xf32> to vector<32x256xf32>
    %246 = arith.mulf %243, %245 : vector<32x256xf32>
    %247 = arith.truncf %246 : vector<32x256xf32> to vector<32x256xbf16>
    %c0_87 = arith.constant 0 : index
    %c0_88 = arith.constant 0 : index
    %248 = vector.load %arg17[%c0_87, %c0_88] : memref<288x256xbf16, #tpu.memory_space<vmem>>, vector<32x256xbf16>
    tpu.vector_store %arg17[%c0_87, %c0_88], %247 {strides = array<i32>} : memref<288x256xbf16, #tpu.memory_space<vmem>>, vector<32x256xbf16>,
    %249 = vector.extract_strided_slice %235 {offsets = [0, 246], sizes = [32, 10], strides = [1, 1]} : vector<32x256xf32> to vector<32x10xf32>
    %250 = vector.extract_strided_slice %235 {offsets = [0, 0], sizes = [32, 246], strides = [1, 1]} : vector<32x256xf32> to vector<32x246xf32>
    %251 = tpu.concatenate %249, %250 in 1 : vector<32x10xf32>, vector<32x246xf32> -> vector<32x256xf32>
    %252 = vector.extract_strided_slice %0 {offsets = [1, 0], sizes = [1, 256], strides = [1, 1]} : vector<9x256xf32> to vector<1x256xf32>
    %253 = vector.broadcast %252 : vector<1x256xf32> to vector<32x256xf32>
    %254 = arith.mulf %251, %253 : vector<32x256xf32>
    %255 = arith.truncf %254 : vector<32x256xf32> to vector<32x256xbf16>
    %c32_89 = arith.constant 32 : index
    %c0_90 = arith.constant 0 : index
    %256 = vector.load %arg17[%c32_89, %c0_90] : memref<288x256xbf16, #tpu.memory_space<vmem>>, vector<32x256xbf16>
    tpu.vector_store %arg17[%c32_89, %c0_90], %255 {strides = array<i32>} : memref<288x256xbf16, #tpu.memory_space<vmem>>, vector<32x256xbf16>,
    %257 = vector.extract_strided_slice %235 {offsets = [0, 247], sizes = [32, 9], strides = [1, 1]} : vector<32x256xf32> to vector<32x9xf32>
    %258 = vector.extract_strided_slice %235 {offsets = [0, 0], sizes = [32, 247], strides = [1, 1]} : vector<32x256xf32> to vector<32x247xf32>
    %259 = tpu.concatenate %257, %258 in 1 : vector<32x9xf32>, vector<32x247xf32> -> vector<32x256xf32>
    %260 = vector.extract_strided_slice %0 {offsets = [2, 0], sizes = [1, 256], strides = [1, 1]} : vector<9x256xf32> to vector<1x256xf32>
    %261 = vector.broadcast %260 : vector<1x256xf32> to vector<32x256xf32>
    %262 = arith.mulf %259, %261 : vector<32x256xf32>
    %263 = arith.truncf %262 : vector<32x256xf32> to vector<32x256xbf16>
    %c64_91 = arith.constant 64 : index
    %c0_92 = arith.constant 0 : index
    %264 = vector.load %arg17[%c64_91, %c0_92] : memref<288x256xbf16, #tpu.memory_space<vmem>>, vector<32x256xbf16>
    tpu.vector_store %arg17[%c64_91, %c0_92], %263 {strides = array<i32>} : memref<288x256xbf16, #tpu.memory_space<vmem>>, vector<32x256xbf16>,
    %265 = vector.extract_strided_slice %235 {offsets = [0, 255], sizes = [32, 1], strides = [1, 1]} : vector<32x256xf32> to vector<32x1xf32>
    %266 = vector.extract_strided_slice %235 {offsets = [0, 0], sizes = [32, 255], strides = [1, 1]} : vector<32x256xf32> to vector<32x255xf32>
    %267 = tpu.concatenate %265, %266 in 1 : vector<32x1xf32>, vector<32x255xf32> -> vector<32x256xf32>
    %268 = vector.extract_strided_slice %0 {offsets = [3, 0], sizes = [1, 256], strides = [1, 1]} : vector<9x256xf32> to vector<1x256xf32>
    %269 = vector.broadcast %268 : vector<1x256xf32> to vector<32x256xf32>
    %270 = arith.mulf %267, %269 : vector<32x256xf32>
    %271 = arith.truncf %270 : vector<32x256xf32> to vector<32x256xbf16>
    %c96_93 = arith.constant 96 : index
    %c0_94 = arith.constant 0 : index
    %272 = vector.load %arg17[%c96_93, %c0_94] : memref<288x256xbf16, #tpu.memory_space<vmem>>, vector<32x256xbf16>
    tpu.vector_store %arg17[%c96_93, %c0_94], %271 {strides = array<i32>} : memref<288x256xbf16, #tpu.memory_space<vmem>>, vector<32x256xbf16>,
    %273 = vector.extract_strided_slice %0 {offsets = [4, 0], sizes = [1, 256], strides = [1, 1]} : vector<9x256xf32> to vector<1x256xf32>
    %274 = vector.broadcast %273 : vector<1x256xf32> to vector<32x256xf32>
    %275 = arith.mulf %235, %274 : vector<32x256xf32>
    %276 = arith.truncf %275 : vector<32x256xf32> to vector<32x256xbf16>
    %c128_95 = arith.constant 128 : index
    %c0_96 = arith.constant 0 : index
    %277 = vector.load %arg17[%c128_95, %c0_96] : memref<288x256xbf16, #tpu.memory_space<vmem>>, vector<32x256xbf16>
    tpu.vector_store %arg17[%c128_95, %c0_96], %276 {strides = array<i32>} : memref<288x256xbf16, #tpu.memory_space<vmem>>, vector<32x256xbf16>,
    %278 = vector.extract_strided_slice %235 {offsets = [0, 1], sizes = [32, 255], strides = [1, 1]} : vector<32x256xf32> to vector<32x255xf32>
    %279 = vector.extract_strided_slice %235 {offsets = [0, 0], sizes = [32, 1], strides = [1, 1]} : vector<32x256xf32> to vector<32x1xf32>
    %280 = tpu.concatenate %278, %279 in 1 : vector<32x255xf32>, vector<32x1xf32> -> vector<32x256xf32>
    %281 = vector.extract_strided_slice %0 {offsets = [5, 0], sizes = [1, 256], strides = [1, 1]} : vector<9x256xf32> to vector<1x256xf32>
    %282 = vector.broadcast %281 : vector<1x256xf32> to vector<32x256xf32>
    %283 = arith.mulf %280, %282 : vector<32x256xf32>
    %284 = arith.truncf %283 : vector<32x256xf32> to vector<32x256xbf16>
    %c160_97 = arith.constant 160 : index
    %c0_98 = arith.constant 0 : index
    %285 = vector.load %arg17[%c160_97, %c0_98] : memref<288x256xbf16, #tpu.memory_space<vmem>>, vector<32x256xbf16>
    tpu.vector_store %arg17[%c160_97, %c0_98], %284 {strides = array<i32>} : memref<288x256xbf16, #tpu.memory_space<vmem>>, vector<32x256xbf16>,
    %286 = vector.extract_strided_slice %235 {offsets = [0, 9], sizes = [32, 247], strides = [1, 1]} : vector<32x256xf32> to vector<32x247xf32>
    %287 = vector.extract_strided_slice %235 {offsets = [0, 0], sizes = [32, 9], strides = [1, 1]} : vector<32x256xf32> to vector<32x9xf32>
    %288 = tpu.concatenate %286, %287 in 1 : vector<32x247xf32>, vector<32x9xf32> -> vector<32x256xf32>
    %289 = vector.extract_strided_slice %0 {offsets = [6, 0], sizes = [1, 256], strides = [1, 1]} : vector<9x256xf32> to vector<1x256xf32>
    %290 = vector.broadcast %289 : vector<1x256xf32> to vector<32x256xf32>
    %291 = arith.mulf %288, %290 : vector<32x256xf32>
    %292 = arith.truncf %291 : vector<32x256xf32> to vector<32x256xbf16>
    %c192_99 = arith.constant 192 : index
    %c0_100 = arith.constant 0 : index
    %293 = vector.load %arg17[%c192_99, %c0_100] : memref<288x256xbf16, #tpu.memory_space<vmem>>, vector<32x256xbf16>
    tpu.vector_store %arg17[%c192_99, %c0_100], %292 {strides = array<i32>} : memref<288x256xbf16, #tpu.memory_space<vmem>>, vector<32x256xbf16>,
    %294 = vector.extract_strided_slice %235 {offsets = [0, 10], sizes = [32, 246], strides = [1, 1]} : vector<32x256xf32> to vector<32x246xf32>
    %295 = vector.extract_strided_slice %235 {offsets = [0, 0], sizes = [32, 10], strides = [1, 1]} : vector<32x256xf32> to vector<32x10xf32>
    %296 = tpu.concatenate %294, %295 in 1 : vector<32x246xf32>, vector<32x10xf32> -> vector<32x256xf32>
    %297 = vector.extract_strided_slice %0 {offsets = [7, 0], sizes = [1, 256], strides = [1, 1]} : vector<9x256xf32> to vector<1x256xf32>
    %298 = vector.broadcast %297 : vector<1x256xf32> to vector<32x256xf32>
    %299 = arith.mulf %296, %298 : vector<32x256xf32>
    %300 = arith.truncf %299 : vector<32x256xf32> to vector<32x256xbf16>
    %c224_101 = arith.constant 224 : index
    %c0_102 = arith.constant 0 : index
    %301 = vector.load %arg17[%c224_101, %c0_102] : memref<288x256xbf16, #tpu.memory_space<vmem>>, vector<32x256xbf16>
    tpu.vector_store %arg17[%c224_101, %c0_102], %300 {strides = array<i32>} : memref<288x256xbf16, #tpu.memory_space<vmem>>, vector<32x256xbf16>,
    %302 = vector.extract_strided_slice %235 {offsets = [0, 11], sizes = [32, 245], strides = [1, 1]} : vector<32x256xf32> to vector<32x245xf32>
    %303 = vector.extract_strided_slice %235 {offsets = [0, 0], sizes = [32, 11], strides = [1, 1]} : vector<32x256xf32> to vector<32x11xf32>
    %304 = tpu.concatenate %302, %303 in 1 : vector<32x245xf32>, vector<32x11xf32> -> vector<32x256xf32>
    %305 = vector.extract_strided_slice %0 {offsets = [8, 0], sizes = [1, 256], strides = [1, 1]} : vector<9x256xf32> to vector<1x256xf32>
    %306 = vector.broadcast %305 : vector<1x256xf32> to vector<32x256xf32>
    %307 = arith.mulf %304, %306 : vector<32x256xf32>
    %308 = arith.truncf %307 : vector<32x256xf32> to vector<32x256xbf16>
    %c256_103 = arith.constant 256 : index
    %c0_104 = arith.constant 0 : index
    %309 = vector.load %arg17[%c256_103, %c0_104] : memref<288x256xbf16, #tpu.memory_space<vmem>>, vector<32x256xbf16>
    tpu.vector_store %arg17[%c256_103, %c0_104], %308 {strides = array<i32>} : memref<288x256xbf16, #tpu.memory_space<vmem>>, vector<32x256xbf16>,
    %c0_105 = arith.constant 0 : index
    %c0_106 = arith.constant 0 : index
    %310 = vector.load %arg17[%c0_105, %c0_106] : memref<288x256xbf16, #tpu.memory_space<vmem>>, vector<288x256xbf16>
    %cst_107 = arith.constant dense<0.000000e+00> : vector<32x256xf32>
    %311 = tpu.matmul %239, %310, %cst_107 {dimension_numbers = #tpu.dot_dimension_numbers<[1], [0], [0], [1], [0, 0, 1, 1], [], []>} : vector<32x288xbf16>, vector<288x256xbf16>, vector<32x256xf32> -> vector<32x256xf32>
    %312 = vector.broadcast %240 : vector<32x1xf32> to vector<32x256xf32>
    %313 = arith.addf %311, %312 : vector<32x256xf32>
    %314 = vector.extract_strided_slice %237 {offsets = [0, 1], sizes = [32, 1], strides = [1, 1]} : vector<32x3xf32> to vector<32x1xf32>
    %315 = vector.extract_strided_slice %237 {offsets = [0, 2], sizes = [32, 1], strides = [1, 1]} : vector<32x3xf32> to vector<32x1xf32>
    %316 = vector.broadcast %1 : vector<1x256xf32> to vector<32x256xf32>
    %317 = arith.mulf %313, %316 : vector<32x256xf32>
    %cst_108 = arith.constant dense<0.000000e+00> : vector<32xf32>
    %318 = vector.multi_reduction <add>, %317, %cst_108 [1] : vector<32x256xf32> to vector<32xf32>
    %319 = vector.shape_cast %318 : vector<32xf32> to vector<32x1xf32>
    %cst_109 = arith.constant 5.000000e-03 : f32
    %320 = vector.broadcast %cst_109 : f32 to vector<32x1xf32>
    %321 = arith.mulf %319, %320 : vector<32x1xf32>
    %322 = vector.broadcast %321 : vector<32x1xf32> to vector<32x256xf32>
    %323 = arith.subf %313, %322 : vector<32x256xf32>
    %324 = vector.broadcast %1 : vector<1x256xf32> to vector<32x256xf32>
    %325 = arith.mulf %323, %324 : vector<32x256xf32>
    %326 = arith.mulf %325, %325 : vector<32x256xf32>
    %cst_110 = arith.constant dense<0.000000e+00> : vector<32xf32>
    %327 = vector.multi_reduction <add>, %326, %cst_110 [1] : vector<32x256xf32> to vector<32xf32>
    %328 = vector.shape_cast %327 : vector<32xf32> to vector<32x1xf32>
    %cst_111 = arith.constant 5.000000e-03 : f32
    %329 = vector.broadcast %cst_111 : f32 to vector<32x1xf32>
    %330 = arith.mulf %328, %329 : vector<32x1xf32>
    %331 = vector.broadcast %321 : vector<32x1xf32> to vector<32x256xf32>
    %332 = arith.subf %313, %331 : vector<32x256xf32>
    %cst_112 = arith.constant 9.99999974E-6 : f32
    %333 = vector.broadcast %cst_112 : f32 to vector<32x1xf32>
    %334 = arith.addf %330, %333 : vector<32x1xf32>
    %335 = math.rsqrt %334 : vector<32x1xf32>
    %336 = vector.broadcast %335 : vector<32x1xf32> to vector<32x256xf32>
    %337 = arith.mulf %332, %336 : vector<32x256xf32>
    %338 = vector.broadcast %314 : vector<32x1xf32> to vector<32x256xf32>
    %339 = arith.mulf %337, %338 : vector<32x256xf32>
    %340 = vector.broadcast %315 : vector<32x1xf32> to vector<32x256xf32>
    %341 = arith.addf %339, %340 : vector<32x256xf32>
    %342 = arith.addf %341, %127 : vector<32x256xf32>
    %cst_113 = arith.constant 0.000000e+00 : f32
    %343 = vector.broadcast %cst_113 : f32 to vector<32x256xf32>
    %344 = arith.maximumf %342, %343 : vector<32x256xf32>
    %c3_114 = arith.constant 3 : index
    %c0_115 = arith.constant 0 : index
    %c0_116 = arith.constant 0 : index
    %345 = vector.load %arg4[%c3_114, %c0_115, %c0_116] : memref<5x32x3xf32, #tpu.memory_space<vmem>>, vector<1x32x3xf32>
    %346 = vector.shape_cast %345 : vector<1x32x3xf32> to vector<32x3xf32>
    %c2_117 = arith.constant 2 : index
    %c0_118 = arith.constant 0 : index
    %c0_119 = arith.constant 0 : index
    %347 = vector.load %arg3[%c2_117, %c0_118, %c0_119] : memref<4x32x288xbf16, #tpu.memory_space<vmem>>, vector<1x32x288xbf16>
    %348 = vector.shape_cast %347 : vector<1x32x288xbf16> to vector<32x288xbf16>
    %349 = vector.extract_strided_slice %346 {offsets = [0, 0], sizes = [32, 1], strides = [1, 1]} : vector<32x3xf32> to vector<32x1xf32>
    %350 = vector.extract_strided_slice %344 {offsets = [0, 245], sizes = [32, 11], strides = [1, 1]} : vector<32x256xf32> to vector<32x11xf32>
    %351 = vector.extract_strided_slice %344 {offsets = [0, 0], sizes = [32, 245], strides = [1, 1]} : vector<32x256xf32> to vector<32x245xf32>
    %352 = tpu.concatenate %350, %351 in 1 : vector<32x11xf32>, vector<32x245xf32> -> vector<32x256xf32>
    %353 = vector.extract_strided_slice %0 {offsets = [0, 0], sizes = [1, 256], strides = [1, 1]} : vector<9x256xf32> to vector<1x256xf32>
    %354 = vector.broadcast %353 : vector<1x256xf32> to vector<32x256xf32>
    %355 = arith.mulf %352, %354 : vector<32x256xf32>
    %356 = arith.truncf %355 : vector<32x256xf32> to vector<32x256xbf16>
    %c0_120 = arith.constant 0 : index
    %c0_121 = arith.constant 0 : index
    %357 = vector.load %arg17[%c0_120, %c0_121] : memref<288x256xbf16, #tpu.memory_space<vmem>>, vector<32x256xbf16>
    tpu.vector_store %arg17[%c0_120, %c0_121], %356 {strides = array<i32>} : memref<288x256xbf16, #tpu.memory_space<vmem>>, vector<32x256xbf16>,
    %358 = vector.extract_strided_slice %344 {offsets = [0, 246], sizes = [32, 10], strides = [1, 1]} : vector<32x256xf32> to vector<32x10xf32>
    %359 = vector.extract_strided_slice %344 {offsets = [0, 0], sizes = [32, 246], strides = [1, 1]} : vector<32x256xf32> to vector<32x246xf32>
    %360 = tpu.concatenate %358, %359 in 1 : vector<32x10xf32>, vector<32x246xf32> -> vector<32x256xf32>
    %361 = vector.extract_strided_slice %0 {offsets = [1, 0], sizes = [1, 256], strides = [1, 1]} : vector<9x256xf32> to vector<1x256xf32>
    %362 = vector.broadcast %361 : vector<1x256xf32> to vector<32x256xf32>
    %363 = arith.mulf %360, %362 : vector<32x256xf32>
    %364 = arith.truncf %363 : vector<32x256xf32> to vector<32x256xbf16>
    %c32_122 = arith.constant 32 : index
    %c0_123 = arith.constant 0 : index
    %365 = vector.load %arg17[%c32_122, %c0_123] : memref<288x256xbf16, #tpu.memory_space<vmem>>, vector<32x256xbf16>
    tpu.vector_store %arg17[%c32_122, %c0_123], %364 {strides = array<i32>} : memref<288x256xbf16, #tpu.memory_space<vmem>>, vector<32x256xbf16>,
    %366 = vector.extract_strided_slice %344 {offsets = [0, 247], sizes = [32, 9], strides = [1, 1]} : vector<32x256xf32> to vector<32x9xf32>
    %367 = vector.extract_strided_slice %344 {offsets = [0, 0], sizes = [32, 247], strides = [1, 1]} : vector<32x256xf32> to vector<32x247xf32>
    %368 = tpu.concatenate %366, %367 in 1 : vector<32x9xf32>, vector<32x247xf32> -> vector<32x256xf32>
    %369 = vector.extract_strided_slice %0 {offsets = [2, 0], sizes = [1, 256], strides = [1, 1]} : vector<9x256xf32> to vector<1x256xf32>
    %370 = vector.broadcast %369 : vector<1x256xf32> to vector<32x256xf32>
    %371 = arith.mulf %368, %370 : vector<32x256xf32>
    %372 = arith.truncf %371 : vector<32x256xf32> to vector<32x256xbf16>
    %c64_124 = arith.constant 64 : index
    %c0_125 = arith.constant 0 : index
    %373 = vector.load %arg17[%c64_124, %c0_125] : memref<288x256xbf16, #tpu.memory_space<vmem>>, vector<32x256xbf16>
    tpu.vector_store %arg17[%c64_124, %c0_125], %372 {strides = array<i32>} : memref<288x256xbf16, #tpu.memory_space<vmem>>, vector<32x256xbf16>,
    %374 = vector.extract_strided_slice %344 {offsets = [0, 255], sizes = [32, 1], strides = [1, 1]} : vector<32x256xf32> to vector<32x1xf32>
    %375 = vector.extract_strided_slice %344 {offsets = [0, 0], sizes = [32, 255], strides = [1, 1]} : vector<32x256xf32> to vector<32x255xf32>
    %376 = tpu.concatenate %374, %375 in 1 : vector<32x1xf32>, vector<32x255xf32> -> vector<32x256xf32>
    %377 = vector.extract_strided_slice %0 {offsets = [3, 0], sizes = [1, 256], strides = [1, 1]} : vector<9x256xf32> to vector<1x256xf32>
    %378 = vector.broadcast %377 : vector<1x256xf32> to vector<32x256xf32>
    %379 = arith.mulf %376, %378 : vector<32x256xf32>
    %380 = arith.truncf %379 : vector<32x256xf32> to vector<32x256xbf16>
    %c96_126 = arith.constant 96 : index
    %c0_127 = arith.constant 0 : index
    %381 = vector.load %arg17[%c96_126, %c0_127] : memref<288x256xbf16, #tpu.memory_space<vmem>>, vector<32x256xbf16>
    tpu.vector_store %arg17[%c96_126, %c0_127], %380 {strides = array<i32>} : memref<288x256xbf16, #tpu.memory_space<vmem>>, vector<32x256xbf16>,
    %382 = vector.extract_strided_slice %0 {offsets = [4, 0], sizes = [1, 256], strides = [1, 1]} : vector<9x256xf32> to vector<1x256xf32>
    %383 = vector.broadcast %382 : vector<1x256xf32> to vector<32x256xf32>
    %384 = arith.mulf %344, %383 : vector<32x256xf32>
    %385 = arith.truncf %384 : vector<32x256xf32> to vector<32x256xbf16>
    %c128_128 = arith.constant 128 : index
    %c0_129 = arith.constant 0 : index
    %386 = vector.load %arg17[%c128_128, %c0_129] : memref<288x256xbf16, #tpu.memory_space<vmem>>, vector<32x256xbf16>
    tpu.vector_store %arg17[%c128_128, %c0_129], %385 {strides = array<i32>} : memref<288x256xbf16, #tpu.memory_space<vmem>>, vector<32x256xbf16>,
    %387 = vector.extract_strided_slice %344 {offsets = [0, 1], sizes = [32, 255], strides = [1, 1]} : vector<32x256xf32> to vector<32x255xf32>
    %388 = vector.extract_strided_slice %344 {offsets = [0, 0], sizes = [32, 1], strides = [1, 1]} : vector<32x256xf32> to vector<32x1xf32>
    %389 = tpu.concatenate %387, %388 in 1 : vector<32x255xf32>, vector<32x1xf32> -> vector<32x256xf32>
    %390 = vector.extract_strided_slice %0 {offsets = [5, 0], sizes = [1, 256], strides = [1, 1]} : vector<9x256xf32> to vector<1x256xf32>
    %391 = vector.broadcast %390 : vector<1x256xf32> to vector<32x256xf32>
    %392 = arith.mulf %389, %391 : vector<32x256xf32>
    %393 = arith.truncf %392 : vector<32x256xf32> to vector<32x256xbf16>
    %c160_130 = arith.constant 160 : index
    %c0_131 = arith.constant 0 : index
    %394 = vector.load %arg17[%c160_130, %c0_131] : memref<288x256xbf16, #tpu.memory_space<vmem>>, vector<32x256xbf16>
    tpu.vector_store %arg17[%c160_130, %c0_131], %393 {strides = array<i32>} : memref<288x256xbf16, #tpu.memory_space<vmem>>, vector<32x256xbf16>,
    %395 = vector.extract_strided_slice %344 {offsets = [0, 9], sizes = [32, 247], strides = [1, 1]} : vector<32x256xf32> to vector<32x247xf32>
    %396 = vector.extract_strided_slice %344 {offsets = [0, 0], sizes = [32, 9], strides = [1, 1]} : vector<32x256xf32> to vector<32x9xf32>
    %397 = tpu.concatenate %395, %396 in 1 : vector<32x247xf32>, vector<32x9xf32> -> vector<32x256xf32>
    %398 = vector.extract_strided_slice %0 {offsets = [6, 0], sizes = [1, 256], strides = [1, 1]} : vector<9x256xf32> to vector<1x256xf32>
    %399 = vector.broadcast %398 : vector<1x256xf32> to vector<32x256xf32>
    %400 = arith.mulf %397, %399 : vector<32x256xf32>
    %401 = arith.truncf %400 : vector<32x256xf32> to vector<32x256xbf16>
    %c192_132 = arith.constant 192 : index
    %c0_133 = arith.constant 0 : index
    %402 = vector.load %arg17[%c192_132, %c0_133] : memref<288x256xbf16, #tpu.memory_space<vmem>>, vector<32x256xbf16>
    tpu.vector_store %arg17[%c192_132, %c0_133], %401 {strides = array<i32>} : memref<288x256xbf16, #tpu.memory_space<vmem>>, vector<32x256xbf16>,
    %403 = vector.extract_strided_slice %344 {offsets = [0, 10], sizes = [32, 246], strides = [1, 1]} : vector<32x256xf32> to vector<32x246xf32>
    %404 = vector.extract_strided_slice %344 {offsets = [0, 0], sizes = [32, 10], strides = [1, 1]} : vector<32x256xf32> to vector<32x10xf32>
    %405 = tpu.concatenate %403, %404 in 1 : vector<32x246xf32>, vector<32x10xf32> -> vector<32x256xf32>
    %406 = vector.extract_strided_slice %0 {offsets = [7, 0], sizes = [1, 256], strides = [1, 1]} : vector<9x256xf32> to vector<1x256xf32>
    %407 = vector.broadcast %406 : vector<1x256xf32> to vector<32x256xf32>
    %408 = arith.mulf %405, %407 : vector<32x256xf32>
    %409 = arith.truncf %408 : vector<32x256xf32> to vector<32x256xbf16>
    %c224_134 = arith.constant 224 : index
    %c0_135 = arith.constant 0 : index
    %410 = vector.load %arg17[%c224_134, %c0_135] : memref<288x256xbf16, #tpu.memory_space<vmem>>, vector<32x256xbf16>
    tpu.vector_store %arg17[%c224_134, %c0_135], %409 {strides = array<i32>} : memref<288x256xbf16, #tpu.memory_space<vmem>>, vector<32x256xbf16>,
    %411 = vector.extract_strided_slice %344 {offsets = [0, 11], sizes = [32, 245], strides = [1, 1]} : vector<32x256xf32> to vector<32x245xf32>
    %412 = vector.extract_strided_slice %344 {offsets = [0, 0], sizes = [32, 11], strides = [1, 1]} : vector<32x256xf32> to vector<32x11xf32>
    %413 = tpu.concatenate %411, %412 in 1 : vector<32x245xf32>, vector<32x11xf32> -> vector<32x256xf32>
    %414 = vector.extract_strided_slice %0 {offsets = [8, 0], sizes = [1, 256], strides = [1, 1]} : vector<9x256xf32> to vector<1x256xf32>
    %415 = vector.broadcast %414 : vector<1x256xf32> to vector<32x256xf32>
    %416 = arith.mulf %413, %415 : vector<32x256xf32>
    %417 = arith.truncf %416 : vector<32x256xf32> to vector<32x256xbf16>
    %c256_136 = arith.constant 256 : index
    %c0_137 = arith.constant 0 : index
    %418 = vector.load %arg17[%c256_136, %c0_137] : memref<288x256xbf16, #tpu.memory_space<vmem>>, vector<32x256xbf16>
    tpu.vector_store %arg17[%c256_136, %c0_137], %417 {strides = array<i32>} : memref<288x256xbf16, #tpu.memory_space<vmem>>, vector<32x256xbf16>,
    %c0_138 = arith.constant 0 : index
    %c0_139 = arith.constant 0 : index
    %419 = vector.load %arg17[%c0_138, %c0_139] : memref<288x256xbf16, #tpu.memory_space<vmem>>, vector<288x256xbf16>
    %cst_140 = arith.constant dense<0.000000e+00> : vector<32x256xf32>
    %420 = tpu.matmul %348, %419, %cst_140 {dimension_numbers = #tpu.dot_dimension_numbers<[1], [0], [0], [1], [0, 0, 1, 1], [], []>} : vector<32x288xbf16>, vector<288x256xbf16>, vector<32x256xf32> -> vector<32x256xf32>
    %421 = vector.broadcast %349 : vector<32x1xf32> to vector<32x256xf32>
    %422 = arith.addf %420, %421 : vector<32x256xf32>
    %423 = vector.extract_strided_slice %346 {offsets = [0, 1], sizes = [32, 1], strides = [1, 1]} : vector<32x3xf32> to vector<32x1xf32>
    %424 = vector.extract_strided_slice %346 {offsets = [0, 2], sizes = [32, 1], strides = [1, 1]} : vector<32x3xf32> to vector<32x1xf32>
    %425 = vector.broadcast %1 : vector<1x256xf32> to vector<32x256xf32>
    %426 = arith.mulf %422, %425 : vector<32x256xf32>
    %cst_141 = arith.constant dense<0.000000e+00> : vector<32xf32>
    %427 = vector.multi_reduction <add>, %426, %cst_141 [1] : vector<32x256xf32> to vector<32xf32>
    %428 = vector.shape_cast %427 : vector<32xf32> to vector<32x1xf32>
    %cst_142 = arith.constant 5.000000e-03 : f32
    %429 = vector.broadcast %cst_142 : f32 to vector<32x1xf32>
    %430 = arith.mulf %428, %429 : vector<32x1xf32>
    %431 = vector.broadcast %430 : vector<32x1xf32> to vector<32x256xf32>
    %432 = arith.subf %422, %431 : vector<32x256xf32>
    %433 = vector.broadcast %1 : vector<1x256xf32> to vector<32x256xf32>
    %434 = arith.mulf %432, %433 : vector<32x256xf32>
    %435 = arith.mulf %434, %434 : vector<32x256xf32>
    %cst_143 = arith.constant dense<0.000000e+00> : vector<32xf32>
    %436 = vector.multi_reduction <add>, %435, %cst_143 [1] : vector<32x256xf32> to vector<32xf32>
    %437 = vector.shape_cast %436 : vector<32xf32> to vector<32x1xf32>
    %cst_144 = arith.constant 5.000000e-03 : f32
    %438 = vector.broadcast %cst_144 : f32 to vector<32x1xf32>
    %439 = arith.mulf %437, %438 : vector<32x1xf32>
    %440 = vector.broadcast %430 : vector<32x1xf32> to vector<32x256xf32>
    %441 = arith.subf %422, %440 : vector<32x256xf32>
    %cst_145 = arith.constant 9.99999974E-6 : f32
    %442 = vector.broadcast %cst_145 : f32 to vector<32x1xf32>
    %443 = arith.addf %439, %442 : vector<32x1xf32>
    %444 = math.rsqrt %443 : vector<32x1xf32>
    %445 = vector.broadcast %444 : vector<32x1xf32> to vector<32x256xf32>
    %446 = arith.mulf %441, %445 : vector<32x256xf32>
    %447 = vector.broadcast %423 : vector<32x1xf32> to vector<32x256xf32>
    %448 = arith.mulf %446, %447 : vector<32x256xf32>
    %449 = vector.broadcast %424 : vector<32x1xf32> to vector<32x256xf32>
    %450 = arith.addf %448, %449 : vector<32x256xf32>
    %cst_146 = arith.constant 0.000000e+00 : f32
    %451 = vector.broadcast %cst_146 : f32 to vector<32x256xf32>
    %452 = arith.maximumf %450, %451 : vector<32x256xf32>
    %c4_147 = arith.constant 4 : index
    %c0_148 = arith.constant 0 : index
    %c0_149 = arith.constant 0 : index
    %453 = vector.load %arg4[%c4_147, %c0_148, %c0_149] : memref<5x32x3xf32, #tpu.memory_space<vmem>>, vector<1x32x3xf32>
    %454 = vector.shape_cast %453 : vector<1x32x3xf32> to vector<32x3xf32>
    %c3_150 = arith.constant 3 : index
    %c0_151 = arith.constant 0 : index
    %c0_152 = arith.constant 0 : index
    %455 = vector.load %arg3[%c3_150, %c0_151, %c0_152] : memref<4x32x288xbf16, #tpu.memory_space<vmem>>, vector<1x32x288xbf16>
    %456 = vector.shape_cast %455 : vector<1x32x288xbf16> to vector<32x288xbf16>
    %457 = vector.extract_strided_slice %454 {offsets = [0, 0], sizes = [32, 1], strides = [1, 1]} : vector<32x3xf32> to vector<32x1xf32>
    %458 = vector.extract_strided_slice %452 {offsets = [0, 245], sizes = [32, 11], strides = [1, 1]} : vector<32x256xf32> to vector<32x11xf32>
    %459 = vector.extract_strided_slice %452 {offsets = [0, 0], sizes = [32, 245], strides = [1, 1]} : vector<32x256xf32> to vector<32x245xf32>
    %460 = tpu.concatenate %458, %459 in 1 : vector<32x11xf32>, vector<32x245xf32> -> vector<32x256xf32>
    %461 = vector.extract_strided_slice %0 {offsets = [0, 0], sizes = [1, 256], strides = [1, 1]} : vector<9x256xf32> to vector<1x256xf32>
    %462 = vector.broadcast %461 : vector<1x256xf32> to vector<32x256xf32>
    %463 = arith.mulf %460, %462 : vector<32x256xf32>
    %464 = arith.truncf %463 : vector<32x256xf32> to vector<32x256xbf16>
    %c0_153 = arith.constant 0 : index
    %c0_154 = arith.constant 0 : index
    %465 = vector.load %arg17[%c0_153, %c0_154] : memref<288x256xbf16, #tpu.memory_space<vmem>>, vector<32x256xbf16>
    tpu.vector_store %arg17[%c0_153, %c0_154], %464 {strides = array<i32>} : memref<288x256xbf16, #tpu.memory_space<vmem>>, vector<32x256xbf16>,
    %466 = vector.extract_strided_slice %452 {offsets = [0, 246], sizes = [32, 10], strides = [1, 1]} : vector<32x256xf32> to vector<32x10xf32>
    %467 = vector.extract_strided_slice %452 {offsets = [0, 0], sizes = [32, 246], strides = [1, 1]} : vector<32x256xf32> to vector<32x246xf32>
    %468 = tpu.concatenate %466, %467 in 1 : vector<32x10xf32>, vector<32x246xf32> -> vector<32x256xf32>
    %469 = vector.extract_strided_slice %0 {offsets = [1, 0], sizes = [1, 256], strides = [1, 1]} : vector<9x256xf32> to vector<1x256xf32>
    %470 = vector.broadcast %469 : vector<1x256xf32> to vector<32x256xf32>
    %471 = arith.mulf %468, %470 : vector<32x256xf32>
    %472 = arith.truncf %471 : vector<32x256xf32> to vector<32x256xbf16>
    %c32_155 = arith.constant 32 : index
    %c0_156 = arith.constant 0 : index
    %473 = vector.load %arg17[%c32_155, %c0_156] : memref<288x256xbf16, #tpu.memory_space<vmem>>, vector<32x256xbf16>
    tpu.vector_store %arg17[%c32_155, %c0_156], %472 {strides = array<i32>} : memref<288x256xbf16, #tpu.memory_space<vmem>>, vector<32x256xbf16>,
    %474 = vector.extract_strided_slice %452 {offsets = [0, 247], sizes = [32, 9], strides = [1, 1]} : vector<32x256xf32> to vector<32x9xf32>
    %475 = vector.extract_strided_slice %452 {offsets = [0, 0], sizes = [32, 247], strides = [1, 1]} : vector<32x256xf32> to vector<32x247xf32>
    %476 = tpu.concatenate %474, %475 in 1 : vector<32x9xf32>, vector<32x247xf32> -> vector<32x256xf32>
    %477 = vector.extract_strided_slice %0 {offsets = [2, 0], sizes = [1, 256], strides = [1, 1]} : vector<9x256xf32> to vector<1x256xf32>
    %478 = vector.broadcast %477 : vector<1x256xf32> to vector<32x256xf32>
    %479 = arith.mulf %476, %478 : vector<32x256xf32>
    %480 = arith.truncf %479 : vector<32x256xf32> to vector<32x256xbf16>
    %c64_157 = arith.constant 64 : index
    %c0_158 = arith.constant 0 : index
    %481 = vector.load %arg17[%c64_157, %c0_158] : memref<288x256xbf16, #tpu.memory_space<vmem>>, vector<32x256xbf16>
    tpu.vector_store %arg17[%c64_157, %c0_158], %480 {strides = array<i32>} : memref<288x256xbf16, #tpu.memory_space<vmem>>, vector<32x256xbf16>,
    %482 = vector.extract_strided_slice %452 {offsets = [0, 255], sizes = [32, 1], strides = [1, 1]} : vector<32x256xf32> to vector<32x1xf32>
    %483 = vector.extract_strided_slice %452 {offsets = [0, 0], sizes = [32, 255], strides = [1, 1]} : vector<32x256xf32> to vector<32x255xf32>
    %484 = tpu.concatenate %482, %483 in 1 : vector<32x1xf32>, vector<32x255xf32> -> vector<32x256xf32>
    %485 = vector.extract_strided_slice %0 {offsets = [3, 0], sizes = [1, 256], strides = [1, 1]} : vector<9x256xf32> to vector<1x256xf32>
    %486 = vector.broadcast %485 : vector<1x256xf32> to vector<32x256xf32>
    %487 = arith.mulf %484, %486 : vector<32x256xf32>
    %488 = arith.truncf %487 : vector<32x256xf32> to vector<32x256xbf16>
    %c96_159 = arith.constant 96 : index
    %c0_160 = arith.constant 0 : index
    %489 = vector.load %arg17[%c96_159, %c0_160] : memref<288x256xbf16, #tpu.memory_space<vmem>>, vector<32x256xbf16>
    tpu.vector_store %arg17[%c96_159, %c0_160], %488 {strides = array<i32>} : memref<288x256xbf16, #tpu.memory_space<vmem>>, vector<32x256xbf16>,
    %490 = vector.extract_strided_slice %0 {offsets = [4, 0], sizes = [1, 256], strides = [1, 1]} : vector<9x256xf32> to vector<1x256xf32>
    %491 = vector.broadcast %490 : vector<1x256xf32> to vector<32x256xf32>
    %492 = arith.mulf %452, %491 : vector<32x256xf32>
    %493 = arith.truncf %492 : vector<32x256xf32> to vector<32x256xbf16>
    %c128_161 = arith.constant 128 : index
    %c0_162 = arith.constant 0 : index
    %494 = vector.load %arg17[%c128_161, %c0_162] : memref<288x256xbf16, #tpu.memory_space<vmem>>, vector<32x256xbf16>
    tpu.vector_store %arg17[%c128_161, %c0_162], %493 {strides = array<i32>} : memref<288x256xbf16, #tpu.memory_space<vmem>>, vector<32x256xbf16>,
    %495 = vector.extract_strided_slice %452 {offsets = [0, 1], sizes = [32, 255], strides = [1, 1]} : vector<32x256xf32> to vector<32x255xf32>
    %496 = vector.extract_strided_slice %452 {offsets = [0, 0], sizes = [32, 1], strides = [1, 1]} : vector<32x256xf32> to vector<32x1xf32>
    %497 = tpu.concatenate %495, %496 in 1 : vector<32x255xf32>, vector<32x1xf32> -> vector<32x256xf32>
    %498 = vector.extract_strided_slice %0 {offsets = [5, 0], sizes = [1, 256], strides = [1, 1]} : vector<9x256xf32> to vector<1x256xf32>
    %499 = vector.broadcast %498 : vector<1x256xf32> to vector<32x256xf32>
    %500 = arith.mulf %497, %499 : vector<32x256xf32>
    %501 = arith.truncf %500 : vector<32x256xf32> to vector<32x256xbf16>
    %c160_163 = arith.constant 160 : index
    %c0_164 = arith.constant 0 : index
    %502 = vector.load %arg17[%c160_163, %c0_164] : memref<288x256xbf16, #tpu.memory_space<vmem>>, vector<32x256xbf16>
    tpu.vector_store %arg17[%c160_163, %c0_164], %501 {strides = array<i32>} : memref<288x256xbf16, #tpu.memory_space<vmem>>, vector<32x256xbf16>,
    %503 = vector.extract_strided_slice %452 {offsets = [0, 9], sizes = [32, 247], strides = [1, 1]} : vector<32x256xf32> to vector<32x247xf32>
    %504 = vector.extract_strided_slice %452 {offsets = [0, 0], sizes = [32, 9], strides = [1, 1]} : vector<32x256xf32> to vector<32x9xf32>
    %505 = tpu.concatenate %503, %504 in 1 : vector<32x247xf32>, vector<32x9xf32> -> vector<32x256xf32>
    %506 = vector.extract_strided_slice %0 {offsets = [6, 0], sizes = [1, 256], strides = [1, 1]} : vector<9x256xf32> to vector<1x256xf32>
    %507 = vector.broadcast %506 : vector<1x256xf32> to vector<32x256xf32>
    %508 = arith.mulf %505, %507 : vector<32x256xf32>
    %509 = arith.truncf %508 : vector<32x256xf32> to vector<32x256xbf16>
    %c192_165 = arith.constant 192 : index
    %c0_166 = arith.constant 0 : index
    %510 = vector.load %arg17[%c192_165, %c0_166] : memref<288x256xbf16, #tpu.memory_space<vmem>>, vector<32x256xbf16>
    tpu.vector_store %arg17[%c192_165, %c0_166], %509 {strides = array<i32>} : memref<288x256xbf16, #tpu.memory_space<vmem>>, vector<32x256xbf16>,
    %511 = vector.extract_strided_slice %452 {offsets = [0, 10], sizes = [32, 246], strides = [1, 1]} : vector<32x256xf32> to vector<32x246xf32>
    %512 = vector.extract_strided_slice %452 {offsets = [0, 0], sizes = [32, 10], strides = [1, 1]} : vector<32x256xf32> to vector<32x10xf32>
    %513 = tpu.concatenate %511, %512 in 1 : vector<32x246xf32>, vector<32x10xf32> -> vector<32x256xf32>
    %514 = vector.extract_strided_slice %0 {offsets = [7, 0], sizes = [1, 256], strides = [1, 1]} : vector<9x256xf32> to vector<1x256xf32>
    %515 = vector.broadcast %514 : vector<1x256xf32> to vector<32x256xf32>
    %516 = arith.mulf %513, %515 : vector<32x256xf32>
    %517 = arith.truncf %516 : vector<32x256xf32> to vector<32x256xbf16>
    %c224_167 = arith.constant 224 : index
    %c0_168 = arith.constant 0 : index
    %518 = vector.load %arg17[%c224_167, %c0_168] : memref<288x256xbf16, #tpu.memory_space<vmem>>, vector<32x256xbf16>
    tpu.vector_store %arg17[%c224_167, %c0_168], %517 {strides = array<i32>} : memref<288x256xbf16, #tpu.memory_space<vmem>>, vector<32x256xbf16>,
    %519 = vector.extract_strided_slice %452 {offsets = [0, 11], sizes = [32, 245], strides = [1, 1]} : vector<32x256xf32> to vector<32x245xf32>
    %520 = vector.extract_strided_slice %452 {offsets = [0, 0], sizes = [32, 11], strides = [1, 1]} : vector<32x256xf32> to vector<32x11xf32>
    %521 = tpu.concatenate %519, %520 in 1 : vector<32x245xf32>, vector<32x11xf32> -> vector<32x256xf32>
    %522 = vector.extract_strided_slice %0 {offsets = [8, 0], sizes = [1, 256], strides = [1, 1]} : vector<9x256xf32> to vector<1x256xf32>
    %523 = vector.broadcast %522 : vector<1x256xf32> to vector<32x256xf32>
    %524 = arith.mulf %521, %523 : vector<32x256xf32>
    %525 = arith.truncf %524 : vector<32x256xf32> to vector<32x256xbf16>
    %c256_169 = arith.constant 256 : index
    %c0_170 = arith.constant 0 : index
    %526 = vector.load %arg17[%c256_169, %c0_170] : memref<288x256xbf16, #tpu.memory_space<vmem>>, vector<32x256xbf16>
    tpu.vector_store %arg17[%c256_169, %c0_170], %525 {strides = array<i32>} : memref<288x256xbf16, #tpu.memory_space<vmem>>, vector<32x256xbf16>,
    %c0_171 = arith.constant 0 : index
    %c0_172 = arith.constant 0 : index
    %527 = vector.load %arg17[%c0_171, %c0_172] : memref<288x256xbf16, #tpu.memory_space<vmem>>, vector<288x256xbf16>
    %cst_173 = arith.constant dense<0.000000e+00> : vector<32x256xf32>
    %528 = tpu.matmul %456, %527, %cst_173 {dimension_numbers = #tpu.dot_dimension_numbers<[1], [0], [0], [1], [0, 0, 1, 1], [], []>} : vector<32x288xbf16>, vector<288x256xbf16>, vector<32x256xf32> -> vector<32x256xf32>
    %529 = vector.broadcast %457 : vector<32x1xf32> to vector<32x256xf32>
    %530 = arith.addf %528, %529 : vector<32x256xf32>
    %531 = vector.extract_strided_slice %454 {offsets = [0, 1], sizes = [32, 1], strides = [1, 1]} : vector<32x3xf32> to vector<32x1xf32>
    %532 = vector.extract_strided_slice %454 {offsets = [0, 2], sizes = [32, 1], strides = [1, 1]} : vector<32x3xf32> to vector<32x1xf32>
    %533 = vector.broadcast %1 : vector<1x256xf32> to vector<32x256xf32>
    %534 = arith.mulf %530, %533 : vector<32x256xf32>
    %cst_174 = arith.constant dense<0.000000e+00> : vector<32xf32>
    %535 = vector.multi_reduction <add>, %534, %cst_174 [1] : vector<32x256xf32> to vector<32xf32>
    %536 = vector.shape_cast %535 : vector<32xf32> to vector<32x1xf32>
    %cst_175 = arith.constant 5.000000e-03 : f32
    %537 = vector.broadcast %cst_175 : f32 to vector<32x1xf32>
    %538 = arith.mulf %536, %537 : vector<32x1xf32>
    %539 = vector.broadcast %538 : vector<32x1xf32> to vector<32x256xf32>
    %540 = arith.subf %530, %539 : vector<32x256xf32>
    %541 = vector.broadcast %1 : vector<1x256xf32> to vector<32x256xf32>
    %542 = arith.mulf %540, %541 : vector<32x256xf32>
    %543 = arith.mulf %542, %542 : vector<32x256xf32>
    %cst_176 = arith.constant dense<0.000000e+00> : vector<32xf32>
    %544 = vector.multi_reduction <add>, %543, %cst_176 [1] : vector<32x256xf32> to vector<32xf32>
    %545 = vector.shape_cast %544 : vector<32xf32> to vector<32x1xf32>
    %cst_177 = arith.constant 5.000000e-03 : f32
    %546 = vector.broadcast %cst_177 : f32 to vector<32x1xf32>
    %547 = arith.mulf %545, %546 : vector<32x1xf32>
    %548 = vector.broadcast %538 : vector<32x1xf32> to vector<32x256xf32>
    %549 = arith.subf %530, %548 : vector<32x256xf32>
    %cst_178 = arith.constant 9.99999974E-6 : f32
    %550 = vector.broadcast %cst_178 : f32 to vector<32x1xf32>
    %551 = arith.addf %547, %550 : vector<32x1xf32>
    %552 = math.rsqrt %551 : vector<32x1xf32>
    %553 = vector.broadcast %552 : vector<32x1xf32> to vector<32x256xf32>
    %554 = arith.mulf %549, %553 : vector<32x256xf32>
    %555 = vector.broadcast %531 : vector<32x1xf32> to vector<32x256xf32>
    %556 = arith.mulf %554, %555 : vector<32x256xf32>
    %557 = vector.broadcast %532 : vector<32x1xf32> to vector<32x256xf32>
    %558 = arith.addf %556, %557 : vector<32x256xf32>
    %559 = arith.addf %558, %344 : vector<32x256xf32>
    %cst_179 = arith.constant 0.000000e+00 : f32
    %560 = vector.broadcast %cst_179 : f32 to vector<32x256xf32>
    %561 = arith.maximumf %559, %560 : vector<32x256xf32>
    %c0_180 = arith.constant 0 : index
    %c0_181 = arith.constant 0 : index
    %562 = vector.load %arg6[%c0_180, %c0_181] : memref<4x3xf32, #tpu.memory_space<vmem>>, vector<4x3xf32>
    %c0_182 = arith.constant 0 : index
    %c0_183 = arith.constant 0 : index
    %563 = vector.load %arg5[%c0_182, %c0_183] : memref<4x32xbf16, #tpu.memory_space<vmem>>, vector<4x32xbf16>
    %564 = arith.truncf %561 : vector<32x256xf32> to vector<32x256xbf16>
    %cst_184 = arith.constant dense<0.000000e+00> : vector<4x256xf32>
    %565 = tpu.matmul %563, %564, %cst_184 {dimension_numbers = #tpu.dot_dimension_numbers<[1], [0], [0], [1], [0, 0, 1, 1], [], []>} : vector<4x32xbf16>, vector<32x256xbf16>, vector<4x256xf32> -> vector<4x256xf32>
    %566 = vector.extract_strided_slice %562 {offsets = [0, 0], sizes = [4, 1], strides = [1, 1]} : vector<4x3xf32> to vector<4x1xf32>
    %567 = vector.broadcast %566 : vector<4x1xf32> to vector<4x256xf32>
    %568 = arith.addf %565, %567 : vector<4x256xf32>
    %569 = vector.extract_strided_slice %562 {offsets = [0, 1], sizes = [4, 1], strides = [1, 1]} : vector<4x3xf32> to vector<4x1xf32>
    %570 = vector.extract_strided_slice %562 {offsets = [0, 2], sizes = [4, 1], strides = [1, 1]} : vector<4x3xf32> to vector<4x1xf32>
    %571 = vector.broadcast %1 : vector<1x256xf32> to vector<4x256xf32>
    %572 = arith.mulf %568, %571 : vector<4x256xf32>
    %cst_185 = arith.constant dense<0.000000e+00> : vector<4xf32>
    %573 = vector.multi_reduction <add>, %572, %cst_185 [1] : vector<4x256xf32> to vector<4xf32>
    %574 = vector.shape_cast %573 : vector<4xf32> to vector<4x1xf32>
    %cst_186 = arith.constant 5.000000e-03 : f32
    %575 = vector.broadcast %cst_186 : f32 to vector<4x1xf32>
    %576 = arith.mulf %574, %575 : vector<4x1xf32>
    %577 = vector.broadcast %576 : vector<4x1xf32> to vector<4x256xf32>
    %578 = arith.subf %568, %577 : vector<4x256xf32>
    %579 = vector.broadcast %1 : vector<1x256xf32> to vector<4x256xf32>
    %580 = arith.mulf %578, %579 : vector<4x256xf32>
    %581 = arith.mulf %580, %580 : vector<4x256xf32>
    %cst_187 = arith.constant dense<0.000000e+00> : vector<4xf32>
    %582 = vector.multi_reduction <add>, %581, %cst_187 [1] : vector<4x256xf32> to vector<4xf32>
    %583 = vector.shape_cast %582 : vector<4xf32> to vector<4x1xf32>
    %cst_188 = arith.constant 5.000000e-03 : f32
    %584 = vector.broadcast %cst_188 : f32 to vector<4x1xf32>
    %585 = arith.mulf %583, %584 : vector<4x1xf32>
    %586 = vector.broadcast %576 : vector<4x1xf32> to vector<4x256xf32>
    %587 = arith.subf %568, %586 : vector<4x256xf32>
    %cst_189 = arith.constant 9.99999974E-6 : f32
    %588 = vector.broadcast %cst_189 : f32 to vector<4x1xf32>
    %589 = arith.addf %585, %588 : vector<4x1xf32>
    %590 = math.rsqrt %589 : vector<4x1xf32>
    %591 = vector.broadcast %590 : vector<4x1xf32> to vector<4x256xf32>
    %592 = arith.mulf %587, %591 : vector<4x256xf32>
    %593 = vector.broadcast %569 : vector<4x1xf32> to vector<4x256xf32>
    %594 = arith.mulf %592, %593 : vector<4x256xf32>
    %595 = vector.broadcast %570 : vector<4x1xf32> to vector<4x256xf32>
    %596 = arith.addf %594, %595 : vector<4x256xf32>
    %cst_190 = arith.constant 0.000000e+00 : f32
    %597 = vector.broadcast %cst_190 : f32 to vector<4x256xf32>
    %598 = arith.maximumf %596, %597 : vector<4x256xf32>
    %599 = vector.extract_strided_slice %598 {offsets = [0, 0], sizes = [1, 128], strides = [1, 1]} : vector<4x256xf32> to vector<1x128xf32>
    %600 = arith.truncf %599 : vector<1x128xf32> to vector<1x128xbf16>
    %c0_191 = arith.constant 0 : index
    %c0_192 = arith.constant 0 : index
    %601 = vector.load %arg18[%c0_191, %c0_192] : memref<2x512xbf16, #tpu.memory_space<vmem>>, vector<1x128xbf16>
    tpu.vector_store %arg18[%c0_191, %c0_192], %600 {strides = array<i32>} : memref<2x512xbf16, #tpu.memory_space<vmem>>, vector<1x128xbf16>,
    %602 = vector.extract_strided_slice %598 {offsets = [1, 0], sizes = [1, 128], strides = [1, 1]} : vector<4x256xf32> to vector<1x128xf32>
    %603 = arith.truncf %602 : vector<1x128xf32> to vector<1x128xbf16>
    %c0_193 = arith.constant 0 : index
    %c128_194 = arith.constant 128 : index
    %604 = vector.load %arg18[%c0_193, %c128_194] : memref<2x512xbf16, #tpu.memory_space<vmem>>, vector<1x128xbf16>
    tpu.vector_store %arg18[%c0_193, %c128_194], %603 {strides = array<i32>} : memref<2x512xbf16, #tpu.memory_space<vmem>>, vector<1x128xbf16>,
    %605 = vector.extract_strided_slice %598 {offsets = [2, 0], sizes = [1, 128], strides = [1, 1]} : vector<4x256xf32> to vector<1x128xf32>
    %606 = arith.truncf %605 : vector<1x128xf32> to vector<1x128xbf16>
    %c0_195 = arith.constant 0 : index
    %c256_196 = arith.constant 256 : index
    %607 = vector.load %arg18[%c0_195, %c256_196] : memref<2x512xbf16, #tpu.memory_space<vmem>>, vector<1x128xbf16>
    tpu.vector_store %arg18[%c0_195, %c256_196], %606 {strides = array<i32>} : memref<2x512xbf16, #tpu.memory_space<vmem>>, vector<1x128xbf16>,
    %608 = vector.extract_strided_slice %598 {offsets = [3, 0], sizes = [1, 128], strides = [1, 1]} : vector<4x256xf32> to vector<1x128xf32>
    %609 = arith.truncf %608 : vector<1x128xf32> to vector<1x128xbf16>
    %c0_197 = arith.constant 0 : index
    %c384 = arith.constant 384 : index
    %610 = vector.load %arg18[%c0_197, %c384] : memref<2x512xbf16, #tpu.memory_space<vmem>>, vector<1x128xbf16>
    tpu.vector_store %arg18[%c0_197, %c384], %609 {strides = array<i32>} : memref<2x512xbf16, #tpu.memory_space<vmem>>, vector<1x128xbf16>,
    %611 = vector.extract_strided_slice %598 {offsets = [0, 128], sizes = [1, 128], strides = [1, 1]} : vector<4x256xf32> to vector<1x128xf32>
    %612 = arith.truncf %611 : vector<1x128xf32> to vector<1x128xbf16>
    %c1_198 = arith.constant 1 : index
    %c0_199 = arith.constant 0 : index
    %613 = vector.load %arg18[%c1_198, %c0_199] : memref<2x512xbf16, #tpu.memory_space<vmem>>, vector<1x128xbf16>
    tpu.vector_store %arg18[%c1_198, %c0_199], %612 {strides = array<i32>} : memref<2x512xbf16, #tpu.memory_space<vmem>>, vector<1x128xbf16>,
    %614 = vector.extract_strided_slice %598 {offsets = [1, 128], sizes = [1, 128], strides = [1, 1]} : vector<4x256xf32> to vector<1x128xf32>
    %615 = arith.truncf %614 : vector<1x128xf32> to vector<1x128xbf16>
    %c1_200 = arith.constant 1 : index
    %c128_201 = arith.constant 128 : index
    %616 = vector.load %arg18[%c1_200, %c128_201] : memref<2x512xbf16, #tpu.memory_space<vmem>>, vector<1x128xbf16>
    tpu.vector_store %arg18[%c1_200, %c128_201], %615 {strides = array<i32>} : memref<2x512xbf16, #tpu.memory_space<vmem>>, vector<1x128xbf16>,
    %617 = vector.extract_strided_slice %598 {offsets = [2, 128], sizes = [1, 128], strides = [1, 1]} : vector<4x256xf32> to vector<1x128xf32>
    %618 = arith.truncf %617 : vector<1x128xf32> to vector<1x128xbf16>
    %c1_202 = arith.constant 1 : index
    %c256_203 = arith.constant 256 : index
    %619 = vector.load %arg18[%c1_202, %c256_203] : memref<2x512xbf16, #tpu.memory_space<vmem>>, vector<1x128xbf16>
    tpu.vector_store %arg18[%c1_202, %c256_203], %618 {strides = array<i32>} : memref<2x512xbf16, #tpu.memory_space<vmem>>, vector<1x128xbf16>,
    %620 = vector.extract_strided_slice %598 {offsets = [3, 128], sizes = [1, 128], strides = [1, 1]} : vector<4x256xf32> to vector<1x128xf32>
    %621 = arith.truncf %620 : vector<1x128xf32> to vector<1x128xbf16>
    %c1_204 = arith.constant 1 : index
    %c384_205 = arith.constant 384 : index
    %622 = vector.load %arg18[%c1_204, %c384_205] : memref<2x512xbf16, #tpu.memory_space<vmem>>, vector<1x128xbf16>
    tpu.vector_store %arg18[%c1_204, %c384_205], %621 {strides = array<i32>} : memref<2x512xbf16, #tpu.memory_space<vmem>>, vector<1x128xbf16>,
    %c0_206 = arith.constant 0 : index
    %c0_207 = arith.constant 0 : index
    %623 = vector.load %arg18[%c0_206, %c0_207] : memref<2x512xbf16, #tpu.memory_space<vmem>>, vector<2x512xbf16>
    %624 = vector.extract_strided_slice %623 {offsets = [0, 256], sizes = [2, 256], strides = [1, 1]} : vector<2x512xbf16> to vector<2x256xbf16>
    %c0_208 = arith.constant 0 : index
    %c0_209 = arith.constant 0 : index
    %625 = vector.load %arg7[%c0_208, %c0_209] : memref<256x640xbf16, #tpu.memory_space<vmem>>, vector<256x640xbf16>
    %cst_210 = arith.constant dense<0.000000e+00> : vector<2x640xf32>
    %626 = tpu.matmul %624, %625, %cst_210 {dimension_numbers = #tpu.dot_dimension_numbers<[1], [0], [0], [1], [0, 0, 1, 1], [], []>} : vector<2x256xbf16>, vector<256x640xbf16>, vector<2x640xf32> -> vector<2x640xf32>
    %c0_211 = arith.constant 0 : index
    %c0_212 = arith.constant 0 : index
    %627 = vector.load %arg8[%c0_211, %c0_212] : memref<1x640xf32, #tpu.memory_space<vmem>>, vector<1x640xf32>
    %628 = vector.broadcast %627 : vector<1x640xf32> to vector<2x640xf32>
    %629 = arith.addf %626, %628 : vector<2x640xf32>
    %630 = vector.extract_strided_slice %623 {offsets = [0, 0], sizes = [2, 256], strides = [1, 1]} : vector<2x512xbf16> to vector<2x256xbf16>
    %c0_213 = arith.constant 0 : index
    %c0_214 = arith.constant 0 : index
    %631 = vector.load %arg9[%c0_213, %c0_214] : memref<256x64xbf16, #tpu.memory_space<vmem>>, vector<256x64xbf16>
    %cst_215 = arith.constant dense<0.000000e+00> : vector<2x64xf32>
    %632 = tpu.matmul %630, %631, %cst_215 {dimension_numbers = #tpu.dot_dimension_numbers<[1], [0], [0], [1], [0, 0, 1, 1], [], []>} : vector<2x256xbf16>, vector<256x64xbf16>, vector<2x64xf32> -> vector<2x64xf32>
    %c0_216 = arith.constant 0 : index
    %c0_217 = arith.constant 0 : index
    %633 = vector.load %arg10[%c0_216, %c0_217] : memref<1x64xf32, #tpu.memory_space<vmem>>, vector<1x64xf32>
    %634 = vector.broadcast %633 : vector<1x64xf32> to vector<2x64xf32>
    %635 = arith.addf %632, %634 : vector<2x64xf32>
    %cst_218 = arith.constant 0.000000e+00 : f32
    %636 = vector.broadcast %cst_218 : f32 to vector<2x64xf32>
    %637 = arith.maximumf %635, %636 : vector<2x64xf32>
    %c0_219 = arith.constant 0 : index
    %c0_220 = arith.constant 0 : index
    %638 = vector.load %arg11[%c0_219, %c0_220] : memref<64x2xf32, #tpu.memory_space<vmem>>, vector<64x2xf32>
    %cst_221 = arith.constant dense<0.000000e+00> : vector<2x2xf32>
    %639 = tpu.matmul %637, %638, %cst_221 {dimension_numbers = #tpu.dot_dimension_numbers<[1], [0], [0], [1], [0, 0, 1, 1], [], []>} : vector<2x64xf32>, vector<64x2xf32>, vector<2x2xf32> -> vector<2x2xf32>
    %c0_222 = arith.constant 0 : index
    %c0_223 = arith.constant 0 : index
    %640 = vector.load %arg12[%c0_222, %c0_223] : memref<1x2xf32, #tpu.memory_space<vmem>>, vector<1x2xf32>
    %641 = vector.broadcast %640 : vector<1x2xf32> to vector<2x2xf32>
    %642 = arith.addf %639, %641 : vector<2x2xf32>
    %643 = math.tanh %642 : vector<2x2xf32>
    %644 = vector.extract_strided_slice %643 {offsets = [0, 0], sizes = [2, 1], strides = [1, 1]} : vector<2x2xf32> to vector<2x1xf32>
    %c0_224 = arith.constant 0 : index
    %c0_225 = arith.constant 0 : index
    %645 = vector.load %arg13[%c0_224, %c0_225] : memref<2x1xf32, #tpu.memory_space<vmem>>, vector<2x1xf32>
    tpu.vector_store %arg13[%c0_224, %c0_225], %644 {strides = array<i32>} : memref<2x1xf32, #tpu.memory_space<vmem>>, vector<2x1xf32>,
    %646 = vector.extract_strided_slice %643 {offsets = [0, 1], sizes = [2, 1], strides = [1, 1]} : vector<2x2xf32> to vector<2x1xf32>
    %c0_226 = arith.constant 0 : index
    %c0_227 = arith.constant 0 : index
    %647 = vector.load %arg14[%c0_226, %c0_227] : memref<2x1xf32, #tpu.memory_space<vmem>>, vector<2x1xf32>
    tpu.vector_store %arg14[%c0_226, %c0_227], %646 {strides = array<i32>} : memref<2x1xf32, #tpu.memory_space<vmem>>, vector<2x1xf32>,
    %648 = tpu.iota {dimensions = array<i32: 1>} : vector<1x640xi32>
    %c570_i32 = arith.constant 570 : i32
    %649 = vector.broadcast %c570_i32 : i32 to vector<1x640xi32>
    %650 = arith.cmpi slt, %648, %649 : vector<1x640xi32>
    %cst_228 = arith.constant -1.000000e+30 : f32
    %651 = vector.shape_cast %650 : vector<1x640xi1> to vector<1x640xi1>
    %652 = vector.broadcast %651 : vector<1x640xi1> to vector<2x640xi1>
    %653 = vector.broadcast %cst_228 : f32 to vector<2x640xf32>
    %654 = arith.select %652, %629, %653 : vector<2x640xi1>, vector<2x640xf32>
    %cst_229 = arith.constant dense<0xFF800000> : vector<2xf32>
    %655 = vector.multi_reduction <maximumf>, %654, %cst_229 [1] : vector<2x640xf32> to vector<2xf32>
    %656 = vector.shape_cast %655 : vector<2xf32> to vector<2x1xf32>
    %657 = vector.broadcast %656 : vector<2x1xf32> to vector<2x640xf32>
    %658 = arith.subf %654, %657 : vector<2x640xf32>
    %659 = math.exp %658 : vector<2x640xf32>
    %cst_230 = arith.constant dense<0.000000e+00> : vector<2xf32>
    %660 = vector.multi_reduction <add>, %659, %cst_230 [1] : vector<2x640xf32> to vector<2xf32>
    %661 = vector.shape_cast %660 : vector<2xf32> to vector<2x1xf32>
    %662 = vector.broadcast %661 : vector<2x1xf32> to vector<2x640xf32>
    %663 = arith.divf %659, %662 : vector<2x640xf32>
    %c0_231 = arith.constant 0 : index
    %c0_232 = arith.constant 0 : index
    %664 = vector.load %arg15[%c0_231, %c0_232] : memref<2x640xf32, #tpu.memory_space<vmem>>, vector<2x640xf32>
    tpu.vector_store %arg15[%c0_231, %c0_232], %663 {strides = array<i32>} : memref<2x640xf32, #tpu.memory_space<vmem>>, vector<2x640xf32>,
    return
  }
}

</mosaic_0001>

<bundles_post_ra>
// kernel: _forward.1
= control target key start
LH: loop header
LB: loop body
LE: loop exit
PB: predicated region body
PF: predicated region fallthrough
CT: control target
= control target key end

     0   :  { %s8580_s0 = inlined_call_operand.vmem [shape: f32[8,100], index: 0, kind: input, shape index: {}]   ;;  %s8581_s1 = inlined_call_operand.vmem [shape: f32[9,256], index: 1, kind: input, shape index: {}]   ;;  %s8582_s2 = inlined_call_operand.hbm [shape: bf16[32,36], index: 2, kind: input, shape index: {}]   ;;  %s8583_s3 = inlined_call_operand.hbm [shape: bf16[4,32,288], index: 3, kind: input, shape index: {}]   ;;  %s8584_s4 = inlined_call_operand.vmem [shape: f32[5,32,3], index: 4, kind: input, shape index: {}]   ;;  %s8585_s5 = inlined_call_operand.hbm [shape: bf16[4,32], index: 5, kind: input, shape index: {}]   ;;  %s8586_s6 = inlined_call_operand.hbm [shape: f32[4,3], index: 6, kind: input, shape index: {}]   ;;  %s8587_s7 = inlined_call_operand.vmem [shape: bf16[256,640], index: 7, kind: input, shape index: {}]   ;;  %s8588_s8 = inlined_call_operand.hbm [shape: f32[1,640], index: 8, kind: input, shape index: {}]   ;;  %s8589_s9 = inlined_call_operand.vmem [shape: bf16[256,64], index: 9, kind: input, shape index: {}]   ;;  %s8590_s10 = inlined_call_operand.hbm [shape: f32[1,64], index: 10, kind: input, shape index: {}]   ;;  %s8591_s11 = inlined_call_operand.vmem [shape: f32[64,2], index: 11, kind: input, shape index: {}]   ;;  %s8592_s12 = inlined_call_operand.hbm [shape: f32[1,2], index: 12, kind: input, shape index: {}]   ;;  %s8593_s13 = inlined_call_operand.vmem [shape: f32[2,1], index: 13, kind: output, shape index: {0}]   ;;  %s8594_s14 = inlined_call_operand.vmem [shape: f32[2,1], index: 14, kind: output, shape index: {1}]   ;;  %s8595_s15 = inlined_call_operand.hbm [shape: f32[2,640], index: 15, kind: output, shape index: {2}]  }
   0x1   :  { %8679 = sst [smem:[#allocation45_spill]] %s8594_s14 }
   0x2   :  { %21 = vsyncpa [#allocation6], 0 }
   0x3   :  { %22 = vsyncpa [#allocation9], 0 }
   0x4   :  { %23 = vsyncpa [#allocation12], 0 }
   0x5   :  { %24 = vsyncpa [#allocation15], 0 }
   0x6   :  { %25 = vsyncpa [#allocation7], 0  ;;  %s5893_s18 = smov [#allocation8]   ;;  %s5707_s22 = scalar_lea.hbm %s8583_s3, 3072 }
   0x7   :  { %s47_s19 = sshll.u32 %s5893_s18, 4  ;;  %p5708_p0 = scmp.ne.s32.totalorder %s8583_s3, %s5707_s22  ;;  %s48_s19 = int_to_ptr.vmem [resolvable:$true] %s47_s19 }
   0x8   :  { %p5711_p1 = scmp.lt.u32.totalorder %s5707_s22, %s8583_s3 }
   0xa   :  { %p5713_p2 = pnand %p5711_p1, %p5708_p0 }
   0xc   :  { %5716 = shalt.err (!%p5713_p2)
}
   0xd   :  { %s5717_s27 = scalar_lea.vmem %s48_s19, 3072  ;;  %p5722_p4 = scmp.lt.s32.totalorder %s48_s19, %s48_s19 }
   0xe   :  { %p5718_p3 = scmp.ne.s32.totalorder %s48_s19, %s5717_s27  ;;  %p5723_p5 = scmp.lt.s32.totalorder %s5717_s27, %s5717_s27 }
  0x10   :  { %p5724_p6 = por %p5723_p5, %p5722_p4 }
  0x12   :  { %p5725_p7 = pnand %p5724_p6, %p5718_p3 }
  0x14   :  { %5728 = shalt.err (!%p5725_p7)
}
  0x15   :  { %s5894_s28 = smov 192   ;;  %s5895_s29 = smov 12  }
  0x16   :  { %53 = dma.hbm_to_vmem [thread:$0]  %s8583_s3, 3072, %s48_s19, [#allocation9], %s5894_s28, %s5894_s28, %s5895_s29  }
  0x17   :  { %s5896_s17 = smov [#allocation11]   ;;  %s5897_s20 = smov [#allocation14]  }
  0x18   :  { %s72_s18 = sshll.u32 %s5896_s17, 4  ;;  %s96_s21 = sshll.u32 %s5897_s20, 4  ;;  %s73_s18 = int_to_ptr.vmem [resolvable:$true] %s72_s18  ;;  %s97_s21 = int_to_ptr.vmem [resolvable:$true] %s96_s21 }
  0x19   :  { %s5729_s24 = scalar_lea.hbm %s8586_s6, 64 }
  0x1a   :  { %p5730_p8 = scmp.ne.s32.totalorder %s8586_s6, %s5729_s24  ;;  %p5733_p9 = scmp.lt.u32.totalorder %s5729_s24, %s8586_s6 }
  0x1c   :  { %p5735_p10 = pnand %p5733_p9, %p5730_p8 }
  0x1e   :  { %5738 = shalt.err (!%p5735_p10)
}
  0x1f   :  { %s5739_s3 = scalar_lea.vmem %s73_s18, 64  ;;  %p5744_p12 = scmp.lt.s32.totalorder %s73_s18, %s73_s18 }
  0x20   :  { %p5740_p11 = scmp.ne.s32.totalorder %s73_s18, %s5739_s3  ;;  %p5745_p13 = scmp.lt.s32.totalorder %s5739_s3, %s5739_s3 }
  0x22   :  { %p5746_p0 = por %p5745_p13, %p5744_p12 }
  0x24   :  { %p5747_p1 = pnand %p5746_p0, %p5740_p11 }
  0x26   :  { %5750 = shalt.err (!%p5747_p1)
}
  0x27   :  { %75 = dma.hbm_to_vmem [thread:$0]  %s8586_s6, 64, %s73_s18, [#allocation12]  }
  0x28   :  { %s5751_s16 = scalar_lea.hbm %s8590_s10, 16 }
  0x29   :  { %p5752_p2 = scmp.ne.s32.totalorder %s8590_s10, %s5751_s16  ;;  %p5755_p3 = scmp.lt.u32.totalorder %s5751_s16, %s8590_s10 }
  0x2b   :  { %p5757_p4 = pnand %p5755_p3, %p5752_p2 }
  0x2d   :  { %5760 = shalt.err (!%p5757_p4)
}
  0x2e   :  { %s5761_s23 = scalar_lea.vmem %s97_s21, 16  ;;  %s5765_s24 = scalar_lea.vmem %s97_s21, 32 }
  0x2f   :  { %p5762_p5 = scmp.ne.s32.totalorder %s97_s21, %s5761_s23  ;;  %p5766_p6 = scmp.lt.s32.totalorder %s97_s21, %s97_s21 }
  0x30   :  { %p5767_p7 = scmp.lt.s32.totalorder %s5765_s24, %s5761_s23 }
  0x32   :  { %p5768_p8 = por %p5767_p7, %p5766_p6 }
  0x34   :  { %p5769_p9 = pnand %p5768_p8, %p5762_p5 }
  0x36   :  { %5772 = shalt.err (!%p5769_p9)
}
  0x37   :  { %99 = dma.hbm_to_vmem [thread:$0]  %s8590_s10, 16, %s97_s21, [#allocation15]  }
  0x38   :  { %s5898_s25 = smov [#allocation5]   ;;  %s5773_s19 = scalar_lea.hbm %s8582_s2, 256 }
  0x39   :  { %s35_s26 = sshll.u32 %s5898_s25, 4  ;;  %p5774_p10 = scmp.ne.s32.totalorder %s8582_s2, %s5773_s19  ;;  %s36_s26 = int_to_ptr.vmem [resolvable:$true] %s35_s26 }
  0x3a   :  { %p5777_p11 = scmp.lt.u32.totalorder %s5773_s19, %s8582_s2 }
  0x3c   :  { %p5779_p12 = pnand %p5777_p11, %p5774_p10 }
  0x3e   :  { %5782 = shalt.err (!%p5779_p12)
}
  0x3f   :  { %s5783_s14 = scalar_lea.vmem %s36_s26, 256  ;;  %p5788_p0 = scmp.lt.s32.totalorder %s36_s26, %s36_s26 }
  0x40   :  { %p5784_p13 = scmp.ne.s32.totalorder %s36_s26, %s5783_s14  ;;  %p5789_p1 = scmp.lt.s32.totalorder %s5783_s14, %s5783_s14 }
  0x42   :  { %p5790_p2 = por %p5789_p1, %p5788_p0 }
  0x44   :  { %p5791_p3 = pnand %p5790_p2, %p5784_p13 }
  0x46   :  { %5794 = shalt.err (!%p5791_p3)
}
  0x47   :  { %s5899_s10 = smov 64   ;;  %s5900_s21 = smov 4  }
  0x48   :  { %41 = dma.hbm_to_vmem [thread:$0]  %s8582_s2, 256, %s36_s26, [#allocation6], %s5899_s10, %s5899_s10, %s5900_s21  }
  0x49   :  { %s5901_s22 = smov [#allocation10]   ;;  %s5902_s24 = smov [#allocation13]  }
  0x4a   :  { %s62_s23 = sshll.u32 %s5901_s22, 4  ;;  %s84_s6 = sshll.u32 %s5902_s24, 4  ;;  %s63_s23 = int_to_ptr.vmem [resolvable:$true] %s62_s23  ;;  %s85_s6 = int_to_ptr.vmem [resolvable:$true] %s84_s6 }
  0x4b   :  { %s5795_s27 = scalar_lea.hbm %s8585_s5, 32 }
  0x4c   :  { %p5796_p4 = scmp.ne.s32.totalorder %s8585_s5, %s5795_s27  ;;  %p5799_p5 = scmp.lt.u32.totalorder %s5795_s27, %s8585_s5 }
  0x4e   :  { %p5801_p6 = pnand %p5799_p5, %p5796_p4 }
  0x50   :  { %5804 = shalt.err (!%p5801_p6)
}
  0x51   :  { %s5805_s2 = scalar_lea.vmem %s63_s23, 32  ;;  %p5810_p8 = scmp.lt.s32.totalorder %s63_s23, %s63_s23 }
  0x52   :  { %p5806_p7 = scmp.ne.s32.totalorder %s63_s23, %s5805_s2  ;;  %p5811_p9 = scmp.lt.s32.totalorder %s5805_s2, %s5805_s2 }
  0x54   :  { %p5812_p10 = por %p5811_p9, %p5810_p8 }
  0x56   :  { %p5813_p11 = pnand %p5812_p10, %p5806_p7 }
  0x58   :  { %5816 = shalt.err (!%p5813_p11)
}
  0x59   :  { %65 = dma.hbm_to_vmem [thread:$0]  %s8585_s5, 32, %s63_s23, [#allocation9]  }
  0x5a   :  { %s5817_s10 = scalar_lea.hbm %s8588_s8, 80 }
  0x5b   :  { %p5818_p12 = scmp.ne.s32.totalorder %s8588_s8, %s5817_s10  ;;  %p5821_p13 = scmp.lt.u32.totalorder %s5817_s10, %s8588_s8 }
  0x5d   :  { %p5823_p0 = pnand %p5821_p13, %p5818_p12 }
  0x5f   :  { %5826 = shalt.err (!%p5823_p0)
}
  0x60   :  { %s5827_s24 = scalar_lea.vmem %s85_s6, 80  ;;  %s5831_s18 = scalar_lea.vmem %s85_s6, 96 }
  0x61   :  { %p5828_p1 = scmp.ne.s32.totalorder %s85_s6, %s5827_s24  ;;  %p5832_p2 = scmp.lt.s32.totalorder %s85_s6, %s85_s6 }
  0x62   :  { %p5833_p3 = scmp.lt.s32.totalorder %s5831_s18, %s5827_s24 }
  0x64   :  { %p5834_p4 = por %p5833_p3, %p5832_p2 }
  0x66   :  { %p5835_p5 = pnand %p5834_p4, %p5828_p1 }
  0x68   :  { %5838 = shalt.err (!%p5835_p5)
}
  0x69   :  { %87 = dma.hbm_to_vmem [thread:$0]  %s8588_s8, 80, %s85_s6, [#allocation12]  }
  0x6a   :  { %s5903_s25 = smov [#allocation16]   ;;  %s5839_s28 = scalar_lea.hbm %s8592_s12, 16 }
  0x6b   :  { %s108_s27 = sshll.u32 %s5903_s25, 4  ;;  %p5840_p6 = scmp.ne.s32.totalorder %s8592_s12, %s5839_s28  ;;  %s109_s27 = int_to_ptr.vmem [resolvable:$true] %s108_s27 }
  0x6c   :  { %p5843_p7 = scmp.lt.u32.totalorder %s5839_s28, %s8592_s12 }
  0x6e   :  { %p5845_p8 = pnand %p5843_p7, %p5840_p6 }
  0x70   :  { %5848 = shalt.err (!%p5845_p8)
}
  0x71   :  { %s5849_s16 = scalar_lea.vmem %s109_s27, 16  ;;  %s5853_s8 = scalar_lea.vmem %s109_s27, 32 }
  0x72   :  { %p5850_p9 = scmp.ne.s32.totalorder %s109_s27, %s5849_s16  ;;  %p5854_p10 = scmp.lt.s32.totalorder %s109_s27, %s109_s27 }
  0x73   :  { %p5855_p11 = scmp.lt.s32.totalorder %s5853_s8, %s5849_s16 }
  0x75   :  { %p5856_p12 = por %p5855_p11, %p5854_p10 }
  0x77   :  { %p5857_p13 = pnand %p5856_p12, %p5850_p9 }
  0x79   :  { %5860 = shalt.err (!%p5857_p13)
}
  0x7a   :  { %111 = dma.hbm_to_vmem [thread:$0]  %s8592_s12, 16, %s109_s27, [#allocation15]  }
  0x7b   :  { %5883 = dma.done.wait [#allocation6], 256  }
  0x7c   :  { %5884 = vsyncadd [#allocation6], 4294967040 }
  0x7d   :  { %5885 = dma.done.wait [#allocation9], 3104  }
  0x7e   :  { %5886 = vsyncadd [#allocation9], 4294964192 }
  0x7f   :  { %5887 = dma.done.wait [#allocation12], 144  }
  0x80   :  { %5888 = vsyncadd [#allocation12], 4294967152 }
  0x81   :  { %5889 = dma.done.wait [#allocation15], 32  }
  0x82   :  { %5890 = vsyncadd [#allocation15], 4294967264  ;;  %v8597_v0 = vmov 0.0   ;;  %vm140_vm0 = vcmask 811008   ;;  %v139_v1 = vld [vmem:[%s8580_s0] sm:$0x1]  ;;  %v8596_v10 = vlaneseq }
  0x83   :  { %138 = vst [vmem:[#allocation2] sm:$0xff] %v8597_v0  ;;  %v142_v2 = vld [vmem:[%s8580_s0 + $0x1] sm:$0x1]  ;;  %v144_v3 = vld [vmem:[%s8580_s0 + $0x2] sm:$0x1]  ;;  %s5905_s2 = smov 9  }
  0x84   :  { %141 = vst.msk [vmem:[#allocation2] sm:$0x1] %vm140_vm0, %v139_v1  ;;  %143 = vst.msk [vmem:[#allocation2 + $0x1] sm:$0x1] %vm140_vm0, %v142_v2  ;;  %v146_v4 = vld [vmem:[%s8580_s0 + $0x3] sm:$0x1] }
  0x85   :  { %145 = vst.msk [vmem:[#allocation2 + $0x2] sm:$0x1] %vm140_vm0, %v144_v3  ;;  %v148_v5 = vld [vmem:[%s8580_s0 + $0x4] sm:$0x1]  ;;  %v150_v6 = vld [vmem:[%s8580_s0 + $0x5] sm:$0x1] }
  0x86   :  { %147 = vst.msk [vmem:[#allocation2 + $0x3] sm:$0x1] %vm140_vm0, %v146_v4  ;;  %149 = vst.msk [vmem:[#allocation2 + $0x4] sm:$0x1] %vm140_vm0, %v148_v5  ;;  %v152_v7 = vld [vmem:[%s8580_s0 + $0x6] sm:$0x1] }
  0x87   :  { %151 = vst.msk [vmem:[#allocation2 + $0x5] sm:$0x1] %vm140_vm0, %v150_v6  ;;  %v154_v8 = vld [vmem:[%s8580_s0 + $0x7] sm:$0x1]  ;;  %153 = vst.msk [vmem:[#allocation2 + $0x6] sm:$0x1] %vm140_vm0, %v152_v7 }
  0x88   :  { %155 = vst.msk [vmem:[#allocation2 + $0x7] sm:$0x1] %vm140_vm0, %v154_v8  ;;  %s5906_s26 = smov 10   ;;  %s5907_s30 = smov 1   ;;  %v6123_v12 = vshrl.u32 %v8596_v10, 7  ;;  %v6128_v13 = vld [vmem:[%s8581_s1] sm:$0xff] }
  0x89   :  { %s5908_s16 = smov 127   ;;  %v6133_v14 = vld [vmem:[%s8581_s1 + $0x8] sm:$0xff]  ;;  %s5909_s10 = smov 11   ;;  %v8600_v23 = vmov 0   ;;  %v6171_v25 = vld [vmem:[%s8584_s4] sm:$0xff]  ;;  %v6176_v26 = vld [vmem:[%s8584_s4 + $0x10] sm:$0xff] }
  0x8a   :  { %8680 = vst [vmem:[#allocation23_spill] sm:$0xff] %v6123_v12  ;;  %v6138_v15 = vsub.s32 4, %v6123_v12  ;;  %s5910_s21 = smov 119   ;;  %s5911_s17 = smov 118   ;;  %497 = vmatprep.mubr.bf16.mxu0 %v8600_v23  ;;  %5443 = vset.pattern.permute.xlu1 %v8600_v23  ;;  %v6166_v24 = vld [vmem:[%s8584_s4 + $0x8] sm:$0xff]  ;;  %v6183_v27 = vld [vmem:[%s8584_s4 + $0x18] sm:$0xff] }
  0x8b   :  { %s5912_s20 = smov 117   ;;  %5442 = vset.pattern.permute.xlu0 %v8600_v23  ;;  %v6188_v30 = vsub.s32 1, %v6123_v12  ;;  %v6191_v33 = vsub.s32 2, %v6123_v12  ;;  %v6194_v34 = vsub.s32 3, %v6123_v12  ;;  %vm196_vm1 = vcmask 80896  }
  0x8c   :  { %8681 = vst [vmem:[#allocation24_spill] sm:$0xff] %v6138_v15  ;;  %v6142_v16 = vrot.slane %v6133_v14, %v6138_v15  ;;  %v6146_v17 = vrot.slane %v6128_v13, %v6138_v15  ;;  %v313_v37 = vsub.s32 5, %v6123_v12  ;;  %v6206_v38 = vsub.s32 0, %v6123_v12 }
  0x8d   :  { %8683 = vst [vmem:[#allocation26_spill] sm:$0xff] %v6188_v30  ;;  %8684 = vst [vmem:[#allocation27_spill] sm:$0xff] %v6191_v33  ;;  %v6198_v35 = vrot.slane %v6128_v13, %v6188_v30  ;;  %v6202_v36 = vrot.slane %v6133_v14, %v6188_v30  ;;  %vm226_vm2 = vcmask 72704   ;;  %v6210_v41 = vrot.slane %v6128_v13, %v6191_v33 }
  0x8e   :  { %8682 = vst [vmem:[#allocation25_spill] sm:$0xff] %v6142_v16  ;;  %v291_v18 = vcombine.low %v6146_v17, %v6142_v16  ;;  %8685 = vst [vmem:[#allocation28_spill] sm:$0xff] %v6194_v34  ;;  %v6214_v42 = vrot.slane %v6133_v14, %v6191_v33  ;;  %vm256_vm3 = vcmask 7168   ;;  %v6220_v45 = vrot.slane %v6128_v13, %v6194_v34 }
  0x8f   :  { %v156_v9 = vld [vmem:[#allocation2] sm:$0xff]  ;;  %8686 = vst [vmem:[#allocation29_spill] sm:$0xff] %v6206_v38  ;;  %v6224_v46 = vrot.slane %v6133_v14, %v6194_v34  ;;  %vm305_vm4 = vcmask 1039360   ;;  %v6229_v49 = vrot.slane %v6128_v13, %v313_v37  ;;  %v6232_v50 = vrot.slane %v6133_v14, %v313_v37 }
  0x90   :  { %224 = vrot.lane.b32.xlu1 %v156_v9, %s5905_s2  ;;  %194 = vrot.lane.b32.xlu0 %v156_v9, %s5906_s26  ;;  %v166_v11 = vcombine.high %v156_v9, %v156_v9  ;;  %v293_v19 = vmul.f32 %v291_v18, %v156_v9  ;;  %vm172_vm5 = vcmask 89088   ;;  %v6236_v51 = vrot.slane %v6128_v13, %v6206_v38 }
  0x91   :  { %v343_v52 = vsub.s32 6, %v6123_v12  ;;  %v6241_v57 = vrot.slane %v6133_v14, %v6206_v38  ;;  %vm335_vm6 = vcmask 973824   ;;  %vm365_vm7 = vcmask 965632  }
  0x92   :  { %v295_v20 = vcombine.high %v293_v19, %v293_v19  ;;  %v297_v22 = vpack.c.bf16 %v293_v19, %v293_v19  ;;  %v373_v18 = vsub.s32 7, %v6123_v12  ;;  %vm395_vm8 = vcmask 957440  }
  0x93   :  { %v6252_v5 = vrot.slane %v6128_v13, %v343_v52  ;;  %v6255_v6 = vrot.slane %v6133_v14, %v343_v52  ;;  %vm458_vm9 = vcmask 1041408   ;;  %vm451_vm10 = vcmask 293888  }
  0x94   :  { %254 = vrot.lane.b32.xlu1 %v156_v9, %s5907_s30  ;;  %301 = vrot.lane.b32.xlu0 %v156_v9, %s5908_s16  ;;  %v298_v21 = vpack.c.bf16 %v295_v20, %v295_v20  ;;  %299 = vst [vmem:[#allocation3 + $0x10] sm:$0x3] %v297_v22  ;;  %vm1193_vm11 = vcmask 261120   ;;  %vm3879_vm12 = vcmask 1043456   ;;  %vm3917_vm13 = vcmask 1040384  }
  0x95   :  { %8687 = vst [vmem:[#allocation30_spill] sm:$0xff] %v6252_v5  ;;  %vm3918_vm14 = vsmask.f32 256  ;;  %vm3988_vm0 = vsmask.f32 7938 }
  0x96   :  { %300 = vst [vmem:[#allocation3 + $0x18] sm:$0x3] %v298_v21  ;;  %vm8392_vm15 = vmand %vm3917_vm13, %vm3918_vm14 }
  0x98   :  { %170 = vrot.lane.b32.xlu1 %v156_v9, %s5909_s10  ;;  %191 = vrot.lane.b32.xlu0 %v166_v11, %s5906_s26 }
  0x9c   :  { %221 = vrot.lane.b32.xlu1 %v166_v11, %s5905_s2  ;;  %251 = vrot.lane.b32.xlu0 %v166_v11, %s5907_s30 }
  0xa0   :  { %303 = vrot.lane.b32.xlu1 %v166_v11, %s5908_s16  ;;  %167 = vrot.lane.b32.xlu0 %v166_v11, %s5909_s10 }
  0xa4   :  { %333 = vrot.lane.b32.xlu1 %v166_v11, %s5910_s21  ;;  %331 = vrot.lane.b32.xlu0 %v156_v9, %s5910_s21 }
  0xa8   :  { %363 = vrot.lane.b32.xlu1 %v166_v11, %s5911_s17  ;;  %361 = vrot.lane.b32.xlu0 %v156_v9, %s5911_s17 }
  0xac   :  { %393 = vrot.lane.b32.xlu1 %v166_v11, %s5912_s20  ;;  %391 = vrot.lane.b32.xlu0 %v156_v9, %s5912_s20 }
  0xb0   :  { %428 = vperm.xlu1 %5443, %v6166_v24   ;;  %423 = vperm.xlu0 %5442, %v6171_v25  }
  0xb4   :  { %433 = vperm.xlu1 %5443, %v6176_v26   ;;  %438 = vperm.xlu0 %5442, %v6183_v27  }
 0x102   :  { %v225_v28 = vpop.permute.xlu1 %224  ;;  %v195_v29 = vpop.permute.xlu0 %194 }
 0x106   :  { %v255_v31 = vpop.permute.xlu1 %254  ;;  %v302_v32 = vpop.permute.xlu0 %301 }
 0x10a   :  { %v171_v39 = vpop.permute.xlu1 %170  ;;  %v192_v40 = vpop.permute.xlu0 %191 }
 0x10b   :  { %v197_v43 = vsel %vm196_vm1, %v195_v29, %v192_v40  ;;  %v200_v44 = vsel %vm196_vm1, %v192_v40, %v195_v29 }
 0x10c   :  { %v209_v47 = vmul.f32 %v6198_v35, %v200_v44  ;;  %v210_v48 = vmul.f32 %v6202_v36, %v197_v43 }
 0x10e   :  { %v211_v53 = vpack.c.bf16 %v209_v47, %v209_v47  ;;  %v212_v54 = vpack.c.bf16 %v210_v48, %v210_v48  ;;  %v222_v55 = vpop.permute.xlu1 %221  ;;  %v252_v56 = vpop.permute.xlu0 %251 }
 0x10f   :  { %v227_v58 = vsel %vm226_vm2, %v225_v28, %v222_v55  ;;  %v230_v59 = vsel %vm226_vm2, %v222_v55, %v225_v28  ;;  %v257_v60 = vsel %vm256_vm3, %v255_v31, %v252_v56  ;;  %v260_v61 = vsel %vm256_vm3, %v252_v56, %v255_v31 }
 0x110   :  { %v215_v62 = vrot.slane %v211_v53, 6  ;;  %v216_v63 = vrot.slane %v212_v54, 6  ;;  %v239_v1 = vmul.f32 %v6210_v41, %v230_v59  ;;  %v240_v2 = vmul.f32 %v6214_v42, %v227_v58 }
 0x111   :  { %v269_v3 = vmul.f32 %v6220_v45, %v260_v61  ;;  %v270_v4 = vmul.f32 %v6224_v46, %v257_v60  ;;  %v6269_v59 = vrot.slane %v6128_v13, %v373_v18 }
 0x112   :  { %219 = vst [vmem:[#allocation3] sm:$0xc] %v215_v62  ;;  %220 = vst [vmem:[#allocation3 + $0x8] sm:$0xc] %v216_v63  ;;  %v241_v7 = vpack.c.bf16 %v239_v1, %v239_v1  ;;  %v242_v8 = vpack.c.bf16 %v240_v2, %v240_v2  ;;  %v304_v9 = vpop.permute.xlu1 %303  ;;  %v168_v11 = vpop.permute.xlu0 %167 }
 0x113   :  { %v271_v19 = vpack.c.bf16 %v269_v3, %v269_v3  ;;  %v272_v20 = vpack.c.bf16 %v270_v4, %v270_v4  ;;  %v306_v21 = vsel %vm305_vm4, %v302_v32, %v304_v9  ;;  %v310_v22 = vsel %vm305_vm4, %v304_v9, %v302_v32  ;;  %8688 = vst [vmem:[#allocation31_spill] sm:$0xff] %v6269_v59 }
 0x114   :  { %v245_v28 = vrot.slane %v241_v7, 4  ;;  %v246_v29 = vrot.slane %v242_v8, 4  ;;  %v319_v31 = vmul.f32 %v6229_v49, %v306_v21  ;;  %v320_v37 = vmul.f32 %v6232_v50, %v310_v22  ;;  %v5108_v21 = vld [vmem:[%s8581_s1 + $0x18] ss:$0 sm:$0xff] }
 0x115   :  { %v275_v40 = vrot.slane %v271_v19, 2  ;;  %v276_v43 = vrot.slane %v272_v20, 2  ;;  %v173_v44 = vsel %vm172_vm5, %v171_v39, %v168_v11  ;;  %v176_v47 = vsel %vm172_vm5, %v168_v11, %v171_v39  ;;  %v5107_v20 = vld [vmem:[%s8581_s1 + $0x10] ss:$0 sm:$0xff] }
 0x116   :  { %249 = vst [vmem:[#allocation3] sm:$0x30] %v245_v28  ;;  %250 = vst [vmem:[#allocation3 + $0x8] sm:$0x30] %v246_v29  ;;  %v321_v48 = vpack.c.bf16 %v319_v31, %v319_v31  ;;  %v322_v52 = vpack.c.bf16 %v320_v37, %v320_v37  ;;  %v185_v53 = vmul.f32 %v6236_v51, %v176_v47  ;;  %v334_v54 = vpop.permute.xlu1 %333  ;;  %v332_v55 = vpop.permute.xlu0 %331 }
 0x117   :  { %v186_v32 = vmul.f32 %v6241_v57, %v173_v44  ;;  %279 = vst [vmem:[#allocation3] sm:$0xc0] %v275_v40  ;;  %280 = vst [vmem:[#allocation3 + $0x8] sm:$0xc0] %v276_v43  ;;  %v336_v56 = vsel %vm335_vm6, %v332_v55, %v334_v54  ;;  %v340_v58 = vsel %vm335_vm6, %v334_v54, %v332_v55 }
 0x118   :  { %v6272_v39 = vrot.slane %v6133_v14, %v373_v18  ;;  %v325_v60 = vrot.slane %v321_v48, 6  ;;  %v326_v61 = vrot.slane %v322_v52, 6  ;;  %v187_v62 = vpack.c.bf16 %v185_v53, %v185_v53 }
 0x119   :  { %v188_v63 = vpack.c.bf16 %v186_v32, %v186_v32  ;;  %v349_v1 = vmul.f32 %v6252_v5, %v336_v56  ;;  %v350_v2 = vmul.f32 %v6255_v6, %v340_v58 }
 0x11a   :  { %8689 = vst [vmem:[#allocation32_spill] sm:$0xff] %v6272_v39  ;;  %329 = vst [vmem:[#allocation3 + $0x10] sm:$0xc] %v325_v60  ;;  %v364_v3 = vpop.permute.xlu1 %363  ;;  %v362_v4 = vpop.permute.xlu0 %361 }
 0x11b   :  { %330 = vst [vmem:[#allocation3 + $0x18] sm:$0xc] %v326_v61  ;;  %189 = vst [vmem:[#allocation3] sm:$0x3] %v187_v62  ;;  %v351_v7 = vpack.c.bf16 %v349_v1, %v349_v1  ;;  %v352_v13 = vpack.c.bf16 %v350_v2, %v350_v2  ;;  %v366_v8 = vsel %vm365_vm7, %v362_v4, %v364_v3  ;;  %v5481_v62 = vld [vmem:[#allocation5] sm:$0xff]  }
 0x11c   :  { %190 = vst [vmem:[#allocation3 + $0x8] sm:$0x3] %v188_v63  ;;  %v370_v14 = vsel %vm365_vm7, %v364_v3, %v362_v4  ;;  %v379_v9 = vmul.f32 %v6269_v59, %v366_v8  ;;  %v5482_v63 = vld [vmem:[#allocation5 + $0x8] sm:$0xff]  }
 0x11d   :  { %v380_v11 = vmul.f32 %v6272_v39, %v370_v14  ;;  %v355_v18 = vrot.slane %v351_v7, 4  ;;  %v356_v19 = vrot.slane %v352_v13, 4 }
 0x11e   :  { %v381_v22 = vpack.c.bf16 %v379_v9, %v379_v9  ;;  %v394_v29 = vpop.permute.xlu1 %393  ;;  %v392_v31 = vpop.permute.xlu0 %391 }
 0x11f   :  { %v382_v28 = vpack.c.bf16 %v380_v11, %v380_v11  ;;  %359 = vst [vmem:[#allocation3 + $0x10] sm:$0x30] %v355_v18  ;;  %360 = vst [vmem:[#allocation3 + $0x18] sm:$0x30] %v356_v19  ;;  %v396_v37 = vsel %vm395_vm8, %v392_v31, %v394_v29  ;;  %v400_v40 = vsel %vm395_vm8, %v394_v29, %v392_v31 }
 0x120   :  { %v385_v43 = vrot.slane %v381_v22, 2  ;;  %v409_v47 = vmul.f32 %v5107_v20, %v396_v37  ;;  %v410_v48 = vmul.f32 %v5108_v21, %v400_v40 }
 0x121   :  { %v386_v44 = vrot.slane %v382_v28, 2 }
 0x122   :  { %v415_v53 = vld [vmem:[#allocation3] sm:$0xff]  ;;  %389 = vst [vmem:[#allocation3 + $0x10] sm:$0xc0] %v385_v43  ;;  %v411_v32 = vpack.c.bf16 %v409_v47, %v409_v47  ;;  %v412_v54 = vpack.c.bf16 %v410_v48, %v410_v48 }
 0x123   :  { %v416_v52 = vld [vmem:[#allocation3 + $0x8] sm:$0xff]  ;;  %390 = vst [vmem:[#allocation3 + $0x18] sm:$0xc0] %v386_v44 }
 0x124   :  { %465 = vmatprep.subr.bf16.mxu0 %v416_v52  ;;  %413 = vst [vmem:[#allocation3 + $0x20] sm:$0x3] %v411_v32  ;;  %414 = vst [vmem:[#allocation3 + $0x28] sm:$0x3] %v412_v54 }
 0x125   :  { %466 = vmatpush1.bf16.msra.mxu0 %v415_v53 }
 0x129   :  { %v417_v56 = vld [vmem:[#allocation3 + $0x10] sm:$0xff] }
 0x12a   :  { %v418_v55 = vld [vmem:[#allocation3 + $0x18] sm:$0xff] }
 0x12b   :  { %467 = vmatprep.subr.bf16.mxu0 %v418_v55  ;;  %v420_v58 = vld [vmem:[#allocation3 + $0x28] sm:$0x3]  ;;  %v419_v60 = vld [vmem:[#allocation3 + $0x20] sm:$0x3] }
 0x12c   :  { %468 = vmatpush1.bf16.msra.mxu0 %v417_v56  ;;  %v460_v61 = vsel %vm458_vm9, %v419_v60, 0 }
 0x12d   :  { %5111 = vmatprep.subr.msk.bf16.mxu0 %vm458_vm9, %v420_v58 }
 0x12f   :  { %v424_v1 = vpop.permute.xlu0 %423  ;;  %v429_v3 = vpop.permute.xlu1 %428 }
 0x130   :  { %470 = vmatpush1.bf16.msra.mxu0 %v460_v61  ;;  %v8604_v61 = vmov 1  }
 0x131   :  { %5445 = vset.pattern.permute.xlu1 %v8604_v61  ;;  %5444 = vset.pattern.permute.xlu0 %v8604_v61 }
 0x133   :  { %5112 = vmatmul.mubr.msk.bf16.vlgmr.msra.gmra.mrb[0].mxu0 %vm451_vm10, %v5481_v62  ;;  %v434_v28 = vpop.permute.xlu1 %433  ;;  %v439_v37 = vpop.permute.xlu0 %438 }
 0x134   :  { %507 = vmatprep.mubr.bf16.mxu0 %v8600_v23 }
 0x13b   :  { %5113 = vmatmul.mubr.msk.bf16.gmra.mrb[4].mxu0 %vm451_vm10, %v5482_v63 }
 0x206   :  { %v499_v2 = vpop.f32.mrb[0].mxu0 }
 0x207   :  { %v500_v4 = vadd.f32 %v499_v2, %v424_v1  ;;  %v501_v7 = vpop.f32.mrb[1].mxu0 }
 0x208   :  { %v502_v13 = vadd.f32 %v501_v7, %v424_v1  ;;  %v503_v8 = vpop.f32.mrb[2].mxu0 }
 0x209   :  { %v518_v14 = vmul.f32 %v500_v4, %v6146_v17  ;;  %v504_v9 = vadd.f32 %v503_v8, %v429_v3  ;;  %v505_v11 = vpop.f32.mrb[3].mxu0 }
 0x20a   :  { %v519_v18 = vmul.f32 %v502_v13, %v6142_v16  ;;  %v506_v19 = vadd.f32 %v505_v11, %v429_v3 }
 0x20b   :  { %v520_v20 = vmul.f32 %v504_v9, %v6146_v17 }
 0x20c   :  { %v521_v21 = vmul.f32 %v506_v19, %v6142_v16  ;;  %v526_v22 = vadd.f32 %v519_v18, %v518_v14 }
 0x20e   :  { %v509_v29 = vpop.f32.mrb[4].mxu0  ;;  %527 = vadd.xlane.f32.xlu1 %v526_v22  ;;  %v529_v31 = vadd.f32 %v521_v21, %v520_v20 }
 0x20f   :  { %v510_v40 = vadd.f32 %v509_v29, %v434_v28  ;;  %v511_v43 = vpop.f32.mrb[5].mxu0 }
 0x210   :  { %v512_v44 = vadd.f32 %v511_v43, %v434_v28  ;;  %v513_v47 = vpop.f32.mrb[6].mxu0  ;;  %530 = vadd.xlane.f32.xlu0 %v529_v31 }
 0x211   :  { %v522_v48 = vmul.f32 %v510_v40, %v6146_v17  ;;  %v514_v52 = vadd.f32 %v513_v47, %v439_v37  ;;  %v515_v53 = vpop.f32.mrb[7].mxu0 }
 0x212   :  { %v523_v32 = vmul.f32 %v512_v44, %v6142_v16  ;;  %v516_v54 = vadd.f32 %v515_v53, %v439_v37 }
 0x213   :  { %v524_v55 = vmul.f32 %v514_v52, %v6146_v17 }
 0x214   :  { %v525_v56 = vmul.f32 %v516_v54, %v6142_v16  ;;  %v532_v58 = vadd.f32 %v523_v32, %v522_v48 }
 0x216   :  { %533 = vadd.xlane.f32.xlu0 %v532_v58  ;;  %v535_v60 = vadd.f32 %v525_v56, %v524_v55  ;;  %v8598_v56 = vmov 2  }
 0x218   :  { %536 = vadd.xlane.f32.xlu1 %v535_v60 }
 0x29b   :  { %v528_v62 = vpop.xlane.xlu1 %527 }
 0x29c   :  { %v538_v63 = vmul.f32 0.005, %v528_v62 }
 0x29d   :  { %v531_v1 = vpop.xlane.xlu0 %530 }
 0x29e   :  { %v542_v2 = vsub.f32 %v500_v4, %v538_v63  ;;  %v543_v3 = vsub.f32 %v502_v13, %v538_v63  ;;  %v539_v7 = vmul.f32 0.005, %v531_v1 }
 0x2a0   :  { %v6301_v8 = vsub.f32 %v504_v9, %v539_v7  ;;  %v545_v14 = vsub.f32 %v506_v19, %v539_v7  ;;  %v550_v11 = vmul.f32 %v542_v2, %v6146_v17  ;;  %v551_v18 = vmul.f32 %v543_v3, %v6142_v16 }
 0x2a2   :  { %v558_v20 = vmul.f32 %v550_v11, %v550_v11  ;;  %v559_v21 = vmul.f32 %v551_v18, %v551_v18  ;;  %v552_v22 = vmul.f32 %v6301_v8, %v6146_v17  ;;  %v553_v28 = vmul.f32 %v545_v14, %v6142_v16 }
 0x2a3   :  { %v534_v29 = vpop.xlane.xlu0 %533 }
 0x2a4   :  { %v540_v31 = vmul.f32 0.005, %v534_v29  ;;  %v566_v37 = vadd.f32 %v559_v21, %v558_v20  ;;  %v560_v4 = vmul.f32 %v552_v22, %v552_v22  ;;  %v561_v13 = vmul.f32 %v553_v28, %v553_v28 }
 0x2a6   :  { %v6308_v43 = vsub.f32 %v510_v40, %v540_v31  ;;  %v6310_v9 = vsub.f32 %v512_v44, %v540_v31  ;;  %567 = vadd.xlane.f32.xlu0 %v566_v37  ;;  %v569_v19 = vadd.f32 %v561_v13, %v560_v4  ;;  %v537_v40 = vpop.xlane.xlu1 %536 }
 0x2a7   :  { %v541_v44 = vmul.f32 0.005, %v537_v40 }
 0x2a8   :  { %570 = vadd.xlane.f32.xlu1 %v569_v19  ;;  %v554_v47 = vmul.f32 %v6308_v43, %v6146_v17  ;;  %v555_v48 = vmul.f32 %v6310_v9, %v6142_v16 }
 0x2a9   :  { %v6327_v58 = vsub.f32 %v514_v52, %v541_v44  ;;  %v6329_v60 = vsub.f32 %v516_v54, %v541_v44 }
 0x2aa   :  { %v562_v53 = vmul.f32 %v554_v47, %v554_v47  ;;  %v563_v32 = vmul.f32 %v555_v48, %v555_v48 }
 0x2ac   :  { %v572_v55 = vadd.f32 %v563_v32, %v562_v53 }
 0x2ae   :  { %573 = vadd.xlane.f32.xlu0 %v572_v55 }
 0x2b9   :  { %603 = vperm.xlu1 %5445, %v6166_v24  }
 0x2bd   :  { %5446 = vset.pattern.permute.xlu1 %v8598_v56 }
 0x2be   :  { %623 = vperm.xlu1 %5446, %v6171_v25  }
 0x2c2   :  { %627 = vperm.xlu1 %5446, %v6166_v24   ;;  %v556_v24 = vmul.f32 %v6327_v58, %v6146_v17 }
 0x2c4   :  { %599 = vperm.xlu0 %5444, %v6171_v25   ;;  %v557_v25 = vmul.f32 %v6329_v60, %v6142_v16  ;;  %v564_v62 = vmul.f32 %v556_v24, %v556_v24 }
 0x2c6   :  { %5447 = vset.pattern.permute.xlu1 %v8604_v61  ;;  %v565_v63 = vmul.f32 %v557_v25, %v557_v25 }
 0x2c7   :  { %607 = vperm.xlu1 %5447, %v6176_v26  }
 0x2c8   :  { %5450 = vset.pattern.permute.xlu0 %v8600_v23  ;;  %v575_v1 = vadd.f32 %v565_v63, %v564_v62 }
 0x2cb   :  { %611 = vperm.xlu1 %5447, %v6183_v27  }
 0x2cf   :  { %5448 = vset.pattern.permute.xlu1 %v8598_v56 }
 0x2d0   :  { %631 = vperm.xlu1 %5448, %v6176_v26  }
 0x2f4   :  { %576 = vadd.xlane.f32.xlu1 %v575_v1 }
 0x305   :  { %635 = vperm.xlu1 %5448, %v6183_v27  }
 0x309   :  { %5449 = vset.pattern.permute.xlu1 %v8600_v23 }
 0x333   :  { %v568_v26 = vpop.xlane.xlu0 %567 }
 0x334   :  { %v578_v7 = vmul.f32 0.005, %v568_v26 }
 0x335   :  { %v571_v52 = vpop.xlane.xlu1 %570 }
 0x336   :  { %v582_v11 = vadd.f32 1e-05, %v578_v7  ;;  %v579_v54 = vmul.f32 0.005, %v571_v52 }
 0x338   :  { %5643 = vrsqrt.f32 %v582_v11  ;;  %v583_v18 = vadd.f32 1e-05, %v579_v54 }
 0x339   :  { %v604_v21 = vpop.permute.xlu1 %603 }
 0x33a   :  { %5645 = vrsqrt.f32 %v583_v18 }
 0x33b   :  { %v574_v20 = vpop.xlane.xlu0 %573 }
 0x33c   :  { %v580_v24 = vmul.f32 0.005, %v574_v20 }
 0x33d   :  { %v624_v19 = vpop.permute.xlu1 %623 }
 0x33e   :  { %v584_v62 = vadd.f32 1e-05, %v580_v24 }
 0x340   :  { %5647 = vrsqrt.f32 %v584_v62 }
 0x342   :  { %v5644_v22 = vpop.eup %5643 }
 0x343   :  { %v590_v28 = vmul.f32 %v5644_v22, %v542_v2  ;;  %v591_v29 = vmul.f32 %v5644_v22, %v543_v3  ;;  %v600_v31 = vpop.permute.xlu0 %599  ;;  %v628_v2 = vpop.permute.xlu1 %627 }
 0x344   :  { %v5646_v37 = vpop.eup %5645 }
 0x345   :  { %v593_v4 = vmul.f32 %v5646_v37, %v545_v14  ;;  %v614_v13 = vmul.f32 %v600_v31, %v590_v28  ;;  %v615_v27 = vmul.f32 %v600_v31, %v591_v29  ;;  %v592_v48 = vmul.f32 %v5646_v37, %v6301_v8 }
 0x347   :  { %v639_v47 = vadd.f32 %v624_v19, %v615_v27  ;;  %v617_v53 = vmul.f32 %v604_v21, %v593_v4  ;;  %v638_v32 = vadd.f32 %v624_v19, %v614_v13  ;;  %v616_v3 = vmul.f32 %v604_v21, %v592_v48  ;;  %v608_v63 = vpop.permute.xlu1 %607 }
 0x349   :  { %v6338_v55 = vmax.f32 %v639_v47, 0.0  ;;  %v641_v40 = vadd.f32 %v628_v2, %v617_v53  ;;  %v6344_v14 = vmax.f32 %v638_v32, 0.0  ;;  %v640_v8 = vadd.f32 %v628_v2, %v616_v3 }
 0x34a   :  { %v5648_v1 = vpop.eup %5647 }
 0x34b   :  { %8690 = vst [vmem:[#allocation33_spill] sm:$0xff] %v6338_v55  ;;  %901 = vrot.lane.b32.xlu0 %v6338_v55, %s5908_s16  ;;  %671 = vrot.lane.b32.xlu1 %v6338_v55, %s5909_s10  ;;  %8691 = vst [vmem:[#allocation34_spill] sm:$0xff] %v6344_v14  ;;  %v6350_v44 = vmax.f32 %v641_v40, 0.0  ;;  %v6356_v25 = vmax.f32 %v640_v8, 0.0  ;;  %v612_v26 = vpop.permute.xlu1 %611  ;;  %v595_v7 = vmul.f32 %v5648_v1, %v6310_v9 }
 0x34c   :  { %v594_v54 = vmul.f32 %v5648_v1, %v6308_v43 }
 0x34d   :  { %8692 = vst [vmem:[#allocation35_spill] sm:$0xff] %v6350_v44  ;;  %8693 = vst [vmem:[#allocation36_spill] sm:$0xff] %v6356_v25  ;;  %v619_v52 = vmul.f32 %v608_v63, %v595_v7 }
 0x34e   :  { %v618_v9 = vmul.f32 %v608_v63, %v594_v54 }
 0x34f   :  { %953 = vrot.lane.b32.xlu0 %v6338_v55, %s5910_s21  ;;  %687 = vrot.lane.b32.xlu1 %v6344_v14, %s5909_s10  ;;  %v632_v11 = vpop.permute.xlu1 %631 }
 0x350   :  { %v643_v18 = vadd.f32 %v632_v11, %v619_v52  ;;  %v642_v21 = vadd.f32 %v632_v11, %v618_v9 }
 0x352   :  { %v6392_v20 = vmax.f32 %v643_v18, 0.0  ;;  %v6400_v43 = vmax.f32 %v642_v21, 0.0 }
 0x353   :  { %727 = vrot.lane.b32.xlu1 %v6338_v55, %s5906_s26  ;;  %673 = vrot.lane.b32.xlu0 %v6350_v44, %s5909_s10 }
 0x354   :  { %8694 = vst [vmem:[#allocation37_spill] sm:$0xff] %v6392_v20  ;;  %8695 = vst [vmem:[#allocation38_spill] sm:$0xff] %v6400_v43 }
 0x357   :  { %739 = vrot.lane.b32.xlu1 %v6344_v14, %s5906_s26  ;;  %689 = vrot.lane.b32.xlu0 %v6356_v25, %s5909_s10 }
 0x35b   :  { %779 = vrot.lane.b32.xlu1 %v6338_v55, %s5905_s2  ;;  %729 = vrot.lane.b32.xlu0 %v6350_v44, %s5906_s26 }
 0x35f   :  { %791 = vrot.lane.b32.xlu1 %v6344_v14, %s5905_s2  ;;  %741 = vrot.lane.b32.xlu0 %v6356_v25, %s5906_s26 }
 0x363   :  { %831 = vrot.lane.b32.xlu1 %v6338_v55, %s5907_s30  ;;  %781 = vrot.lane.b32.xlu0 %v6350_v44, %s5905_s2 }
 0x367   :  { %843 = vrot.lane.b32.xlu1 %v6344_v14, %s5907_s30  ;;  %793 = vrot.lane.b32.xlu0 %v6356_v25, %s5905_s2 }
 0x36b   :  { %899 = vrot.lane.b32.xlu1 %v6344_v14, %s5908_s16  ;;  %833 = vrot.lane.b32.xlu0 %v6350_v44, %s5907_s30 }
 0x36f   :  { %951 = vrot.lane.b32.xlu1 %v6344_v14, %s5910_s21  ;;  %845 = vrot.lane.b32.xlu0 %v6356_v25, %s5907_s30 }
 0x373   :  { %903 = vrot.lane.b32.xlu1 %v6356_v25, %s5908_s16  ;;  %905 = vrot.lane.b32.xlu0 %v6350_v44, %s5908_s16 }
 0x377   :  { %955 = vrot.lane.b32.xlu1 %v6356_v25, %s5910_s21  ;;  %909 = vrot.lane.b32.xlu0 %v6392_v20, %s5908_s16 }
 0x37b   :  { %675 = vrot.lane.b32.xlu1 %v6392_v20, %s5909_s10 }
 0x37f   :  { %691 = vrot.lane.b32.xlu1 %v6400_v43, %s5909_s10 }
 0x381   :  { %v577_v22 = vpop.xlane.xlu1 %576 }
 0x382   :  { %v581_v28 = vmul.f32 0.005, %v577_v22 }
 0x383   :  { %731 = vrot.lane.b32.xlu1 %v6392_v20, %s5906_s26 }
 0x384   :  { %v585_v29 = vadd.f32 1e-05, %v581_v28  ;;  %v5485_v28 = vld [vmem:[#allocation8 + $0x4] ss:$12 sps:$4 sm:$0xff]  }
 0x385   :  { %v636_v19 = vpop.permute.xlu1 %635  ;;  %1232 = vmatprep.mubr.bf16.mxu1 %v5485_v28 }
 0x386   :  { %5649 = vrsqrt.f32 %v585_v29 }
 0x387   :  { %743 = vrot.lane.b32.xlu1 %v6400_v43, %s5906_s26 }
 0x38b   :  { %783 = vrot.lane.b32.xlu1 %v6392_v20, %s5905_s2 }
 0x38f   :  { %795 = vrot.lane.b32.xlu1 %v6400_v43, %s5905_s2 }
 0x390   :  { %v5650_v31 = vpop.eup %5649 }
 0x391   :  { %v596_v37 = vmul.f32 %v5650_v31, %v6327_v58  ;;  %v597_v4 = vmul.f32 %v5650_v31, %v6329_v60 }
 0x393   :  { %v620_v13 = vmul.f32 %v612_v26, %v596_v37  ;;  %v621_v27 = vmul.f32 %v612_v26, %v597_v4  ;;  %835 = vrot.lane.b32.xlu1 %v6392_v20, %s5907_s30 }
 0x395   :  { %v645_v47 = vadd.f32 %v636_v19, %v621_v27  ;;  %v644_v48 = vadd.f32 %v636_v19, %v620_v13 }
 0x397   :  { %v6416_v53 = vmax.f32 %v645_v47, 0.0  ;;  %847 = vrot.lane.b32.xlu1 %v6400_v43, %s5907_s30  ;;  %v6422_v32 = vmax.f32 %v644_v48, 0.0 }
 0x399   :  { %8696 = vst [vmem:[#allocation39_spill] sm:$0xff] %v6416_v53  ;;  %677 = vrot.lane.b32.xlu0 %v6416_v53, %s5909_s10  ;;  %8697 = vst [vmem:[#allocation40_spill] sm:$0xff] %v6422_v32 }
 0x39b   :  { %907 = vrot.lane.b32.xlu1 %v6400_v43, %s5908_s16 }
 0x39d   :  { %693 = vrot.lane.b32.xlu0 %v6422_v32, %s5909_s10 }
 0x39f   :  { %959 = vrot.lane.b32.xlu1 %v6400_v43, %s5910_s21 }
 0x3a1   :  { %733 = vrot.lane.b32.xlu0 %v6416_v53, %s5906_s26 }
 0x3a3   :  { %1003 = vrot.lane.b32.xlu1 %v6344_v14, %s5911_s17 }
 0x3a5   :  { %745 = vrot.lane.b32.xlu0 %v6422_v32, %s5906_s26 }
 0x3a7   :  { %911 = vrot.lane.b32.xlu1 %v6422_v32, %s5908_s16 }
 0x3a9   :  { %785 = vrot.lane.b32.xlu0 %v6416_v53, %s5905_s2 }
 0x3ab   :  { %1007 = vrot.lane.b32.xlu1 %v6356_v25, %s5911_s17 }
 0x3ad   :  { %797 = vrot.lane.b32.xlu0 %v6422_v32, %s5905_s2 }
 0x3af   :  { %963 = vrot.lane.b32.xlu1 %v6422_v32, %s5910_s21 }
 0x3b1   :  { %837 = vrot.lane.b32.xlu0 %v6416_v53, %s5907_s30 }
 0x3b3   :  { %1011 = vrot.lane.b32.xlu1 %v6400_v43, %s5911_s17 }
 0x3b5   :  { %849 = vrot.lane.b32.xlu0 %v6422_v32, %s5907_s30 }
 0x3b7   :  { %1015 = vrot.lane.b32.xlu1 %v6422_v32, %s5911_s17 }
 0x3b9   :  { %957 = vrot.lane.b32.xlu0 %v6350_v44, %s5910_s21 }
 0x3bb   :  { %1055 = vrot.lane.b32.xlu1 %v6344_v14, %s5912_s20 }
 0x3bd   :  { %v6458_v58 = vpop.permute.xlu0 %901  ;;  %961 = vrot.lane.b32.xlu0 %v6392_v20, %s5910_s21  ;;  %v672_v60 = vpop.permute.xlu1 %671 }
 0x3bf   :  { %1059 = vrot.lane.b32.xlu1 %v6356_v25, %s5912_s20 }
 0x3c1   :  { %v6464_v2 = vpop.permute.xlu0 %953  ;;  %1005 = vrot.lane.b32.xlu0 %v6338_v55, %s5911_s17  ;;  %v688_v3 = vpop.permute.xlu1 %687 }
 0x3c2   :  { %v695_v24 = vsel %vm172_vm5, %v688_v3, %v672_v60  ;;  %v707_v62 = vsel %vm172_vm5, %v672_v60, %v688_v3  ;;  %v6521_v3 = vld [vmem:[%s8584_s4 + $0x20] sm:$0xff] }
 0x3c3   :  { %1063 = vrot.lane.b32.xlu1 %v6400_v43, %s5912_s20  ;;  %v711_v52 = vmul.f32 %v707_v62, %v6236_v51  ;;  %v712_v11 = vmul.f32 %v695_v24, %v6241_v57  ;;  %8698 = vst [vmem:[#allocation41_spill] sm:$0xff] %v6521_v3  ;;  %v6532_v24 = vld [vmem:[%s8584_s4 + $0x30] sm:$0xff] }
 0x3c4   :  { %8700 = vst [vmem:[#allocation43_spill] sm:$0xff] %v6532_v24 }
 0x3c5   :  { %v674_v40 = vpop.permute.xlu0 %673  ;;  %913 = vrot.lane.b32.xlu0 %v6416_v53, %s5908_s16  ;;  %v6472_v8 = vpop.permute.xlu1 %727 }
 0x3c7   :  { %1067 = vrot.lane.b32.xlu1 %v6422_v32, %s5912_s20 }
 0x3c9   :  { %v690_v63 = vpop.permute.xlu0 %689  ;;  %1009 = vrot.lane.b32.xlu0 %v6350_v44, %s5911_s17  ;;  %v6480_v1 = vpop.permute.xlu1 %739 }
 0x3ca   :  { %v696_v26 = vsel %vm172_vm5, %v690_v63, %v674_v40  ;;  %v708_v7 = vsel %vm172_vm5, %v674_v40, %v690_v63  ;;  %v6527_v40 = vld [vmem:[%s8584_s4 + $0x28] sm:$0xff]  ;;  %v759_v59 = vsel %vm196_vm1, %v6472_v8, %v6480_v1 }
 0x3cb   :  { %v713_v54 = vmul.f32 %v708_v7, %v6236_v51  ;;  %v714_v18 = vmul.f32 %v696_v26, %v6241_v57  ;;  %1145 = vperm.xlu1 %5449, %v6521_v3   ;;  %8699 = vst [vmem:[#allocation42_spill] sm:$0xff] %v6527_v40  ;;  %v6539_v26 = vld [vmem:[%s8584_s4 + $0x38] sm:$0xff] }
 0x3cc   :  { %8701 = vst [vmem:[#allocation44_spill] sm:$0xff] %v6539_v26 }
 0x3cd   :  { %v719_v9 = vpack.c.bf16 %v713_v54, %v711_v52  ;;  %v720_v21 = vpack.c.bf16 %v714_v18, %v712_v11  ;;  %965 = vrot.lane.b32.xlu0 %v6416_v53, %s5910_s21  ;;  %v6490_v22 = vpop.permute.xlu1 %779  ;;  %v730_v4 = vpop.permute.xlu0 %729 }
 0x3cf   :  { %1200 = vmatprep.subr.bf16.mxu1 %v720_v21  ;;  %1155 = vperm.xlu1 %5449, %v6532_v24  }
 0x3d0   :  { %1201 = vmatpush1.bf16.msra.mxu1 %v719_v9 }
 0x3d1   :  { %1013 = vrot.lane.b32.xlu0 %v6392_v20, %s5911_s17  ;;  %v6494_v29 = vpop.permute.xlu1 %791  ;;  %v742_v19 = vpop.permute.xlu0 %741 }
 0x3d2   :  { %v748_v23 = vsel %vm196_vm1, %v742_v19, %v730_v4  ;;  %v760_v38 = vsel %vm196_vm1, %v730_v4, %v742_v19 }
 0x3d3   :  { %1160 = vperm.xlu1 %5449, %v6539_v26   ;;  %v766_v12 = vmul.f32 %v748_v23, %v6202_v36  ;;  %v765_v23 = vmul.f32 %v760_v38, %v6198_v35  ;;  %v799_v38 = vsel %vm226_vm2, %v6494_v29, %v6490_v22 }
 0x3d5   :  { %1017 = vrot.lane.b32.xlu0 %v6416_v53, %s5911_s17  ;;  %v6498_v31 = vpop.permute.xlu1 %831  ;;  %v782_v48 = vpop.permute.xlu0 %781 }
 0x3d7   :  { %5451 = vset.pattern.permute.xlu1 %v8604_v61 }
 0x3d9   :  { %1057 = vrot.lane.b32.xlu0 %v6338_v55, %s5912_s20  ;;  %v6502_v37 = vpop.permute.xlu1 %843  ;;  %v794_v63 = vpop.permute.xlu0 %793 }
 0x3dd   :  { %1061 = vrot.lane.b32.xlu0 %v6350_v44, %s5912_s20  ;;  %v6506_v13 = vpop.permute.xlu1 %899  ;;  %v6543_v52 = vpop.permute.xlu0 %833 }
 0x3e1   :  { %1065 = vrot.lane.b32.xlu0 %v6392_v20, %s5912_s20  ;;  %v6510_v27 = vpop.permute.xlu1 %951  ;;  %v6546_v18 = vpop.permute.xlu0 %845 }
 0x3e5   :  { %1069 = vrot.lane.b32.xlu0 %v6416_v53, %s5912_s20  ;;  %v6514_v47 = vpop.permute.xlu1 %903  ;;  %v6548_v21 = vpop.permute.xlu0 %905 }
 0x3e9   :  { %v6516_v60 = vpop.permute.xlu1 %955  ;;  %1150 = vperm.xlu0 %5450, %v6527_v40   ;;  %v6550_v10 = vpop.permute.xlu0 %909 }
 0x3ed   :  { %v676_v62 = vpop.permute.xlu1 %675  ;;  %5452 = vset.pattern.permute.xlu0 %v8604_v61  ;;  %v747_v61 = vsel %vm196_vm1, %v6480_v1, %v6472_v8 }
 0x3ee   :  { %v764_v4 = vmul.f32 %v747_v61, %v6202_v36 }
 0x3f1   :  { %v692_v7 = vpop.permute.xlu1 %691 }
 0x3f2   :  { %v697_v30 = vsel %vm172_vm5, %v692_v7, %v676_v62  ;;  %v709_v15 = vsel %vm172_vm5, %v676_v62, %v692_v7 }
 0x3f3   :  { %v715_v40 = vmul.f32 %v709_v15, %v6236_v51  ;;  %v716_v3 = vmul.f32 %v697_v30, %v6241_v57  ;;  %v772_v15 = vpack.c.bf16 %v766_v12, %v764_v4  ;;  %v800_v30 = vsel %vm226_vm2, %v794_v63, %v782_v48 }
 0x3f4   :  { %v818_v12 = vmul.f32 %v800_v30, %v6214_v42 }
 0x3f5   :  { %v732_v11 = vpop.permute.xlu1 %731 }
 0x3f9   :  { %v744_v54 = vpop.permute.xlu1 %743 }
 0x3fd   :  { %v784_v9 = vpop.permute.xlu1 %783 }
 0x401   :  { %v796_v28 = vpop.permute.xlu1 %795 }
 0x405   :  { %v6552_v0 = vpop.permute.xlu1 %835 }
 0x409   :  { %v6560_v34 = vpop.permute.xlu1 %847 }
 0x40b   :  { %v678_v56 = vpop.permute.xlu0 %677 }
 0x40f   :  { %v694_v33 = vpop.permute.xlu0 %693 }
 0x410   :  { %v698_v26 = vsel %vm172_vm5, %v694_v33, %v678_v56  ;;  %v710_v24 = vsel %vm172_vm5, %v678_v56, %v694_v33  ;;  %v763_v33 = vmul.f32 %v759_v59, %v6198_v35  ;;  %v6577_v56 = vpop.permute.xlu1 %907  ;;  %v812_v59 = vsel %vm226_vm2, %v782_v48, %v794_v63 }
 0x411   :  { %v717_v62 = vmul.f32 %v710_v24, %v6236_v51  ;;  %v718_v7 = vmul.f32 %v698_v26, %v6241_v57  ;;  %v749_v24 = vsel %vm196_vm1, %v744_v54, %v732_v11  ;;  %v761_v26 = vsel %vm196_vm1, %v732_v11, %v744_v54 }
 0x412   :  { %v771_v8 = vpack.c.bf16 %v765_v23, %v763_v33  ;;  %v816_v48 = vmul.f32 %v799_v38, %v6214_v42  ;;  %v817_v63 = vmul.f32 %v812_v59, %v6210_v41 }
 0x413   :  { %v721_v19 = vpack.c.bf16 %v717_v62, %v715_v40  ;;  %v722_v39 = vpack.c.bf16 %v718_v7, %v716_v3  ;;  %v734_v5 = vpop.permute.xlu0 %733  ;;  %v767_v3 = vmul.f32 %v761_v26, %v6198_v35  ;;  %v768_v40 = vmul.f32 %v749_v24, %v6202_v36 }
 0x414   :  { %v811_v62 = vsel %vm226_vm2, %v6490_v22, %v6494_v29  ;;  %v6597_v7 = vpop.permute.xlu1 %959  ;;  %v824_v33 = vpack.c.bf16 %v818_v12, %v816_v48  ;;  %v801_v22 = vsel %vm226_vm2, %v796_v28, %v784_v9  ;;  %v813_v29 = vsel %vm226_vm2, %v784_v9, %v796_v28 }
 0x415   :  { %1202 = vmatprep.subr.bf16.mxu1 %v722_v39  ;;  %v851_v24 = vsel %vm256_vm3, %v6502_v37, %v6498_v31  ;;  %v819_v9 = vmul.f32 %v813_v29, %v6210_v41  ;;  %v820_v28 = vmul.f32 %v801_v22, %v6214_v42 }
 0x416   :  { %1203 = vmatpush1.bf16.msra.mxu1 %v721_v19  ;;  %v815_v19 = vmul.f32 %v811_v62, %v6210_v41 }
 0x417   :  { %v746_v61 = vpop.permute.xlu0 %745  ;;  %1204 = vmatprep.subr.bf16.mxu1 %v772_v15  ;;  %v852_v15 = vsel %vm256_vm3, %v6546_v18, %v6543_v52 }
 0x418   :  { %v750_v1 = vsel %vm196_vm1, %v746_v61, %v734_v5  ;;  %v762_v39 = vsel %vm196_vm1, %v734_v5, %v746_v61  ;;  %v823_v30 = vpack.c.bf16 %v817_v63, %v815_v19  ;;  %v870_v38 = vmul.f32 %v852_v15, %v6224_v46  ;;  %v6616_v12 = vpop.permute.xlu1 %1003 }
 0x419   :  { %v769_v11 = vmul.f32 %v762_v39, %v6198_v35  ;;  %v770_v54 = vmul.f32 %v750_v1, %v6202_v36  ;;  %v853_v63 = vsel %vm256_vm3, %v6560_v34, %v6552_v0 }
 0x41a   :  { %1205 = vmatpush1.bf16.msra.mxu1 %v771_v8  ;;  %v864_v8 = vsel %vm256_vm3, %v6543_v52, %v6546_v18  ;;  %v863_v52 = vsel %vm256_vm3, %v6498_v31, %v6502_v37  ;;  %v868_v18 = vmul.f32 %v851_v24, %v6224_v46  ;;  %v872_v22 = vmul.f32 %v853_v63, %v6224_v46 }
 0x41b   :  { %v773_v5 = vpack.c.bf16 %v769_v11, %v767_v3  ;;  %v774_v4 = vpack.c.bf16 %v770_v54, %v768_v40  ;;  %v786_v23 = vpop.permute.xlu0 %785  ;;  %v869_v54 = vmul.f32 %v864_v8, %v6220_v45  ;;  %v867_v48 = vmul.f32 %v863_v52, %v6220_v45 }
 0x41c   :  { %v876_v62 = vpack.c.bf16 %v870_v38, %v868_v18  ;;  %v912_v31 = vpop.permute.xlu1 %911  ;;  %v885_v8 = vmul.f32 %v6356_v25, %v6146_v17  ;;  %v931_v52 = vsel %vm305_vm4, %v6458_v58, %v6506_v13  ;;  %v916_v18 = vsel %vm305_vm4, %v6514_v47, %v6548_v21 }
 0x41d   :  { %1206 = vmatprep.subr.bf16.mxu1 %v774_v4  ;;  %v875_v4 = vpack.c.bf16 %v869_v54, %v867_v48  ;;  %v887_v48 = vmul.f32 %v6400_v43, %v6146_v17  ;;  %v936_v63 = vmul.f32 %v931_v52, %v6232_v50 }
 0x41e   :  { %1207 = vmatpush1.bf16.msra.mxu1 %v773_v5  ;;  %v865_v5 = vsel %vm256_vm3, %v6552_v0, %v6560_v34 }
 0x41f   :  { %v798_v26 = vpop.permute.xlu0 %797  ;;  %1208 = vmatprep.subr.bf16.mxu1 %v824_v33  ;;  %v886_v33 = vmul.f32 %v6350_v44, %v6142_v16  ;;  %v871_v15 = vmul.f32 %v865_v5, %v6220_v45  ;;  %v937_v5 = vmul.f32 %v916_v18, %v6229_v49 }
 0x420   :  { %v802_v61 = vsel %vm226_vm2, %v798_v26, %v786_v23  ;;  %v814_v59 = vsel %vm226_vm2, %v786_v23, %v798_v26  ;;  %v884_v26 = vmul.f32 %v6338_v55, %v6142_v16  ;;  %v6644_v38 = vpop.permute.xlu1 %1007 }
 0x421   :  { %v821_v1 = vmul.f32 %v814_v59, %v6210_v41  ;;  %v822_v39 = vmul.f32 %v802_v61, %v6214_v42  ;;  %v890_v59 = vmul.f32 %v6416_v53, %v6142_v16 }
 0x422   :  { %1209 = vmatpush1.bf16.msra.mxu1 %v823_v30  ;;  %v892_v61 = vpack.c.bf16 %v886_v33, %v884_v26  ;;  %v983_v33 = vsel %vm335_vm6, %v6464_v2, %v6510_v27 }
 0x423   :  { %v825_v3 = vpack.c.bf16 %v821_v1, %v819_v9  ;;  %v826_v40 = vpack.c.bf16 %v822_v39, %v820_v28  ;;  %v838_v11 = vpop.permute.xlu0 %837  ;;  %v932_v9 = vsel %vm305_vm4, %v6548_v21, %v6514_v47  ;;  %v883_v28 = vmul.f32 %v6344_v14, %v6146_v17 }
 0x424   :  { %v888_v39 = vmul.f32 %v6392_v20, %v6142_v16  ;;  %v964_v47 = vpop.permute.xlu1 %963 }
 0x425   :  { %1210 = vmatprep.subr.bf16.mxu1 %v826_v40  ;;  %v889_v40 = vmul.f32 %v6422_v32, %v6146_v17 }
 0x426   :  { %1211 = vmatpush1.bf16.msra.mxu1 %v825_v3  ;;  %v891_v3 = vpack.c.bf16 %v885_v8, %v883_v28  ;;  %v894_v54 = vpack.c.bf16 %v890_v59, %v888_v39  ;;  %v967_v59 = vsel %vm335_vm6, %v6510_v27, %v6464_v2 }
 0x427   :  { %v850_v37 = vpop.permute.xlu0 %849  ;;  %1212 = vmatprep.subr.bf16.mxu1 %v876_v62  ;;  %v915_v62 = vsel %vm305_vm4, %v6506_v13, %v6458_v58  ;;  %v933_v58 = vsel %vm305_vm4, %v6550_v10, %v6577_v56 }
 0x428   :  { %v854_v23 = vsel %vm256_vm3, %v850_v37, %v838_v11  ;;  %v866_v19 = vsel %vm256_vm3, %v838_v11, %v850_v37  ;;  %v938_v11 = vmul.f32 %v932_v9, %v6232_v50  ;;  %v893_v37 = vpack.c.bf16 %v889_v40, %v887_v48 }
 0x429   :  { %v873_v29 = vmul.f32 %v866_v19, %v6220_v45  ;;  %v874_v0 = vmul.f32 %v854_v23, %v6224_v46  ;;  %v917_v19 = vsel %vm305_vm4, %v6577_v56, %v6550_v10  ;;  %v940_v56 = vmul.f32 %v933_v58, %v6232_v50 }
 0x42a   :  { %1213 = vmatpush1.bf16.msra.mxu1 %v875_v4  ;;  %v935_v4 = vmul.f32 %v915_v62, %v6229_v49  ;;  %v944_v23 = vpack.c.bf16 %v938_v11, %v936_v63 }
 0x42b   :  { %v877_v34 = vpack.c.bf16 %v873_v29, %v871_v15  ;;  %v878_v30 = vpack.c.bf16 %v874_v0, %v872_v22  ;;  %v958_v24 = vpop.permute.xlu0 %957  ;;  %v939_v29 = vmul.f32 %v917_v19, %v6229_v49 }
 0x42c   :  { %v984_v13 = vsel %vm335_vm6, %v958_v24, %v6516_v60  ;;  %v943_v15 = vpack.c.bf16 %v937_v5, %v935_v4  ;;  %v968_v0 = vsel %vm335_vm6, %v6516_v60, %v958_v24  ;;  %v988_v60 = vmul.f32 %v983_v33, %v6255_v6  ;;  %v8702_v24 = vld [vmem:[#allocation30_spill] sm:$0xff] }
 0x42d   :  { %1214 = vmatprep.subr.bf16.mxu1 %v878_v30  ;;  %v1012_v30 = vpop.permute.xlu1 %1011  ;;  %v990_v26 = vmul.f32 %v984_v13, %v6255_v6  ;;  %v989_v9 = vmul.f32 %v968_v0, %v8702_v24  ;;  %v987_v18 = vmul.f32 %v967_v59, %v8702_v24 }
 0x42e   :  { %1215 = vmatpush1.bf16.msra.mxu1 %v877_v34 }
 0x42f   :  { %v962_v1 = vpop.permute.xlu0 %961  ;;  %1216 = vmatprep.subr.bf16.mxu1 %v892_v61  ;;  %v995_v11 = vpack.c.bf16 %v989_v9, %v987_v18 }
 0x430   :  { %v969_v52 = vsel %vm335_vm6, %v6597_v7, %v962_v1  ;;  %v985_v40 = vsel %vm335_vm6, %v962_v1, %v6597_v7 }
 0x431   :  { %v1016_v27 = vpop.permute.xlu1 %1015  ;;  %v992_v48 = vmul.f32 %v985_v40, %v6255_v6  ;;  %v5486_v40 = vld [vmem:[#allocation8 + $0x1c] ss:$12 sps:$4 sm:$0xff]  }
 0x432   :  { %1217 = vmatpush1.bf16.msra.mxu1 %v891_v3  ;;  %v996_v3 = vpack.c.bf16 %v990_v26, %v988_v60 }
 0x433   :  { %v1006_v21 = vpop.permute.xlu0 %1005  ;;  %1218 = vmatprep.subr.bf16.mxu1 %v894_v54  ;;  %v991_v54 = vmul.f32 %v969_v52, %v8702_v24  ;;  %v5483_v52 = vld [vmem:[#allocation8] ss:$12 sps:$4 sm:$0xff]  }
 0x434   :  { %v1035_v63 = vsel %vm365_vm7, %v1006_v21, %v6616_v12  ;;  %v1019_v58 = vsel %vm365_vm7, %v6616_v12, %v1006_v21 }
 0x435   :  { %v1056_v0 = vpop.permute.xlu1 %1055 }
 0x436   :  { %1219 = vmatpush1.bf16.msra.mxu1 %v893_v37  ;;  %v8703_v37 = vld [vmem:[#allocation32_spill] sm:$0xff] }
 0x437   :  { %v914_v22 = vpop.permute.xlu0 %913  ;;  %1220 = vmatprep.subr.bf16.mxu1 %v944_v23  ;;  %v1040_v13 = vmul.f32 %v1035_v63, %v8703_v37  ;;  %v6741_v63 = vld [vmem:[%s8581_s1 + $0x18] ss:$0 sm:$0xff] }
 0x438   :  { %v918_v34 = vsel %vm305_vm4, %v912_v31, %v914_v22  ;;  %v934_v10 = vsel %vm305_vm4, %v914_v22, %v912_v31 }
 0x439   :  { %v941_v8 = vmul.f32 %v918_v34, %v6229_v49  ;;  %v942_v61 = vmul.f32 %v934_v10, %v6232_v50 }
 0x43a   :  { %1221 = vmatpush1.bf16.msra.mxu1 %v943_v15 }
 0x43b   :  { %v945_v28 = vpack.c.bf16 %v941_v8, %v939_v29  ;;  %v946_v31 = vpack.c.bf16 %v942_v61, %v940_v56  ;;  %v1010_v39 = vpop.permute.xlu0 %1009  ;;  %v8704_v29 = vld [vmem:[#allocation31_spill] sm:$0xff] }
 0x43c   :  { %v1036_v2 = vsel %vm365_vm7, %v1010_v39, %v6644_v38  ;;  %v1020_v1 = vsel %vm365_vm7, %v6644_v38, %v1010_v39  ;;  %v1039_v38 = vmul.f32 %v1019_v58, %v8704_v29  ;;  %v5488_v58 = vld [vmem:[#allocation8 + $0x18] ss:$12 sps:$4 sm:$0xff]  }
 0x43d   :  { %1222 = vmatprep.subr.bf16.mxu1 %v946_v31  ;;  %v1042_v4 = vmul.f32 %v1036_v2, %v8703_v37 }
 0x43e   :  { %1223 = vmatpush1.bf16.msra.mxu1 %v945_v28  ;;  %v1060_v28 = vpop.permute.xlu1 %1059 }
 0x43f   :  { %v966_v62 = vpop.permute.xlu0 %965  ;;  %1224 = vmatprep.subr.bf16.mxu1 %v996_v3  ;;  %v1048_v34 = vpack.c.bf16 %v1042_v4, %v1040_v13 }
 0x440   :  { %v970_v5 = vsel %vm335_vm6, %v964_v47, %v966_v62  ;;  %v986_v7 = vsel %vm335_vm6, %v966_v62, %v964_v47  ;;  %v1041_v47 = vmul.f32 %v1020_v1, %v8704_v29  ;;  %v6735_v62 = vld [vmem:[%s8581_s1 + $0x10] ss:$0 sm:$0xff] }
 0x441   :  { %v993_v23 = vmul.f32 %v970_v5, %v8702_v24  ;;  %v994_v19 = vmul.f32 %v986_v7, %v6255_v6 }
 0x442   :  { %1225 = vmatpush1.bf16.msra.mxu1 %v995_v11  ;;  %v1047_v12 = vpack.c.bf16 %v1041_v47, %v1039_v38 }
 0x443   :  { %v997_v33 = vpack.c.bf16 %v993_v23, %v991_v54  ;;  %v998_v15 = vpack.c.bf16 %v994_v19, %v992_v48  ;;  %v1014_v22 = vpop.permute.xlu0 %1013  ;;  %v1064_v54 = vpop.permute.xlu1 %1063 }
 0x444   :  { %v1021_v10 = vsel %vm365_vm7, %v1012_v30, %v1014_v22  ;;  %v1037_v56 = vsel %vm365_vm7, %v1014_v22, %v1012_v30 }
 0x445   :  { %1226 = vmatprep.subr.bf16.mxu1 %v998_v15  ;;  %v1043_v61 = vmul.f32 %v1021_v10, %v8704_v29  ;;  %v1044_v59 = vmul.f32 %v1037_v56, %v8703_v37 }
 0x446   :  { %1227 = vmatpush1.bf16.msra.mxu1 %v997_v33 }
 0x447   :  { %v1018_v26 = vpop.permute.xlu0 %1017  ;;  %1228 = vmatprep.subr.bf16.mxu1 %v1048_v34  ;;  %v1068_v15 = vpop.permute.xlu1 %1067 }
 0x448   :  { %v1022_v21 = vsel %vm365_vm7, %v1016_v27, %v1018_v26  ;;  %v1038_v8 = vsel %vm365_vm7, %v1018_v26, %v1016_v27  ;;  %v8705_v26 = vmov 0  }
 0x449   :  { %v1045_v60 = vmul.f32 %v1022_v21, %v8704_v29  ;;  %v1046_v9 = vmul.f32 %v1038_v8, %v8703_v37  ;;  %v5489_v8 = vld [vmem:[#allocation8 + $0x8] ss:$12 sps:$4 sm:$0xff]  }
 0x44a   :  { %1229 = vmatpush1.bf16.msra.mxu1 %v1047_v12 }
 0x44b   :  { %v1049_v31 = vpack.c.bf16 %v1045_v60, %v1043_v61  ;;  %v1050_v30 = vpack.c.bf16 %v1046_v9, %v1044_v59  ;;  %v1058_v39 = vpop.permute.xlu0 %1057  ;;  %v5490_v61 = vld [vmem:[#allocation8 + $0x20] ss:$12 sps:$4 sm:$0xff]   ;;  %v1146_v59 = vpop.permute.xlu1 %1145 }
 0x44c   :  { %v1071_v18 = vsel %vm395_vm8, %v1056_v0, %v1058_v39  ;;  %v1087_v3 = vsel %vm395_vm8, %v1058_v39, %v1056_v0 }
 0x44d   :  { %1230 = vmatprep.subr.bf16.mxu1 %v1050_v30  ;;  %v1091_v48 = vmul.f32 %v6735_v62, %v1071_v18  ;;  %v1092_v5 = vmul.f32 %v6741_v63, %v1087_v3 }
 0x44e   :  { %1231 = vmatpush1.bf16.msra.mxu1 %v1049_v31 }
 0x44f   :  { %v1062_v2 = vpop.permute.xlu0 %1061 }
 0x450   :  { %v1072_v27 = vsel %vm395_vm8, %v1060_v28, %v1062_v2  ;;  %v1088_v11 = vsel %vm395_vm8, %v1062_v2, %v1060_v28 }
 0x451   :  { %v1093_v7 = vmul.f32 %v6735_v62, %v1072_v27  ;;  %v1094_v1 = vmul.f32 %v6741_v63, %v1088_v11  ;;  %1233 = vmatmul.mubr.bf16.vlgmr.msra.gmra.mrb[0].mxu1 %v5483_v52 }
 0x452   :  { %1242 = vmatprep.mubr.bf16.mxu1 %v5486_v40  ;;  %v1156_v40 = vpop.permute.xlu1 %1155 }
 0x453   :  { %v1099_v4 = vpack.c.bf16 %v1093_v7, %v1091_v48  ;;  %v1100_v23 = vpack.c.bf16 %v1094_v1, %v1092_v5  ;;  %v1066_v19 = vpop.permute.xlu0 %1065 }
 0x454   :  { %v1073_v13 = vsel %vm395_vm8, %v1064_v54, %v1066_v19  ;;  %v1089_v33 = vsel %vm395_vm8, %v1066_v19, %v1064_v54 }
 0x455   :  { %1253 = vmatprep.subr.bf16.mxu1 %v1100_v23  ;;  %v1095_v34 = vmul.f32 %v6735_v62, %v1073_v13  ;;  %v1096_v38 = vmul.f32 %v6741_v63, %v1089_v33 }
 0x456   :  { %1254 = vmatpush1.bf16.msra.mxu1 %v1099_v4  ;;  %v1161_v23 = vpop.permute.xlu1 %1160 }
 0x457   :  { %v1070_v22 = vpop.permute.xlu0 %1069 }
 0x458   :  { %v1074_v47 = vsel %vm395_vm8, %v1068_v15, %v1070_v22  ;;  %v1090_v0 = vsel %vm395_vm8, %v1070_v22, %v1068_v15 }
 0x459   :  { %v1097_v10 = vmul.f32 %v6735_v62, %v1074_v47  ;;  %v1098_v56 = vmul.f32 %v6741_v63, %v1090_v0  ;;  %1243 = vmatmul.mubr.bf16.gmra.mrb[4].mxu1 %v5488_v58 }
 0x45a   :  { %1285 = vmatprep.mubr.bf16.mxu1 %v8705_v26 }
 0x45b   :  { %v1101_v12 = vpack.c.bf16 %v1097_v10, %v1095_v34  ;;  %v1102_v21 = vpack.c.bf16 %v1098_v56, %v1096_v38  ;;  %v8706_v56 = vld [vmem:[#allocation41_spill] sm:$0xff] }
 0x45d   :  { %1255 = vmatprep.subr.bf16.mxu1 %v1102_v21 }
 0x45e   :  { %1256 = vmatpush1.bf16.msra.mxu1 %v1101_v12  ;;  %v8707_v12 = vmov 2  }
 0x461   :  { %5124 = vmatmul.mubr.msk.bf16.vlgmr.msra.gmra.mrb[0].mxu1 %vm1193_vm11, %v5489_v8 }
 0x462   :  { %1295 = vmatprep.mubr.bf16.mxu1 %v8705_v26 }
 0x468   :  { %v1151_v9 = vpop.permute.xlu0 %1150 }
 0x469   :  { %5125 = vmatmul.mubr.msk.bf16.gmra.mrb[4].mxu1 %vm1193_vm11, %v5490_v61 }
 0x534   :  { %v1287_v60 = vpop.f32.mrb[0].mxu1 }
 0x535   :  { %v5350_v28 = vadd.f32 %v1287_v60, %v1146_v59  ;;  %v1289_v31 = vpop.f32.mrb[1].mxu1 }
 0x536   :  { %v5351_v30 = vadd.f32 %v1289_v31, %v1146_v59  ;;  %v1291_v39 = vpop.f32.mrb[2].mxu1 }
 0x537   :  { %v1306_v52 = vmul.f32 %v5350_v28, %v6146_v17  ;;  %v5352_v18 = vadd.f32 %v1291_v39, %v1151_v9  ;;  %v1293_v3 = vpop.f32.mrb[3].mxu1 }
 0x538   :  { %v1307_v2 = vmul.f32 %v5351_v30, %v6142_v16  ;;  %v5353_v27 = vadd.f32 %v1293_v3, %v1151_v9 }
 0x539   :  { %v1308_v11 = vmul.f32 %v5352_v18, %v6146_v17 }
 0x53a   :  { %v1309_v54 = vmul.f32 %v5353_v27, %v6142_v16  ;;  %v1314_v48 = vadd.f32 %v1307_v2, %v1306_v52 }
 0x53c   :  { %v1297_v5 = vpop.f32.mrb[4].mxu1  ;;  %1315 = vadd.xlane.f32.xlu0 %v1314_v48  ;;  %v1317_v7 = vadd.f32 %v1309_v54, %v1308_v11 }
 0x53d   :  { %v5354_v1 = vadd.f32 %v1297_v5, %v1156_v40  ;;  %v1299_v4 = vpop.f32.mrb[5].mxu1 }
 0x53e   :  { %v5355_v19 = vadd.f32 %v1299_v4, %v1156_v40  ;;  %v1301_v58 = vpop.f32.mrb[6].mxu1  ;;  %1318 = vadd.xlane.f32.xlu1 %v1317_v7 }
 0x53f   :  { %v1310_v13 = vmul.f32 %v5354_v1, %v6146_v17  ;;  %v5356_v33 = vadd.f32 %v1301_v58, %v1161_v23  ;;  %v1303_v15 = vpop.f32.mrb[7].mxu1 }
 0x540   :  { %v1311_v22 = vmul.f32 %v5355_v19, %v6142_v16  ;;  %v5357_v47 = vadd.f32 %v1303_v15, %v1161_v23 }
 0x541   :  { %v1312_v0 = vmul.f32 %v5356_v33, %v6146_v17 }
 0x542   :  { %v1313_v34 = vmul.f32 %v5357_v47, %v6142_v16  ;;  %v1320_v38 = vadd.f32 %v1311_v22, %v1310_v13 }
 0x544   :  { %1321 = vadd.xlane.f32.xlu0 %v1320_v38  ;;  %v1323_v10 = vadd.f32 %v1313_v34, %v1312_v0 }
 0x548   :  { %1324 = vadd.xlane.f32.xlu0 %v1323_v10 }
 0x54f   :  { %1387 = vperm.xlu1 %5451, %v8706_v56  }
 0x553   :  { %5453 = vset.pattern.permute.xlu1 %v8707_v12 }
 0x5c9   :  { %v1316_v21 = vpop.xlane.xlu0 %1315 }
 0x5ca   :  { %v1326_v8 = vmul.f32 0.005, %v1316_v21 }
 0x5cb   :  { %v1319_v61 = vpop.xlane.xlu1 %1318 }
 0x5cc   :  { %v1330_v59 = vsub.f32 %v5350_v28, %v1326_v8  ;;  %v1331_v60 = vsub.f32 %v5351_v30, %v1326_v8  ;;  %v1327_v9 = vmul.f32 0.005, %v1319_v61 }
 0x5ce   :  { %v1338_v31 = vmul.f32 %v1330_v59, %v6146_v17  ;;  %v1339_v39 = vmul.f32 %v1331_v60, %v6142_v16  ;;  %v6770_v52 = vsub.f32 %v5352_v18, %v1327_v9  ;;  %v1333_v3 = vsub.f32 %v5353_v27, %v1327_v9  ;;  %v8710_v9 = vld [vmem:[#allocation43_spill] sm:$0xff] }
 0x5d0   :  { %v1340_v40 = vmul.f32 %v6770_v52, %v6146_v17  ;;  %v1341_v2 = vmul.f32 %v1333_v3, %v6142_v16  ;;  %v1346_v11 = vmul.f32 %v1338_v31, %v1338_v31  ;;  %v1347_v54 = vmul.f32 %v1339_v39, %v1339_v39  ;;  %v8711_v31 = vld [vmem:[#allocation44_spill] sm:$0xff] }
 0x5d1   :  { %v1322_v48 = vpop.xlane.xlu0 %1321 }
 0x5d2   :  { %v1328_v5 = vmul.f32 0.005, %v1322_v48  ;;  %v1354_v7 = vadd.f32 %v1347_v54, %v1346_v11  ;;  %v1348_v28 = vmul.f32 %v1340_v40, %v1340_v40  ;;  %v1349_v30 = vmul.f32 %v1341_v2, %v1341_v2 }
 0x5d4   :  { %v6775_v4 = vsub.f32 %v5354_v1, %v1328_v5  ;;  %v6777_v23 = vsub.f32 %v5355_v19, %v1328_v5  ;;  %1355 = vadd.xlane.f32.xlu1 %v1354_v7  ;;  %v1357_v18 = vadd.f32 %v1349_v30, %v1348_v28 }
 0x5d5   :  { %v1325_v58 = vpop.xlane.xlu0 %1324 }
 0x5d6   :  { %v1342_v27 = vmul.f32 %v6775_v4, %v6146_v17  ;;  %v1343_v13 = vmul.f32 %v6777_v23, %v6142_v16  ;;  %v1329_v15 = vmul.f32 0.005, %v1325_v58  ;;  %1358 = vadd.xlane.f32.xlu0 %v1357_v18 }
 0x5d8   :  { %v6783_v22 = vsub.f32 %v5356_v33, %v1329_v15  ;;  %v6785_v0 = vsub.f32 %v5357_v47, %v1329_v15  ;;  %v1350_v34 = vmul.f32 %v1342_v27, %v1342_v27  ;;  %v1351_v1 = vmul.f32 %v1343_v13, %v1343_v13  ;;  %v8708_v33 = vld [vmem:[#allocation42_spill] sm:$0xff] }
 0x5d9   :  { %v8709_v47 = vmov 1  }
 0x5da   :  { %v1344_v19 = vmul.f32 %v6783_v22, %v6146_v17  ;;  %v1345_v38 = vmul.f32 %v6785_v0, %v6142_v16  ;;  %v1360_v10 = vadd.f32 %v1351_v1, %v1350_v34 }
 0x5dc   :  { %1361 = vadd.xlane.f32.xlu1 %v1360_v10  ;;  %v1352_v21 = vmul.f32 %v1344_v19, %v1344_v19  ;;  %v1353_v8 = vmul.f32 %v1345_v38, %v1345_v38 }
 0x5de   :  { %v1363_v61 = vadd.f32 %v1353_v8, %v1352_v21 }
 0x5e0   :  { %1364 = vadd.xlane.f32.xlu0 %v1363_v61 }
 0x5ed   :  { %1411 = vperm.xlu1 %5453, %v8706_v56   ;;  %v1388_v56 = vpop.permute.xlu1 %1387 }
 0x5f1   :  { %1415 = vperm.xlu1 %5453, %v8708_v33  }
 0x5f5   :  { %5454 = vset.pattern.permute.xlu1 %v8709_v47 }
 0x5f6   :  { %1395 = vperm.xlu1 %5454, %v8710_v9   ;;  %1391 = vperm.xlu0 %5452, %v8708_v33  }
 0x5fa   :  { %1399 = vperm.xlu1 %5454, %v8711_v31   ;;  %5457 = vset.pattern.permute.xlu0 %v8705_v26 }
 0x5fe   :  { %5455 = vset.pattern.permute.xlu1 %v8707_v12 }
 0x5ff   :  { %1419 = vperm.xlu1 %5455, %v8710_v9  }
 0x603   :  { %1423 = vperm.xlu1 %5455, %v8711_v31  }
 0x607   :  { %5456 = vset.pattern.permute.xlu1 %v8705_v26 }
 0x661   :  { %v1356_v39 = vpop.xlane.xlu1 %1355 }
 0x662   :  { %v1366_v40 = vmul.f32 0.005, %v1356_v39 }
 0x663   :  { %v1359_v2 = vpop.xlane.xlu0 %1358 }
 0x664   :  { %v1370_v11 = vadd.f32 1e-05, %v1366_v40  ;;  %v1367_v54 = vmul.f32 0.005, %v1359_v2 }
 0x666   :  { %5651 = vrsqrt.f32 %v1370_v11  ;;  %v1371_v48 = vadd.f32 1e-05, %v1367_v54 }
 0x668   :  { %5653 = vrsqrt.f32 %v1371_v48 }
 0x669   :  { %v1362_v5 = vpop.xlane.xlu1 %1361 }
 0x66a   :  { %v1368_v31 = vmul.f32 0.005, %v1362_v5 }
 0x66d   :  { %v1365_v28 = vpop.xlane.xlu0 %1364  ;;  %v1412_v34 = vpop.permute.xlu1 %1411 }
 0x66e   :  { %v1369_v39 = vmul.f32 0.005, %v1365_v28 }
 0x670   :  { %v5652_v7 = vpop.eup %5651  ;;  %v1373_v40 = vadd.f32 1e-05, %v1369_v39 }
 0x671   :  { %v1378_v30 = vmul.f32 %v5652_v7, %v1330_v59  ;;  %v1379_v18 = vmul.f32 %v5652_v7, %v1331_v60  ;;  %v1416_v59 = vpop.permute.xlu1 %1415 }
 0x672   :  { %v5654_v58 = vpop.eup %5653 }
 0x673   :  { %v1402_v27 = vmul.f32 %v1388_v56, %v1378_v30  ;;  %v1403_v13 = vmul.f32 %v1388_v56, %v1379_v18  ;;  %v1381_v15 = vmul.f32 %v5654_v58, %v1333_v3  ;;  %v1380_v21 = vmul.f32 %v5654_v58, %v6770_v52 }
 0x674   :  { %v1372_v56 = vadd.f32 1e-05, %v1368_v31 }
 0x675   :  { %v1427_v1 = vadd.f32 %v1412_v34, %v1403_v13  ;;  %v1392_v19 = vpop.permute.xlu0 %1391  ;;  %v1426_v38 = vadd.f32 %v1412_v34, %v1402_v27  ;;  %v1396_v2 = vpop.permute.xlu1 %1395 }
 0x676   :  { %v1405_v8 = vmul.f32 %v1392_v19, %v1381_v15  ;;  %v1404_v61 = vmul.f32 %v1392_v19, %v1380_v21  ;;  %5655 = vrsqrt.f32 %v1372_v56 }
 0x677   :  { %v6802_v10 = vmax.f32 %v1427_v1, 0.0  ;;  %v6809_v60 = vmax.f32 %v1426_v38, 0.0  ;;  %5657 = vrsqrt.f32 %v1373_v40 }
 0x678   :  { %v1429_v3 = vadd.f32 %v1416_v59, %v1405_v8  ;;  %v1428_v33 = vadd.f32 %v1416_v59, %v1404_v61  ;;  %v5493_v8 = vld [vmem:[#allocation8 + $0x34] ss:$12 sps:$4 sm:$0xff]  }
 0x679   :  { %1690 = vrot.lane.b32.xlu0 %v6802_v10, %s5908_s16  ;;  %1460 = vrot.lane.b32.xlu1 %v6802_v10, %s5909_s10  ;;  %v1400_v11 = vpop.permute.xlu1 %1399 }
 0x67a   :  { %v6815_v52 = vmax.f32 %v1429_v3, 0.0  ;;  %v6821_v9 = vmax.f32 %v1428_v33, 0.0  ;;  %2020 = vmatprep.mubr.bf16.mxu0 %v5493_v8 }
 0x67d   :  { %1742 = vrot.lane.b32.xlu0 %v6802_v10, %s5910_s21  ;;  %1476 = vrot.lane.b32.xlu1 %v6809_v60, %s5909_s10 }
 0x67e   :  { %v1420_v7 = vpop.permute.xlu1 %1419 }
 0x680   :  { %v5656_v54 = vpop.eup %5655 }
 0x681   :  { %1516 = vrot.lane.b32.xlu1 %v6802_v10, %s5906_s26  ;;  %1462 = vrot.lane.b32.xlu0 %v6815_v52, %s5909_s10  ;;  %v1383_v48 = vmul.f32 %v5656_v54, %v6777_v23  ;;  %v5658_v5 = vpop.eup %5657  ;;  %v1382_v23 = vmul.f32 %v5656_v54, %v6775_v4 }
 0x682   :  { %v1385_v30 = vmul.f32 %v5658_v5, %v6785_v0  ;;  %v1424_v58 = vpop.permute.xlu1 %1423  ;;  %v1384_v27 = vmul.f32 %v5658_v5, %v6783_v22 }
 0x683   :  { %v1407_v28 = vmul.f32 %v1396_v2, %v1383_v48  ;;  %v1406_v34 = vmul.f32 %v1396_v2, %v1382_v23 }
 0x684   :  { %v1409_v13 = vmul.f32 %v1400_v11, %v1385_v30  ;;  %v1408_v1 = vmul.f32 %v1400_v11, %v1384_v27 }
 0x685   :  { %1528 = vrot.lane.b32.xlu1 %v6809_v60, %s5906_s26  ;;  %1478 = vrot.lane.b32.xlu0 %v6821_v9, %s5909_s10  ;;  %v1431_v18 = vadd.f32 %v1420_v7, %v1407_v28  ;;  %v1430_v4 = vadd.f32 %v1420_v7, %v1406_v34  ;;  %v6979_v34 = vld [vmem:[%s8584_s4 + $0x50] sm:$0xff] }
 0x686   :  { %v1433_v15 = vadd.f32 %v1424_v58, %v1409_v13  ;;  %v1432_v22 = vadd.f32 %v1424_v58, %v1408_v1  ;;  %v6972_v58 = vld [vmem:[%s8584_s4 + $0x48] sm:$0xff]  ;;  %8714 = vst [vmem:[#allocation31_spill] sm:$0xff] %v6979_v34 }
 0x687   :  { %v6859_v0 = vmax.f32 %v1431_v18, 0.0  ;;  %v6871_v38 = vmax.f32 %v1430_v4, 0.0  ;;  %v6966_v18 = vld [vmem:[%s8584_s4 + $0x40] sm:$0xff]  ;;  %8713 = vst [vmem:[#allocation32_spill] sm:$0xff] %v6972_v58 }
 0x688   :  { %v6865_v19 = vmax.f32 %v1433_v15, 0.0  ;;  %v6873_v21 = vmax.f32 %v1432_v22, 0.0  ;;  %8712 = vst [vmem:[#allocation30_spill] sm:$0xff] %v6966_v18  ;;  %v6986_v22 = vld [vmem:[%s8584_s4 + $0x58] sm:$0xff] }
 0x689   :  { %1568 = vrot.lane.b32.xlu1 %v6802_v10, %s5905_s2  ;;  %1518 = vrot.lane.b32.xlu0 %v6815_v52, %s5906_s26  ;;  %8715 = vst [vmem:[#allocation41_spill] sm:$0xff] %v6986_v22 }
 0x68d   :  { %1580 = vrot.lane.b32.xlu1 %v6809_v60, %s5905_s2  ;;  %1530 = vrot.lane.b32.xlu0 %v6821_v9, %s5906_s26 }
 0x691   :  { %1620 = vrot.lane.b32.xlu1 %v6802_v10, %s5907_s30  ;;  %1570 = vrot.lane.b32.xlu0 %v6815_v52, %s5905_s2 }
 0x695   :  { %1632 = vrot.lane.b32.xlu1 %v6809_v60, %s5907_s30  ;;  %1582 = vrot.lane.b32.xlu0 %v6821_v9, %s5905_s2 }
 0x699   :  { %1688 = vrot.lane.b32.xlu1 %v6809_v60, %s5908_s16  ;;  %1622 = vrot.lane.b32.xlu0 %v6815_v52, %s5907_s30 }
 0x69d   :  { %1740 = vrot.lane.b32.xlu1 %v6809_v60, %s5910_s21  ;;  %1634 = vrot.lane.b32.xlu0 %v6821_v9, %s5907_s30 }
 0x6a1   :  { %1692 = vrot.lane.b32.xlu1 %v6821_v9, %s5908_s16  ;;  %1694 = vrot.lane.b32.xlu0 %v6815_v52, %s5908_s16 }
 0x6a5   :  { %1744 = vrot.lane.b32.xlu1 %v6821_v9, %s5910_s21  ;;  %1698 = vrot.lane.b32.xlu0 %v6859_v0, %s5908_s16 }
 0x6a9   :  { %1464 = vrot.lane.b32.xlu1 %v6859_v0, %s5909_s10  ;;  %1466 = vrot.lane.b32.xlu0 %v6865_v19, %s5909_s10 }
 0x6ad   :  { %1480 = vrot.lane.b32.xlu1 %v6871_v38, %s5909_s10  ;;  %1482 = vrot.lane.b32.xlu0 %v6873_v21, %s5909_s10 }
 0x6b1   :  { %1520 = vrot.lane.b32.xlu1 %v6859_v0, %s5906_s26  ;;  %1522 = vrot.lane.b32.xlu0 %v6865_v19, %s5906_s26 }
 0x6b5   :  { %1532 = vrot.lane.b32.xlu1 %v6871_v38, %s5906_s26  ;;  %1534 = vrot.lane.b32.xlu0 %v6873_v21, %s5906_s26 }
 0x6b9   :  { %1572 = vrot.lane.b32.xlu1 %v6859_v0, %s5905_s2  ;;  %1574 = vrot.lane.b32.xlu0 %v6865_v19, %s5905_s2 }
 0x6bd   :  { %1584 = vrot.lane.b32.xlu1 %v6871_v38, %s5905_s2  ;;  %1586 = vrot.lane.b32.xlu0 %v6873_v21, %s5905_s2 }
 0x6c1   :  { %1624 = vrot.lane.b32.xlu1 %v6859_v0, %s5907_s30  ;;  %1626 = vrot.lane.b32.xlu0 %v6865_v19, %s5907_s30 }
 0x6c5   :  { %1636 = vrot.lane.b32.xlu1 %v6871_v38, %s5907_s30  ;;  %1638 = vrot.lane.b32.xlu0 %v6873_v21, %s5907_s30 }
 0x6c9   :  { %1696 = vrot.lane.b32.xlu1 %v6871_v38, %s5908_s16  ;;  %1746 = vrot.lane.b32.xlu0 %v6815_v52, %s5910_s21 }
 0x6cd   :  { %1748 = vrot.lane.b32.xlu1 %v6871_v38, %s5910_s21  ;;  %1750 = vrot.lane.b32.xlu0 %v6859_v0, %s5910_s21 }
 0x6d1   :  { %1792 = vrot.lane.b32.xlu1 %v6809_v60, %s5911_s17  ;;  %1794 = vrot.lane.b32.xlu0 %v6802_v10, %s5911_s17 }
 0x6d5   :  { %1700 = vrot.lane.b32.xlu1 %v6873_v21, %s5908_s16  ;;  %1702 = vrot.lane.b32.xlu0 %v6865_v19, %s5908_s16 }
 0x6d9   :  { %1796 = vrot.lane.b32.xlu1 %v6821_v9, %s5911_s17  ;;  %1798 = vrot.lane.b32.xlu0 %v6815_v52, %s5911_s17 }
 0x6dd   :  { %1752 = vrot.lane.b32.xlu1 %v6873_v21, %s5910_s21  ;;  %1754 = vrot.lane.b32.xlu0 %v6865_v19, %s5910_s21 }
 0x6e1   :  { %1800 = vrot.lane.b32.xlu1 %v6871_v38, %s5911_s17  ;;  %1802 = vrot.lane.b32.xlu0 %v6859_v0, %s5911_s17 }
 0x6e5   :  { %1804 = vrot.lane.b32.xlu1 %v6873_v21, %s5911_s17  ;;  %1806 = vrot.lane.b32.xlu0 %v6865_v19, %s5911_s17 }
 0x6e9   :  { %1844 = vrot.lane.b32.xlu1 %v6809_v60, %s5912_s20  ;;  %1846 = vrot.lane.b32.xlu0 %v6802_v10, %s5912_s20 }
 0x6eb   :  { %v6939_v59 = vpop.permute.xlu0 %1690  ;;  %v1461_v61 = vpop.permute.xlu1 %1460 }
 0x6ed   :  { %1848 = vrot.lane.b32.xlu1 %v6821_v9, %s5912_s20  ;;  %1850 = vrot.lane.b32.xlu0 %v6815_v52, %s5912_s20 }
 0x6ef   :  { %v6945_v3 = vpop.permute.xlu0 %1742  ;;  %v1477_v33 = vpop.permute.xlu1 %1476 }
 0x6f0   :  { %v1484_v39 = vsel %vm172_vm5, %v1477_v33, %v1461_v61  ;;  %v1496_v40 = vsel %vm172_vm5, %v1461_v61, %v1477_v33 }
 0x6f1   :  { %1852 = vrot.lane.b32.xlu1 %v6871_v38, %s5912_s20  ;;  %1854 = vrot.lane.b32.xlu0 %v6859_v0, %s5912_s20  ;;  %v1500_v5 = vmul.f32 %v1496_v40, %v6236_v51  ;;  %v1501_v7 = vmul.f32 %v1484_v39, %v6241_v57 }
 0x6f3   :  { %v1463_v31 = vpop.permute.xlu0 %1462  ;;  %v1517_v56 = vpop.permute.xlu1 %1516 }
 0x6f5   :  { %1856 = vrot.lane.b32.xlu1 %v6873_v21, %s5912_s20  ;;  %1858 = vrot.lane.b32.xlu0 %v6865_v19, %s5912_s20 }
 0x6f7   :  { %v1479_v2 = vpop.permute.xlu0 %1478  ;;  %v1529_v11 = vpop.permute.xlu1 %1528 }
 0x6f8   :  { %v1485_v54 = vsel %vm172_vm5, %v1479_v2, %v1463_v31  ;;  %v1497_v48 = vsel %vm172_vm5, %v1463_v31, %v1479_v2  ;;  %v1536_v32 = vsel %vm196_vm1, %v1529_v11, %v1517_v56 }
 0x6f9   :  { %v1502_v28 = vmul.f32 %v1497_v48, %v6236_v51  ;;  %v1503_v30 = vmul.f32 %v1485_v54, %v6241_v57  ;;  %1934 = vperm.xlu1 %5456, %v6966_v18   ;;  %1939 = vperm.xlu0 %5457, %v6972_v58  }
 0x6fb   :  { %v1508_v23 = vpack.c.bf16 %v1502_v28, %v1500_v5  ;;  %v1509_v27 = vpack.c.bf16 %v1503_v30, %v1501_v7  ;;  %v1519_v13 = vpop.permute.xlu0 %1518  ;;  %v6974_v15 = vpop.permute.xlu1 %1568 }
 0x6fd   :  { %1988 = vmatprep.subr.bf16.mxu0 %v1509_v27  ;;  %1944 = vperm.xlu1 %5456, %v6979_v34  }
 0x6fe   :  { %1989 = vmatpush1.bf16.msra.mxu0 %v1508_v23  ;;  %5459 = vset.pattern.permute.xlu0 %v8709_v47 }
 0x6ff   :  { %v1531_v1 = vpop.permute.xlu0 %1530  ;;  %v1581_v4 = vpop.permute.xlu1 %1580 }
 0x700   :  { %v1537_v27 = vsel %vm196_vm1, %v1531_v1, %v1519_v13  ;;  %v1549_v53 = vsel %vm196_vm1, %v1519_v13, %v1531_v1  ;;  %v1548_v1 = vsel %vm196_vm1, %v1517_v56, %v1529_v11 }
 0x701   :  { %1949 = vperm.xlu1 %5456, %v6986_v22   ;;  %v1555_v43 = vmul.f32 %v1537_v27, %v6202_v36  ;;  %v1553_v27 = vmul.f32 %v1536_v32, %v6202_v36  ;;  %v1554_v12 = vmul.f32 %v1549_v53, %v6198_v35 }
 0x703   :  { %v1571_v8 = vpop.permute.xlu0 %1570  ;;  %v6990_v61 = vpop.permute.xlu1 %1620 }
 0x705   :  { %5458 = vset.pattern.permute.xlu1 %v8709_v47 }
 0x707   :  { %v1583_v33 = vpop.permute.xlu0 %1582  ;;  %v6993_v31 = vpop.permute.xlu1 %1632 }
 0x708   :  { %v1601_v56 = vsel %vm226_vm2, %v1571_v8, %v1583_v33 }
 0x70b   :  { %v6995_v39 = vpop.permute.xlu0 %1622  ;;  %v6997_v40 = vpop.permute.xlu1 %1688 }
 0x70f   :  { %v6999_v2 = vpop.permute.xlu0 %1634  ;;  %v7001_v54 = vpop.permute.xlu1 %1740 }
 0x713   :  { %v7003_v48 = vpop.permute.xlu0 %1694  ;;  %v7005_v5 = vpop.permute.xlu1 %1692 }
 0x717   :  { %v7007_v7 = vpop.permute.xlu0 %1698  ;;  %v7009_v28 = vpop.permute.xlu1 %1744 }
 0x71b   :  { %v1467_v30 = vpop.permute.xlu0 %1466  ;;  %v1465_v23 = vpop.permute.xlu1 %1464 }
 0x71f   :  { %v1483_v20 = vpop.permute.xlu0 %1482  ;;  %v1481_v25 = vpop.permute.xlu1 %1480 }
 0x720   :  { %v1487_v44 = vsel %vm172_vm5, %v1483_v20, %v1467_v30  ;;  %v1499_v55 = vsel %vm172_vm5, %v1467_v30, %v1483_v20  ;;  %v1486_v14 = vsel %vm172_vm5, %v1481_v25, %v1465_v23  ;;  %v1498_v22 = vsel %vm172_vm5, %v1465_v23, %v1481_v25 }
 0x721   :  { %v1506_v34 = vmul.f32 %v1499_v55, %v6236_v51  ;;  %v1507_v47 = vmul.f32 %v1487_v44, %v6241_v57  ;;  %v1504_v58 = vmul.f32 %v1498_v22, %v6236_v51  ;;  %v1505_v13 = vmul.f32 %v1486_v14, %v6241_v57 }
 0x722   :  { %v1589_v25 = vsel %vm226_vm2, %v1583_v33, %v1571_v8  ;;  %v1552_v55 = vmul.f32 %v1548_v1, %v6198_v35  ;;  %v1561_v23 = vpack.c.bf16 %v1555_v43, %v1553_v27  ;;  %v1588_v14 = vsel %vm226_vm2, %v1581_v4, %v6974_v15 }
 0x723   :  { %v1510_v18 = vpack.c.bf16 %v1506_v34, %v1504_v58  ;;  %v1511_v20 = vpack.c.bf16 %v1507_v47, %v1505_v13  ;;  %v1523_v30 = vpop.permute.xlu0 %1522  ;;  %v1521_v26 = vpop.permute.xlu1 %1520  ;;  %v1607_v32 = vmul.f32 %v1589_v25, %v6214_v42  ;;  %v1600_v33 = vsel %vm226_vm2, %v6974_v15, %v1581_v4 }
 0x724   :  { %v1560_v44 = vpack.c.bf16 %v1554_v12, %v1552_v55  ;;  %v1605_v13 = vmul.f32 %v1588_v14, %v6214_v42  ;;  %v1606_v1 = vmul.f32 %v1601_v56, %v6210_v41  ;;  %v1641_v25 = vsel %vm256_vm3, %v6999_v2, %v6995_v39 }
 0x725   :  { %1990 = vmatprep.subr.bf16.mxu0 %v1511_v20  ;;  %v1604_v55 = vmul.f32 %v1600_v33, %v6210_v41  ;;  %v1640_v15 = vsel %vm256_vm3, %v6993_v31, %v6990_v61  ;;  %v1653_v4 = vsel %vm256_vm3, %v6995_v39, %v6999_v2  ;;  %v1652_v2 = vsel %vm256_vm3, %v6990_v61, %v6993_v31 }
 0x726   :  { %1991 = vmatpush1.bf16.msra.mxu0 %v1510_v18  ;;  %v1675_v61 = vmul.f32 %v6815_v52, %v6142_v16 }
 0x727   :  { %v1535_v53 = vpop.permute.xlu0 %1534  ;;  %v1533_v11 = vpop.permute.xlu1 %1532  ;;  %1992 = vmatprep.subr.bf16.mxu0 %v1561_v23  ;;  %v1613_v23 = vpack.c.bf16 %v1607_v32, %v1605_v13 }
 0x728   :  { %v1539_v47 = vsel %vm196_vm1, %v1535_v53, %v1523_v30  ;;  %v1551_v58 = vsel %vm196_vm1, %v1523_v30, %v1535_v53  ;;  %v1538_v34 = vsel %vm196_vm1, %v1533_v11, %v1521_v26  ;;  %v1550_v43 = vsel %vm196_vm1, %v1521_v26, %v1533_v11 }
 0x729   :  { %v1558_v12 = vmul.f32 %v1551_v58, %v6198_v35  ;;  %v1559_v18 = vmul.f32 %v1539_v47, %v6202_v36  ;;  %v1556_v22 = vmul.f32 %v1550_v43, %v6198_v35  ;;  %v1557_v8 = vmul.f32 %v1538_v34, %v6202_v36 }
 0x72a   :  { %1993 = vmatpush1.bf16.msra.mxu0 %v1560_v44  ;;  %v1612_v53 = vpack.c.bf16 %v1606_v1, %v1604_v55  ;;  %v1659_v44 = vmul.f32 %v1641_v25, %v6224_v46 }
 0x72b   :  { %v1562_v27 = vpack.c.bf16 %v1558_v12, %v1556_v22  ;;  %v1563_v20 = vpack.c.bf16 %v1559_v18, %v1557_v8  ;;  %v1575_v30 = vpop.permute.xlu0 %1574  ;;  %v1573_v26 = vpop.permute.xlu1 %1572  ;;  %v1657_v18 = vmul.f32 %v1640_v15, %v6224_v46  ;;  %v1658_v22 = vmul.f32 %v1653_v4, %v6220_v45 }
 0x72d   :  { %1994 = vmatprep.subr.bf16.mxu0 %v1563_v20  ;;  %v1665_v20 = vpack.c.bf16 %v1659_v44, %v1657_v18 }
 0x72e   :  { %1995 = vmatpush1.bf16.msra.mxu0 %v1562_v27  ;;  %v1656_v27 = vmul.f32 %v1652_v2, %v6220_v45 }
 0x72f   :  { %v1587_v14 = vpop.permute.xlu0 %1586  ;;  %v1585_v56 = vpop.permute.xlu1 %1584  ;;  %1996 = vmatprep.subr.bf16.mxu0 %v1613_v23 }
 0x730   :  { %v1591_v11 = vsel %vm226_vm2, %v1587_v14, %v1575_v30  ;;  %v1603_v32 = vsel %vm226_vm2, %v1575_v30, %v1587_v14  ;;  %v1590_v47 = vsel %vm226_vm2, %v1585_v56, %v1573_v26  ;;  %v1602_v58 = vsel %vm226_vm2, %v1573_v26, %v1585_v56 }
 0x731   :  { %v1610_v34 = vmul.f32 %v1603_v32, %v6210_v41  ;;  %v1611_v43 = vmul.f32 %v1591_v11, %v6214_v42  ;;  %v1608_v12 = vmul.f32 %v1602_v58, %v6210_v41  ;;  %v1609_v39 = vmul.f32 %v1590_v47, %v6214_v42 }
 0x732   :  { %1997 = vmatpush1.bf16.msra.mxu0 %v1612_v53  ;;  %v1664_v30 = vpack.c.bf16 %v1658_v22, %v1656_v27  ;;  %v1673_v47 = vmul.f32 %v6802_v10, %v6142_v16  ;;  %v1674_v58 = vmul.f32 %v6821_v9, %v6146_v17  ;;  %v1677_v10 = vmul.f32 %v6859_v0, %v6142_v16 }
 0x733   :  { %v1614_v8 = vpack.c.bf16 %v1610_v34, %v1608_v12  ;;  %v1615_v33 = vpack.c.bf16 %v1611_v43, %v1609_v39  ;;  %v1627_v13 = vpop.permute.xlu0 %1626  ;;  %v1625_v1 = vpop.permute.xlu1 %1624  ;;  %v1679_v43 = vmul.f32 %v6865_v19, %v6142_v16  ;;  %v1672_v12 = vmul.f32 %v6809_v60, %v6146_v17 }
 0x734   :  { %v1681_v34 = vpack.c.bf16 %v1675_v61, %v1673_v47  ;;  %v1721_v39 = vsel %vm305_vm4, %v7003_v48, %v7005_v5  ;;  %v1678_v9 = vmul.f32 %v6873_v21, %v6146_v17  ;;  %v1720_v19 = vsel %vm305_vm4, %v6939_v59, %v6997_v40 }
 0x735   :  { %1998 = vmatprep.subr.bf16.mxu0 %v1615_v33  ;;  %v1705_v60 = vsel %vm305_vm4, %v7005_v5, %v7003_v48  ;;  %v1680_v22 = vpack.c.bf16 %v1674_v58, %v1672_v12  ;;  %v1683_v33 = vpack.c.bf16 %v1679_v43, %v1677_v10  ;;  %v1704_v0 = vsel %vm305_vm4, %v6997_v40, %v6939_v59 }
 0x736   :  { %1999 = vmatpush1.bf16.msra.mxu0 %v1614_v8  ;;  %v1727_v8 = vmul.f32 %v1721_v39, %v6232_v50  ;;  %v1725_v21 = vmul.f32 %v1720_v19, %v6232_v50  ;;  %v1724_v5 = vmul.f32 %v1704_v0, %v6229_v49  ;;  %v1772_v40 = vsel %vm335_vm6, %v6945_v3, %v7001_v54 }
 0x737   :  { %v1639_v26 = vpop.permute.xlu0 %1638  ;;  %v1637_v25 = vpop.permute.xlu1 %1636  ;;  %2000 = vmatprep.subr.bf16.mxu0 %v1665_v20 }
 0x738   :  { %v1643_v31 = vsel %vm256_vm3, %v1639_v26, %v1627_v13  ;;  %v1655_v55 = vsel %vm256_vm3, %v1627_v13, %v1639_v26  ;;  %v1642_v23 = vsel %vm256_vm3, %v1637_v25, %v1625_v1  ;;  %v1654_v53 = vsel %vm256_vm3, %v1625_v1, %v1637_v25 }
 0x739   :  { %v1662_v15 = vmul.f32 %v1655_v55, %v6220_v45  ;;  %v1663_v4 = vmul.f32 %v1643_v31, %v6224_v46  ;;  %v1660_v44 = vmul.f32 %v1654_v53, %v6220_v45  ;;  %v1661_v14 = vmul.f32 %v1642_v23, %v6224_v46 }
 0x73a   :  { %2001 = vmatpush1.bf16.msra.mxu0 %v1664_v30  ;;  %v1676_v13 = vmul.f32 %v6871_v38, %v6146_v17  ;;  %v1726_v1 = vmul.f32 %v1705_v60, %v6229_v49  ;;  %v1733_v30 = vpack.c.bf16 %v1727_v8, %v1725_v21 }
 0x73b   :  { %v1666_v56 = vpack.c.bf16 %v1662_v15, %v1660_v44  ;;  %v1667_v11 = vpack.c.bf16 %v1663_v4, %v1661_v14  ;;  %v1747_v52 = vpop.permute.xlu0 %1746  ;;  %v1697_v32 = vpop.permute.xlu1 %1696 }
 0x73c   :  { %v1682_v48 = vpack.c.bf16 %v1678_v9, %v1676_v13  ;;  %v1773_v26 = vsel %vm335_vm6, %v1747_v52, %v7009_v28  ;;  %v1706_v38 = vsel %vm305_vm4, %v1697_v32, %v7007_v7  ;;  %v1722_v59 = vsel %vm305_vm4, %v7007_v7, %v1697_v32 }
 0x73d   :  { %2002 = vmatprep.subr.bf16.mxu0 %v1667_v11  ;;  %v1732_v25 = vpack.c.bf16 %v1726_v1, %v1724_v5  ;;  %v1757_v55 = vsel %vm335_vm6, %v7009_v28, %v1747_v52  ;;  %v1779_v23 = vmul.f32 %v1773_v26, %v6255_v6  ;;  %v1728_v7 = vmul.f32 %v1706_v38, %v6229_v49 }
 0x73e   :  { %2003 = vmatpush1.bf16.msra.mxu0 %v1666_v56  ;;  %v1729_v4 = vmul.f32 %v1722_v59, %v6232_v50  ;;  %v1756_v56 = vsel %vm335_vm6, %v7001_v54, %v6945_v3  ;;  %v1777_v28 = vmul.f32 %v1772_v40, %v6255_v6  ;;  %v1778_v11 = vmul.f32 %v1757_v55, %v8702_v24 }
 0x73f   :  { %v1751_v2 = vpop.permute.xlu0 %1750  ;;  %v1749_v18 = vpop.permute.xlu1 %1748  ;;  %2004 = vmatprep.subr.bf16.mxu0 %v1681_v34  ;;  %v1776_v43 = vmul.f32 %v1756_v56, %v8702_v24 }
 0x740   :  { %v1758_v34 = vsel %vm335_vm6, %v1749_v18, %v1751_v2  ;;  %v1785_v12 = vpack.c.bf16 %v1779_v23, %v1777_v28  ;;  %v1774_v39 = vsel %vm335_vm6, %v1751_v2, %v1749_v18 }
 0x741   :  { %v1784_v3 = vpack.c.bf16 %v1778_v11, %v1776_v43  ;;  %v1780_v54 = vmul.f32 %v1758_v34, %v8702_v24  ;;  %v1781_v60 = vmul.f32 %v1774_v39, %v6255_v6  ;;  %v5491_v11 = vld [vmem:[#allocation8 + $0x30] ss:$12 sps:$4 sm:$0xff]  }
 0x742   :  { %2005 = vmatpush1.bf16.msra.mxu0 %v1680_v22 }
 0x743   :  { %v1795_v27 = vpop.permute.xlu0 %1794  ;;  %v1793_v20 = vpop.permute.xlu1 %1792  ;;  %2006 = vmatprep.subr.bf16.mxu0 %v1683_v33 }
 0x744   :  { %v1824_v22 = vsel %vm365_vm7, %v1795_v27, %v1793_v20  ;;  %v1808_v21 = vsel %vm365_vm7, %v1793_v20, %v1795_v27 }
 0x745   :  { %v1829_v1 = vmul.f32 %v1824_v22, %v8703_v37  ;;  %v1828_v40 = vmul.f32 %v1808_v21, %v8704_v29 }
 0x746   :  { %2007 = vmatpush1.bf16.msra.mxu0 %v1682_v48 }
 0x747   :  { %v1703_v61 = vpop.permute.xlu0 %1702  ;;  %v1701_v31 = vpop.permute.xlu1 %1700  ;;  %2008 = vmatprep.subr.bf16.mxu0 %v1733_v30 }
 0x748   :  { %v1707_v53 = vsel %vm305_vm4, %v1701_v31, %v1703_v61  ;;  %v1723_v15 = vsel %vm305_vm4, %v1703_v61, %v1701_v31 }
 0x749   :  { %v1730_v44 = vmul.f32 %v1707_v53, %v6229_v49  ;;  %v1731_v14 = vmul.f32 %v1723_v15, %v6232_v50 }
 0x74a   :  { %2009 = vmatpush1.bf16.msra.mxu0 %v1732_v25 }
 0x74b   :  { %v1734_v52 = vpack.c.bf16 %v1730_v44, %v1728_v7  ;;  %v1735_v32 = vpack.c.bf16 %v1731_v14, %v1729_v4  ;;  %v1799_v47 = vpop.permute.xlu0 %1798  ;;  %v1797_v58 = vpop.permute.xlu1 %1796 }
 0x74c   :  { %v1825_v10 = vsel %vm365_vm7, %v1799_v47, %v1797_v58  ;;  %v1809_v2 = vsel %vm365_vm7, %v1797_v58, %v1799_v47  ;;  %v5494_v47 = vld [vmem:[#allocation8 + $0x4c] ss:$12 sps:$4 sm:$0xff]  }
 0x74d   :  { %2010 = vmatprep.subr.bf16.mxu0 %v1735_v32  ;;  %v1831_v18 = vmul.f32 %v1825_v10, %v8703_v37  ;;  %v1830_v38 = vmul.f32 %v1809_v2, %v8704_v29 }
 0x74e   :  { %2011 = vmatpush1.bf16.msra.mxu0 %v1734_v52 }
 0x74f   :  { %v1755_v9 = vpop.permute.xlu0 %1754  ;;  %v1753_v19 = vpop.permute.xlu1 %1752  ;;  %2012 = vmatprep.subr.bf16.mxu0 %v1785_v12  ;;  %v1837_v59 = vpack.c.bf16 %v1831_v18, %v1829_v1  ;;  %v1836_v27 = vpack.c.bf16 %v1830_v38, %v1828_v40  ;;  %v7178_v1 = vld [vmem:[%s8581_s1 + $0x18] ss:$0 sm:$0xff]  ;;  %v5497_v40 = vld [vmem:[#allocation8 + $0x38] ss:$12 sps:$4 sm:$0xff]  }
 0x750   :  { %v1759_v8 = vsel %vm335_vm6, %v1753_v19, %v1755_v9  ;;  %v1775_v33 = vsel %vm335_vm6, %v1755_v9, %v1753_v19  ;;  %8717 = vst [vmem:[#allocation43_spill] sm:$0xff] %v7178_v1 }
 0x751   :  { %v1782_v13 = vmul.f32 %v1759_v8, %v8702_v24  ;;  %v1783_v0 = vmul.f32 %v1775_v33, %v6255_v6  ;;  %v5496_v8 = vld [vmem:[#allocation8 + $0x48] ss:$12 sps:$4 sm:$0xff]  }
 0x752   :  { %2013 = vmatpush1.bf16.msra.mxu0 %v1784_v3 }
 0x753   :  { %v1786_v48 = vpack.c.bf16 %v1782_v13, %v1780_v54  ;;  %v1787_v5 = vpack.c.bf16 %v1783_v0, %v1781_v60  ;;  %v1803_v30 = vpop.permute.xlu0 %1802  ;;  %v1801_v26 = vpop.permute.xlu1 %1800 }
 0x754   :  { %v1810_v25 = vsel %vm365_vm7, %v1801_v26, %v1803_v30  ;;  %v1826_v61 = vsel %vm365_vm7, %v1803_v30, %v1801_v26  ;;  %v8718_v26 = vmov 0  }
 0x755   :  { %2014 = vmatprep.subr.bf16.mxu0 %v1787_v5  ;;  %v1832_v53 = vmul.f32 %v1810_v25, %v8704_v29  ;;  %v1833_v15 = vmul.f32 %v1826_v61, %v8703_v37  ;;  %v5498_v25 = vld [vmem:[#allocation8 + $0x50] ss:$12 sps:$4 sm:$0xff]  }
 0x756   :  { %2015 = vmatpush1.bf16.msra.mxu0 %v1786_v48 }
 0x757   :  { %v1807_v31 = vpop.permute.xlu0 %1806  ;;  %v1805_v55 = vpop.permute.xlu1 %1804  ;;  %2016 = vmatprep.subr.bf16.mxu0 %v1837_v59 }
 0x758   :  { %v1811_v20 = vsel %vm365_vm7, %v1805_v55, %v1807_v31  ;;  %v1827_v23 = vsel %vm365_vm7, %v1807_v31, %v1805_v55 }
 0x759   :  { %v1834_v7 = vmul.f32 %v1811_v20, %v8704_v29  ;;  %v1835_v4 = vmul.f32 %v1827_v23, %v8703_v37 }
 0x75a   :  { %2017 = vmatpush1.bf16.msra.mxu0 %v1836_v27 }
 0x75b   :  { %v1838_v44 = vpack.c.bf16 %v1834_v7, %v1832_v53  ;;  %v1839_v14 = vpack.c.bf16 %v1835_v4, %v1833_v15  ;;  %v1847_v56 = vpop.permute.xlu0 %1846  ;;  %v1845_v28 = vpop.permute.xlu1 %1844 }
 0x75c   :  { %v1860_v52 = vsel %vm395_vm8, %v1845_v28, %v1847_v56  ;;  %v1876_v32 = vsel %vm395_vm8, %v1847_v56, %v1845_v28 }
 0x75d   :  { %2018 = vmatprep.subr.bf16.mxu0 %v1839_v14  ;;  %v1880_v39 = vmul.f32 %v6735_v62, %v1860_v52  ;;  %v1881_v10 = vmul.f32 %v6741_v63, %v1876_v32 }
 0x75e   :  { %2019 = vmatpush1.bf16.msra.mxu0 %v1838_v44 }
 0x75f   :  { %v1851_v58 = vpop.permute.xlu0 %1850  ;;  %v1849_v34 = vpop.permute.xlu1 %1848 }
 0x760   :  { %v1861_v43 = vsel %vm395_vm8, %v1849_v34, %v1851_v58  ;;  %v1877_v12 = vsel %vm395_vm8, %v1851_v58, %v1849_v34 }
 0x761   :  { %v1882_v3 = vmul.f32 %v6735_v62, %v1861_v43  ;;  %v1883_v54 = vmul.f32 %v6741_v63, %v1877_v12  ;;  %2021 = vmatmul.mubr.bf16.vlgmr.msra.gmra.mrb[8].mxu0 %v5491_v11  ;;  %v7172_v63 = vld [vmem:[%s8581_s1 + $0x10] ss:$0 sm:$0xff] }
 0x762   :  { %2030 = vmatprep.mubr.bf16.mxu0 %v5494_v47  ;;  %8716 = vst [vmem:[#allocation42_spill] sm:$0xff] %v7172_v63 }
 0x763   :  { %v1888_v9 = vpack.c.bf16 %v1882_v3, %v1880_v39  ;;  %v1889_v19 = vpack.c.bf16 %v1883_v54, %v1881_v10  ;;  %v1855_v60 = vpop.permute.xlu0 %1854  ;;  %v1853_v22 = vpop.permute.xlu1 %1852 }
 0x764   :  { %v1862_v33 = vsel %vm395_vm8, %v1853_v22, %v1855_v60  ;;  %v1878_v2 = vsel %vm395_vm8, %v1855_v60, %v1853_v22 }
 0x765   :  { %2041 = vmatprep.subr.bf16.mxu0 %v1889_v19  ;;  %v1884_v21 = vmul.f32 %v7172_v63, %v1862_v33  ;;  %v1885_v48 = vmul.f32 %v7178_v1, %v1878_v2  ;;  %v8719_v2 = vld [vmem:[#allocation30_spill] sm:$0xff] }
 0x766   :  { %2042 = vmatpush1.bf16.msra.mxu0 %v1888_v9 }
 0x767   :  { %v1859_v18 = vpop.permute.xlu0 %1858  ;;  %v1857_v13 = vpop.permute.xlu1 %1856 }
 0x768   :  { %v1863_v0 = vsel %vm395_vm8, %v1857_v13, %v1859_v18  ;;  %v1879_v62 = vsel %vm395_vm8, %v1859_v18, %v1857_v13  ;;  %v8720_v18 = vmov 2  }
 0x769   :  { %v1886_v5 = vmul.f32 %v7172_v63, %v1863_v0  ;;  %v1887_v30 = vmul.f32 %v7178_v1, %v1879_v62  ;;  %2031 = vmatmul.mubr.bf16.gmra.mrb[12].mxu0 %v5496_v8 }
 0x76a   :  { %2073 = vmatprep.mubr.bf16.mxu0 %v8718_v26 }
 0x76b   :  { %v1890_v38 = vpack.c.bf16 %v1886_v5, %v1884_v21  ;;  %v1891_v59 = vpack.c.bf16 %v1887_v30, %v1885_v48 }
 0x76d   :  { %2043 = vmatprep.subr.bf16.mxu0 %v1891_v59 }
 0x76e   :  { %2044 = vmatpush1.bf16.msra.mxu0 %v1890_v38 }
 0x771   :  { %5136 = vmatmul.mubr.msk.bf16.vlgmr.msra.gmra.mrb[8].mxu0 %vm1193_vm11, %v5497_v40 }
 0x772   :  { %2083 = vmatprep.mubr.bf16.mxu0 %v8718_v26 }
 0x778   :  { %v1935_v61 = vpop.permute.xlu1 %1934  ;;  %v1940_v55 = vpop.permute.xlu0 %1939 }
 0x779   :  { %5137 = vmatmul.mubr.msk.bf16.gmra.mrb[12].mxu0 %vm1193_vm11, %v5498_v25 }
 0x77c   :  { %v1945_v44 = vpop.permute.xlu1 %1944 }
 0x780   :  { %v1950_v43 = vpop.permute.xlu1 %1949 }
 0x844   :  { %v2075_v31 = vpop.f32.mrb[8].mxu0 }
 0x845   :  { %v5358_v27 = vadd.f32 %v2075_v31, %v1935_v61  ;;  %v2077_v20 = vpop.f32.mrb[9].mxu0 }
 0x846   :  { %v5359_v23 = vadd.f32 %v2077_v20, %v1935_v61  ;;  %v2079_v53 = vpop.f32.mrb[10].mxu0 }
 0x847   :  { %v2094_v15 = vmul.f32 %v5358_v27, %v6146_v17  ;;  %v5360_v7 = vadd.f32 %v2079_v53, %v1940_v55  ;;  %v2081_v4 = vpop.f32.mrb[11].mxu0 }
 0x848   :  { %v2095_v14 = vmul.f32 %v5359_v23, %v6142_v16  ;;  %v5361_v56 = vadd.f32 %v2081_v4, %v1940_v55 }
 0x849   :  { %v2096_v28 = vmul.f32 %v5360_v7, %v6146_v17 }
 0x84a   :  { %v2097_v11 = vmul.f32 %v5361_v56, %v6142_v16  ;;  %v2102_v52 = vadd.f32 %v2095_v14, %v2094_v15 }
 0x84c   :  { %v2085_v32 = vpop.f32.mrb[12].mxu0  ;;  %2103 = vadd.xlane.f32.xlu0 %v2102_v52  ;;  %v2105_v47 = vadd.f32 %v2097_v11, %v2096_v28 }
 0x84d   :  { %v5362_v58 = vadd.f32 %v2085_v32, %v1945_v44  ;;  %v2087_v34 = vpop.f32.mrb[13].mxu0 }
 0x84e   :  { %v5363_v12 = vadd.f32 %v2087_v34, %v1945_v44  ;;  %v2089_v39 = vpop.f32.mrb[14].mxu0  ;;  %2106 = vadd.xlane.f32.xlu1 %v2105_v47 }
 0x84f   :  { %v2098_v10 = vmul.f32 %v5362_v58, %v6146_v17  ;;  %v5364_v3 = vadd.f32 %v2089_v39, %v1950_v43  ;;  %v2091_v54 = vpop.f32.mrb[15].mxu0 }
 0x850   :  { %v2099_v9 = vmul.f32 %v5363_v12, %v6142_v16  ;;  %v5365_v19 = vadd.f32 %v2091_v54, %v1950_v43 }
 0x851   :  { %v2100_v60 = vmul.f32 %v5364_v3, %v6146_v17 }
 0x852   :  { %v2101_v22 = vmul.f32 %v5365_v19, %v6142_v16  ;;  %v2108_v8 = vadd.f32 %v2099_v9, %v2098_v10  ;;  %v8722_v9 = vmov 1  }
 0x854   :  { %2109 = vadd.xlane.f32.xlu0 %v2108_v8  ;;  %v2111_v33 = vadd.f32 %v2101_v22, %v2100_v60  ;;  %v8724_v60 = vld [vmem:[#allocation41_spill] sm:$0xff] }
 0x858   :  { %2112 = vadd.xlane.f32.xlu0 %v2111_v33 }
 0x85f   :  { %2175 = vperm.xlu1 %5458, %v8719_v2  }
 0x863   :  { %5460 = vset.pattern.permute.xlu1 %v8720_v18 }
 0x8d9   :  { %v2104_v13 = vpop.xlane.xlu0 %2103 }
 0x8da   :  { %v2114_v0 = vmul.f32 0.005, %v2104_v13 }
 0x8db   :  { %v2107_v62 = vpop.xlane.xlu1 %2106 }
 0x8dc   :  { %v2118_v21 = vsub.f32 %v5358_v27, %v2114_v0  ;;  %v2119_v48 = vsub.f32 %v5359_v23, %v2114_v0  ;;  %v2115_v5 = vmul.f32 0.005, %v2107_v62 }
 0x8de   :  { %v2126_v30 = vmul.f32 %v2118_v21, %v6146_v17  ;;  %v2127_v38 = vmul.f32 %v2119_v48, %v6142_v16  ;;  %v7199_v59 = vsub.f32 %v5360_v7, %v2115_v5  ;;  %v2121_v40 = vsub.f32 %v5361_v56, %v2115_v5 }
 0x8df   :  { %v2176_v22 = vpop.permute.xlu1 %2175 }
 0x8e0   :  { %v2128_v25 = vmul.f32 %v7199_v59, %v6146_v17  ;;  %v2129_v61 = vmul.f32 %v2121_v40, %v6142_v16  ;;  %v2134_v31 = vmul.f32 %v2126_v30, %v2126_v30  ;;  %v2135_v55 = vmul.f32 %v2127_v38, %v2127_v38 }
 0x8e1   :  { %v2110_v20 = vpop.xlane.xlu0 %2109 }
 0x8e2   :  { %v2116_v53 = vmul.f32 0.005, %v2110_v20  ;;  %v2142_v15 = vadd.f32 %v2135_v55, %v2134_v31  ;;  %v2136_v27 = vmul.f32 %v2128_v25, %v2128_v25  ;;  %v2137_v23 = vmul.f32 %v2129_v61, %v2129_v61 }
 0x8e4   :  { %v7204_v4 = vsub.f32 %v5362_v58, %v2116_v53  ;;  %v7206_v44 = vsub.f32 %v5363_v12, %v2116_v53  ;;  %2143 = vadd.xlane.f32.xlu1 %v2142_v15  ;;  %v2145_v7 = vadd.f32 %v2137_v23, %v2136_v27 }
 0x8e5   :  { %v2113_v14 = vpop.xlane.xlu0 %2112 }
 0x8e6   :  { %v2130_v56 = vmul.f32 %v7204_v4, %v6146_v17  ;;  %v2131_v28 = vmul.f32 %v7206_v44, %v6142_v16  ;;  %v2117_v11 = vmul.f32 0.005, %v2113_v14  ;;  %2146 = vadd.xlane.f32.xlu0 %v2145_v7  ;;  %v8725_v14 = vld [vmem:[#allocation34_spill] sm:$0xff] }
 0x8e8   :  { %v7212_v52 = vsub.f32 %v5364_v3, %v2117_v11  ;;  %v7214_v32 = vsub.f32 %v5365_v19, %v2117_v11  ;;  %v2138_v47 = vmul.f32 %v2130_v56, %v2130_v56  ;;  %v2139_v58 = vmul.f32 %v2131_v28, %v2131_v28  ;;  %v8721_v3 = vld [vmem:[#allocation32_spill] sm:$0xff]  ;;  %v8723_v19 = vld [vmem:[#allocation31_spill] sm:$0xff]  ;;  %v8726_v28 = vld [vmem:[#allocation33_spill] sm:$0xff] }
 0x8ea   :  { %v2132_v34 = vmul.f32 %v7212_v52, %v6146_v17  ;;  %v2133_v43 = vmul.f32 %v7214_v32, %v6142_v16  ;;  %v2148_v12 = vadd.f32 %v2139_v58, %v2138_v47 }
 0x8ec   :  { %2149 = vadd.xlane.f32.xlu1 %v2148_v12  ;;  %v2140_v39 = vmul.f32 %v2132_v34, %v2132_v34  ;;  %v2141_v10 = vmul.f32 %v2133_v43, %v2133_v43 }
 0x8ee   :  { %v2151_v54 = vadd.f32 %v2141_v10, %v2140_v39  ;;  %v8729_v39 = vld [vmem:[#allocation35_spill] sm:$0xff] }
 0x8f0   :  { %2152 = vadd.xlane.f32.xlu0 %v2151_v54  ;;  %v8730_v54 = vld [vmem:[#allocation36_spill] sm:$0xff] }
 0x8fd   :  { %2199 = vperm.xlu1 %5460, %v8719_v2  }
 0x901   :  { %2203 = vperm.xlu1 %5460, %v8721_v3  }
 0x905   :  { %5461 = vset.pattern.permute.xlu1 %v8722_v9 }
 0x906   :  { %2183 = vperm.xlu1 %5461, %v8723_v19   ;;  %2179 = vperm.xlu0 %5459, %v8721_v3  }
 0x90a   :  { %2187 = vperm.xlu1 %5461, %v8724_v60   ;;  %5463 = vset.pattern.permute.xlu0 %v8718_v26 }
 0x90e   :  { %5462 = vset.pattern.permute.xlu1 %v8720_v18 }
 0x90f   :  { %2207 = vperm.xlu1 %5462, %v8723_v19  }
 0x913   :  { %2211 = vperm.xlu1 %5462, %v8724_v60  }
 0x917   :  { %5464 = vset.pattern.permute.xlu1 %v8718_v26 }
 0x971   :  { %v2144_v8 = vpop.xlane.xlu1 %2143 }
 0x972   :  { %v2154_v33 = vmul.f32 0.005, %v2144_v8 }
 0x973   :  { %v2147_v2 = vpop.xlane.xlu0 %2146 }
 0x974   :  { %v2158_v13 = vadd.f32 1e-05, %v2154_v33  ;;  %v2155_v0 = vmul.f32 0.005, %v2147_v2 }
 0x976   :  { %5659 = vrsqrt.f32 %v2158_v13  ;;  %v2159_v62 = vadd.f32 1e-05, %v2155_v0 }
 0x978   :  { %5661 = vrsqrt.f32 %v2159_v62 }
 0x979   :  { %v2150_v5 = vpop.xlane.xlu1 %2149 }
 0x97d   :  { %v2153_v31 = vpop.xlane.xlu0 %2152  ;;  %v2200_v53 = vpop.permute.xlu1 %2199 }
 0x97e   :  { %v2157_v8 = vmul.f32 0.005, %v2153_v31 }
 0x980   :  { %v5660_v30 = vpop.eup %5659  ;;  %v2161_v33 = vadd.f32 1e-05, %v2157_v8 }
 0x981   :  { %v2166_v38 = vmul.f32 %v5660_v30, %v2118_v21  ;;  %v2167_v25 = vmul.f32 %v5660_v30, %v2119_v48  ;;  %v2204_v34 = vpop.permute.xlu1 %2203 }
 0x982   :  { %v5662_v61 = vpop.eup %5661 }
 0x983   :  { %v2190_v55 = vmul.f32 %v2176_v22, %v2166_v38  ;;  %v2191_v20 = vmul.f32 %v2176_v22, %v2167_v25  ;;  %v2169_v23 = vmul.f32 %v5662_v61, %v2121_v40  ;;  %v2168_v21 = vmul.f32 %v5662_v61, %v7199_v59 }
 0x984   :  { %v2156_v59 = vmul.f32 0.005, %v2150_v5 }
 0x985   :  { %v2214_v15 = vadd.f32 %v2200_v53, %v2190_v55  ;;  %v2215_v27 = vadd.f32 %v2200_v53, %v2191_v20  ;;  %v2180_v7 = vpop.permute.xlu0 %2179  ;;  %v2184_v2 = vpop.permute.xlu1 %2183  ;;  %v8733_v20 = vld [vmem:[#allocation37_spill] sm:$0xff] }
 0x986   :  { %v2193_v48 = vmul.f32 %v2180_v7, %v2169_v23  ;;  %v2192_v40 = vmul.f32 %v2180_v7, %v2168_v21  ;;  %v2160_v60 = vadd.f32 1e-05, %v2156_v59  ;;  %v8734_v23 = vld [vmem:[#allocation38_spill] sm:$0xff] }
 0x987   :  { %v2222_v56 = vadd.f32 %v2214_v15, %v8725_v14  ;;  %v2223_v11 = vadd.f32 %v2215_v27, %v8726_v28  ;;  %v8736_v28 = vld [vmem:[#allocation39_spill] sm:$0xff] }
 0x988   :  { %v2217_v43 = vadd.f32 %v2204_v34, %v2193_v48  ;;  %v2216_v12 = vadd.f32 %v2204_v34, %v2192_v40  ;;  %5663 = vrsqrt.f32 %v2160_v60  ;;  %v8738_v48 = vld [vmem:[#allocation40_spill] sm:$0xff] }
 0x989   :  { %v7233_v47 = vmax.f32 %v2222_v56, 0.0  ;;  %v7235_v58 = vmax.f32 %v2223_v11, 0.0  ;;  %5665 = vrsqrt.f32 %v2161_v33  ;;  %v2188_v0 = vpop.permute.xlu1 %2187 }
 0x98a   :  { %v2225_v10 = vadd.f32 %v2217_v43, %v8729_v39  ;;  %v2224_v3 = vadd.f32 %v2216_v12, %v8730_v54  ;;  %v5501_v12 = vld [vmem:[#allocation8 + $0x64] ss:$12 sps:$4 sm:$0xff]  }
 0x98b   :  { %8727 = vst [vmem:[#allocation44_spill] sm:$0xff] %v7233_v47  ;;  %8728 = vst [vmem:[#allocation30_spill] sm:$0xff] %v7235_v58  ;;  %2256 = vrot.lane.b32.xlu1 %v7235_v58, %s5909_s10  ;;  %2272 = vrot.lane.b32.xlu0 %v7233_v47, %s5909_s10 }
 0x98c   :  { %v7252_v19 = vmax.f32 %v2225_v10, 0.0  ;;  %v7258_v22 = vmax.f32 %v2224_v3, 0.0  ;;  %2816 = vmatprep.mubr.bf16.mxu1 %v5501_v12 }
 0x98e   :  { %8731 = vst [vmem:[#allocation32_spill] sm:$0xff] %v7252_v19  ;;  %8732 = vst [vmem:[#allocation31_spill] sm:$0xff] %v7258_v22  ;;  %v2208_v5 = vpop.permute.xlu1 %2207 }
 0x98f   :  { %2486 = vrot.lane.b32.xlu1 %v7235_v58, %s5908_s16  ;;  %2312 = vrot.lane.b32.xlu0 %v7235_v58, %s5906_s26 }
 0x992   :  { %v5664_v13 = vpop.eup %5663  ;;  %v2212_v15 = vpop.permute.xlu1 %2211 }
 0x993   :  { %2538 = vrot.lane.b32.xlu1 %v7235_v58, %s5910_s21  ;;  %2324 = vrot.lane.b32.xlu0 %v7233_v47, %s5906_s26  ;;  %v2171_v62 = vmul.f32 %v5664_v13, %v7206_v44  ;;  %v5666_v30 = vpop.eup %5665  ;;  %v2170_v38 = vmul.f32 %v5664_v13, %v7204_v4 }
 0x994   :  { %v2173_v31 = vmul.f32 %v5666_v30, %v7214_v32  ;;  %v2172_v4 = vmul.f32 %v5666_v30, %v7212_v52 }
 0x995   :  { %v2195_v25 = vmul.f32 %v2184_v2, %v2171_v62  ;;  %v2194_v44 = vmul.f32 %v2184_v2, %v2170_v38 }
 0x996   :  { %v2197_v27 = vmul.f32 %v2188_v0, %v2173_v31  ;;  %v2196_v56 = vmul.f32 %v2188_v0, %v2172_v4  ;;  %v7421_v4 = vld [vmem:[%s8584_s4 + $0x70] sm:$0xff] }
 0x997   :  { %2258 = vrot.lane.b32.xlu1 %v7252_v19, %s5909_s10  ;;  %2364 = vrot.lane.b32.xlu0 %v7235_v58, %s5905_s2  ;;  %v2219_v61 = vadd.f32 %v2208_v5, %v2195_v25  ;;  %v2218_v55 = vadd.f32 %v2208_v5, %v2194_v44  ;;  %v7409_v44 = vld [vmem:[%s8584_s4 + $0x68] sm:$0xff]  ;;  %8743 = vst [vmem:[#allocation38_spill] sm:$0xff] %v7421_v4 }
 0x998   :  { %v2221_v32 = vadd.f32 %v2212_v15, %v2197_v27  ;;  %v2220_v52 = vadd.f32 %v2212_v15, %v2196_v56  ;;  %8741 = vst [vmem:[#allocation36_spill] sm:$0xff] %v7409_v44 }
 0x999   :  { %v2227_v53 = vadd.f32 %v2219_v61, %v8733_v20  ;;  %v2226_v7 = vadd.f32 %v2218_v55, %v8734_v23  ;;  %v7414_v55 = vld [vmem:[%s8584_s4 + $0x60] sm:$0xff] }
 0x99a   :  { %v2229_v11 = vadd.f32 %v2221_v32, %v8736_v28  ;;  %v2228_v34 = vadd.f32 %v2220_v52, %v8738_v48  ;;  %8742 = vst [vmem:[#allocation37_spill] sm:$0xff] %v7414_v55  ;;  %v7428_v32 = vld [vmem:[%s8584_s4 + $0x78] sm:$0xff] }
 0x99b   :  { %2274 = vrot.lane.b32.xlu1 %v7258_v22, %s5909_s10  ;;  %2376 = vrot.lane.b32.xlu0 %v7233_v47, %s5905_s2  ;;  %v7294_v14 = vmax.f32 %v2227_v53, 0.0  ;;  %v7301_v21 = vmax.f32 %v2226_v7, 0.0  ;;  %8744 = vst [vmem:[#allocation39_spill] sm:$0xff] %v7428_v32 }
 0x99c   :  { %v7308_v40 = vmax.f32 %v2229_v11, 0.0  ;;  %v7314_v43 = vmax.f32 %v2228_v34, 0.0 }
 0x99d   :  { %8735 = vst [vmem:[#allocation41_spill] sm:$0xff] %v7294_v14  ;;  %8737 = vst [vmem:[#allocation34_spill] sm:$0xff] %v7301_v21 }
 0x99e   :  { %8739 = vst [vmem:[#allocation33_spill] sm:$0xff] %v7308_v40  ;;  %8740 = vst [vmem:[#allocation35_spill] sm:$0xff] %v7314_v43 }
 0x99f   :  { %2314 = vrot.lane.b32.xlu1 %v7252_v19, %s5906_s26  ;;  %2416 = vrot.lane.b32.xlu0 %v7235_v58, %s5907_s30 }
 0x9a3   :  { %2326 = vrot.lane.b32.xlu1 %v7258_v22, %s5906_s26  ;;  %2428 = vrot.lane.b32.xlu0 %v7233_v47, %s5907_s30 }
 0x9a7   :  { %2366 = vrot.lane.b32.xlu1 %v7252_v19, %s5905_s2  ;;  %2484 = vrot.lane.b32.xlu0 %v7233_v47, %s5908_s16 }
 0x9ab   :  { %2378 = vrot.lane.b32.xlu1 %v7258_v22, %s5905_s2  ;;  %2536 = vrot.lane.b32.xlu0 %v7233_v47, %s5910_s21 }
 0x9af   :  { %2418 = vrot.lane.b32.xlu1 %v7252_v19, %s5907_s30  ;;  %2488 = vrot.lane.b32.xlu0 %v7258_v22, %s5908_s16 }
 0x9b3   :  { %2430 = vrot.lane.b32.xlu1 %v7258_v22, %s5907_s30  ;;  %2540 = vrot.lane.b32.xlu0 %v7258_v22, %s5910_s21 }
 0x9b7   :  { %2490 = vrot.lane.b32.xlu1 %v7252_v19, %s5908_s16  ;;  %2260 = vrot.lane.b32.xlu0 %v7294_v14, %s5909_s10 }
 0x9bb   :  { %2494 = vrot.lane.b32.xlu1 %v7294_v14, %s5908_s16  ;;  %2276 = vrot.lane.b32.xlu0 %v7301_v21, %s5909_s10 }
 0x9bf   :  { %2262 = vrot.lane.b32.xlu1 %v7308_v40, %s5909_s10  ;;  %2316 = vrot.lane.b32.xlu0 %v7294_v14, %s5906_s26 }
 0x9c3   :  { %2278 = vrot.lane.b32.xlu1 %v7314_v43, %s5909_s10  ;;  %2328 = vrot.lane.b32.xlu0 %v7301_v21, %s5906_s26 }
 0x9c7   :  { %2318 = vrot.lane.b32.xlu1 %v7308_v40, %s5906_s26  ;;  %2368 = vrot.lane.b32.xlu0 %v7294_v14, %s5905_s2 }
 0x9cb   :  { %2330 = vrot.lane.b32.xlu1 %v7314_v43, %s5906_s26  ;;  %2380 = vrot.lane.b32.xlu0 %v7301_v21, %s5905_s2 }
 0x9cf   :  { %2370 = vrot.lane.b32.xlu1 %v7308_v40, %s5905_s2  ;;  %2420 = vrot.lane.b32.xlu0 %v7294_v14, %s5907_s30 }
 0x9d3   :  { %2382 = vrot.lane.b32.xlu1 %v7314_v43, %s5905_s2  ;;  %2432 = vrot.lane.b32.xlu0 %v7301_v21, %s5907_s30 }
 0x9d7   :  { %2422 = vrot.lane.b32.xlu1 %v7308_v40, %s5907_s30  ;;  %2492 = vrot.lane.b32.xlu0 %v7301_v21, %s5908_s16 }
 0x9db   :  { %2434 = vrot.lane.b32.xlu1 %v7314_v43, %s5907_s30  ;;  %2544 = vrot.lane.b32.xlu0 %v7301_v21, %s5910_s21 }
 0x9df   :  { %2542 = vrot.lane.b32.xlu1 %v7252_v19, %s5910_s21  ;;  %2588 = vrot.lane.b32.xlu0 %v7233_v47, %s5911_s17 }
 0x9e3   :  { %2546 = vrot.lane.b32.xlu1 %v7294_v14, %s5910_s21  ;;  %2496 = vrot.lane.b32.xlu0 %v7314_v43, %s5908_s16 }
 0x9e7   :  { %2590 = vrot.lane.b32.xlu1 %v7235_v58, %s5911_s17  ;;  %2592 = vrot.lane.b32.xlu0 %v7258_v22, %s5911_s17 }
 0x9eb   :  { %2498 = vrot.lane.b32.xlu1 %v7308_v40, %s5908_s16  ;;  %2548 = vrot.lane.b32.xlu0 %v7314_v43, %s5910_s21 }
 0x9ef   :  { %2594 = vrot.lane.b32.xlu1 %v7252_v19, %s5911_s17  ;;  %2596 = vrot.lane.b32.xlu0 %v7301_v21, %s5911_s17 }
 0x9f3   :  { %2550 = vrot.lane.b32.xlu1 %v7308_v40, %s5910_s21  ;;  %2600 = vrot.lane.b32.xlu0 %v7314_v43, %s5911_s17 }
 0x9f7   :  { %2598 = vrot.lane.b32.xlu1 %v7294_v14, %s5911_s17  ;;  %2640 = vrot.lane.b32.xlu0 %v7233_v47, %s5912_s20 }
 0x9fb   :  { %2602 = vrot.lane.b32.xlu1 %v7308_v40, %s5911_s17  ;;  %2644 = vrot.lane.b32.xlu0 %v7258_v22, %s5912_s20 }
 0x9fd   :  { %v2273_v39 = vpop.permute.xlu0 %2272  ;;  %v2257_v10 = vpop.permute.xlu1 %2256 }
 0x9fe   :  { %v2280_v2 = vsel %vm172_vm5, %v2273_v39, %v2257_v10  ;;  %v2292_v13 = vsel %vm172_vm5, %v2257_v10, %v2273_v39 }
 0x9ff   :  { %2642 = vrot.lane.b32.xlu1 %v7235_v58, %s5912_s20  ;;  %2648 = vrot.lane.b32.xlu0 %v7301_v21, %s5912_s20  ;;  %v2296_v38 = vmul.f32 %v2292_v13, %v6236_v51  ;;  %v2297_v25 = vmul.f32 %v2280_v2, %v6241_v57 }
 0xa01   :  { %v7380_v59 = vpop.permute.xlu1 %2486  ;;  %v7382_v54 = vpop.permute.xlu0 %2312 }
 0xa03   :  { %2646 = vrot.lane.b32.xlu1 %v7252_v19, %s5912_s20  ;;  %2652 = vrot.lane.b32.xlu0 %v7314_v43, %s5912_s20 }
 0xa05   :  { %v7388_v3 = vpop.permute.xlu1 %2538  ;;  %v2325_v60 = vpop.permute.xlu0 %2324 }
 0xa07   :  { %2650 = vrot.lane.b32.xlu1 %v7294_v14, %s5912_s20  ;;  %2730 = vperm.xlu0 %5463, %v7414_v55  }
 0xa09   :  { %v2259_v8 = vpop.permute.xlu1 %2258  ;;  %v7392_v33 = vpop.permute.xlu0 %2364 }
 0xa0b   :  { %2654 = vrot.lane.b32.xlu1 %v7308_v40, %s5912_s20  ;;  %2745 = vperm.xlu0 %5463, %v7428_v32  }
 0xa0d   :  { %v2275_v0 = vpop.permute.xlu1 %2274  ;;  %v7398_v62 = vpop.permute.xlu0 %2376 }
 0xa0e   :  { %v2281_v5 = vsel %vm172_vm5, %v2275_v0, %v2259_v8  ;;  %v2293_v30 = vsel %vm172_vm5, %v2259_v8, %v2275_v0 }
 0xa0f   :  { %v2298_v61 = vmul.f32 %v2293_v30, %v6236_v51  ;;  %v2299_v31 = vmul.f32 %v2281_v5, %v6241_v57  ;;  %2735 = vperm.xlu1 %5464, %v7409_v44   ;;  %5465 = vset.pattern.permute.xlu0 %v8722_v9 }
 0xa11   :  { %v2304_v20 = vpack.c.bf16 %v2298_v61, %v2296_v38  ;;  %v2305_v53 = vpack.c.bf16 %v2299_v31, %v2297_v25  ;;  %v2315_v15 = vpop.permute.xlu1 %2314  ;;  %v7423_v27 = vpop.permute.xlu0 %2416  ;;  %v2332_v61 = vsel %vm196_vm1, %v2325_v60, %v7382_v54 }
 0xa13   :  { %2784 = vmatprep.subr.bf16.mxu1 %v2305_v53  ;;  %2740 = vperm.xlu1 %5464, %v7421_v4  }
 0xa14   :  { %2785 = vmatpush1.bf16.msra.mxu1 %v2304_v20 }
 0xa15   :  { %v2327_v23 = vpop.permute.xlu1 %2326  ;;  %v7432_v7 = vpop.permute.xlu0 %2428 }
 0xa16   :  { %v2333_v30 = vsel %vm196_vm1, %v2327_v23, %v2315_v15  ;;  %v2345_v20 = vsel %vm196_vm1, %v2315_v15, %v2327_v23  ;;  %v2349_v15 = vmul.f32 %v2332_v61, %v6202_v36 }
 0xa17   :  { %5466 = vset.pattern.permute.xlu1 %v8722_v9  ;;  %v2351_v53 = vmul.f32 %v2333_v30, %v6202_v36  ;;  %v2350_v23 = vmul.f32 %v2345_v20, %v6198_v35 }
 0xa19   :  { %v2367_v56 = vpop.permute.xlu1 %2366  ;;  %v7436_v52 = vpop.permute.xlu0 %2484 }
 0xa1d   :  { %v2379_v28 = vpop.permute.xlu1 %2378  ;;  %v7438_v11 = vpop.permute.xlu0 %2536 }
 0xa21   :  { %v7440_v48 = vpop.permute.xlu1 %2418  ;;  %v7442_v34 = vpop.permute.xlu0 %2488 }
 0xa25   :  { %v7444_v12 = vpop.permute.xlu1 %2430  ;;  %v7446_v39 = vpop.permute.xlu0 %2540 }
 0xa29   :  { %v7448_v10 = vpop.permute.xlu1 %2490  ;;  %v2261_v8 = vpop.permute.xlu0 %2260 }
 0xa2d   :  { %v7450_v2 = vpop.permute.xlu1 %2494  ;;  %v2277_v13 = vpop.permute.xlu0 %2276 }
 0xa2e   :  { %v2282_v38 = vsel %vm172_vm5, %v2277_v13, %v2261_v8  ;;  %v2294_v25 = vsel %vm172_vm5, %v2261_v8, %v2277_v13  ;;  %v2344_v13 = vsel %vm196_vm1, %v7382_v54, %v2325_v60  ;;  %v2384_v54 = vsel %vm226_vm2, %v7398_v62, %v7392_v33 }
 0xa2f   :  { %v2300_v55 = vmul.f32 %v2294_v25, %v6236_v51  ;;  %v2301_v18 = vmul.f32 %v2282_v38, %v6241_v57  ;;  %v2357_v25 = vpack.c.bf16 %v2351_v53, %v2349_v15  ;;  %v2385_v38 = vsel %vm226_vm2, %v2379_v28, %v2367_v56 }
 0xa31   :  { %v2263_v0 = vpop.permute.xlu1 %2262  ;;  %v2317_v5 = vpop.permute.xlu0 %2316 }
 0xa35   :  { %v2279_v31 = vpop.permute.xlu1 %2278  ;;  %v2329_v32 = vpop.permute.xlu0 %2328 }
 0xa36   :  { %v2283_v4 = vsel %vm172_vm5, %v2279_v31, %v2263_v0  ;;  %v2295_v9 = vsel %vm172_vm5, %v2263_v0, %v2279_v31  ;;  %v2348_v0 = vmul.f32 %v2344_v13, %v6198_v35 }
 0xa37   :  { %v2302_v44 = vmul.f32 %v2295_v9, %v6236_v51  ;;  %v2303_v8 = vmul.f32 %v2283_v4, %v6241_v57  ;;  %v2334_v9 = vsel %vm196_vm1, %v2329_v32, %v2317_v5  ;;  %v2346_v4 = vsel %vm196_vm1, %v2317_v5, %v2329_v32 }
 0xa38   :  { %v2356_v60 = vpack.c.bf16 %v2350_v23, %v2348_v0  ;;  %v2352_v20 = vmul.f32 %v2346_v4, %v6198_v35  ;;  %v2353_v32 = vmul.f32 %v2334_v9, %v6202_v36 }
 0xa39   :  { %v2306_v30 = vpack.c.bf16 %v2302_v44, %v2300_v55  ;;  %v2307_v26 = vpack.c.bf16 %v2303_v8, %v2301_v18  ;;  %v2319_v1 = vpop.permute.xlu1 %2318  ;;  %v2369_v63 = vpop.permute.xlu0 %2368  ;;  %v2397_v18 = vsel %vm226_vm2, %v2367_v56, %v2379_v28  ;;  %v2403_v55 = vmul.f32 %v2385_v38, %v6214_v42 }
 0xa3a   :  { %v2396_v8 = vsel %vm226_vm2, %v7392_v33, %v7398_v62  ;;  %v2401_v56 = vmul.f32 %v2384_v54, %v6214_v42  ;;  %v2402_v28 = vmul.f32 %v2397_v18, %v6210_v41  ;;  %v2436_v62 = vsel %vm256_vm3, %v7432_v7, %v7423_v27 }
 0xa3b   :  { %2786 = vmatprep.subr.bf16.mxu1 %v2307_v26  ;;  %v2449_v54 = vsel %vm256_vm3, %v7440_v48, %v7444_v12 }
 0xa3c   :  { %2787 = vmatpush1.bf16.msra.mxu1 %v2306_v30  ;;  %v2400_v30 = vmul.f32 %v2396_v8, %v6210_v41  ;;  %v2409_v0 = vpack.c.bf16 %v2403_v55, %v2401_v56 }
 0xa3d   :  { %v2331_v44 = vpop.permute.xlu1 %2330  ;;  %2788 = vmatprep.subr.bf16.mxu1 %v2357_v25  ;;  %v2381_v61 = vpop.permute.xlu0 %2380  ;;  %v2437_v25 = vsel %vm256_vm3, %v7444_v12, %v7440_v48  ;;  %v2448_v48 = vsel %vm256_vm3, %v7423_v27, %v7432_v7  ;;  %v2453_v12 = vmul.f32 %v2436_v62, %v6224_v46 }
 0xa3e   :  { %v2335_v31 = vsel %vm196_vm1, %v2331_v44, %v2319_v1  ;;  %v2347_v26 = vsel %vm196_vm1, %v2319_v1, %v2331_v44  ;;  %v2386_v38 = vsel %vm226_vm2, %v2381_v61, %v2369_v63  ;;  %v2398_v33 = vsel %vm226_vm2, %v2369_v63, %v2381_v61 }
 0xa3f   :  { %v2354_v5 = vmul.f32 %v2347_v26, %v6198_v35  ;;  %v2355_v53 = vmul.f32 %v2335_v31, %v6202_v36  ;;  %v2408_v9 = vpack.c.bf16 %v2402_v28, %v2400_v30  ;;  %v2404_v63 = vmul.f32 %v2398_v33, %v6210_v41 }
 0xa40   :  { %2789 = vmatpush1.bf16.msra.mxu1 %v2356_v60  ;;  %v2455_v60 = vmul.f32 %v2437_v25, %v6224_v46  ;;  %v2405_v61 = vmul.f32 %v2386_v38, %v6214_v42  ;;  %v2452_v28 = vmul.f32 %v2448_v48, %v6220_v45  ;;  %v2471_v25 = vmul.f32 %v7252_v19, %v6142_v16 }
 0xa41   :  { %v2358_v13 = vpack.c.bf16 %v2354_v5, %v2352_v20  ;;  %v2359_v15 = vpack.c.bf16 %v2355_v53, %v2353_v32  ;;  %v2371_v1 = vpop.permute.xlu1 %2370  ;;  %v2421_v23 = vpop.permute.xlu0 %2420  ;;  %v2454_v53 = vmul.f32 %v2449_v54, %v6220_v45  ;;  %v2473_v48 = vmul.f32 %v7294_v14, %v6142_v16 }
 0xa42   :  { %v2461_v56 = vpack.c.bf16 %v2455_v60, %v2453_v12  ;;  %v2469_v60 = vmul.f32 %v7235_v58, %v6142_v16  ;;  %v2516_v12 = vsel %vm305_vm4, %v7380_v59, %v7436_v52 }
 0xa43   :  { %2790 = vmatprep.subr.bf16.mxu1 %v2359_v15  ;;  %v2460_v27 = vpack.c.bf16 %v2454_v53, %v2452_v28  ;;  %v2474_v53 = vmul.f32 %v7314_v43, %v6146_v17 }
 0xa44   :  { %2791 = vmatpush1.bf16.msra.mxu1 %v2358_v13 }
 0xa45   :  { %v2383_v4 = vpop.permute.xlu1 %2382  ;;  %2792 = vmatprep.subr.bf16.mxu1 %v2409_v0  ;;  %v2433_v44 = vpop.permute.xlu0 %2432 }
 0xa46   :  { %v2387_v18 = vsel %vm226_vm2, %v2383_v4, %v2371_v1  ;;  %v2399_v55 = vsel %vm226_vm2, %v2371_v1, %v2383_v4  ;;  %v2438_v13 = vsel %vm256_vm3, %v2433_v44, %v2421_v23  ;;  %v2450_v15 = vsel %vm256_vm3, %v2421_v23, %v2433_v44 }
 0xa47   :  { %v2406_v31 = vmul.f32 %v2399_v55, %v6210_v41  ;;  %v2407_v26 = vmul.f32 %v2387_v18, %v6214_v42  ;;  %v2456_v38 = vmul.f32 %v2450_v15, %v6220_v45  ;;  %v2457_v33 = vmul.f32 %v2438_v13, %v6224_v46 }
 0xa48   :  { %2793 = vmatpush1.bf16.msra.mxu1 %v2408_v9  ;;  %v2470_v18 = vmul.f32 %v7258_v22, %v6146_v17  ;;  %v2477_v55 = vpack.c.bf16 %v2471_v25, %v2469_v60  ;;  %v2500_v13 = vsel %vm305_vm4, %v7436_v52, %v7380_v59  ;;  %v2472_v15 = vmul.f32 %v7301_v21, %v6146_v17 }
 0xa49   :  { %v2410_v20 = vpack.c.bf16 %v2406_v31, %v2404_v63  ;;  %v2411_v32 = vpack.c.bf16 %v2407_v26, %v2405_v61  ;;  %v2423_v5 = vpop.permute.xlu1 %2422  ;;  %v2493_v8 = vpop.permute.xlu0 %2492  ;;  %v2475_v63 = vmul.f32 %v7308_v40, %v6142_v16  ;;  %v2517_v61 = vsel %vm305_vm4, %v7448_v10, %v7442_v34 }
 0xa4a   :  { %v2468_v31 = vmul.f32 %v7233_v47, %v6146_v17  ;;  %v2518_v59 = vsel %vm305_vm4, %v7450_v2, %v2493_v8 }
 0xa4b   :  { %2794 = vmatprep.subr.bf16.mxu1 %v2411_v32  ;;  %v2479_v28 = vpack.c.bf16 %v2475_v63, %v2473_v48 }
 0xa4c   :  { %2795 = vmatpush1.bf16.msra.mxu1 %v2410_v20  ;;  %v2501_v20 = vsel %vm305_vm4, %v7442_v34, %v7448_v10 }
 0xa4d   :  { %v2435_v1 = vpop.permute.xlu1 %2434  ;;  %2796 = vmatprep.subr.bf16.mxu1 %v2461_v56  ;;  %v7516_v7 = vpop.permute.xlu0 %2544  ;;  %v2523_v56 = vmul.f32 %v2517_v61, %v6232_v50  ;;  %v2522_v34 = vmul.f32 %v2501_v20, %v6229_v49 }
 0xa4e   :  { %v2439_v30 = vsel %vm256_vm3, %v2435_v1, %v2423_v5  ;;  %v2451_v0 = vsel %vm256_vm3, %v2423_v5, %v2435_v1  ;;  %v2476_v5 = vpack.c.bf16 %v2470_v18, %v2468_v31  ;;  %v2521_v1 = vmul.f32 %v2516_v12, %v6232_v50 }
 0xa4f   :  { %v2458_v62 = vmul.f32 %v2451_v0, %v6220_v45  ;;  %v2459_v23 = vmul.f32 %v2439_v30, %v6224_v46  ;;  %v2478_v30 = vpack.c.bf16 %v2474_v53, %v2472_v15  ;;  %v2520_v0 = vmul.f32 %v2500_v13, %v6229_v49 }
 0xa50   :  { %2797 = vmatpush1.bf16.msra.mxu1 %v2460_v27  ;;  %v2529_v25 = vpack.c.bf16 %v2523_v56, %v2521_v1  ;;  %v2552_v31 = vsel %vm335_vm6, %v7438_v11, %v7388_v3 }
 0xa51   :  { %v2462_v9 = vpack.c.bf16 %v2458_v62, %v2456_v38  ;;  %v2463_v4 = vpack.c.bf16 %v2459_v23, %v2457_v33  ;;  %v2543_v54 = vpop.permute.xlu1 %2542  ;;  %v7528_v44 = vpop.permute.xlu0 %2588  ;;  %v2502_v38 = vsel %vm305_vm4, %v2493_v8, %v7450_v2  ;;  %v2568_v33 = vsel %vm335_vm6, %v7388_v3, %v7438_v11 }
 0xa52   :  { %v2569_v52 = vsel %vm335_vm6, %v2543_v54, %v7446_v39  ;;  %v2528_v62 = vpack.c.bf16 %v2522_v34, %v2520_v0  ;;  %v2525_v8 = vmul.f32 %v2518_v59, %v6232_v50  ;;  %v2572_v53 = vmul.f32 %v2552_v31, %v8702_v24 }
 0xa53   :  { %2798 = vmatprep.subr.bf16.mxu1 %v2463_v4  ;;  %v2553_v4 = vsel %vm335_vm6, %v7446_v39, %v2543_v54  ;;  %v2573_v39 = vmul.f32 %v2568_v33, %v6255_v6 }
 0xa54   :  { %2799 = vmatpush1.bf16.msra.mxu1 %v2462_v9  ;;  %v2524_v9 = vmul.f32 %v2502_v38, %v6229_v49  ;;  %v2574_v54 = vmul.f32 %v2553_v4, %v8702_v24 }
 0xa55   :  { %v2547_v26 = vpop.permute.xlu1 %2546  ;;  %2800 = vmatprep.subr.bf16.mxu1 %v2477_v55  ;;  %v2497_v32 = vpop.permute.xlu0 %2496  ;;  %v2575_v55 = vmul.f32 %v2569_v52, %v6255_v6 }
 0xa56   :  { %v2580_v11 = vpack.c.bf16 %v2574_v54, %v2572_v53 }
 0xa57   :  { %v2581_v56 = vpack.c.bf16 %v2575_v55, %v2573_v39 }
 0xa58   :  { %2801 = vmatpush1.bf16.msra.mxu1 %v2476_v5 }
 0xa59   :  { %v2591_v10 = vpop.permute.xlu1 %2590  ;;  %2802 = vmatprep.subr.bf16.mxu1 %v2479_v28  ;;  %v2593_v27 = vpop.permute.xlu0 %2592  ;;  %v2570_v28 = vsel %vm335_vm6, %v2547_v26, %v7516_v7 }
 0xa5a   :  { %v2577_v1 = vmul.f32 %v2570_v28, %v6255_v6  ;;  %v2620_v34 = vsel %vm365_vm7, %v2591_v10, %v7528_v44  ;;  %v2604_v52 = vsel %vm365_vm7, %v7528_v44, %v2591_v10  ;;  %v5502_v28 = vld [vmem:[#allocation8 + $0x7c] ss:$12 sps:$4 sm:$0xff]  }
 0xa5b   :  { %v2625_v33 = vmul.f32 %v2620_v34, %v8703_v37 }
 0xa5c   :  { %2803 = vmatpush1.bf16.msra.mxu1 %v2478_v30 }
 0xa5d   :  { %v2499_v23 = vpop.permute.xlu1 %2498  ;;  %2804 = vmatprep.subr.bf16.mxu1 %v2529_v25  ;;  %v2549_v60 = vpop.permute.xlu0 %2548 }
 0xa5e   :  { %v2503_v18 = vsel %vm305_vm4, %v2497_v32, %v2499_v23  ;;  %v2519_v2 = vsel %vm305_vm4, %v2499_v23, %v2497_v32  ;;  %v2554_v32 = vsel %vm335_vm6, %v7516_v7, %v2547_v26 }
 0xa5f   :  { %v2526_v63 = vmul.f32 %v2503_v18, %v6229_v49  ;;  %v2527_v61 = vmul.f32 %v2519_v2, %v6232_v50  ;;  %v2576_v13 = vmul.f32 %v2554_v32, %v8702_v24 }
 0xa60   :  { %2805 = vmatpush1.bf16.msra.mxu1 %v2528_v62 }
 0xa61   :  { %v2530_v48 = vpack.c.bf16 %v2526_v63, %v2524_v9  ;;  %v2531_v12 = vpack.c.bf16 %v2527_v61, %v2525_v8  ;;  %v2595_v20 = vpop.permute.xlu1 %2594  ;;  %v2597_v5 = vpop.permute.xlu0 %2596 }
 0xa62   :  { %v2621_v3 = vsel %vm365_vm7, %v2595_v20, %v2593_v27  ;;  %v2605_v7 = vsel %vm365_vm7, %v2593_v27, %v2595_v20  ;;  %v2624_v27 = vmul.f32 %v2604_v52, %v8704_v29  ;;  %v5504_v52 = vld [vmem:[#allocation8 + $0x78] ss:$12 sps:$4 sm:$0xff]  }
 0xa63   :  { %2806 = vmatprep.subr.bf16.mxu1 %v2531_v12  ;;  %v2627_v26 = vmul.f32 %v2621_v3, %v8703_v37  ;;  %v2626_v4 = vmul.f32 %v2605_v7, %v8704_v29 }
 0xa64   :  { %2807 = vmatpush1.bf16.msra.mxu1 %v2530_v48 }
 0xa65   :  { %v2551_v15 = vpop.permute.xlu1 %2550  ;;  %2808 = vmatprep.subr.bf16.mxu1 %v2581_v56  ;;  %v2601_v30 = vpop.permute.xlu0 %2600  ;;  %v2632_v44 = vpack.c.bf16 %v2626_v4, %v2624_v27 }
 0xa66   :  { %v2555_v0 = vsel %vm335_vm6, %v2549_v60, %v2551_v15  ;;  %v2571_v25 = vsel %vm335_vm6, %v2551_v15, %v2549_v60  ;;  %v2633_v60 = vpack.c.bf16 %v2627_v26, %v2625_v33 }
 0xa67   :  { %v2578_v38 = vmul.f32 %v2555_v0, %v8702_v24  ;;  %v2579_v59 = vmul.f32 %v2571_v25, %v6255_v6 }
 0xa68   :  { %2809 = vmatpush1.bf16.msra.mxu1 %v2580_v11 }
 0xa69   :  { %v2582_v62 = vpack.c.bf16 %v2578_v38, %v2576_v13  ;;  %v2583_v23 = vpack.c.bf16 %v2579_v59, %v2577_v1  ;;  %v2599_v9 = vpop.permute.xlu1 %2598  ;;  %v2641_v18 = vpop.permute.xlu0 %2640  ;;  %v8745_v1 = vld [vmem:[#allocation42_spill] sm:$0xff] }
 0xa6a   :  { %v2606_v2 = vsel %vm365_vm7, %v2597_v5, %v2599_v9  ;;  %v2622_v8 = vsel %vm365_vm7, %v2599_v9, %v2597_v5  ;;  %v5499_v5 = vld [vmem:[#allocation8 + $0x60] ss:$12 sps:$4 sm:$0xff]  }
 0xa6b   :  { %2810 = vmatprep.subr.bf16.mxu1 %v2583_v23  ;;  %v2628_v61 = vmul.f32 %v2606_v2, %v8704_v29  ;;  %v2629_v31 = vmul.f32 %v2622_v8, %v8703_v37  ;;  %v5704_v2 = vld [vmem:[%s8581_s1 + $0x18] ss:$0 sm:$0xff] }
 0xa6c   :  { %2811 = vmatpush1.bf16.msra.mxu1 %v2582_v62 }
 0xa6d   :  { %v2603_v55 = vpop.permute.xlu1 %2602  ;;  %2812 = vmatprep.subr.bf16.mxu1 %v2633_v60  ;;  %v2645_v48 = vpop.permute.xlu0 %2644 }
 0xa6e   :  { %v2607_v10 = vsel %vm365_vm7, %v2601_v30, %v2603_v55  ;;  %v2623_v63 = vsel %vm365_vm7, %v2603_v55, %v2601_v30  ;;  %v8746_v30 = vld [vmem:[#allocation43_spill] sm:$0xff] }
 0xa6f   :  { %v2630_v39 = vmul.f32 %v2607_v10, %v8704_v29  ;;  %v2631_v54 = vmul.f32 %v2623_v63, %v8703_v37  ;;  %v8747_v10 = vmov 0  }
 0xa70   :  { %2813 = vmatpush1.bf16.msra.mxu1 %v2632_v44 }
 0xa71   :  { %v2634_v12 = vpack.c.bf16 %v2630_v39, %v2628_v61  ;;  %v2635_v20 = vpack.c.bf16 %v2631_v54, %v2629_v31  ;;  %v2643_v32 = vpop.permute.xlu1 %2642  ;;  %v2649_v15 = vpop.permute.xlu0 %2648  ;;  %v5505_v31 = vld [vmem:[#allocation8 + $0x68] ss:$12 sps:$4 sm:$0xff]   ;;  %v5506_v39 = vld [vmem:[#allocation8 + $0x80] ss:$12 sps:$4 sm:$0xff]  }
 0xa72   :  { %v2656_v53 = vsel %vm395_vm8, %v2641_v18, %v2643_v32  ;;  %v2672_v56 = vsel %vm395_vm8, %v2643_v32, %v2641_v18  ;;  %v5703_v18 = vld [vmem:[%s8581_s1 + $0x10] ss:$0 sm:$0xff] }
 0xa73   :  { %2814 = vmatprep.subr.bf16.mxu1 %v2635_v20  ;;  %v2676_v34 = vmul.f32 %v8745_v1, %v2656_v53  ;;  %v2677_v0 = vmul.f32 %v8746_v30, %v2672_v56 }
 0xa74   :  { %2815 = vmatpush1.bf16.msra.mxu1 %v2634_v12 }
 0xa75   :  { %v2647_v3 = vpop.permute.xlu1 %2646  ;;  %v2653_v23 = vpop.permute.xlu0 %2652 }
 0xa76   :  { %v2657_v11 = vsel %vm395_vm8, %v2645_v48, %v2647_v3  ;;  %v2673_v13 = vsel %vm395_vm8, %v2647_v3, %v2645_v48 }
 0xa77   :  { %v2678_v25 = vmul.f32 %v8745_v1, %v2657_v11  ;;  %v2679_v7 = vmul.f32 %v8746_v30, %v2673_v13  ;;  %2817 = vmatmul.mubr.bf16.vlgmr.msra.gmra.mrb[8].mxu1 %v5499_v5 }
 0xa78   :  { %2826 = vmatprep.mubr.bf16.mxu1 %v5502_v28 }
 0xa79   :  { %v2684_v26 = vpack.c.bf16 %v2678_v25, %v2676_v34  ;;  %v2685_v38 = vpack.c.bf16 %v2679_v7, %v2677_v0  ;;  %v2651_v59 = vpop.permute.xlu1 %2650 }
 0xa7a   :  { %v2658_v33 = vsel %vm395_vm8, %v2649_v15, %v2651_v59  ;;  %v2674_v62 = vsel %vm395_vm8, %v2651_v59, %v2649_v15 }
 0xa7b   :  { %2837 = vmatprep.subr.bf16.mxu1 %v2685_v38  ;;  %v2680_v27 = vmul.f32 %v5703_v18, %v2658_v33  ;;  %v2681_v8 = vmul.f32 %v5704_v2, %v2674_v62 }
 0xa7c   :  { %2838 = vmatpush1.bf16.msra.mxu1 %v2684_v26 }
 0xa7d   :  { %v2655_v9 = vpop.permute.xlu1 %2654 }
 0xa7e   :  { %v2659_v4 = vsel %vm395_vm8, %v2653_v23, %v2655_v9  ;;  %v2675_v60 = vsel %vm395_vm8, %v2655_v9, %v2653_v23 }
 0xa7f   :  { %v2682_v55 = vmul.f32 %v5703_v18, %v2659_v4  ;;  %v2683_v44 = vmul.f32 %v5704_v2, %v2675_v60  ;;  %2827 = vmatmul.mubr.bf16.gmra.mrb[12].mxu1 %v5504_v52 }
 0xa80   :  { %2869 = vmatprep.mubr.bf16.mxu1 %v8747_v10 }
 0xa81   :  { %v2686_v63 = vpack.c.bf16 %v2682_v55, %v2680_v27  ;;  %v2687_v61 = vpack.c.bf16 %v2683_v44, %v2681_v8 }
 0xa83   :  { %2839 = vmatprep.subr.bf16.mxu1 %v2687_v61 }
 0xa84   :  { %2840 = vmatpush1.bf16.msra.mxu1 %v2686_v63 }
 0xa86   :  { %v2731_v54 = vpop.permute.xlu0 %2730 }
 0xa87   :  { %5148 = vmatmul.mubr.msk.bf16.vlgmr.msra.gmra.mrb[8].mxu1 %vm1193_vm11, %v5505_v31 }
 0xa88   :  { %2879 = vmatprep.mubr.bf16.mxu1 %v8747_v10 }
 0xa8a   :  { %v2746_v25 = vpop.permute.xlu0 %2745 }
 0xa8e   :  { %v2736_v12 = vpop.permute.xlu1 %2735 }
 0xa8f   :  { %5149 = vmatmul.mubr.msk.bf16.gmra.mrb[12].mxu1 %vm1193_vm11, %v5506_v39 }
 0xa90   :  { %3868 = vmatprep.mubr.bf16.mxu1 %v8747_v10 }
 0xa92   :  { %v2741_v30 = vpop.permute.xlu1 %2740 }
 0xb5a   :  { %v2871_v48 = vpop.f32.mrb[8].mxu1 }
 0xb5b   :  { %v5366_v20 = vadd.f32 %v2871_v48, %v2731_v54  ;;  %v2873_v32 = vpop.f32.mrb[9].mxu1 }
 0xb5c   :  { %v5367_v5 = vadd.f32 %v2873_v32, %v2731_v54  ;;  %v2875_v53 = vpop.f32.mrb[10].mxu1 }
 0xb5d   :  { %v2890_v56 = vmul.f32 %v5366_v20, %v6146_v17  ;;  %v5368_v28 = vadd.f32 %v2875_v53, %v2736_v12  ;;  %v2877_v3 = vpop.f32.mrb[11].mxu1 }
 0xb5e   :  { %v2891_v11 = vmul.f32 %v5367_v5, %v6142_v16  ;;  %v5369_v13 = vadd.f32 %v2877_v3, %v2736_v12 }
 0xb5f   :  { %v2892_v15 = vmul.f32 %v5368_v28, %v6146_v17 }
 0xb60   :  { %v2893_v1 = vmul.f32 %v5369_v13, %v6142_v16  ;;  %v2898_v34 = vadd.f32 %v2891_v11, %v2890_v56 }
 0xb62   :  { %v2881_v0 = vpop.f32.mrb[12].mxu1  ;;  %2899 = vadd.xlane.f32.xlu1 %v2898_v34  ;;  %v2901_v7 = vadd.f32 %v2893_v1, %v2892_v15 }
 0xb63   :  { %v5370_v26 = vadd.f32 %v2881_v0, %v2741_v30  ;;  %v2883_v38 = vpop.f32.mrb[13].mxu1 }
 0xb64   :  { %v5371_v59 = vadd.f32 %v2883_v38, %v2741_v30  ;;  %v2885_v52 = vpop.f32.mrb[14].mxu1  ;;  %2902 = vadd.xlane.f32.xlu0 %v2901_v7 }
 0xb65   :  { %v2894_v33 = vmul.f32 %v5370_v26, %v6146_v17  ;;  %v5372_v62 = vadd.f32 %v2885_v52, %v2746_v25  ;;  %v2887_v23 = vpop.f32.mrb[15].mxu1  ;;  %v8748_v52 = vld [vmem:[#allocation36_spill] sm:$0xff] }
 0xb66   :  { %v2895_v9 = vmul.f32 %v5371_v59, %v6142_v16  ;;  %v5373_v4 = vadd.f32 %v2887_v23, %v2746_v25  ;;  %v8752_v23 = vld [vmem:[#allocation38_spill] sm:$0xff] }
 0xb67   :  { %v2896_v60 = vmul.f32 %v5372_v62, %v6146_v17 }
 0xb68   :  { %v2897_v18 = vmul.f32 %v5373_v4, %v6142_v16  ;;  %v2904_v27 = vadd.f32 %v2895_v9, %v2894_v33  ;;  %v8749_v33 = vmov 2   ;;  %v8753_v9 = vld [vmem:[#allocation39_spill] sm:$0xff] }
 0xb6a   :  { %2905 = vadd.xlane.f32.xlu0 %v2904_v27  ;;  %v2907_v2 = vadd.f32 %v2897_v18, %v2896_v60 }
 0xb6c   :  { %2908 = vadd.xlane.f32.xlu1 %v2907_v2 }
 0xbef   :  { %v2900_v8 = vpop.xlane.xlu1 %2899 }
 0xbf0   :  { %v2910_v55 = vmul.f32 0.005, %v2900_v8 }
 0xbf1   :  { %v2903_v44 = vpop.xlane.xlu0 %2902 }
 0xbf2   :  { %v2914_v63 = vsub.f32 %v5366_v20, %v2910_v55  ;;  %v2915_v61 = vsub.f32 %v5367_v5, %v2910_v55  ;;  %v2911_v31 = vmul.f32 0.005, %v2903_v44 }
 0xbf4   :  { %v2922_v39 = vmul.f32 %v2914_v63, %v6146_v17  ;;  %v2923_v54 = vmul.f32 %v2915_v61, %v6142_v16  ;;  %v2916_v48 = vsub.f32 %v5368_v28, %v2911_v31  ;;  %v2917_v12 = vsub.f32 %v5369_v13, %v2911_v31 }
 0xbf6   :  { %v2924_v32 = vmul.f32 %v2916_v48, %v6146_v17  ;;  %v2925_v53 = vmul.f32 %v2917_v12, %v6142_v16  ;;  %v2930_v56 = vmul.f32 %v2922_v39, %v2922_v39  ;;  %v2931_v3 = vmul.f32 %v2923_v54, %v2923_v54 }
 0xbf7   :  { %v2906_v11 = vpop.xlane.xlu0 %2905 }
 0xbf8   :  { %v2932_v15 = vmul.f32 %v2924_v32, %v2924_v32  ;;  %v2933_v1 = vmul.f32 %v2925_v53, %v2925_v53  ;;  %v2912_v34 = vmul.f32 0.005, %v2906_v11  ;;  %v2938_v30 = vadd.f32 %v2931_v3, %v2930_v56 }
 0xbf9   :  { %v2909_v60 = vpop.xlane.xlu1 %2908 }
 0xbfa   :  { %v7645_v20 = vsub.f32 %v5370_v26, %v2912_v34  ;;  %v7647_v5 = vsub.f32 %v5371_v59, %v2912_v34  ;;  %2939 = vadd.xlane.f32.xlu0 %v2938_v30  ;;  %v2941_v0 = vadd.f32 %v2933_v1, %v2932_v15  ;;  %v8750_v26 = vld [vmem:[#allocation37_spill] sm:$0xff]  ;;  %v8751_v59 = vmov 1  }
 0xbfb   :  { %v2913_v18 = vmul.f32 0.005, %v2909_v60 }
 0xbfc   :  { %v2926_v28 = vmul.f32 %v7645_v20, %v6146_v17  ;;  %v2927_v13 = vmul.f32 %v7647_v5, %v6142_v16  ;;  %2942 = vadd.xlane.f32.xlu1 %v2941_v0 }
 0xbfd   :  { %v7664_v27 = vsub.f32 %v5372_v62, %v2913_v18  ;;  %v7666_v2 = vsub.f32 %v5373_v4, %v2913_v18 }
 0xbfe   :  { %v2934_v25 = vmul.f32 %v2926_v28, %v2926_v28  ;;  %v2935_v7 = vmul.f32 %v2927_v13, %v2927_v13 }
 0xbff   :  { %v2928_v8 = vmul.f32 %v7664_v27, %v6146_v17  ;;  %v2929_v55 = vmul.f32 %v7666_v2, %v6142_v16 }
 0xc00   :  { %v2944_v38 = vadd.f32 %v2935_v7, %v2934_v25 }
 0xc01   :  { %v2936_v44 = vmul.f32 %v2928_v8, %v2928_v8  ;;  %v2937_v31 = vmul.f32 %v2929_v55, %v2929_v55 }
 0xc02   :  { %2945 = vadd.xlane.f32.xlu0 %v2944_v38 }
 0xc03   :  { %v2947_v39 = vadd.f32 %v2937_v31, %v2936_v44 }
 0xc0d   :  { %2975 = vperm.xlu1 %5466, %v8748_v52  }
 0xc11   :  { %5467 = vset.pattern.permute.xlu1 %v8749_v33 }
 0xc12   :  { %2995 = vperm.xlu1 %5467, %v8750_v26  }
 0xc16   :  { %2999 = vperm.xlu1 %5467, %v8748_v52  }
 0xc18   :  { %2971 = vperm.xlu0 %5465, %v8750_v26  }
 0xc1a   :  { %5468 = vset.pattern.permute.xlu1 %v8751_v59 }
 0xc1b   :  { %2979 = vperm.xlu1 %5468, %v8752_v23  }
 0xc1c   :  { %5470 = vset.pattern.permute.xlu0 %v8747_v10 }
 0xc1f   :  { %2983 = vperm.xlu1 %5468, %v8753_v9  }
 0xc23   :  { %5469 = vset.pattern.permute.xlu1 %v8749_v33 }
 0xc24   :  { %3003 = vperm.xlu1 %5469, %v8752_v23  }
 0xc48   :  { %2948 = vadd.xlane.f32.xlu1 %v2947_v39 }
 0xc59   :  { %3007 = vperm.xlu1 %5469, %v8753_v9  }
 0xc5d   :  { %5471 = vset.pattern.permute.xlu1 %v8747_v10 }
 0xc87   :  { %v2940_v54 = vpop.xlane.xlu0 %2939 }
 0xc88   :  { %v2950_v32 = vmul.f32 0.005, %v2940_v54 }
 0xc89   :  { %v2943_v62 = vpop.xlane.xlu1 %2942 }
 0xc8a   :  { %v2954_v53 = vadd.f32 1e-05, %v2950_v32  ;;  %v2951_v4 = vmul.f32 0.005, %v2943_v62 }
 0xc8c   :  { %5667 = vrsqrt.f32 %v2954_v53  ;;  %v2955_v56 = vadd.f32 1e-05, %v2951_v4 }
 0xc8d   :  { %v2976_v3 = vpop.permute.xlu1 %2975 }
 0xc8e   :  { %5669 = vrsqrt.f32 %v2955_v56 }
 0xc8f   :  { %v2946_v11 = vpop.xlane.xlu0 %2945 }
 0xc90   :  { %v2952_v62 = vmul.f32 0.005, %v2946_v11 }
 0xc91   :  { %v2996_v1 = vpop.permute.xlu1 %2995 }
 0xc92   :  { %v2956_v53 = vadd.f32 1e-05, %v2952_v62 }
 0xc94   :  { %5671 = vrsqrt.f32 %v2956_v53 }
 0xc95   :  { %v3000_v60 = vpop.permute.xlu1 %2999 }
 0xc96   :  { %v5668_v15 = vpop.eup %5667 }
 0xc97   :  { %v2962_v34 = vmul.f32 %v5668_v15, %v2914_v63  ;;  %v2963_v30 = vmul.f32 %v5668_v15, %v2915_v61  ;;  %v2972_v0 = vpop.permute.xlu0 %2971 }
 0xc98   :  { %v5670_v28 = vpop.eup %5669 }
 0xc99   :  { %v2964_v13 = vmul.f32 %v5670_v28, %v2916_v48  ;;  %v2965_v25 = vmul.f32 %v5670_v28, %v2917_v12  ;;  %v2986_v7 = vmul.f32 %v2972_v0, %v2962_v34  ;;  %v2987_v38 = vmul.f32 %v2972_v0, %v2963_v30 }
 0xc9a   :  { %v2980_v4 = vpop.permute.xlu1 %2979 }
 0xc9b   :  { %v2988_v52 = vmul.f32 %v2976_v3, %v2964_v13  ;;  %v2989_v26 = vmul.f32 %v2976_v3, %v2965_v25  ;;  %v3010_v23 = vadd.f32 %v2996_v1, %v2986_v7  ;;  %v3011_v9 = vadd.f32 %v2996_v1, %v2987_v38 }
 0xc9d   :  { %v3012_v18 = vadd.f32 %v3000_v60, %v2988_v52  ;;  %v3013_v8 = vadd.f32 %v3000_v60, %v2989_v26  ;;  %v7674_v55 = vmax.f32 %v3010_v23, 0.0  ;;  %v7676_v44 = vmax.f32 %v3011_v9, 0.0 }
 0xc9e   :  { %v5672_v56 = vpop.eup %5671  ;;  %v2984_v3 = vpop.permute.xlu1 %2983 }
 0xc9f   :  { %v7678_v31 = vmax.f32 %v3012_v18, 0.0  ;;  %v7680_v63 = vmax.f32 %v3013_v8, 0.0  ;;  %3274 = vrot.lane.b32.xlu1 %v7676_v44, %s5908_s16  ;;  %3044 = vrot.lane.b32.xlu0 %v7676_v44, %s5909_s10  ;;  %v7692_v48 = vmul.f32 %v7674_v55, %v6146_v17  ;;  %v7696_v12 = vmul.f32 %v7676_v44, %v6142_v16 }
 0xca0   :  { %v2967_v11 = vmul.f32 %v5672_v56, %v7647_v5  ;;  %v2966_v34 = vmul.f32 %v5672_v56, %v7645_v20 }
 0xca1   :  { %v7688_v61 = vmul.f32 %v7678_v31, %v6146_v17  ;;  %v7700_v39 = vmul.f32 %v7680_v63, %v6142_v16 }
 0xca2   :  { %v2991_v15 = vmul.f32 %v2980_v4, %v2967_v11  ;;  %v2990_v5 = vmul.f32 %v2980_v4, %v2966_v34 }
 0xca3   :  { %3326 = vrot.lane.b32.xlu1 %v7676_v44, %s5910_s21  ;;  %3060 = vrot.lane.b32.xlu0 %v7674_v55, %s5909_s10  ;;  %v3004_v1 = vpop.permute.xlu1 %3003 }
 0xca4   :  { %v3015_v30 = vadd.f32 %v3004_v1, %v2991_v15  ;;  %v3014_v28 = vadd.f32 %v3004_v1, %v2990_v5 }
 0xca6   :  { %v7748_v0 = vmax.f32 %v3015_v30, 0.0  ;;  %v3022_v20 = vmax.f32 %v3014_v28, 0.0 }
 0xca7   :  { %3100 = vrot.lane.b32.xlu0 %v7676_v44, %s5906_s26  ;;  %3046 = vrot.lane.b32.xlu1 %v7680_v63, %s5909_s10 }
 0xca8   :  { %v7771_v4 = vmul.f32 %v3022_v20, %v6146_v17 }
 0xcab   :  { %3112 = vrot.lane.b32.xlu0 %v7674_v55, %s5906_s26  ;;  %3062 = vrot.lane.b32.xlu1 %v7678_v31, %s5909_s10 }
 0xcaf   :  { %3152 = vrot.lane.b32.xlu0 %v7676_v44, %s5905_s2  ;;  %3102 = vrot.lane.b32.xlu1 %v7680_v63, %s5906_s26 }
 0xcb3   :  { %3164 = vrot.lane.b32.xlu0 %v7674_v55, %s5905_s2  ;;  %3114 = vrot.lane.b32.xlu1 %v7678_v31, %s5906_s26 }
 0xcb7   :  { %3204 = vrot.lane.b32.xlu0 %v7676_v44, %s5907_s30  ;;  %3154 = vrot.lane.b32.xlu1 %v7680_v63, %s5905_s2 }
 0xcbb   :  { %3216 = vrot.lane.b32.xlu0 %v7674_v55, %s5907_s30  ;;  %3166 = vrot.lane.b32.xlu1 %v7678_v31, %s5905_s2 }
 0xcbf   :  { %3272 = vrot.lane.b32.xlu0 %v7674_v55, %s5908_s16  ;;  %3206 = vrot.lane.b32.xlu1 %v7680_v63, %s5907_s30 }
 0xcc3   :  { %3324 = vrot.lane.b32.xlu0 %v7674_v55, %s5910_s21  ;;  %3218 = vrot.lane.b32.xlu1 %v7678_v31, %s5907_s30 }
 0xcc7   :  { %3276 = vrot.lane.b32.xlu0 %v7678_v31, %s5908_s16  ;;  %3278 = vrot.lane.b32.xlu1 %v7680_v63, %s5908_s16 }
 0xccb   :  { %3328 = vrot.lane.b32.xlu0 %v7678_v31, %s5910_s21  ;;  %3282 = vrot.lane.b32.xlu1 %v7748_v0, %s5908_s16 }
 0xccf   :  { %3048 = vrot.lane.b32.xlu0 %v7748_v0, %s5909_s10 }
 0xcd3   :  { %3064 = vrot.lane.b32.xlu0 %v3022_v20, %s5909_s10 }
 0xcd5   :  { %v2949_v13 = vpop.xlane.xlu1 %2948 }
 0xcd6   :  { %v2953_v25 = vmul.f32 0.005, %v2949_v13 }
 0xcd7   :  { %3104 = vrot.lane.b32.xlu0 %v7748_v0, %s5906_s26 }
 0xcd8   :  { %v2957_v7 = vadd.f32 1e-05, %v2953_v25 }
 0xcd9   :  { %v3008_v60 = vpop.permute.xlu1 %3007 }
 0xcda   :  { %5673 = vrsqrt.f32 %v2957_v7 }
 0xcdb   :  { %3116 = vrot.lane.b32.xlu0 %v3022_v20, %s5906_s26 }
 0xcdf   :  { %3156 = vrot.lane.b32.xlu0 %v7748_v0, %s5905_s2 }
 0xce3   :  { %3168 = vrot.lane.b32.xlu0 %v3022_v20, %s5905_s2 }
 0xce4   :  { %v5674_v38 = vpop.eup %5673 }
 0xce5   :  { %v2968_v52 = vmul.f32 %v5674_v38, %v7664_v27  ;;  %v2969_v26 = vmul.f32 %v5674_v38, %v7666_v2  ;;  %v7780_v2 = vmul.f32 %v7748_v0, %v6142_v16 }
 0xce7   :  { %v2992_v23 = vmul.f32 %v2984_v3, %v2968_v52  ;;  %v2993_v9 = vmul.f32 %v2984_v3, %v2969_v26  ;;  %3208 = vrot.lane.b32.xlu0 %v7748_v0, %s5907_s30 }
 0xce9   :  { %v3016_v18 = vadd.f32 %v3008_v60, %v2992_v23  ;;  %v3017_v8 = vadd.f32 %v3008_v60, %v2993_v9 }
 0xceb   :  { %v3024_v62 = vmax.f32 %v3016_v18, 0.0  ;;  %v7767_v53 = vmax.f32 %v3017_v8, 0.0  ;;  %3220 = vrot.lane.b32.xlu0 %v3022_v20, %s5907_s30 }
 0xced   :  { %v7774_v27 = vmul.f32 %v3024_v62, %v6146_v17  ;;  %3050 = vrot.lane.b32.xlu1 %v7767_v53, %s5909_s10  ;;  %v7784_v56 = vmul.f32 %v7767_v53, %v6142_v16 }
 0xcef   :  { %3280 = vrot.lane.b32.xlu0 %v3022_v20, %s5908_s16 }
 0xcf1   :  { %3066 = vrot.lane.b32.xlu1 %v3024_v62, %s5909_s10 }
 0xcf3   :  { %3332 = vrot.lane.b32.xlu0 %v3022_v20, %s5910_s21 }
 0xcf5   :  { %3106 = vrot.lane.b32.xlu1 %v7767_v53, %s5906_s26 }
 0xcf7   :  { %3376 = vrot.lane.b32.xlu0 %v7674_v55, %s5911_s17 }
 0xcf9   :  { %3118 = vrot.lane.b32.xlu1 %v3024_v62, %s5906_s26 }
 0xcfb   :  { %3284 = vrot.lane.b32.xlu0 %v3024_v62, %s5908_s16 }
 0xcfd   :  { %3158 = vrot.lane.b32.xlu1 %v7767_v53, %s5905_s2 }
 0xcff   :  { %3380 = vrot.lane.b32.xlu0 %v7678_v31, %s5911_s17 }
 0xd01   :  { %3170 = vrot.lane.b32.xlu1 %v3024_v62, %s5905_s2 }
 0xd03   :  { %3336 = vrot.lane.b32.xlu0 %v3024_v62, %s5910_s21 }
 0xd05   :  { %3210 = vrot.lane.b32.xlu1 %v7767_v53, %s5907_s30 }
 0xd07   :  { %3384 = vrot.lane.b32.xlu0 %v3022_v20, %s5911_s17 }
 0xd09   :  { %3222 = vrot.lane.b32.xlu1 %v3024_v62, %s5907_s30 }
 0xd0b   :  { %3388 = vrot.lane.b32.xlu0 %v3024_v62, %s5911_s17 }
 0xd0d   :  { %3330 = vrot.lane.b32.xlu1 %v7680_v63, %s5910_s21 }
 0xd0f   :  { %3428 = vrot.lane.b32.xlu0 %v7674_v55, %s5912_s20 }
 0xd11   :  { %v3045_v15 = vpop.permute.xlu0 %3044  ;;  %3334 = vrot.lane.b32.xlu1 %v7748_v0, %s5910_s21  ;;  %v7816_v1 = vpop.permute.xlu1 %3274 }
 0xd13   :  { %3432 = vrot.lane.b32.xlu0 %v7678_v31, %s5912_s20 }
 0xd15   :  { %v3061_v34 = vpop.permute.xlu0 %3060  ;;  %3378 = vrot.lane.b32.xlu1 %v7676_v44, %s5911_s17  ;;  %v7822_v30 = vpop.permute.xlu1 %3326 }
 0xd16   :  { %v3068_v28 = vsel %vm172_vm5, %v3061_v34, %v3045_v15  ;;  %v3080_v13 = vsel %vm172_vm5, %v3045_v15, %v3061_v34  ;;  %v5509_v34 = vld [vmem:[#allocation8 + $0x94] ss:$12 sps:$4 sm:$0xff]  }
 0xd17   :  { %3436 = vrot.lane.b32.xlu0 %v3022_v20, %s5912_s20  ;;  %v3084_v38 = vmul.f32 %v3080_v13, %v6236_v51  ;;  %v3085_v52 = vmul.f32 %v3068_v28, %v6241_v57  ;;  %3604 = vmatprep.mubr.bf16.mxu0 %v5509_v34 }
 0xd19   :  { %v3101_v5 = vpop.permute.xlu0 %3100  ;;  %3286 = vrot.lane.b32.xlu1 %v7767_v53, %s5908_s16  ;;  %v3047_v55 = vpop.permute.xlu1 %3046 }
 0xd1b   :  { %3440 = vrot.lane.b32.xlu0 %v3024_v62, %s5912_s20 }
 0xd1d   :  { %v3113_v31 = vpop.permute.xlu0 %3112  ;;  %3382 = vrot.lane.b32.xlu1 %v7680_v63, %s5911_s17  ;;  %v3063_v25 = vpop.permute.xlu1 %3062 }
 0xd1e   :  { %v3069_v7 = vsel %vm172_vm5, %v3063_v25, %v3047_v55  ;;  %v3081_v20 = vsel %vm172_vm5, %v3047_v55, %v3063_v25  ;;  %v3120_v62 = vsel %vm196_vm1, %v3113_v31, %v3101_v5  ;;  %v3132_v15 = vsel %vm196_vm1, %v3101_v5, %v3113_v31 }
 0xd1f   :  { %v3086_v26 = vmul.f32 %v3081_v20, %v6236_v51  ;;  %v3087_v23 = vmul.f32 %v3069_v7, %v6241_v57  ;;  %v3136_v7 = vmul.f32 %v3132_v15, %v6198_v35  ;;  %v3137_v20 = vmul.f32 %v3120_v62, %v6202_v36 }
 0xd21   :  { %v3092_v9 = vpack.c.bf16 %v3086_v26, %v3084_v38  ;;  %v3093_v60 = vpack.c.bf16 %v3087_v23, %v3085_v52  ;;  %v3153_v18 = vpop.permute.xlu0 %3152  ;;  %3338 = vrot.lane.b32.xlu1 %v7767_v53, %s5910_s21  ;;  %v3103_v8 = vpop.permute.xlu1 %3102 }
 0xd23   :  { %3096 = vst [vmem:[#allocation3] sm:$0xff] %v3092_v9  ;;  %3097 = vst [vmem:[#allocation3 + $0x8] sm:$0xff] %v3093_v60  ;;  %3572 = vmatprep.subr.bf16.mxu0 %v3093_v60 }
 0xd24   :  { %3573 = vmatpush1.bf16.msra.mxu0 %v3092_v9 }
 0xd25   :  { %v3165_v55 = vpop.permute.xlu0 %3164  ;;  %3386 = vrot.lane.b32.xlu1 %v7748_v0, %s5911_s17  ;;  %v3115_v28 = vpop.permute.xlu1 %3114 }
 0xd26   :  { %v3121_v13 = vsel %vm196_vm1, %v3115_v28, %v3103_v8  ;;  %v3133_v25 = vsel %vm196_vm1, %v3103_v8, %v3115_v28  ;;  %v3172_v9 = vsel %vm226_vm2, %v3165_v55, %v3153_v18  ;;  %v3184_v60 = vsel %vm226_vm2, %v3153_v18, %v3165_v55 }
 0xd27   :  { %v3138_v38 = vmul.f32 %v3133_v25, %v6198_v35  ;;  %v3139_v5 = vmul.f32 %v3121_v13, %v6202_v36  ;;  %v7865_v28 = vmul.f32 %v3184_v60, %v6210_v41  ;;  %v7868_v13 = vmul.f32 %v3172_v9, %v6214_v42 }
 0xd29   :  { %v7850_v31 = vpack.c.bf16 %v3138_v38, %v3136_v7  ;;  %v7852_v52 = vpack.c.bf16 %v3139_v5, %v3137_v20  ;;  %v3205_v26 = vpop.permute.xlu0 %3204  ;;  %3390 = vrot.lane.b32.xlu1 %v7767_v53, %s5911_s17  ;;  %v3155_v23 = vpop.permute.xlu1 %3154 }
 0xd2b   :  { %3148 = vst [vmem:[#allocation3 + $0x20] sm:$0xff] %v7850_v31  ;;  %3149 = vst [vmem:[#allocation3 + $0x28] sm:$0xff] %v7852_v52 }
 0xd2d   :  { %v3217_v8 = vpop.permute.xlu0 %3216  ;;  %3430 = vrot.lane.b32.xlu1 %v7676_v44, %s5912_s20  ;;  %v3167_v62 = vpop.permute.xlu1 %3166 }
 0xd2e   :  { %v3173_v15 = vsel %vm226_vm2, %v3167_v62, %v3155_v23  ;;  %v3185_v34 = vsel %vm226_vm2, %v3155_v23, %v3167_v62  ;;  %v3224_v38 = vsel %vm256_vm3, %v3217_v8, %v3205_v26  ;;  %v3236_v5 = vsel %vm256_vm3, %v3205_v26, %v3217_v8 }
 0xd2f   :  { %v7871_v25 = vmul.f32 %v3185_v34, %v6210_v41  ;;  %v7874_v18 = vmul.f32 %v3173_v15, %v6214_v42  ;;  %v7897_v34 = vmul.f32 %v3236_v5, %v6220_v45  ;;  %v7900_v26 = vmul.f32 %v3224_v38, %v6224_v46 }
 0xd31   :  { %v3273_v7 = vpop.permute.xlu0 %3272  ;;  %3434 = vrot.lane.b32.xlu1 %v7680_v63, %s5912_s20  ;;  %v3207_v20 = vpop.permute.xlu1 %3206 }
 0xd35   :  { %v3325_v23 = vpop.permute.xlu0 %3324  ;;  %3438 = vrot.lane.b32.xlu1 %v7748_v0, %s5912_s20  ;;  %v3219_v9 = vpop.permute.xlu1 %3218 }
 0xd36   :  { %v7888_v60 = vsel %vm335_vm6, %v3325_v23, %v7822_v30  ;;  %v7892_v62 = vsel %vm335_vm6, %v7822_v30, %v3325_v23  ;;  %v3225_v63 = vsel %vm256_vm3, %v3219_v9, %v3207_v20  ;;  %v3237_v15 = vsel %vm256_vm3, %v3207_v20, %v3219_v9 }
 0xd37   :  { %v7903_v0 = vmul.f32 %v3237_v15, %v6220_v45  ;;  %v7906_v8 = vmul.f32 %v3225_v63, %v6224_v46  ;;  %v3288_v30 = vsel %vm305_vm4, %v3273_v7, %v7816_v1  ;;  %v3304_v23 = vsel %vm305_vm4, %v7816_v1, %v3273_v7 }
 0xd38   :  { %v7921_v11 = vmul.f32 %v3288_v30, %v6229_v49  ;;  %v7924_v1 = vmul.f32 %v3304_v23, %v6232_v50  ;;  %v7941_v30 = vld [vmem:[%s8584_s4 + $0x88] sm:$0xff]  ;;  %v7946_v23 = vld [vmem:[%s8584_s4 + $0x80] sm:$0xff] }
 0xd39   :  { %v3277_v38 = vpop.permute.xlu0 %3276  ;;  %3442 = vrot.lane.b32.xlu1 %v7767_v53, %s5912_s20  ;;  %v3279_v9 = vpop.permute.xlu1 %3278  ;;  %8754 = vst [vmem:[#allocation40_spill] sm:$0xff] %v7941_v30  ;;  %8755 = vst [vmem:[#allocation42_spill] sm:$0xff] %v7946_v23  ;;  %3518 = vperm.xlu0 %5470, %v7946_v23  }
 0xd3a   :  { %v3289_v63 = vsel %vm305_vm4, %v3277_v38, %v3279_v9  ;;  %v3305_v15 = vsel %vm305_vm4, %v3279_v9, %v3277_v38  ;;  %v7953_v38 = vld [vmem:[%s8584_s4 + $0x90] sm:$0xff]  ;;  %v7958_v9 = vld [vmem:[%s8584_s4 + $0x98] sm:$0xff] }
 0xd3b   :  { %v7927_v7 = vmul.f32 %v3289_v63, %v6229_v49  ;;  %v7930_v3 = vmul.f32 %v3305_v15, %v6232_v50  ;;  %8756 = vst [vmem:[#allocation43_spill] sm:$0xff] %v7953_v38  ;;  %8757 = vst [vmem:[#allocation36_spill] sm:$0xff] %v7958_v9 }
 0xd3d   :  { %v7936_v54 = vpop.permute.xlu0 %3328  ;;  %3523 = vperm.xlu1 %5471, %v7941_v30   ;;  %3533 = vperm.xlu0 %5470, %v7958_v9   ;;  %v7964_v44 = vpop.permute.xlu1 %3282 }
 0xd41   :  { %v3049_v63 = vpop.permute.xlu0 %3048  ;;  %3528 = vperm.xlu1 %5471, %v7953_v38   ;;  %5472 = vset.pattern.permute.xlu0 %v8751_v59 }
 0xd45   :  { %v3065_v15 = vpop.permute.xlu0 %3064  ;;  %5473 = vset.pattern.permute.xlu1 %v8751_v59 }
 0xd46   :  { %v3070_v43 = vsel %vm172_vm5, %v3065_v15, %v3049_v63  ;;  %v3082_v14 = vsel %vm172_vm5, %v3049_v63, %v3065_v15 }
 0xd47   :  { %v3088_v47 = vmul.f32 %v3082_v14, %v6236_v51  ;;  %v3089_v9 = vmul.f32 %v3070_v43, %v6241_v57 }
 0xd49   :  { %v3105_v53 = vpop.permute.xlu0 %3104 }
 0xd4d   :  { %v3117_v32 = vpop.permute.xlu0 %3116 }
 0xd4e   :  { %v3122_v63 = vsel %vm196_vm1, %v3117_v32, %v3105_v53 }
 0xd51   :  { %v3157_v20 = vpop.permute.xlu0 %3156 }
 0xd55   :  { %v3169_v5 = vpop.permute.xlu0 %3168 }
 0xd59   :  { %v3209_v55 = vpop.permute.xlu0 %3208 }
 0xd5d   :  { %v3221_v21 = vpop.permute.xlu0 %3220 }
 0xd5f   :  { %v3051_v40 = vpop.permute.xlu1 %3050 }
 0xd61   :  { %v7974_v16 = vpop.permute.xlu0 %3280 }
 0xd63   :  { %v3067_v19 = vpop.permute.xlu1 %3066 }
 0xd64   :  { %v3071_v22 = vsel %vm172_vm5, %v3067_v19, %v3051_v40  ;;  %v3083_v58 = vsel %vm172_vm5, %v3051_v40, %v3067_v19  ;;  %v3134_v19 = vsel %vm196_vm1, %v3105_v53, %v3117_v32  ;;  %v3186_v53 = vsel %vm226_vm2, %v3157_v20, %v3169_v5 }
 0xd65   :  { %v3090_v38 = vmul.f32 %v3083_v58, %v6236_v51  ;;  %v3091_v59 = vmul.f32 %v3071_v22, %v6241_v57  ;;  %v3141_v58 = vmul.f32 %v3122_v63, %v6202_v36  ;;  %v7986_v43 = vpop.permute.xlu0 %3332  ;;  %vm4972_vm5 = vcmask 1024  }
 0xd67   :  { %v3094_v23 = vpack.c.bf16 %v3090_v38, %v3088_v47  ;;  %v3095_v33 = vpack.c.bf16 %v3091_v59, %v3089_v9  ;;  %v3107_v30 = vpop.permute.xlu1 %3106  ;;  %v3140_v47 = vmul.f32 %v3134_v19, %v6198_v35  ;;  %v3226_v19 = vsel %vm256_vm3, %v3221_v21, %v3209_v55 }
 0xd69   :  { %3098 = vst [vmem:[#allocation3 + $0x10] sm:$0xff] %v3094_v23  ;;  %3099 = vst [vmem:[#allocation3 + $0x18] sm:$0xff] %v3095_v33  ;;  %3574 = vmatprep.subr.bf16.mxu0 %v3095_v33  ;;  %v3377_v9 = vpop.permute.xlu0 %3376 }
 0xd6a   :  { %3575 = vmatpush1.bf16.msra.mxu0 %v3094_v23  ;;  %v8758_v23 = vpack.c.bf16 %v7874_v18, %v7868_v13 }
 0xd6b   :  { %v3119_v14 = vpop.permute.xlu1 %3118  ;;  %3576 = vmatprep.subr.bf16.mxu0 %v7852_v52  ;;  %v3174_v52 = vsel %vm226_vm2, %v3169_v5, %v3157_v20  ;;  %v8759_v20 = vpack.c.bf16 %v7871_v25, %v7865_v28 }
 0xd6c   :  { %v3123_v51 = vsel %vm196_vm1, %v3119_v14, %v3107_v30  ;;  %v3135_v57 = vsel %vm196_vm1, %v3107_v30, %v3119_v14  ;;  %v3193_v38 = vmul.f32 %v3174_v52, %v6214_v42  ;;  %v3238_v14 = vsel %vm256_vm3, %v3209_v55, %v3221_v21  ;;  %vm8399_vm1 = vmand %vm3917_vm13, %vm3988_vm0 }
 0xd6d   :  { %v3142_v22 = vmul.f32 %v3135_v57, %v6198_v35  ;;  %v3143_v40 = vmul.f32 %v3123_v51, %v6202_v36  ;;  %v3285_v51 = vpop.permute.xlu0 %3284  ;;  %v3244_v25 = vmul.f32 %v3238_v14, %v6220_v45  ;;  %v8761_v21 = vpack.c.bf16 %v7903_v0, %v7897_v34 }
 0xd6e   :  { %3577 = vmatpush1.bf16.msra.mxu0 %v7850_v31  ;;  %v3192_v31 = vmul.f32 %v3186_v53, %v6210_v41 }
 0xd6f   :  { %v3146_v33 = vpack.c.bf16 %v3142_v22, %v3140_v47  ;;  %v3147_v59 = vpack.c.bf16 %v3143_v40, %v3141_v58  ;;  %v3159_v32 = vpop.permute.xlu1 %3158  ;;  %v3245_v47 = vmul.f32 %v3226_v19, %v6224_v46 }
 0xd71   :  { %3578 = vmatprep.subr.bf16.mxu0 %v3147_v59  ;;  %v3360_v59 = vmul.f32 %v7888_v60, %v8702_v24 }
 0xd72   :  { %3579 = vmatpush1.bf16.msra.mxu0 %v3146_v33 }
 0xd73   :  { %v3171_v30 = vpop.permute.xlu1 %3170  ;;  %3580 = vmatprep.subr.bf16.mxu0 %v8758_v23  ;;  %v8764_v23 = vpack.c.bf16 %v7784_v56, %v7780_v2 }
 0xd74   :  { %v3175_v35 = vsel %vm226_vm2, %v3171_v30, %v3159_v32  ;;  %v3187_v36 = vsel %vm226_vm2, %v3159_v32, %v3171_v30  ;;  %v8762_v30 = vpack.c.bf16 %v7700_v39, %v7696_v12  ;;  %v8765_v12 = vpack.c.bf16 %v7774_v27, %v7771_v4 }
 0xd75   :  { %v3194_v15 = vmul.f32 %v3187_v36, %v6210_v41  ;;  %v3195_v63 = vmul.f32 %v3175_v35, %v6214_v42  ;;  %v8760_v41 = vpack.c.bf16 %v7906_v8, %v7900_v26  ;;  %v3290_v35 = vsel %vm305_vm4, %v7974_v16, %v7964_v44 }
 0xd76   :  { %3581 = vmatpush1.bf16.msra.mxu0 %v8759_v20  ;;  %v3306_v36 = vsel %vm305_vm4, %v7964_v44, %v7974_v16  ;;  %v3312_v56 = vmul.f32 %v3290_v35, %v6229_v49  ;;  %vm5918_vm2 = vmmov 0  }
 0xd77   :  { %v3198_v5 = vpack.c.bf16 %v3194_v15, %v3192_v31  ;;  %v3199_v13 = vpack.c.bf16 %v3195_v63, %v3193_v38  ;;  %v3211_v18 = vpop.permute.xlu1 %3210  ;;  %v3313_v31 = vmul.f32 %v3306_v36, %v6232_v50  ;;  %v5706_v36 = vld [vmem:[%s8581_s1 + $0x18] ss:$0 sm:$0xff] }
 0xd79   :  { %3582 = vmatprep.subr.bf16.mxu0 %v3199_v13 }
 0xd7a   :  { %3583 = vmatpush1.bf16.msra.mxu0 %v3198_v5 }
 0xd7b   :  { %v3223_v57 = vpop.permute.xlu1 %3222  ;;  %3584 = vmatprep.subr.bf16.mxu0 %v8760_v41 }
 0xd7c   :  { %v3227_v42 = vsel %vm256_vm3, %v3223_v57, %v3211_v18  ;;  %v3239_v28 = vsel %vm256_vm3, %v3211_v18, %v3223_v57 }
 0xd7d   :  { %v3246_v58 = vmul.f32 %v3239_v28, %v6220_v45  ;;  %v3247_v22 = vmul.f32 %v3227_v42, %v6224_v46  ;;  %v3361_v45 = vmul.f32 %v7892_v62, %v6255_v6  ;;  %v3381_v46 = vpop.permute.xlu0 %3380 }
 0xd7e   :  { %3585 = vmatpush1.bf16.msra.mxu0 %v8761_v21 }
 0xd7f   :  { %v3250_v55 = vpack.c.bf16 %v3246_v58, %v3244_v25  ;;  %v3251_v40 = vpack.c.bf16 %v3247_v22, %v3245_v47  ;;  %v3331_v26 = vpop.permute.xlu1 %3330 }
 0xd80   :  { %v3341_v8 = vsel %vm335_vm6, %v7936_v54, %v3331_v26  ;;  %v3357_v33 = vsel %vm335_vm6, %v3331_v26, %v7936_v54  ;;  %v8763_v54 = vpack.c.bf16 %v7688_v61, %v7692_v48  ;;  %v8766_v48 = vpack.c.bf16 %v7930_v3, %v7924_v1 }
 0xd81   :  { %v3362_v32 = vmul.f32 %v3341_v8, %v8702_v24  ;;  %v3363_v34 = vmul.f32 %v3357_v33, %v6255_v6  ;;  %3586 = vmatprep.subr.bf16.mxu0 %v3251_v40  ;;  %v3337_v60 = vpop.permute.xlu0 %3336  ;;  %v8767_v3 = vpack.c.bf16 %v7927_v7, %v7921_v11 }
 0xd82   :  { %3587 = vmatpush1.bf16.msra.mxu0 %v3250_v55 }
 0xd83   :  { %v3368_v0 = vpack.c.bf16 %v3362_v32, %v3360_v59  ;;  %v3369_v52 = vpack.c.bf16 %v3363_v34, %v3361_v45  ;;  %v3335_v53 = vpop.permute.xlu1 %3334  ;;  %3588 = vmatprep.subr.bf16.mxu0 %v8762_v30 }
 0xd84   :  { %v3342_v11 = vsel %vm335_vm6, %v7986_v43, %v3335_v53  ;;  %v3358_v7 = vsel %vm335_vm6, %v3335_v53, %v7986_v43 }
 0xd85   :  { %v3385_v38 = vpop.permute.xlu0 %3384  ;;  %v3364_v42 = vmul.f32 %v3342_v11, %v8702_v24  ;;  %v3365_v28 = vmul.f32 %v3358_v7, %v6255_v6 }
 0xd86   :  { %3589 = vmatpush1.bf16.msra.mxu0 %v8763_v54  ;;  %v5510_v54 = vld [vmem:[#allocation8 + $0xac] ss:$12 sps:$4 sm:$0xff]  }
 0xd87   :  { %v3379_v62 = vpop.permute.xlu1 %3378  ;;  %3590 = vmatprep.subr.bf16.mxu0 %v8764_v23 }
 0xd88   :  { %v3392_v4 = vsel %vm365_vm7, %v3377_v9, %v3379_v62  ;;  %v3408_v27 = vsel %vm365_vm7, %v3379_v62, %v3377_v9 }
 0xd89   :  { %v3412_v13 = vmul.f32 %v3392_v4, %v8704_v29  ;;  %v3389_v9 = vpop.permute.xlu0 %3388 }
 0xd8a   :  { %3591 = vmatpush1.bf16.msra.mxu0 %v8765_v12 }
 0xd8b   :  { %v3287_v61 = vpop.permute.xlu1 %3286  ;;  %3592 = vmatprep.subr.bf16.mxu0 %v8766_v48 }
 0xd8c   :  { %v3291_v39 = vsel %vm305_vm4, %v3285_v51, %v3287_v61  ;;  %v3307_v2 = vsel %vm305_vm4, %v3287_v61, %v3285_v51  ;;  %vm4897_vm4 = vcmask 523264  }
 0xd8d   :  { %v3314_v16 = vmul.f32 %v3291_v39, %v6229_v49  ;;  %v3315_v44 = vmul.f32 %v3307_v2, %v6232_v50  ;;  %v3413_v49 = vmul.f32 %v3408_v27, %v8703_v37  ;;  %v3429_v21 = vpop.permute.xlu0 %3428 }
 0xd8e   :  { %3593 = vmatpush1.bf16.msra.mxu0 %v8767_v3 }
 0xd8f   :  { %v3318_v1 = vpack.c.bf16 %v3314_v16, %v3312_v56  ;;  %v3319_v15 = vpack.c.bf16 %v3315_v44, %v3313_v31  ;;  %v3383_v63 = vpop.permute.xlu1 %3382  ;;  %v5512_v31 = vld [vmem:[#allocation8 + $0xa8] ss:$12 sps:$4 sm:$0xff]  }
 0xd90   :  { %v3393_v20 = vsel %vm365_vm7, %v3381_v46, %v3383_v63  ;;  %v3409_v5 = vsel %vm365_vm7, %v3383_v63, %v3381_v46 }
 0xd91   :  { %v3414_v50 = vmul.f32 %v3393_v20, %v8704_v29  ;;  %v3415_v18 = vmul.f32 %v3409_v5, %v8703_v37  ;;  %3594 = vmatprep.subr.bf16.mxu0 %v3319_v15  ;;  %v3433_v46 = vpop.permute.xlu0 %3432 }
 0xd92   :  { %3595 = vmatpush1.bf16.msra.mxu0 %v3318_v1 }
 0xd93   :  { %v3420_v19 = vpack.c.bf16 %v3414_v50, %v3412_v13  ;;  %v3421_v14 = vpack.c.bf16 %v3415_v18, %v3413_v49  ;;  %v3339_v51 = vpop.permute.xlu1 %3338  ;;  %3596 = vmatprep.subr.bf16.mxu0 %v3369_v52  ;;  %v5507_v52 = vld [vmem:[#allocation8 + $0x90] ss:$12 sps:$4 sm:$0xff]   ;;  %v5513_v49 = vld [vmem:[#allocation8 + $0x98] ss:$12 sps:$4 sm:$0xff]  }
 0xd94   :  { %v3343_v57 = vsel %vm335_vm6, %v3337_v60, %v3339_v51  ;;  %v3359_v41 = vsel %vm335_vm6, %v3339_v51, %v3337_v60  ;;  %v5514_v50 = vld [vmem:[#allocation8 + $0xb0] ss:$12 sps:$4 sm:$0xff]  }
 0xd95   :  { %v3366_v25 = vmul.f32 %v3343_v57, %v8702_v24  ;;  %v3367_v47 = vmul.f32 %v3359_v41, %v6255_v6  ;;  %v3437_v23 = vpop.permute.xlu0 %3436 }
 0xd96   :  { %3597 = vmatpush1.bf16.msra.mxu0 %v3368_v0 }
 0xd97   :  { %v3370_v43 = vpack.c.bf16 %v3366_v25, %v3364_v42  ;;  %v3371_v58 = vpack.c.bf16 %v3367_v47, %v3365_v28  ;;  %v3387_v22 = vpop.permute.xlu1 %3386  ;;  %v8768_v28 = vld [vmem:[#allocation25_spill] sm:$0xff] }
 0xd98   :  { %v3394_v55 = vsel %vm365_vm7, %v3385_v38, %v3387_v22  ;;  %v3410_v40 = vsel %vm365_vm7, %v3387_v22, %v3385_v38 }
 0xd99   :  { %3598 = vmatprep.subr.bf16.mxu0 %v3371_v58  ;;  %v3416_v24 = vmul.f32 %v3394_v55, %v8704_v29  ;;  %v3417_v6 = vmul.f32 %v3410_v40, %v8703_v37  ;;  %v3441_v44 = vpop.permute.xlu0 %3440 }
 0xd9a   :  { %3599 = vmatpush1.bf16.msra.mxu0 %v3370_v43 }
 0xd9b   :  { %v3391_v26 = vpop.permute.xlu1 %3390  ;;  %3600 = vmatprep.subr.bf16.mxu0 %v3421_v14 }
 0xd9c   :  { %v3395_v8 = vsel %vm365_vm7, %v3389_v9, %v3391_v26  ;;  %v3411_v33 = vsel %vm365_vm7, %v3391_v26, %v3389_v9 }
 0xd9d   :  { %v3418_v59 = vmul.f32 %v3395_v8, %v8704_v29  ;;  %v3419_v45 = vmul.f32 %v3411_v33, %v8703_v37  ;;  %v5705_v37 = vld [vmem:[%s8581_s1 + $0x10] ss:$0 sm:$0xff] }
 0xd9e   :  { %3601 = vmatpush1.bf16.msra.mxu0 %v3420_v19 }
 0xd9f   :  { %v3422_v32 = vpack.c.bf16 %v3418_v59, %v3416_v24  ;;  %v3423_v34 = vpack.c.bf16 %v3419_v45, %v3417_v6  ;;  %v3431_v0 = vpop.permute.xlu1 %3430 }
 0xda0   :  { %v3444_v53 = vsel %vm395_vm8, %v3429_v21, %v3431_v0  ;;  %v3460_v30 = vsel %vm395_vm8, %v3431_v0, %v3429_v21 }
 0xda1   :  { %3602 = vmatprep.subr.bf16.mxu0 %v3423_v34  ;;  %v3464_v35 = vmul.f32 %v5705_v37, %v3444_v53  ;;  %v3465_v12 = vmul.f32 %v5706_v36, %v3460_v30 }
 0xda2   :  { %3603 = vmatpush1.bf16.msra.mxu0 %v3422_v32 }
 0xda3   :  { %v3435_v60 = vpop.permute.xlu1 %3434 }
 0xda4   :  { %v3445_v62 = vsel %vm395_vm8, %v3433_v46, %v3435_v60  ;;  %v3461_v29 = vsel %vm395_vm8, %v3435_v60, %v3433_v46 }
 0xda5   :  { %v3466_v61 = vmul.f32 %v5705_v37, %v3445_v62  ;;  %v3467_v48 = vmul.f32 %v5706_v36, %v3461_v29  ;;  %3605 = vmatmul.mubr.bf16.vlgmr.msra.gmra.mrb[16].mxu0 %v5507_v52 }
 0xda6   :  { %3614 = vmatprep.mubr.bf16.mxu0 %v5510_v54 }
 0xda7   :  { %v3472_v39 = vpack.c.bf16 %v3466_v61, %v3464_v35  ;;  %v3473_v2 = vpack.c.bf16 %v3467_v48, %v3465_v12  ;;  %v3439_v56 = vpop.permute.xlu1 %3438 }
 0xda8   :  { %v3446_v38 = vsel %vm395_vm8, %v3437_v23, %v3439_v56  ;;  %v3462_v16 = vsel %vm395_vm8, %v3439_v56, %v3437_v23 }
 0xda9   :  { %3625 = vmatprep.subr.bf16.mxu0 %v3473_v2  ;;  %v3468_v1 = vmul.f32 %v5705_v37, %v3446_v38  ;;  %v3469_v15 = vmul.f32 %v5706_v36, %v3462_v16 }
 0xdaa   :  { %3626 = vmatpush1.bf16.msra.mxu0 %v3472_v39 }
 0xdab   :  { %v3443_v4 = vpop.permute.xlu1 %3442 }
 0xdac   :  { %v3447_v27 = vsel %vm395_vm8, %v3441_v44, %v3443_v4  ;;  %v3463_v3 = vsel %vm395_vm8, %v3443_v4, %v3441_v44 }
 0xdad   :  { %v3470_v63 = vmul.f32 %v5705_v37, %v3447_v27  ;;  %v3471_v20 = vmul.f32 %v5706_v36, %v3463_v3  ;;  %3615 = vmatmul.mubr.bf16.gmra.mrb[20].mxu0 %v5512_v31 }
 0xdae   :  { %3657 = vmatprep.mubr.bf16.mxu0 %v8747_v10 }
 0xdaf   :  { %v3474_v5 = vpack.c.bf16 %v3470_v63, %v3468_v1  ;;  %v3475_v13 = vpack.c.bf16 %v3471_v20, %v3469_v15 }
 0xdb1   :  { %3627 = vmatprep.subr.bf16.mxu0 %v3475_v13 }
 0xdb2   :  { %3628 = vmatpush1.bf16.msra.mxu0 %v3474_v5 }
 0xdb5   :  { %5160 = vmatmul.mubr.msk.bf16.vlgmr.msra.gmra.mrb[16].mxu0 %vm1193_vm11, %v5513_v49  ;;  %v8769_v49 = vld [vmem:[#allocation40_spill] sm:$0xff] }
 0xdb6   :  { %3667 = vmatprep.mubr.bf16.mxu0 %v8747_v10 }
 0xdb8   :  { %v3519_v18 = vpop.permute.xlu0 %3518 }
 0xdbc   :  { %v3524_v7 = vpop.permute.xlu1 %3523  ;;  %v3534_v40 = vpop.permute.xlu0 %3533 }
 0xdbd   :  { %5161 = vmatmul.mubr.msk.bf16.gmra.mrb[20].mxu0 %vm1193_vm11, %v5514_v50  ;;  %v8770_v50 = vmov 2  }
 0xdc0   :  { %v3529_v21 = vpop.permute.xlu1 %3528 }
 0xe88   :  { %v3659_v11 = vpop.f32.mrb[16].mxu0 }
 0xe89   :  { %v5374_v9 = vadd.f32 %v3659_v11, %v3519_v18  ;;  %v3661_v19 = vpop.f32.mrb[17].mxu0  ;;  %v8772_v11 = vmov 1  }
 0xe8a   :  { %v5375_v14 = vadd.f32 %v3661_v19, %v3519_v18  ;;  %v3663_v51 = vpop.f32.mrb[18].mxu0  ;;  %v8771_v18 = vld [vmem:[#allocation42_spill] sm:$0xff] }
 0xe8b   :  { %v3678_v57 = vmul.f32 %v5374_v9, %v6146_v17  ;;  %v5376_v41 = vadd.f32 %v3663_v51, %v3524_v7  ;;  %v3665_v42 = vpop.f32.mrb[19].mxu0 }
 0xe8c   :  { %v3679_v25 = vmul.f32 %v5375_v14, %v8768_v28  ;;  %v5377_v47 = vadd.f32 %v3665_v42, %v3524_v7  ;;  %v8773_v7 = vld [vmem:[#allocation43_spill] sm:$0xff] }
 0xe8d   :  { %v3680_v43 = vmul.f32 %v5376_v41, %v6146_v17 }
 0xe8e   :  { %v3681_v58 = vmul.f32 %v5377_v47, %v8768_v28  ;;  %v3686_v22 = vadd.f32 %v3679_v25, %v3678_v57 }
 0xe90   :  { %v3669_v55 = vpop.f32.mrb[20].mxu0  ;;  %3687 = vadd.xlane.f32.xlu1 %v3686_v22  ;;  %v3689_v26 = vadd.f32 %v3681_v58, %v3680_v43  ;;  %v8152_v58 = vld [vmem:[#allocation11] sm:$0xf] }
 0xe91   :  { %v5378_v8 = vadd.f32 %v3669_v55, %v3529_v21  ;;  %v3671_v33 = vpop.f32.mrb[21].mxu0 }
 0xe92   :  { %v5379_v24 = vadd.f32 %v3671_v33, %v3529_v21  ;;  %v3673_v6 = vpop.f32.mrb[22].mxu0  ;;  %3690 = vadd.xlane.f32.xlu0 %v3689_v26 }
 0xe93   :  { %v3682_v59 = vmul.f32 %v5378_v8, %v6146_v17  ;;  %v5380_v45 = vadd.f32 %v3673_v6, %v3534_v40  ;;  %v3675_v46 = vpop.f32.mrb[23].mxu0 }
 0xe94   :  { %v3683_v32 = vmul.f32 %v5379_v24, %v8768_v28  ;;  %v5381_v34 = vadd.f32 %v3675_v46, %v3534_v40 }
 0xe95   :  { %v3684_v0 = vmul.f32 %v5380_v45, %v6146_v17 }
 0xe96   :  { %v3685_v52 = vmul.f32 %v5381_v34, %v8768_v28  ;;  %v3692_v53 = vadd.f32 %v3683_v32, %v3682_v59 }
 0xe98   :  { %3693 = vadd.xlane.f32.xlu0 %v3692_v53  ;;  %v3695_v30 = vadd.f32 %v3685_v52, %v3684_v0 }
 0xe9a   :  { %3696 = vadd.xlane.f32.xlu1 %v3695_v30 }
 0xf1d   :  { %v3688_v54 = vpop.xlane.xlu1 %3687 }
 0xf1e   :  { %v3698_v60 = vmul.f32 0.005, %v3688_v54 }
 0xf1f   :  { %v3691_v62 = vpop.xlane.xlu0 %3690 }
 0xf20   :  { %v8108_v29 = vsub.f32 %v5374_v9, %v3698_v60  ;;  %v8110_v23 = vsub.f32 %v5375_v14, %v3698_v60  ;;  %v3699_v37 = vmul.f32 0.005, %v3691_v62  ;;  %v8774_v9 = vld [vmem:[#allocation36_spill] sm:$0xff] }
 0xf22   :  { %v3710_v35 = vmul.f32 %v8108_v29, %v6146_v17  ;;  %v3711_v36 = vmul.f32 %v8110_v23, %v8768_v28  ;;  %v8116_v12 = vsub.f32 %v5376_v41, %v3699_v37  ;;  %v8118_v61 = vsub.f32 %v5377_v47, %v3699_v37 }
 0xf24   :  { %v3718_v48 = vmul.f32 %v3710_v35, %v3710_v35  ;;  %v3719_v39 = vmul.f32 %v3711_v36, %v3711_v36  ;;  %v3712_v2 = vmul.f32 %v8116_v12, %v6146_v17  ;;  %v3713_v56 = vmul.f32 %v8118_v61, %v8768_v28 }
 0xf25   :  { %v3694_v31 = vpop.xlane.xlu0 %3693 }
 0xf26   :  { %v3720_v38 = vmul.f32 %v3712_v2, %v3712_v2  ;;  %v3721_v16 = vmul.f32 %v3713_v56, %v3713_v56  ;;  %v3700_v44 = vmul.f32 0.005, %v3694_v31  ;;  %v3726_v4 = vadd.f32 %v3719_v39, %v3718_v48  ;;  %v8775_v48 = vld [vmem:[#allocation44_spill] sm:$0xff] }
 0xf27   :  { %v3697_v19 = vpop.xlane.xlu1 %3696  ;;  %v8778_v31 = vld [vmem:[#allocation32_spill] sm:$0xff] }
 0xf28   :  { %v8124_v27 = vsub.f32 %v5378_v8, %v3700_v44  ;;  %v8126_v3 = vsub.f32 %v5379_v24, %v3700_v44  ;;  %3727 = vadd.xlane.f32.xlu0 %v3726_v4  ;;  %v3729_v1 = vadd.f32 %v3721_v16, %v3720_v38  ;;  %v3701_v14 = vmul.f32 0.005, %v3697_v19 }
 0xf2a   :  { %v3714_v15 = vmul.f32 %v8124_v27, %v6146_v17  ;;  %v3715_v63 = vmul.f32 %v8126_v3, %v8768_v28  ;;  %3730 = vadd.xlane.f32.xlu1 %v3729_v1  ;;  %v8142_v51 = vsub.f32 %v5380_v45, %v3701_v14  ;;  %v8144_v57 = vsub.f32 %v5381_v34, %v3701_v14 }
 0xf2c   :  { %v3722_v20 = vmul.f32 %v3714_v15, %v3714_v15  ;;  %v3723_v5 = vmul.f32 %v3715_v63, %v3715_v63  ;;  %v3716_v41 = vmul.f32 %v8142_v51, %v6146_v17  ;;  %v3717_v42 = vmul.f32 %v8144_v57, %v8768_v28 }
 0xf2e   :  { %v3732_v13 = vadd.f32 %v3723_v5, %v3722_v20  ;;  %v3724_v25 = vmul.f32 %v3716_v41, %v3716_v41  ;;  %v3725_v47 = vmul.f32 %v3717_v42, %v3717_v42 }
 0xf30   :  { %3733 = vadd.xlane.f32.xlu0 %v3732_v13  ;;  %v3735_v43 = vadd.f32 %v3725_v47, %v3724_v25 }
 0xf3b   :  { %3763 = vperm.xlu1 %5473, %v8769_v49  }
 0xf3f   :  { %5474 = vset.pattern.permute.xlu1 %v8770_v50 }
 0xf40   :  { %3783 = vperm.xlu1 %5474, %v8771_v18  }
 0xf44   :  { %3787 = vperm.xlu1 %5474, %v8769_v49  }
 0xf46   :  { %3759 = vperm.xlu0 %5472, %v8771_v18  }
 0xf48   :  { %5475 = vset.pattern.permute.xlu1 %v8772_v11 }
 0xf49   :  { %3767 = vperm.xlu1 %5475, %v8773_v7  }
 0xf4d   :  { %3771 = vperm.xlu1 %5475, %v8774_v9  }
 0xf51   :  { %5476 = vset.pattern.permute.xlu1 %v8770_v50 }
 0xf52   :  { %3791 = vperm.xlu1 %5476, %v8773_v7  }
 0xf76   :  { %3736 = vadd.xlane.f32.xlu1 %v3735_v43 }
 0xf87   :  { %3795 = vperm.xlu1 %5476, %v8774_v9  }
 0xf8b   :  { %5477 = vset.pattern.permute.xlu1 %v8747_v10 }
 0xf8c   :  { %3830 = vperm.xlu1 %5477, %v8152_v58  }
 0xf90   :  { %5478 = vset.pattern.permute.xlu1 %v8770_v50 }
 0xfb5   :  { %v3728_v22 = vpop.xlane.xlu0 %3727 }
 0xfb6   :  { %v3738_v21 = vmul.f32 0.005, %v3728_v22 }
 0xfb7   :  { %v3731_v55 = vpop.xlane.xlu1 %3730 }
 0xfb8   :  { %v3742_v40 = vadd.f32 1e-05, %v3738_v21  ;;  %v3739_v26 = vmul.f32 0.005, %v3731_v55 }
 0xfba   :  { %5675 = vrsqrt.f32 %v3742_v40  ;;  %v3743_v8 = vadd.f32 1e-05, %v3739_v26  ;;  %v8779_v26 = vld [vmem:[#allocation34_spill] sm:$0xff] }
 0xfbb   :  { %v3764_v33 = vpop.permute.xlu1 %3763 }
 0xfbc   :  { %5677 = vrsqrt.f32 %v3743_v8 }
 0xfbd   :  { %v3734_v24 = vpop.xlane.xlu0 %3733 }
 0xfbe   :  { %v3740_v63 = vmul.f32 0.005, %v3734_v24 }
 0xfbf   :  { %v3784_v59 = vpop.permute.xlu1 %3783 }
 0xfc0   :  { %v3744_v5 = vadd.f32 1e-05, %v3740_v63 }
 0xfc2   :  { %5679 = vrsqrt.f32 %v3744_v5 }
 0xfc3   :  { %v3788_v37 = vpop.permute.xlu1 %3787 }
 0xfc4   :  { %v5676_v6 = vpop.eup %5675 }
 0xfc5   :  { %v3750_v10 = vmul.f32 %v5676_v6, %v8108_v29  ;;  %v3751_v45 = vmul.f32 %v5676_v6, %v8110_v23  ;;  %v3760_v46 = vpop.permute.xlu0 %3759  ;;  %v8776_v29 = vld [vmem:[#allocation30_spill] sm:$0xff]  ;;  %v8777_v23 = vld [vmem:[#allocation31_spill] sm:$0xff] }
 0xfc6   :  { %v5678_v32 = vpop.eup %5677 }
 0xfc7   :  { %v3752_v34 = vmul.f32 %v5678_v32, %v8116_v12  ;;  %v3753_v0 = vmul.f32 %v5678_v32, %v8118_v61  ;;  %v3774_v52 = vmul.f32 %v3760_v46, %v3750_v10  ;;  %v3775_v53 = vmul.f32 %v3760_v46, %v3751_v45  ;;  %v8782_v10 = vld [vmem:[#allocation33_spill] sm:$0xff] }
 0xfc8   :  { %v3768_v15 = vpop.permute.xlu1 %3767 }
 0xfc9   :  { %v3776_v30 = vmul.f32 %v3764_v33, %v3752_v34  ;;  %v3777_v54 = vmul.f32 %v3764_v33, %v3753_v0  ;;  %v3798_v60 = vadd.f32 %v3784_v59, %v3774_v52  ;;  %v3799_v62 = vadd.f32 %v3784_v59, %v3775_v53  ;;  %v8780_v33 = vld [vmem:[#allocation41_spill] sm:$0xff]  ;;  %v8781_v59 = vld [vmem:[#allocation35_spill] sm:$0xff] }
 0xfcb   :  { %v3800_v35 = vadd.f32 %v3788_v37, %v3776_v30  ;;  %v3801_v36 = vadd.f32 %v3788_v37, %v3777_v54  ;;  %v3806_v39 = vadd.f32 %v3798_v60, %v8775_v48  ;;  %v3807_v2 = vadd.f32 %v3799_v62, %v8776_v29 }
 0xfcc   :  { %v3772_v20 = vpop.permute.xlu1 %3771  ;;  %v5680_v7 = vpop.eup %5679 }
 0xfcd   :  { %v3808_v56 = vadd.f32 %v3800_v35, %v8777_v23  ;;  %v3809_v38 = vadd.f32 %v3801_v36, %v8778_v31  ;;  %v3814_v61 = vmax.f32 %v3806_v39, 0.0  ;;  %v3815_v44 = vmax.f32 %v3807_v2, 0.0  ;;  %v5515_v23 = vld [vmem:[%s8587_s7] ss:$20 sps:$4 sm:$0xff]   ;;  %v5518_v31 = vld [vmem:[%s8587_s7 + $0x8] ss:$20 sps:$4 sm:$0xff]  }
 0xfce   :  { %v3754_v9 = vmul.f32 %v5680_v7, %v8124_v27  ;;  %v3755_v19 = vmul.f32 %v5680_v7, %v8126_v3  ;;  %v5529_v7 = vld [vmem:[%s8587_s7 + $0x54] ss:$20 sps:$4 sm:$0xff]  }
 0xfcf   :  { %v3816_v12 = vmax.f32 %v3808_v56, 0.0  ;;  %v3817_v16 = vmax.f32 %v3809_v38, 0.0  ;;  %v5517_v56 = vld [vmem:[%s8587_s7 + $0x4] ss:$20 sps:$4 sm:$0xff]   ;;  %v5520_v38 = vld [vmem:[%s8587_s7 + $0xc] ss:$20 sps:$4 sm:$0xff]  }
 0xfd0   :  { %v3778_v14 = vmul.f32 %v3768_v15, %v3754_v9  ;;  %v3779_v41 = vmul.f32 %v3768_v15, %v3755_v19  ;;  %4582 = vmatprep.subr.bf16.mxu0 %v5517_v56  ;;  %v5532_v9 = vld [vmem:[%s8587_s7 + $0x5c] ss:$20 sps:$4 sm:$0xff]   ;;  %v5533_v19 = vld [vmem:[%s8587_s7 + $0x78] ss:$20 sps:$4 sm:$0xff]   ;;  %v5598_v56 = vld [vmem:[%s8587_s7 + $0x214] ss:$20 sps:$4 sm:$0xff]  }
 0xfd1   :  { %v3825_v4 = vpack.c.bf16 %v3817_v16, %v3815_v44  ;;  %v3824_v1 = vpack.c.bf16 %v3816_v12, %v3814_v61  ;;  %v3792_v13 = vpop.permute.xlu1 %3791  ;;  %v5526_v12 = vld [vmem:[%s8587_s7 + $0x34] ss:$20 sps:$4 sm:$0xff]   ;;  %4583 = vmatpush1.bf16.msra.mxu0 %v5515_v23  ;;  %v5524_v61 = vld [vmem:[%s8587_s7 + $0x30] ss:$20 sps:$4 sm:$0xff]  }
 0xfd2   :  { %v3802_v25 = vadd.f32 %v3792_v13, %v3778_v14  ;;  %v3803_v47 = vadd.f32 %v3792_v13, %v3779_v41  ;;  %v5521_v16 = vld [vmem:[%s8587_s7 + $0x28] ss:$20 sps:$4 sm:$0xff]   ;;  %v5536_v41 = vld [vmem:[%s8587_s7 + $0x80] ss:$20 sps:$4 sm:$0xff]  }
 0xfd3   :  { %3836 = vmatprep.subr.bf16.mxu1 %v3825_v4  ;;  %v5535_v14 = vld [vmem:[%s8587_s7 + $0x7c] ss:$20 sps:$4 sm:$0xff]  }
 0xfd4   :  { %3837 = vmatpush1.bf16.msra.mxu1 %v3824_v1  ;;  %v3810_v8 = vadd.f32 %v3802_v25, %v8779_v26  ;;  %v3811_v24 = vadd.f32 %v3803_v47, %v8780_v33  ;;  %v5544_v25 = vld [vmem:[%s8587_s7 + $0xac] ss:$20 sps:$4 sm:$0xff]   ;;  %v5553_v26 = vld [vmem:[%s8587_s7 + $0xf4] ss:$20 sps:$4 sm:$0xff]   ;;  %v5551_v33 = vld [vmem:[%s8587_s7 + $0xf0] ss:$20 sps:$4 sm:$0xff]  }
 0xfd5   :  { %v5539_v47 = vld [vmem:[%s8587_s7 + $0xa0] ss:$20 sps:$4 sm:$0xff]   ;;  %v5593_v23 = vld [vmem:[%s8587_s7 + $0x208] ss:$20 sps:$4 sm:$0xff]  }
 0xfd6   :  { %v3818_v46 = vmax.f32 %v3810_v8, 0.0  ;;  %v3819_v32 = vmax.f32 %v3811_v24, 0.0  ;;  %v5556_v8 = vld [vmem:[%s8587_s7 + $0xfc] ss:$20 sps:$4 sm:$0xff]   ;;  %v5554_v24 = vld [vmem:[%s8587_s7 + $0xf8] ss:$20 sps:$4 sm:$0xff]  }
0x1003   :  { %v3737_v49 = vpop.xlane.xlu1 %3736 }
0x1004   :  { %v3741_v18 = vmul.f32 0.005, %v3737_v49 }
0x1006   :  { %v3745_v11 = vadd.f32 1e-05, %v3741_v18 }
0x1007   :  { %v3796_v40 = vpop.permute.xlu1 %3795 }
0x1008   :  { %5681 = vrsqrt.f32 %v3745_v11 }
0x100b   :  { %v3831_v53 = vpop.permute.xlu1 %3830 }
0x1012   :  { %v5682_v42 = vpop.eup %5681 }
0x1013   :  { %v3756_v43 = vmul.f32 %v5682_v42, %v8142_v51  ;;  %v3757_v22 = vmul.f32 %v5682_v42, %v8144_v57  ;;  %v3823_v57 = vld [vmem:[#allocation10] sm:$0x3]  ;;  %v5541_v42 = vld [vmem:[%s8587_s7 + $0xa4] ss:$20 sps:$4 sm:$0xff]  }
0x1015   :  { %v3780_v21 = vmul.f32 %v3772_v20, %v3756_v43  ;;  %v3781_v55 = vmul.f32 %v3772_v20, %v3757_v22  ;;  %v5542_v43 = vld [vmem:[%s8587_s7 + $0xa8] ss:$20 sps:$4 sm:$0xff]   ;;  %v5547_v22 = vld [vmem:[%s8587_s7 + $0xcc] ss:$20 sps:$4 sm:$0xff]  }
0x1017   :  { %v3804_v6 = vadd.f32 %v3796_v40, %v3780_v21  ;;  %v3805_v27 = vadd.f32 %v3796_v40, %v3781_v55  ;;  %v5550_v21 = vld [vmem:[%s8587_s7 + $0xd4] ss:$20 sps:$4 sm:$0xff]   ;;  %v5548_v40 = vld [vmem:[%s8587_s7 + $0xd0] ss:$20 sps:$4 sm:$0xff]  }
0x1018   :  { %v5545_v55 = vld [vmem:[%s8587_s7 + $0xc8] ss:$20 sps:$4 sm:$0xff]  }
0x1019   :  { %v3812_v3 = vadd.f32 %v3804_v6, %v8781_v59  ;;  %v3813_v45 = vadd.f32 %v3805_v27, %v8782_v10  ;;  %v5559_v6 = vld [vmem:[%s8587_s7 + $0x11c] ss:$20 sps:$4 sm:$0xff]   ;;  %v5562_v27 = vld [vmem:[%s8587_s7 + $0x124] ss:$20 sps:$4 sm:$0xff]  }
0x101a   :  { %v5557_v59 = vld [vmem:[%s8587_s7 + $0x118] ss:$20 sps:$4 sm:$0xff]  }
0x101b   :  { %v3820_v34 = vmax.f32 %v3812_v3, 0.0  ;;  %v3821_v0 = vmax.f32 %v3813_v45, 0.0  ;;  %v5560_v3 = vld [vmem:[%s8587_s7 + $0x120] ss:$20 sps:$4 sm:$0xff]   ;;  %v5565_v10 = vld [vmem:[%s8587_s7 + $0x144] ss:$20 sps:$4 sm:$0xff]  }
0x101c   :  { %v5568_v45 = vld [vmem:[%s8587_s7 + $0x14c] ss:$20 sps:$4 sm:$0xff]  }
0x101d   :  { %v3826_v51 = vpack.c.bf16 %v3820_v34, %v3818_v46  ;;  %v3827_v52 = vpack.c.bf16 %v3821_v0, %v3819_v32  ;;  %v5563_v46 = vld [vmem:[%s8587_s7 + $0x140] ss:$20 sps:$4 sm:$0xff]   ;;  %v5566_v32 = vld [vmem:[%s8587_s7 + $0x148] ss:$20 sps:$4 sm:$0xff]  }
0x101e   :  { %v5571_v34 = vld [vmem:[%s8587_s7 + $0x16c] ss:$20 sps:$4 sm:$0xff]   ;;  %v5574_v0 = vld [vmem:[%s8587_s7 + $0x174] ss:$20 sps:$4 sm:$0xff]  }
0x101f   :  { %3838 = vmatprep.subr.bf16.mxu1 %v3827_v52  ;;  %v5572_v52 = vld [vmem:[%s8587_s7 + $0x170] ss:$20 sps:$4 sm:$0xff]  }
0x1020   :  { %3839 = vmatpush1.bf16.msra.mxu1 %v3826_v51  ;;  %v5569_v51 = vld [vmem:[%s8587_s7 + $0x168] ss:$20 sps:$4 sm:$0xff]  }
0x1021   :  { %4623 = vmatprep.subr.bf16.mxu1 %v5520_v38  ;;  %v5601_v38 = vld [vmem:[%s8587_s7 + $0x234] ss:$20 sps:$4 sm:$0xff]  }
0x1023   :  { %5162 = vmatmul.mubr.msk.bf16.vlgmr.msra.gmra.mrb[16].mxu1 %vm1193_vm11, %v3823_v57  ;;  %v5577_v57 = vld [vmem:[%s8587_s7 + $0x194] ss:$20 sps:$4 sm:$0xff]  }
0x1024   :  { %4624 = vmatpush1.bf16.msra.mxu1 %v5518_v31  ;;  %v5596_v31 = vld [vmem:[%s8587_s7 + $0x210] ss:$20 sps:$4 sm:$0xff]  }
0x1025   :  { %4625 = vmatprep.subr.bf16.mxu1 %v5526_v12  ;;  %v5599_v12 = vld [vmem:[%s8587_s7 + $0x230] ss:$20 sps:$4 sm:$0xff]  }
0x1028   :  { %4626 = vmatpush1.bf16.msra.mxu1 %v5524_v61  ;;  %v5607_v61 = vld [vmem:[%s8587_s7 + $0x25c] ss:$20 sps:$4 sm:$0xff]  }
0x1029   :  { %4627 = vmatprep.subr.bf16.mxu1 %v5532_v9 }
0x10f6   :  { %v3870_v30 = vpop.f32.mrb[16].mxu1 }
0x10f7   :  { %v3872_v54 = vpop.f32.mrb[17].mxu1  ;;  %v3871_v60 = vadd.f32 %v3870_v30, %v3831_v53  ;;  %v5575_v30 = vld [vmem:[%s8587_s7 + $0x190] ss:$20 sps:$4 sm:$0xff]  }
0x10f8   :  { %v3873_v62 = vadd.f32 %v3872_v54, %v3831_v53  ;;  %v3874_v37 = vpop.f32.mrb[18].mxu1  ;;  %v5580_v53 = vld [vmem:[%s8587_s7 + $0x19c] ss:$20 sps:$4 sm:$0xff]   ;;  %v5578_v54 = vld [vmem:[%s8587_s7 + $0x198] ss:$20 sps:$4 sm:$0xff]  }
0x10f9   :  { %v3877_v35 = vmul.f32 %v3871_v60, %v6146_v17  ;;  %v3875_v36 = vpop.f32.mrb[19].mxu1  ;;  %v5581_v37 = vld [vmem:[%s8587_s7 + $0x1b8] ss:$20 sps:$4 sm:$0xff]  }
0x10fa   :  { %v3878_v48 = vmul.f32 %v3873_v62, %v8768_v28  ;;  %v5589_v36 = vld [vmem:[%s8587_s7 + $0x1e4] ss:$20 sps:$4 sm:$0xff]  }
0x10fb   :  { %v3880_v39 = vsel %vm3879_vm12, %v3877_v35, 0.0  ;;  %v5584_v35 = vld [vmem:[%s8587_s7 + $0x1c0] ss:$20 sps:$4 sm:$0xff]  }
0x10fc   :  { %v3881_v29 = vsel %vm3879_vm12, %v3878_v48, 0.0  ;;  %v5592_v48 = vld [vmem:[%s8587_s7 + $0x1ec] ss:$20 sps:$4 sm:$0xff]  }
0x10fd   :  { %v3882_v2 = vadd.f32 %v3881_v29, %v3880_v39  ;;  %v5587_v39 = vld [vmem:[%s8587_s7 + $0x1e0] ss:$20 sps:$4 sm:$0xff]   ;;  %v5590_v29 = vld [vmem:[%s8587_s7 + $0x1e8] ss:$20 sps:$4 sm:$0xff]  }
0x10ff   :  { %3883 = vadd.xlane.f32.xlu0 %v3882_v2  ;;  %v5595_v2 = vld [vmem:[%s8587_s7 + $0x20c] ss:$20 sps:$4 sm:$0xff]  }
0x1115   :  { %3903 = vperm.xlu0 %5472, %v8152_v58  }
0x1119   :  { %5479 = vset.pattern.permute.xlu0 %v8770_v50  ;;  %v5523_v50 = vld [vmem:[%s8587_s7 + $0x2c] ss:$20 sps:$4 sm:$0xff]  }
0x111a   :  { %4584 = vmatprep.subr.bf16.mxu0 %v5523_v50  ;;  %v5604_v50 = vld [vmem:[%s8587_s7 + $0x23c] ss:$20 sps:$4 sm:$0xff]  }
0x111b   :  { %4585 = vmatpush1.bf16.msra.mxu0 %v5521_v16  ;;  %v5602_v16 = vld [vmem:[%s8587_s7 + $0x238] ss:$20 sps:$4 sm:$0xff]  }
0x111c   :  { %4586 = vmatprep.subr.bf16.mxu0 %v5529_v7 }
0x118c   :  { %v3884_v44 = vpop.xlane.xlu0 %3883 }
0x118d   :  { %v3885_v4 = vmul.f32 0.005, %v3884_v44  ;;  %v5610_v44 = vld [vmem:[%s8587_s7 + $0x264] ss:$20 sps:$4 sm:$0xff]  }
0x118f   :  { %v8203_v1 = vsub.f32 %v3871_v60, %v3885_v4  ;;  %v8205_v15 = vsub.f32 %v3873_v62, %v3885_v4  ;;  %v5583_v60 = vld [vmem:[%s8587_s7 + $0x1bc] ss:$20 sps:$4 sm:$0xff]   ;;  %v5586_v62 = vld [vmem:[%s8587_s7 + $0x1c4] ss:$20 sps:$4 sm:$0xff]  }
0x1190   :  { %v5605_v4 = vld [vmem:[%s8587_s7 + $0x258] ss:$20 sps:$4 sm:$0xff]  }
0x1191   :  { %v3888_v63 = vmul.f32 %v8203_v1, %v6146_v17  ;;  %v3889_v20 = vmul.f32 %v8205_v15, %v8768_v28  ;;  %v5527_v17 = vld [vmem:[%s8587_s7 + $0x50] ss:$20 sps:$4 sm:$0xff]   ;;  %v5530_v28 = vld [vmem:[%s8587_s7 + $0x58] ss:$20 sps:$4 sm:$0xff]  }
0x1192   :  { %4587 = vmatpush1.bf16.msra.mxu0 %v5527_v17  ;;  %4628 = vmatpush1.bf16.msra.mxu1 %v5530_v28 }
0x1193   :  { %v3890_v5 = vmul.f32 %v3888_v63, %v3888_v63  ;;  %v3891_v13 = vmul.f32 %v3889_v20, %v3889_v20  ;;  %4588 = vmatprep.subr.bf16.mxu0 %v5535_v14  ;;  %v5608_v63 = vld [vmem:[%s8587_s7 + $0x260] ss:$20 sps:$4 sm:$0xff]   ;;  %v5611_v20 = vld [vmem:[%s8587_s7 + $0x150] ss:$20 sps:$4 sm:$0xff]  }
0x1195   :  { %v3892_v49 = vsel %vm3879_vm12, %v3890_v5, 0.0  ;;  %v3893_v18 = vsel %vm3879_vm12, %v3891_v13, 0.0  ;;  %v5612_v5 = vld [vmem:[%s8589_s9 + $0x40] sm:$0xff]  }
0x1196   :  { %v3894_v11 = vadd.f32 %v3893_v18, %v3892_v49  ;;  %4589 = vmatpush1.bf16.msra.mxu0 %v5533_v19  ;;  %v3904_v19 = vpop.permute.xlu0 %3903 }
0x1197   :  { %4590 = vmatprep.subr.bf16.mxu0 %v5541_v42 }
0x1198   :  { %3895 = vadd.xlane.f32.xlu1 %v3894_v11  ;;  %v5916_v11 = vmov 1966171168  }
0x1199   :  { %v3925_v7 = vunpack.c.l.s4 %v5916_v11  ;;  %v5623_v11 = vld [vmem:[%s8587_s7 + $0x1c8] ss:$20 sps:$4 sm:$0xff]  }
0x119a   :  { %4591 = vmatpush1.bf16.msra.mxu0 %v5539_v47 }
0x119b   :  { %4592 = vmatprep.subr.bf16.mxu0 %v5547_v22 }
0x119e   :  { %4593 = vmatpush1.bf16.msra.mxu0 %v5545_v55 }
0x119f   :  { %4594 = vmatprep.subr.bf16.mxu0 %v5553_v26 }
0x11a2   :  { %4595 = vmatpush1.bf16.msra.mxu0 %v5551_v33 }
0x11a3   :  { %4596 = vmatprep.subr.bf16.mxu0 %v5559_v6 }
0x11a6   :  { %4597 = vmatpush1.bf16.msra.mxu0 %v5557_v59  ;;  %v3944_v59 = vld [vmem:[#allocation4 + $0x1] sm:$0x1] }
0x11a7   :  { %4598 = vmatprep.subr.bf16.mxu0 %v5565_v10 }
0x11a9   :  { %3909 = vperm.xlu1 %5478, %v8152_v58   ;;  %v5538_v58 = vld [vmem:[%s8587_s7 + $0x84] ss:$20 sps:$4 sm:$0xff]  }
0x11aa   :  { %4629 = vmatprep.subr.bf16.mxu1 %v5538_v58  ;;  %4599 = vmatpush1.bf16.msra.mxu0 %v5563_v46 }
0x11ab   :  { %4630 = vmatpush1.bf16.msra.mxu1 %v5536_v41  ;;  %4600 = vmatprep.subr.bf16.mxu0 %v5571_v34  ;;  %v3926_v41 = vunpack.c.0.s8 %v3925_v7  ;;  %v5624_v7 = vld [vmem:[%s8589_s9 + $0x58] sm:$0xff]  }
0x11ac   :  { %4631 = vmatprep.subr.bf16.mxu1 %v5544_v25 }
0x11ae   :  { %4601 = vmatpush1.bf16.msra.mxu0 %v5569_v51 }
0x11af   :  { %4632 = vmatpush1.bf16.msra.mxu1 %v5542_v43  ;;  %4602 = vmatprep.subr.bf16.mxu0 %v5577_v57  ;;  %v8783_v43 = vld [vmem:[#allocation23_spill] sm:$0xff] }
0x11b0   :  { %4633 = vmatprep.subr.bf16.mxu1 %v5550_v21  ;;  %v3929_v22 = vsub.s32 %v3926_v41, %v8783_v43  ;;  %v5630_v41 = vld [vmem:[%s8589_s9 + $0x20] sm:$0xff]  }
0x11b2   :  { %4603 = vmatpush1.bf16.msra.mxu0 %v5575_v30 }
0x11b3   :  { %4634 = vmatpush1.bf16.msra.mxu1 %v5548_v40  ;;  %4604 = vmatprep.subr.bf16.mxu0 %v5583_v60  ;;  %v5638_v40 = vld [vmem:[%s8589_s9 + $0x30] sm:$0xff]  }
0x11b4   :  { %4635 = vmatprep.subr.bf16.mxu1 %v5556_v8 }
0x11b6   :  { %4605 = vmatpush1.bf16.msra.mxu0 %v5581_v37 }
0x11b7   :  { %4636 = vmatpush1.bf16.msra.mxu1 %v5554_v24  ;;  %4606 = vmatprep.subr.bf16.mxu0 %v5589_v36 }
0x11b8   :  { %4637 = vmatprep.subr.bf16.mxu1 %v5562_v27 }
0x11ba   :  { %4607 = vmatpush1.bf16.msra.mxu0 %v5587_v39 }
0x11bb   :  { %4638 = vmatpush1.bf16.msra.mxu1 %v5560_v3  ;;  %4608 = vmatprep.subr.bf16.mxu0 %v5595_v2  ;;  %v3956_v3 = vld [vmem:[#allocation4 + $0x2] sm:$0x1] }
0x11bc   :  { %4639 = vmatprep.subr.bf16.mxu1 %v5568_v45 }
0x11be   :  { %4609 = vmatpush1.bf16.msra.mxu0 %v5593_v23 }
0x11bf   :  { %4640 = vmatpush1.bf16.msra.mxu1 %v5566_v32  ;;  %4610 = vmatprep.subr.bf16.mxu0 %v5601_v38  ;;  %v3965_v32 = vld [vmem:[#allocation4 + $0x3] sm:$0x1] }
0x11c0   :  { %4641 = vmatprep.subr.bf16.mxu1 %v5574_v0  ;;  %v4889_v0 = vld [vmem:[%s8591_s11 + $0x38] sm:$0xff] }
0x11c2   :  { %4611 = vmatpush1.bf16.msra.mxu0 %v5599_v12  ;;  %v5613_v12 = vld [vmem:[%s8587_s7 + $0x10] ss:$20 sps:$4 sm:$0xff]  }
0x11c3   :  { %4642 = vmatpush1.bf16.msra.mxu1 %v5572_v52  ;;  %4612 = vmatprep.subr.bf16.mxu0 %v5607_v61 }
0x11c4   :  { %4643 = vmatprep.subr.bf16.mxu1 %v5580_v53 }
0x11c6   :  { %4613 = vmatpush1.bf16.msra.mxu0 %v5605_v4  ;;  %v5616_v4 = vld [vmem:[%s8589_s9 + $0x48] sm:$0xff]  }
0x11c7   :  { %4644 = vmatpush1.bf16.msra.mxu1 %v5578_v54  ;;  %5266 = vmatprep.subr.bf16.mxu0 %v5611_v20  ;;  %v5618_v20 = vld [vmem:[%s8589_s9 + $0x8] sm:$0xff]  }
0x11c8   :  { %4645 = vmatprep.subr.bf16.mxu1 %v5586_v62 }
0x11cb   :  { %4646 = vmatpush1.bf16.msra.mxu1 %v5584_v35 }
0x11cc   :  { %4647 = vmatprep.subr.bf16.mxu1 %v5592_v48 }
0x11cf   :  { %4648 = vmatpush1.bf16.msra.mxu1 %v5590_v29 }
0x11d0   :  { %4649 = vmatprep.subr.bf16.mxu1 %v5598_v56 }
0x11d3   :  { %4650 = vmatpush1.bf16.msra.mxu1 %v5596_v31 }
0x11d4   :  { %4651 = vmatprep.subr.bf16.mxu1 %v5604_v50 }
0x11d7   :  { %4652 = vmatpush1.bf16.msra.mxu1 %v5602_v16  ;;  %v5614_v16 = vld [vmem:[%s8589_s9] sm:$0xff]  }
0x11d8   :  { %4653 = vmatprep.subr.bf16.mxu1 %v5610_v44  ;;  %v5615_v44 = vld [vmem:[%s8587_s7 + $0x178] ss:$20 sps:$4 sm:$0xff]  }
0x11db   :  { %4654 = vmatpush1.bf16.msra.mxu1 %v5608_v63  ;;  %v5617_v63 = vld [vmem:[%s8587_s7 + $0x38] ss:$20 sps:$4 sm:$0xff]  }
0x11dc   :  { %5288 = vmatprep.subr.bf16.mxu1 %v5612_v5  ;;  %v5619_v5 = vld [vmem:[%s8587_s7 + $0x1a0] ss:$20 sps:$4 sm:$0xff]  }
0x1225   :  { %v3896_v13 = vpop.xlane.xlu1 %3895 }
0x1226   :  { %v3897_v49 = vmul.f32 0.005, %v3896_v13  ;;  %v5620_v13 = vld [vmem:[%s8589_s9 + $0x50] sm:$0xff]  }
0x1228   :  { %v3898_v18 = vadd.f32 1e-05, %v3897_v49  ;;  %v5621_v49 = vld [vmem:[%s8587_s7 + $0x60] ss:$20 sps:$4 sm:$0xff]  }
0x1229   :  { %v3910_v14 = vpop.permute.xlu1 %3909 }
0x122a   :  { %5683 = vrsqrt.f32 %v3898_v18  ;;  %v5622_v18 = vld [vmem:[%s8589_s9 + $0x10] sm:$0xff]  }
0x1234   :  { %v5684_v9 = vpop.eup %5683 }
0x1235   :  { %v3900_v17 = vmul.f32 %v5684_v9, %v8203_v1  ;;  %v3901_v28 = vmul.f32 %v5684_v9, %v8205_v15  ;;  %v3920_v1 = vld [vmem:[#allocation4] sm:$0x1] }
0x1236   :  { %v5625_v9 = vld [vmem:[%s8587_s7 + $0x88] ss:$20 sps:$4 sm:$0xff]  }
0x1237   :  { %v3906_v58 = vmul.f32 %v3904_v19, %v3900_v17  ;;  %v3907_v42 = vmul.f32 %v3904_v19, %v3901_v28  ;;  %v5626_v17 = vld [vmem:[%s8589_s9 + $0x18] sm:$0xff]   ;;  %v5627_v28 = vld [vmem:[%s8587_s7 + $0x1f0] ss:$20 sps:$4 sm:$0xff]  }
0x1238   :  { %v5628_v19 = vld [vmem:[%s8589_s9 + $0x60] sm:$0xff]  }
0x1239   :  { %v3912_v25 = vadd.f32 %v3910_v14, %v3906_v58  ;;  %v3913_v47 = vadd.f32 %v3910_v14, %v3907_v42  ;;  %v5629_v14 = vld [vmem:[%s8587_s7 + $0xb0] ss:$20 sps:$4 sm:$0xff]   ;;  %v5631_v58 = vld [vmem:[%s8587_s7 + $0x218] ss:$20 sps:$4 sm:$0xff]  }
0x123a   :  { %v5632_v42 = vld [vmem:[%s8589_s9 + $0x68] sm:$0xff]  }
0x123b   :  { %v3914_v21 = vmax.f32 %v3912_v25, 0.0  ;;  %v3915_v55 = vmax.f32 %v3913_v47, 0.0  ;;  %v5633_v25 = vld [vmem:[%s8587_s7 + $0xd8] ss:$20 sps:$4 sm:$0xff]  }
0x123c   :  { %v5634_v47 = vld [vmem:[%s8589_s9 + $0x28] sm:$0xff]  }
0x123d   :  { %v3916_v15 = vpack.c.bf16 %v3914_v21, %v3914_v21  ;;  %v3968_v26 = vpack.c.bf16 %v3915_v55, %v3915_v55  ;;  %v5636_v21 = vld [vmem:[%s8589_s9 + $0x70] sm:$0xff]  }
0x123e   :  { %v5637_v55 = vld [vmem:[%s8587_s7 + $0x100] ss:$20 sps:$4 sm:$0xff]  }
0x123f   :  { %v3921_v8 = vsel %vm8392_vm15, %v3916_v15, %v3920_v1  ;;  %v3930_v33 = vrot.slane %v3916_v15, %v3929_v22  ;;  %v3976_v24 = vrot.slane %v3968_v26, %v3929_v22  ;;  %v5639_v1 = vld [vmem:[%s8587_s7 + $0x268] ss:$20 sps:$4 sm:$0xff]  }
0x1240   :  { %3922 = vst [vmem:[#allocation4] sm:$0x1] %v3921_v8  ;;  %v5640_v15 = vld [vmem:[%s8589_s9 + $0x78] sm:$0xff]  }
0x1241   :  { %v3937_v6 = vrot.slane %v3930_v33, %v3929_v22  ;;  %v3947_v27 = vcombine.high %v3930_v33, %v3930_v33  ;;  %v3983_v10 = vrot.slane %v3976_v24, %v3929_v22  ;;  %v3996_v34 = vcombine.high %v3976_v24, %v3976_v24  ;;  %v5642_v8 = vld [vmem:[%s8589_s9 + $0x38] sm:$0xff]   ;;  %v4882_v33 = vld [vmem:[%s8591_s11] sm:$0xff]  ;;  %v4883_v24 = vld [vmem:[%s8591_s11 + $0x8] sm:$0xff] }
0x1243   :  { %v3939_v45 = vshrl.u32 %v3937_v6, 16  ;;  %v3954_v46 = vrot.slane %v3947_v27, %v3929_v22  ;;  %v3985_v53 = vshll.u32 %v3983_v10, 16  ;;  %v4003_v62 = vrot.slane %v3996_v34, %v3929_v22  ;;  %v4884_v6 = vld [vmem:[%s8591_s11 + $0x10] sm:$0xff] }
0x1244   :  { %v5917_v27 = vmov 0.0|0.0   ;;  %v4888_v34 = vld [vmem:[%s8591_s11 + $0x30] sm:$0xff] }
0x1245   :  { %v3945_v51 = vsel %vm8392_vm15, %v3939_v45, %v3944_v59  ;;  %v3957_v52 = vsel %vm8392_vm15, %v3954_v46, %v3956_v3  ;;  %v3960_v57 = vshrl.u32 %v3954_v46, 16  ;;  %v4005_v37 = vshll.u32 %v4003_v62, 16  ;;  %v4885_v3 = vld [vmem:[%s8591_s11 + $0x18] sm:$0xff]  ;;  %v4886_v45 = vld [vmem:[%s8591_s11 + $0x20] sm:$0xff]  ;;  %v4887_v46 = vld [vmem:[%s8591_s11 + $0x28] sm:$0xff] }
0x1246   :  { %3946 = vst [vmem:[#allocation4 + $0x1] sm:$0x1] %v3945_v51  ;;  %3958 = vst [vmem:[#allocation4 + $0x2] sm:$0x1] %v3957_v52  ;;  %v5339_v59 = vpack.c.bf16 %v4883_v24, %v4882_v33  ;;  %v5342_v10 = vpack.c.bf16 %v4885_v3, %v4884_v6  ;;  %v5348_v51 = vpack.c.bf16 %v4889_v0, %v4888_v34  ;;  %v8788_v52 = vmov 0.0  }
0x1247   :  { %v3966_v30 = vsel %vm8392_vm15, %v3960_v57, %v3965_v32  ;;  %v3990_v54 = vld [vmem:[#allocation4] sm:$0x1]  ;;  %v5345_v32 = vpack.c.bf16 %v4887_v46, %v4886_v45 }
0x1248   :  { %3967 = vst [vmem:[#allocation4 + $0x3] sm:$0x1] %v3966_v30  ;;  %v3991_v60 = vsel %vm8399_vm1, %v3985_v53, %v3990_v54 }
0x1249   :  { %3992 = vst [vmem:[#allocation4] sm:$0x1] %v3991_v60 }
0x124d   :  { %v3993_v35 = vld [vmem:[#allocation4 + $0x1] sm:$0x1]  ;;  %v4008_v36 = vld [vmem:[#allocation4 + $0x2] sm:$0x1] }
0x124e   :  { %v3994_v48 = vsel %vm8399_vm1, %v3968_v26, %v3993_v35  ;;  %v4009_v39 = vsel %vm8399_vm1, %v4005_v37, %v4008_v36  ;;  %v5641_v26 = vld [vmem:[%s8587_s7 + $0x128] ss:$20 sps:$4 sm:$0xff]   ;;  %v8789_v36 = vlaneseq }
0x124f   :  { %3995 = vst [vmem:[#allocation4 + $0x1] sm:$0x1] %v3994_v48  ;;  %4010 = vst [vmem:[#allocation4 + $0x2] sm:$0x1] %v4009_v39  ;;  %v4012_v29 = vld [vmem:[#allocation4 + $0x3] sm:$0x1] }
0x1250   :  { %v4013_v2 = vsel %vm8399_vm1, %v4003_v62, %v4012_v29  ;;  %v4980_v48 = vand.u32 127, %v8789_v36  ;;  %v4112_v39 = vld [vmem:[#allocation13] sm:$0x1f] }
0x1251   :  { %4014 = vst [vmem:[#allocation4 + $0x3] sm:$0x1] %v4013_v2  ;;  %v8790_v29 = vld [vmem:[#allocation29_spill] sm:$0xff] }
0x1252   :  { %v4117_v2 = vrot.slane %v4112_v39, %v8790_v29 }
0x1258   :  { %v5165_v23 = vld.sshfl [vmem:[#allocation4] sm:$0x33 pattern:$0x75316420] }
0x1259   :  { %v4147_v56 = vcombine.high %v5165_v23, %v5165_v23  ;;  %v8417_v31 = vrot.slane %v5165_v23, %v3929_v22  ;;  %v8791_v23 = vld [vmem:[#allocation27_spill] sm:$0xff] }
0x125b   :  { %v4161_v38 = vrot.slane %v4147_v56, %v3929_v22  ;;  %v8427_v61 = vcombine.high %v8417_v31, %v8417_v31  ;;  %v5635_v22 = vld [vmem:[%s8587_s7 + $0x240] ss:$20 sps:$4 sm:$0xff]   ;;  %v4125_v56 = vrot.slane %v4112_v39, %v8791_v23 }
0x125d   :  { %v4163_v50 = vcombine.high %v4161_v38, %v4161_v38 }
0x125f   :  { %4614 = vmatprep.mubr.bf16.mxu0 %v4163_v50  ;;  %4655 = vmatprep.mubr.bf16.mxu1 %v4163_v50 }
0x1260   :  { %4615 = vmatmul.mubr.bf16.vlgmr.msra.gmra.mrb[24].mxu0 %v8427_v61  ;;  %4656 = vmatmul.mubr.bf16.vlgmr.msra.gmra.mrb[20].mxu1 %v8427_v61 }
0x1261   :  { %5267 = vmatpush3.bf16.msra.mxu0 %v5613_v12  ;;  %5289 = vmatpush3.bf16.msra.mxu1 %v5614_v16 }
0x1262   :  { %4696 = vmatprep.mubr.bf16.mxu0 %v4163_v50  ;;  %4873 = vmatprep.mubr.bf16.mxu1 %v4161_v38  ;;  %v4984_v50 = vadd.s32 512, %v4980_v48 }
0x1263   :  { %5268 = vmatprep.subr.bf16.mxu0 %v5615_v44  ;;  %5290 = vmatprep.subr.bf16.mxu1 %v5616_v4  ;;  %v8794_v4 = vld [vmem:[#allocation26_spill] sm:$0xff] }
0x1264   :  { %vm4989_vm3 = vcmp.lt.s32.totalorder %v4984_v50, 570 }
0x1265   :  { %5269 = vmatpush3.bf16.msra.mxu0 %v5617_v63  ;;  %5291 = vmatpush3.bf16.msra.mxu1 %v5618_v20  ;;  %v4121_v63 = vrot.slane %v4112_v39, %v8794_v4 }
0x1266   :  { %5270 = vmatprep.subr.bf16.mxu0 %v5619_v5  ;;  %5292 = vmatprep.subr.bf16.mxu1 %v5620_v13  ;;  %v5246_v5 = vld [vmem:[#allocation14] ss:$0 sm:$0xff] }
0x1269   :  { %5271 = vmatpush3.bf16.msra.mxu0 %v5621_v49  ;;  %5293 = vmatpush3.bf16.msra.mxu1 %v5622_v18 }
0x126a   :  { %5272 = vmatprep.subr.bf16.mxu0 %v5623_v11  ;;  %5294 = vmatprep.subr.bf16.mxu1 %v5624_v7 }
0x126d   :  { %5273 = vmatpush3.bf16.msra.mxu0 %v5625_v9  ;;  %5295 = vmatpush3.bf16.msra.mxu1 %v5626_v17 }
0x126e   :  { %5274 = vmatprep.subr.bf16.mxu0 %v5627_v28  ;;  %5296 = vmatprep.subr.bf16.mxu1 %v5628_v19 }
0x1271   :  { %5275 = vmatpush3.bf16.msra.mxu0 %v5629_v14  ;;  %5297 = vmatpush3.bf16.msra.mxu1 %v5630_v41 }
0x1272   :  { %5276 = vmatprep.subr.bf16.mxu0 %v5631_v58  ;;  %5298 = vmatprep.subr.bf16.mxu1 %v5632_v42 }
0x1275   :  { %5277 = vmatpush3.bf16.msra.mxu0 %v5633_v25  ;;  %5299 = vmatpush3.bf16.msra.mxu1 %v5634_v47 }
0x1276   :  { %5278 = vmatprep.subr.bf16.mxu0 %v5635_v22  ;;  %5300 = vmatprep.subr.bf16.mxu1 %v5636_v21 }
0x1279   :  { %5279 = vmatpush3.bf16.msra.mxu0 %v5637_v55  ;;  %5301 = vmatpush3.bf16.msra.mxu1 %v5638_v40 }
0x127a   :  { %5280 = vmatprep.subr.bf16.mxu0 %v5639_v1  ;;  %5302 = vmatprep.subr.bf16.mxu1 %v5640_v15 }
0x127d   :  { %5281 = vmatpush3.bf16.msra.mxu0 %v5641_v26  ;;  %5303 = vmatpush3.bf16.msra.mxu1 %v5642_v8 }
0x127e   :  { %5338 = vmatprep.subr.bf16.mxu0 %v5917_v27 }
0x1280   :  { %4697 = vmatmul.mubr.bf16.vlgmr.msra.gmra.mrb[28].mxu0 %v8427_v61  ;;  %4874 = vmatmul.mubr.bf16.vlgmr.msra.gmra.mrb[24].mxu1 %v8417_v31  ;;  %v8792_v31 = vld [vmem:[#allocation28_spill] sm:$0xff] }
0x1281   :  { %5340 = vmatpush3.bf16.msra.mxu0 %v5339_v59  ;;  %5335 = vmatprep.mubr.msk.f32.mxu0 %vm5918_vm2, %v8788_v52  ;;  %v4129_v38 = vrot.slane %v4112_v39, %v8792_v31  ;;  %v8793_v61 = vld [vmem:[#allocation24_spill] sm:$0xff] }
0x1282   :  { %5341 = vmatprep.subr.bf16.mxu0 %v5917_v27  ;;  %v4133_v44 = vrot.slane %v4112_v39, %v8793_v61 }
0x1285   :  { %5343 = vmatpush3.bf16.msra.mxu0 %v5342_v10 }
0x1286   :  { %5344 = vmatprep.subr.bf16.mxu0 %v5917_v27 }
0x1289   :  { %5346 = vmatpush3.bf16.msra.mxu0 %v5345_v32 }
0x128a   :  { %5347 = vmatprep.subr.bf16.mxu0 %v5917_v27 }
0x128d   :  { %5349 = vmatpush3.bf16.msra.mxu0 %v5348_v51 }
0x1333   :  { %v4616_v57 = vpop.f32.mrb[24].mxu0  ;;  %v4657_v53 = vpop.f32.mrb[20].mxu1 }
0x1334   :  { %v4618_v30 = vpop.f32.mrb[25].mxu0  ;;  %v4659_v54 = vpop.f32.mrb[21].mxu1  ;;  %v4617_v9 = vadd.f32 %v4616_v57, %v4117_v2  ;;  %v4658_v17 = vadd.f32 %v4657_v53, %v4125_v56  ;;  %v5263_v2 = vld [vmem:[#allocation16] ss:$0 sm:$0xff] }
0x1335   :  { %v4620_v60 = vpop.f32.mrb[26].mxu0  ;;  %v4661_v62 = vpop.f32.mrb[22].mxu1  ;;  %v4660_v28 = vadd.f32 %v4659_v54, %v4129_v38  ;;  %v4619_v42 = vadd.f32 %v4618_v30, %v4121_v63 }
0x1336   :  { %v4621_v37 = vpop.f32.mrb[27].mxu0  ;;  %v4662_v35 = vpop.f32.mrb[23].mxu1  ;;  %v5005_v22 = vsel %vm458_vm9, %v4617_v9, -inf  ;;  %v5007_v21 = vsel %vm458_vm9, %v4658_v17, -inf }
0x1337   :  { %v5008_v55 = vsel %vm458_vm9, %v4660_v28, -inf  ;;  %v5006_v15 = vsel %vm458_vm9, %v4619_v42, -inf }
0x1338   :  { %v5012_v26 = vmax.f32 %v5007_v21, %v5008_v55 }
0x1353   :  { %v5282_v12 = vpop.f32.mrb[28].mxu0  ;;  %v5304_v16 = vpop.f32.mrb[24].mxu1 }
0x1354   :  { %v5283_v20 = vpop.f32.mrb[29].mxu0  ;;  %v5305_v13 = vpop.f32.mrb[25].mxu1 }
0x1355   :  { %v5284_v49 = vadd.f32 %v5283_v20, %v5282_v12  ;;  %v5306_v18 = vadd.f32 %v5305_v13, %v5304_v16  ;;  %v5285_v11 = vpop.f32.mrb[30].mxu0  ;;  %v5307_v7 = vpop.f32.mrb[26].mxu1  ;;  %v5919_v12 = vmov 1983009808  }
0x1356   :  { %v5286_v19 = vpop.f32.mrb[31].mxu0  ;;  %v5308_v14 = vpop.f32.mrb[27].mxu1  ;;  %v5056_v16 = vunpack.c.l.s4 %v5919_v12 }
0x1357   :  { %v4699_v41 = vadd.f32 %v5284_v49, %v4133_v44  ;;  %v4876_v58 = vadd.f32 %v5306_v18, %v5246_v5 }
0x1358   :  { %v5057_v61 = vunpack.c.0.s8 %v5056_v16 }
0x1359   :  { %v5004_v25 = vsel %vm4989_vm3, %v4699_v41, -1e+30  ;;  %v4881_v47 = vmax.f32 %v4876_v58, 0.0 }
0x135a   :  { %v5009_v40 = vsel %vm458_vm9, %v5004_v25, -inf  ;;  %v5060_v4 = vsub.s32 %v5057_v61, %v8783_v43 }
0x135b   :  { %v5010_v1 = vmax.f32 %v5005_v22, %v5009_v40  ;;  %5336 = vmatmul.mubr.msk.f32.vlgmr.msra.gmra.mrb[32].mxu0 %vm4897_vm4, %v4881_v47 }
0x135d   :  { %v5011_v8 = vmax.f32 %v5010_v1, %v5006_v15 }
0x135f   :  { %v5013_v33 = vmax.f32 %v5011_v8, %v5012_v26 }
0x1361   :  { %5014 = vmax.xlane.f32.xlu0 %v5013_v33 }
0x13ee   :  { %v5015_v24 = vpop.xlane.xlu0 %5014 }
0x13ef   :  { %v5016_v6 = vsub.f32 %v4617_v9, %v5015_v24  ;;  %v5017_v27 = vsub.f32 %v4619_v42, %v5015_v24  ;;  %v5018_v59 = vsub.f32 %v4658_v17, %v5015_v24  ;;  %v5019_v3 = vsub.f32 %v4660_v28, %v5015_v24 }
0x13f0   :  { %v5020_v10 = vsub.f32 %v5004_v25, %v5015_v24 }
0x13f1   :  { %v5021_v45 = vmul.f32 1.442695, %v5016_v6  ;;  %v5023_v46 = vmul.f32 1.442695, %v5017_v27  ;;  %v5025_v32 = vmul.f32 1.442695, %v5018_v59 }
0x13f2   :  { %v5027_v34 = vmul.f32 1.442695, %v5019_v3  ;;  %v5029_v0 = vmul.f32 1.442695, %v5020_v10 }
0x13f3   :  { %5685 = vpow2.f32 %v5021_v45 }
0x13f4   :  { %5687 = vpow2.f32 %v5023_v46 }
0x13f5   :  { %5689 = vpow2.f32 %v5025_v32 }
0x13f6   :  { %5691 = vpow2.f32 %v5027_v34 }
0x13f7   :  { %5693 = vpow2.f32 %v5029_v0 }
0x13fd   :  { %v5686_v51 = vpop.eup %5685 }
0x13fe   :  { %v5688_v52 = vpop.eup %5687  ;;  %v5031_v57 = vsel %vm458_vm9, %v5686_v51, 0.0 }
0x13ff   :  { %v5690_v53 = vpop.eup %5689  ;;  %v5032_v30 = vsel %vm458_vm9, %v5688_v52, 0.0 }
0x1400   :  { %v5692_v54 = vpop.eup %5691  ;;  %v5033_v60 = vadd.f32 %v5032_v30, %v5031_v57  ;;  %v5034_v62 = vsel %vm458_vm9, %v5690_v53, 0.0 }
0x1401   :  { %v5694_v37 = vpop.eup %5693  ;;  %v5036_v36 = vsel %vm458_vm9, %v5692_v54, 0.0 }
0x1402   :  { %v5035_v35 = vadd.f32 %v5034_v62, %v5033_v60  ;;  %v5038_v39 = vsel %vm458_vm9, %v5694_v37, 0.0 }
0x1404   :  { %v5037_v48 = vadd.f32 %v5036_v36, %v5035_v35 }
0x1406   :  { %v5039_v29 = vadd.f32 %v5038_v39, %v5037_v48 }
0x1408   :  { %5040 = vadd.xlane.f32.xlu1 %v5039_v29 }
0x142e   :  { %v4967_v23 = vpop.f32.mrb[32].mxu0 }
0x142f   :  { %v4968_v56 = vadd.f32 %v5263_v2, %v4967_v23  ;;  %v5337_v31 = vpop.f32.mrb[33].mxu0 }
0x1431   :  { %5695 = vtanh.f32 %v4968_v56 }
0x143b   :  { %v5696_v38 = vpop.eup %5695 }
0x143c   :  { %4975 = vrot.lane.b32.xlu0 %v5696_v38, %s5908_s16  ;;  %4973 = vst.msk [vmem:[%s8593_s13] sm:$0x3] %vm4972_vm5, %v5696_v38  ;;  %s5920_s16 = smov [#allocation17]  }
0x143d   :  { %s5091_s28 = sshll.u32 %s5920_s16, 4  ;;  %s5092_s28 = int_to_ptr.vmem [resolvable:$true] %s5091_s28 }
0x143e   :  { %s5861_s13 = scalar_lea.vmem %s5092_s28, 160  ;;  %p5866_p1 = scmp.lt.s32.totalorder %s5092_s28, %s5092_s28 }
0x143f   :  { %p5862_p0 = scmp.ne.s32.totalorder %s5092_s28, %s5861_s13  ;;  %p5867_p2 = scmp.lt.s32.totalorder %s5861_s13, %s5861_s13 }
0x1441   :  { %p5868_p3 = por %p5867_p2, %p5866_p1 }
0x1443   :  { %p5869_p4 = pnand %p5868_p3, %p5862_p0 }
0x1495   :  { %v5041_v50 = vpop.xlane.xlu1 %5040 }
0x1496   :  { %5697 = vrcp.f32 %v5041_v50 }
0x14a0   :  { %v5698_v44 = vpop.eup %5697 }
0x14a1   :  { %v5043_v63 = vmul.f32 %v5698_v44, %v5686_v51  ;;  %v5044_v20 = vmul.f32 %v5698_v44, %v5688_v52  ;;  %v5045_v5 = vmul.f32 %v5698_v44, %v5690_v53  ;;  %v5046_v13 = vmul.f32 %v5698_v44, %v5692_v54 }
0x14a2   :  { %v5047_v49 = vmul.f32 %v5698_v44, %v5694_v37 }
0x14a3   :  { %v5053_v18 = vcombine.low %v5043_v63, %v5044_v20  ;;  %v5054_v11 = vcombine.low %v5045_v5, %v5046_v13 }
0x14a4   :  { %5265 = vst.sshfl [vmem:[#allocation17 + $0x8] sm:$0x3 pattern:$0x76325410] %v5047_v49 }
0x14a5   :  { %v5061_v7 = vrot.slane %v5053_v18, %v5060_v4  ;;  %v5068_v9 = vrot.slane %v5054_v11, %v5060_v4 }
0x14a7   :  { %v5069_v17 = vcombine.low %v5061_v7, %v5068_v9 }
0x14a9   :  { %5079 = vst [vmem:[#allocation17] sm:$0xff] %v5069_v17 }
0x14aa   :  { %5872 = shalt.err (!%p5869_p4)
}
0x14ab   :  { %s5873_s8 = scalar_lea.hbm %s8595_s15, 160 }
0x14ac   :  { %p5874_p5 = scmp.ne.s32.totalorder %s8595_s15, %s5873_s8  ;;  %p5877_p6 = scmp.lt.u32.totalorder %s5873_s8, %s8595_s15 }
0x14ae   :  { %p5879_p7 = pnand %p5877_p6, %p5874_p5 }
0x14b0   :  { %5882 = shalt.err (!%p5879_p7)
}
0x14b1   :  { %5094 = dma.vmem_to_hbm [thread:$0]  %s5092_s28, 160, %s8595_s15, [#allocation7]   ;;  %v4976_v43 = vpop.permute.xlu0 %4975 }
0x14b2   :  { %s8795_s20 = sld [smem:[#allocation45_spill]] }
0x14b8   :  { %4978 = vst.msk [vmem:[%s8795_s20] sm:$0x3] %vm4972_vm5, %v4976_v43 }
0x14b9   :  { %5891 = dma.done.wait [#allocation7], 160  }
0x14ba   :  { %5892 = vsyncadd [#allocation7], 4294967136 }
0x14bb   :  { %5102 = vsyncpa [#allocation6], 1 }
0x14bc   :  { %5103 = vsyncpa [#allocation9], 1 }
0x14bd   :  { %5104 = vsyncpa [#allocation12], 1 }
0x14be   :  { %5105 = vsyncpa [#allocation15], 1 }
0x14bf   :  { %5106 = vsyncpa [#allocation7], 1 }

</bundles_post_ra>
